<compile_context>
chip_gen: v7x
topology: tpu7x:2x2x1
jax: 0.10.0
libtpu: 0.0.40
codegen_flags: <defaults>
</compile_context>

<pallas_src>
import functools

import jax
import jax.numpy as jnp
from jax.experimental import pallas as pl
from jax.experimental.pallas import tpu as pltpu

EPS = 1e-5


def _vmem_spec():
    return pl.BlockSpec(memory_space=pltpu.MemorySpace.VMEM)


# ------------------------------ fused kernel --------------------------------

def _fused_cnn_kernel(B,
                      xT_ref, w1_ref, b1_ref, g1_ref, be1_ref,
                      w2_ref, b2_ref, g2_ref, be2_ref,
                      wf1_ref, bf1_ref, wf2_ref, bf2_ref,
                      out_ref,
                      y1_ref, p1_ref, y2_ref, p2_ref):
    """Whole cnn12x12 forward for B images of size 12x12.

    xT_ref : (B*14, 14)  padded input, transposed per image (row = b*14 + w,
                         col = h) so each conv1 tap loads as a (13, 1) column.
    y1_ref : (B*169, 20) conv1(+bias) rows (b*169 + oh*13 + ow), later BN+ReLU'd.
    p1_ref : (B*64, 20)  zero-padded pooled1, rows (b*64 + h*8 + w), h,w in 0..7.
    y2_ref : (B*36, 40)  conv2(+bias) rows (b*36 + oh*6 + ow), later BN+ReLU'd.
    p2_ref : (B, 360)    pooled2 flattened in (ph, pw, c) order.
    """
    f32 = jnp.float32

    # -------- conv1: 2x2, Cin=1 -> 20, pad=1 (VPU broadcast FMAs) -----------
    w1 = w1_ref[...]                                   # (4, 20), row t=ki*2+kj
    b1 = b1_ref[...]                                   # (1, 20)
    for b in range(B):
        for oh in range(13):
            def col(ki, kj, b=b, oh=oh):
                r = b * 14 + kj
                return xT_ref[r:r + 13, oh + ki:oh + ki + 1]      # (13, 1)
            y = (col(0, 0) * w1[0:1, :] + col(0, 1) * w1[1:2, :]
                 + col(1, 0) * w1[2:3, :] + col(1, 1) * w1[3:4, :] + b1)
            r0 = b * 169 + oh * 13
            y1_ref[r0:r0 + 13, :] = y                              # (13, 20)

    # -------- BN1 (one-pass batch stats) folded to scale/shift, + ReLU ------
    m1 = float(B * 169)
    y1 = y1_ref[...]                                               # (B*169, 20)
    s1 = jnp.sum(y1, axis=0, keepdims=True)
    q1 = jnp.sum(y1 * y1, axis=0, keepdims=True)
    mu1 = s1 * (1.0 / m1)
    var1 = q1 * (1.0 / m1) - mu1 * mu1
    sc1 = g1_ref[...] * jax.lax.rsqrt(var1 + EPS)
    sh1 = be1_ref[...] - mu1 * sc1
    y1_ref[...] = jnp.maximum(y1 * sc1 + sh1, 0.0)

    # -------- maxpool 2x2: 13x13 -> 6x6, written into padded 8x8 ------------
    p1_ref[...] = jnp.zeros(p1_ref.shape, f32)
    for b in range(B):
        for ph in range(6):
            ra = b * 169 + (2 * ph) * 13              # input row 2*ph
            rb = ra + 13                              # input row 2*ph + 1
            blk = jnp.maximum(
                jnp.maximum(y1_ref[pl.ds(ra, 6, stride=2), :],
                            y1_ref[pl.ds(ra + 1, 6, stride=2), :]),
                jnp.maximum(y1_ref[pl.ds(rb, 6, stride=2), :],
                            y1_ref[pl.ds(rb + 1, 6, stride=2), :]))   # (6, 20)
            r0 = b * 64 + (ph + 1) * 8 + 1
            p1_ref[r0:r0 + 6, :] = blk

    # -------- conv2: 3x3, 20 -> 40, pad=1 (in-VMEM im2col + one MXU matmul) -
    blocks = []
    for b in range(B):
        for oh in range(6):
            taps = []
            for ki in range(3):
                for kj in range(3):
                    r0 = b * 64 + (oh + ki) * 8 + kj
                    taps.append(p1_ref[r0:r0 + 6, :])               # (6, 20)
            blocks.append(jnp.concatenate(taps, axis=1))            # (6, 180)
    patches = jnp.concatenate(blocks, axis=0)                       # (B*36, 180)
    y2 = jnp.dot(patches, w2_ref[...],
                 preferred_element_type=jnp.float32) + b2_ref[...]  # (B*36, 40)

    # -------- BN2 + ReLU -----------------------------------------------------
    m2 = float(B * 36)
    s2 = jnp.sum(y2, axis=0, keepdims=True)
    q2 = jnp.sum(y2 * y2, axis=0, keepdims=True)
    mu2 = s2 * (1.0 / m2)
    var2 = q2 * (1.0 / m2) - mu2 * mu2
    sc2 = g2_ref[...] * jax.lax.rsqrt(var2 + EPS)
    sh2 = be2_ref[...] - mu2 * sc2
    y2_ref[...] = jnp.maximum(y2 * sc2 + sh2, 0.0)

    # -------- maxpool 2x2: 6x6 -> 3x3, flattened in (ph, pw, c) order --------
    for b in range(B):
        for ph in range(3):
            ra = b * 36 + (2 * ph) * 6
            rb = ra + 6
            m = jnp.maximum(
                jnp.maximum(y2_ref[pl.ds(ra, 3, stride=2), :],
                            y2_ref[pl.ds(ra + 1, 3, stride=2), :]),
                jnp.maximum(y2_ref[pl.ds(rb, 3, stride=2), :],
                            y2_ref[pl.ds(rb + 1, 3, stride=2), :]))    # (3, 40)
            for pw in range(3):
                c0 = (ph * 3 + pw) * 40
                p2_ref[b:b + 1, c0:c0 + 40] = m[pw:pw + 1, :]

    # -------- fc1 -> fc2 -> softmax (all in-VMEM; extra ReLU is a no-op) -----
    flat = p2_ref[...]                                              # (B, 360)
    h = jnp.dot(flat, wf1_ref[...],
                preferred_element_type=jnp.float32) + bf1_ref[...]  # (B, 150)
    logits = jnp.dot(h, wf2_ref[...],
                     preferred_element_type=jnp.float32) + bf2_ref[...]  # (B, 10)
    mx = jnp.max(logits, axis=1, keepdims=True)
    e = jnp.exp(logits - mx)
    denom = jnp.sum(e, axis=1, keepdims=True)
    out_ref[...] = e * pl.reciprocal(denom, approx=True)


# ------------------------------ host wrapper --------------------------------

def _prep_params(p):
    # conv1 (20,1,2,2) -> (4,20): row t = ki*2+kj, col = out channel.
    w1m = jnp.transpose(p["w1"], (2, 3, 1, 0)).reshape(4, 20)
    # conv2 (40,20,3,3) -> (180,40): row = (ki*3+kj)*20 + cin (matches im2col).
    w2m = jnp.transpose(p["w2"], (2, 3, 1, 0)).reshape(180, 40)
    # fc1 (150,360) expects NCHW flatten (c*9 + ph*3 + pw); permute its input
    # features once to NHWC flatten order (ph*120 + pw*40 + c), inputs on rows.
    wf1p = jnp.transpose(p["wf1"].reshape(150, 40, 3, 3), (2, 3, 1, 0)).reshape(360, 150)
    wf2m = jnp.transpose(p["wf2"])                                  # (150, 10)
    row = lambda v: v.reshape(1, -1)
    return (w1m, row(p["b1"]), row(p["g1"]), row(p["be1"]),
            w2m, row(p["b2"]), row(p["g2"]), row(p["be2"]),
            wf1p, row(p["bf1"]), wf2m, row(p["bf2"]))


@jax.jit
def cnn12x12_forward(x_nchw, params):
    B = x_nchw.shape[0]
    # Pad the 12x12 input by 1 and transpose each image so conv1 tap vectors
    # load as contiguous (13,1) columns inside the kernel.
    xpad = jnp.pad(x_nchw[:, 0], ((0, 0), (1, 1), (1, 1)))          # (B, 14, 14)
    xT = jnp.transpose(xpad, (0, 2, 1)).reshape(B * 14, 14)

    prepped = _prep_params(params)
    kernel = functools.partial(_fused_cnn_kernel, B)

    return pl.pallas_call(
        kernel,
        out_shape=jax.ShapeDtypeStruct((B, 10), jnp.float32),
        in_specs=[_vmem_spec()] * 13,
        out_specs=_vmem_spec(),
        scratch_shapes=[
            pltpu.VMEM((B * 169, 20), jnp.float32),   # conv1 activations (13x13)
            pltpu.VMEM((B * 64, 20), jnp.float32),    # padded pooled1 (8x8)
            pltpu.VMEM((B * 36, 40), jnp.float32),    # conv2 activations (6x6)
            pltpu.VMEM((B, 360), jnp.float32),        # flattened pooled2
        ],
    )(xT, *prepped)


# ------------------------- pure-JAX reference check -------------------------

def reference_forward(x, p):
    def bn(y, g, b):
        mu = y.mean(axis=(0, 2, 3), keepdims=True)
        var = ((y - mu) ** 2).mean(axis=(0, 2, 3), keepdims=True)
        return ((y - mu) / jnp.sqrt(var + EPS)) * g[None, :, None, None] \
            + b[None, :, None, None]

    def conv(y, w, b, pad):
        y = jax.lax.conv_general_dilated(
            y, w, (1, 1), ((pad, pad), (pad, pad)),
            dimension_numbers=("NCHW", "OIHW", "NCHW"))
        return y + b[None, :, None, None]

    def pool(y):
        B, C, H, W = y.shape
        y = y[:, :, : (H // 2) * 2, : (W // 2) * 2]
        return y.reshape(B, C, H // 2, 2, W // 2, 2).max(axis=(3, 5))

    y = jnp.maximum(bn(conv(x, p["w1"], p["b1"], 1), p["g1"], p["be1"]), 0.0)
    y = pool(y)
    y = jnp.maximum(bn(conv(y, p["w2"], p["b2"], 1), p["g2"], p["be2"]), 0.0)
    y = pool(y)
    flat = jnp.maximum(y.reshape(y.shape[0], -1), 0.0)
    h = flat @ p["wf1"].T + p["bf1"]
    logits = h @ p["wf2"].T + p["bf2"]
    return jax.nn.softmax(logits, axis=1)


if __name__ == "__main__":
    key = jax.random.PRNGKey(0)
    ks = jax.random.split(key, 13)
    params = {
        "w1": jax.random.normal(ks[0], (20, 1, 2, 2), jnp.float32) * 0.3,
        "b1": jax.random.normal(ks[1], (20,), jnp.float32) * 0.1,
        "g1": 1.0 + 0.1 * jax.random.normal(ks[2], (20,), jnp.float32),
        "be1": 0.1 * jax.random.normal(ks[3], (20,), jnp.float32),
        "w2": jax.random.normal(ks[4], (40, 20, 3, 3), jnp.float32) * 0.1,
        "b2": jax.random.normal(ks[5], (40,), jnp.float32) * 0.1,
        "g2": 1.0 + 0.1 * jax.random.normal(ks[6], (40,), jnp.float32),
        "be2": 0.1 * jax.random.normal(ks[7], (40,), jnp.float32),
        "wf1": jax.random.normal(ks[8], (150, 360), jnp.float32) * 0.05,
        "bf1": jax.random.normal(ks[9], (150,), jnp.float32) * 0.1,
        "wf2": jax.random.normal(ks[10], (10, 150), jnp.float32) * 0.05,
        "bf2": jax.random.normal(ks[11], (10,), jnp.float32) * 0.1,
    }
    # 12x12 input is required by the architecture (fc1 expects 40*3*3 = 360).
    x = jax.random.normal(ks[12], (2, 1, 12, 12), jnp.float32)

    out = jax.block_until_ready(cnn12x12_forward(x, params))
    ref = jax.block_until_ready(reference_forward(x, params))

    assert out.shape == (2, 10), out.shape
    # tolerances account for the EUP approximate reciprocal in the softmax
    assert bool(jnp.allclose(jnp.sum(out, axis=1), 1.0, atol=5e-3))
    assert bool(jnp.allclose(out, ref, rtol=5e-3, atol=2e-3)), \
        float(jnp.max(jnp.abs(out - ref)))
    print("KERNEL_OK")
</pallas_src>

<mosaic_0001>
module attributes {stable_mosaic.version = 11 : i64} {
  func.func @_fused_cnn_kernel(%arg0: memref<28x14xf32, #tpu.memory_space<vmem>>, %arg1: memref<4x20xf32, #tpu.memory_space<vmem>>, %arg2: memref<1x20xf32, #tpu.memory_space<vmem>>, %arg3: memref<1x20xf32, #tpu.memory_space<vmem>>, %arg4: memref<1x20xf32, #tpu.memory_space<vmem>>, %arg5: memref<180x40xf32, #tpu.memory_space<vmem>>, %arg6: memref<1x40xf32, #tpu.memory_space<vmem>>, %arg7: memref<1x40xf32, #tpu.memory_space<vmem>>, %arg8: memref<1x40xf32, #tpu.memory_space<vmem>>, %arg9: memref<360x150xf32, #tpu.memory_space<vmem>>, %arg10: memref<1x150xf32, #tpu.memory_space<vmem>>, %arg11: memref<150x10xf32, #tpu.memory_space<vmem>>, %arg12: memref<1x10xf32, #tpu.memory_space<vmem>>, %arg13: memref<2x10xf32, #tpu.memory_space<vmem>>, %arg14: memref<338x20xf32, #tpu.memory_space<vmem>>, %arg15: memref<128x20xf32, #tpu.memory_space<vmem>>, %arg16: memref<72x40xf32, #tpu.memory_space<vmem>>, %arg17: memref<2x360xf32, #tpu.memory_space<vmem>>) attributes {dimension_semantics = [], scalar_prefetch = 0 : i64, scratch_operands = 4 : i64, tpu.core_type = #tpu.core_type<tc>} {
    %c0 = arith.constant 0 : index
    %c0_0 = arith.constant 0 : index
    %0 = vector.load %arg1[%c0, %c0_0] : memref<4x20xf32, #tpu.memory_space<vmem>>, vector<4x20xf32>
    %c0_1 = arith.constant 0 : index
    %c0_2 = arith.constant 0 : index
    %1 = vector.load %arg2[%c0_1, %c0_2] : memref<1x20xf32, #tpu.memory_space<vmem>>, vector<1x20xf32>
    %c0_3 = arith.constant 0 : index
    %c0_4 = arith.constant 0 : index
    %2 = vector.load %arg0[%c0_3, %c0_4] : memref<28x14xf32, #tpu.memory_space<vmem>>, vector<13x1xf32>
    %3 = vector.extract_strided_slice %0 {offsets = [0, 0], sizes = [1, 20], strides = [1, 1]} : vector<4x20xf32> to vector<1x20xf32>
    %4 = vector.broadcast %2 : vector<13x1xf32> to vector<13x20xf32>
    %5 = vector.broadcast %3 : vector<1x20xf32> to vector<13x20xf32>
    %6 = arith.mulf %4, %5 : vector<13x20xf32>
    %c1 = arith.constant 1 : index
    %c0_5 = arith.constant 0 : index
    %7 = vector.load %arg0[%c1, %c0_5] : memref<28x14xf32, #tpu.memory_space<vmem>>, vector<13x1xf32>
    %8 = vector.extract_strided_slice %0 {offsets = [1, 0], sizes = [1, 20], strides = [1, 1]} : vector<4x20xf32> to vector<1x20xf32>
    %9 = vector.broadcast %7 : vector<13x1xf32> to vector<13x20xf32>
    %10 = vector.broadcast %8 : vector<1x20xf32> to vector<13x20xf32>
    %11 = arith.mulf %9, %10 : vector<13x20xf32>
    %12 = arith.addf %6, %11 : vector<13x20xf32>
    %c0_6 = arith.constant 0 : index
    %c1_7 = arith.constant 1 : index
    %13 = vector.load %arg0[%c0_6, %c1_7] : memref<28x14xf32, #tpu.memory_space<vmem>>, vector<13x1xf32>
    %14 = vector.extract_strided_slice %0 {offsets = [2, 0], sizes = [1, 20], strides = [1, 1]} : vector<4x20xf32> to vector<1x20xf32>
    %15 = vector.broadcast %13 : vector<13x1xf32> to vector<13x20xf32>
    %16 = vector.broadcast %14 : vector<1x20xf32> to vector<13x20xf32>
    %17 = arith.mulf %15, %16 : vector<13x20xf32>
    %18 = arith.addf %12, %17 : vector<13x20xf32>
    %c1_8 = arith.constant 1 : index
    %c1_9 = arith.constant 1 : index
    %19 = vector.load %arg0[%c1_8, %c1_9] : memref<28x14xf32, #tpu.memory_space<vmem>>, vector<13x1xf32>
    %20 = vector.extract_strided_slice %0 {offsets = [3, 0], sizes = [1, 20], strides = [1, 1]} : vector<4x20xf32> to vector<1x20xf32>
    %21 = vector.broadcast %19 : vector<13x1xf32> to vector<13x20xf32>
    %22 = vector.broadcast %20 : vector<1x20xf32> to vector<13x20xf32>
    %23 = arith.mulf %21, %22 : vector<13x20xf32>
    %24 = arith.addf %18, %23 : vector<13x20xf32>
    %25 = vector.broadcast %1 : vector<1x20xf32> to vector<13x20xf32>
    %26 = arith.addf %24, %25 : vector<13x20xf32>
    %c0_10 = arith.constant 0 : index
    %c0_11 = arith.constant 0 : index
    %27 = vector.load %arg14[%c0_10, %c0_11] : memref<338x20xf32, #tpu.memory_space<vmem>>, vector<13x20xf32>
    tpu.vector_store %arg14[%c0_10, %c0_11], %26 {strides = array<i32>} : memref<338x20xf32, #tpu.memory_space<vmem>>, vector<13x20xf32>,
    %c0_12 = arith.constant 0 : index
    %c1_13 = arith.constant 1 : index
    %28 = vector.load %arg0[%c0_12, %c1_13] : memref<28x14xf32, #tpu.memory_space<vmem>>, vector<13x1xf32>
    %29 = vector.extract_strided_slice %0 {offsets = [0, 0], sizes = [1, 20], strides = [1, 1]} : vector<4x20xf32> to vector<1x20xf32>
    %30 = vector.broadcast %28 : vector<13x1xf32> to vector<13x20xf32>
    %31 = vector.broadcast %29 : vector<1x20xf32> to vector<13x20xf32>
    %32 = arith.mulf %30, %31 : vector<13x20xf32>
    %c1_14 = arith.constant 1 : index
    %c1_15 = arith.constant 1 : index
    %33 = vector.load %arg0[%c1_14, %c1_15] : memref<28x14xf32, #tpu.memory_space<vmem>>, vector<13x1xf32>
    %34 = vector.extract_strided_slice %0 {offsets = [1, 0], sizes = [1, 20], strides = [1, 1]} : vector<4x20xf32> to vector<1x20xf32>
    %35 = vector.broadcast %33 : vector<13x1xf32> to vector<13x20xf32>
    %36 = vector.broadcast %34 : vector<1x20xf32> to vector<13x20xf32>
    %37 = arith.mulf %35, %36 : vector<13x20xf32>
    %38 = arith.addf %32, %37 : vector<13x20xf32>
    %c0_16 = arith.constant 0 : index
    %c2 = arith.constant 2 : index
    %39 = vector.load %arg0[%c0_16, %c2] : memref<28x14xf32, #tpu.memory_space<vmem>>, vector<13x1xf32>
    %40 = vector.extract_strided_slice %0 {offsets = [2, 0], sizes = [1, 20], strides = [1, 1]} : vector<4x20xf32> to vector<1x20xf32>
    %41 = vector.broadcast %39 : vector<13x1xf32> to vector<13x20xf32>
    %42 = vector.broadcast %40 : vector<1x20xf32> to vector<13x20xf32>
    %43 = arith.mulf %41, %42 : vector<13x20xf32>
    %44 = arith.addf %38, %43 : vector<13x20xf32>
    %c1_17 = arith.constant 1 : index
    %c2_18 = arith.constant 2 : index
    %45 = vector.load %arg0[%c1_17, %c2_18] : memref<28x14xf32, #tpu.memory_space<vmem>>, vector<13x1xf32>
    %46 = vector.extract_strided_slice %0 {offsets = [3, 0], sizes = [1, 20], strides = [1, 1]} : vector<4x20xf32> to vector<1x20xf32>
    %47 = vector.broadcast %45 : vector<13x1xf32> to vector<13x20xf32>
    %48 = vector.broadcast %46 : vector<1x20xf32> to vector<13x20xf32>
    %49 = arith.mulf %47, %48 : vector<13x20xf32>
    %50 = arith.addf %44, %49 : vector<13x20xf32>
    %51 = vector.broadcast %1 : vector<1x20xf32> to vector<13x20xf32>
    %52 = arith.addf %50, %51 : vector<13x20xf32>
    %c13 = arith.constant 13 : index
    %c0_19 = arith.constant 0 : index
    %53 = vector.load %arg14[%c13, %c0_19] : memref<338x20xf32, #tpu.memory_space<vmem>>, vector<13x20xf32>
    tpu.vector_store %arg14[%c13, %c0_19], %52 {strides = array<i32>} : memref<338x20xf32, #tpu.memory_space<vmem>>, vector<13x20xf32>,
    %c0_20 = arith.constant 0 : index
    %c2_21 = arith.constant 2 : index
    %54 = vector.load %arg0[%c0_20, %c2_21] : memref<28x14xf32, #tpu.memory_space<vmem>>, vector<13x1xf32>
    %55 = vector.extract_strided_slice %0 {offsets = [0, 0], sizes = [1, 20], strides = [1, 1]} : vector<4x20xf32> to vector<1x20xf32>
    %56 = vector.broadcast %54 : vector<13x1xf32> to vector<13x20xf32>
    %57 = vector.broadcast %55 : vector<1x20xf32> to vector<13x20xf32>
    %58 = arith.mulf %56, %57 : vector<13x20xf32>
    %c1_22 = arith.constant 1 : index
    %c2_23 = arith.constant 2 : index
    %59 = vector.load %arg0[%c1_22, %c2_23] : memref<28x14xf32, #tpu.memory_space<vmem>>, vector<13x1xf32>
    %60 = vector.extract_strided_slice %0 {offsets = [1, 0], sizes = [1, 20], strides = [1, 1]} : vector<4x20xf32> to vector<1x20xf32>
    %61 = vector.broadcast %59 : vector<13x1xf32> to vector<13x20xf32>
    %62 = vector.broadcast %60 : vector<1x20xf32> to vector<13x20xf32>
    %63 = arith.mulf %61, %62 : vector<13x20xf32>
    %64 = arith.addf %58, %63 : vector<13x20xf32>
    %c0_24 = arith.constant 0 : index
    %c3 = arith.constant 3 : index
    %65 = vector.load %arg0[%c0_24, %c3] : memref<28x14xf32, #tpu.memory_space<vmem>>, vector<13x1xf32>
    %66 = vector.extract_strided_slice %0 {offsets = [2, 0], sizes = [1, 20], strides = [1, 1]} : vector<4x20xf32> to vector<1x20xf32>
    %67 = vector.broadcast %65 : vector<13x1xf32> to vector<13x20xf32>
    %68 = vector.broadcast %66 : vector<1x20xf32> to vector<13x20xf32>
    %69 = arith.mulf %67, %68 : vector<13x20xf32>
    %70 = arith.addf %64, %69 : vector<13x20xf32>
    %c1_25 = arith.constant 1 : index
    %c3_26 = arith.constant 3 : index
    %71 = vector.load %arg0[%c1_25, %c3_26] : memref<28x14xf32, #tpu.memory_space<vmem>>, vector<13x1xf32>
    %72 = vector.extract_strided_slice %0 {offsets = [3, 0], sizes = [1, 20], strides = [1, 1]} : vector<4x20xf32> to vector<1x20xf32>
    %73 = vector.broadcast %71 : vector<13x1xf32> to vector<13x20xf32>
    %74 = vector.broadcast %72 : vector<1x20xf32> to vector<13x20xf32>
    %75 = arith.mulf %73, %74 : vector<13x20xf32>
    %76 = arith.addf %70, %75 : vector<13x20xf32>
    %77 = vector.broadcast %1 : vector<1x20xf32> to vector<13x20xf32>
    %78 = arith.addf %76, %77 : vector<13x20xf32>
    %c26 = arith.constant 26 : index
    %c0_27 = arith.constant 0 : index
    %79 = vector.load %arg14[%c26, %c0_27] : memref<338x20xf32, #tpu.memory_space<vmem>>, vector<13x20xf32>
    tpu.vector_store %arg14[%c26, %c0_27], %78 {strides = array<i32>} : memref<338x20xf32, #tpu.memory_space<vmem>>, vector<13x20xf32>,
    %c0_28 = arith.constant 0 : index
    %c3_29 = arith.constant 3 : index
    %80 = vector.load %arg0[%c0_28, %c3_29] : memref<28x14xf32, #tpu.memory_space<vmem>>, vector<13x1xf32>
    %81 = vector.extract_strided_slice %0 {offsets = [0, 0], sizes = [1, 20], strides = [1, 1]} : vector<4x20xf32> to vector<1x20xf32>
    %82 = vector.broadcast %80 : vector<13x1xf32> to vector<13x20xf32>
    %83 = vector.broadcast %81 : vector<1x20xf32> to vector<13x20xf32>
    %84 = arith.mulf %82, %83 : vector<13x20xf32>
    %c1_30 = arith.constant 1 : index
    %c3_31 = arith.constant 3 : index
    %85 = vector.load %arg0[%c1_30, %c3_31] : memref<28x14xf32, #tpu.memory_space<vmem>>, vector<13x1xf32>
    %86 = vector.extract_strided_slice %0 {offsets = [1, 0], sizes = [1, 20], strides = [1, 1]} : vector<4x20xf32> to vector<1x20xf32>
    %87 = vector.broadcast %85 : vector<13x1xf32> to vector<13x20xf32>
    %88 = vector.broadcast %86 : vector<1x20xf32> to vector<13x20xf32>
    %89 = arith.mulf %87, %88 : vector<13x20xf32>
    %90 = arith.addf %84, %89 : vector<13x20xf32>
    %c0_32 = arith.constant 0 : index
    %c4 = arith.constant 4 : index
    %91 = vector.load %arg0[%c0_32, %c4] : memref<28x14xf32, #tpu.memory_space<vmem>>, vector<13x1xf32>
    %92 = vector.extract_strided_slice %0 {offsets = [2, 0], sizes = [1, 20], strides = [1, 1]} : vector<4x20xf32> to vector<1x20xf32>
    %93 = vector.broadcast %91 : vector<13x1xf32> to vector<13x20xf32>
    %94 = vector.broadcast %92 : vector<1x20xf32> to vector<13x20xf32>
    %95 = arith.mulf %93, %94 : vector<13x20xf32>
    %96 = arith.addf %90, %95 : vector<13x20xf32>
    %c1_33 = arith.constant 1 : index
    %c4_34 = arith.constant 4 : index
    %97 = vector.load %arg0[%c1_33, %c4_34] : memref<28x14xf32, #tpu.memory_space<vmem>>, vector<13x1xf32>
    %98 = vector.extract_strided_slice %0 {offsets = [3, 0], sizes = [1, 20], strides = [1, 1]} : vector<4x20xf32> to vector<1x20xf32>
    %99 = vector.broadcast %97 : vector<13x1xf32> to vector<13x20xf32>
    %100 = vector.broadcast %98 : vector<1x20xf32> to vector<13x20xf32>
    %101 = arith.mulf %99, %100 : vector<13x20xf32>
    %102 = arith.addf %96, %101 : vector<13x20xf32>
    %103 = vector.broadcast %1 : vector<1x20xf32> to vector<13x20xf32>
    %104 = arith.addf %102, %103 : vector<13x20xf32>
    %c39 = arith.constant 39 : index
    %c0_35 = arith.constant 0 : index
    %105 = vector.load %arg14[%c39, %c0_35] : memref<338x20xf32, #tpu.memory_space<vmem>>, vector<13x20xf32>
    tpu.vector_store %arg14[%c39, %c0_35], %104 {strides = array<i32>} : memref<338x20xf32, #tpu.memory_space<vmem>>, vector<13x20xf32>,
    %c0_36 = arith.constant 0 : index
    %c4_37 = arith.constant 4 : index
    %106 = vector.load %arg0[%c0_36, %c4_37] : memref<28x14xf32, #tpu.memory_space<vmem>>, vector<13x1xf32>
    %107 = vector.extract_strided_slice %0 {offsets = [0, 0], sizes = [1, 20], strides = [1, 1]} : vector<4x20xf32> to vector<1x20xf32>
    %108 = vector.broadcast %106 : vector<13x1xf32> to vector<13x20xf32>
    %109 = vector.broadcast %107 : vector<1x20xf32> to vector<13x20xf32>
    %110 = arith.mulf %108, %109 : vector<13x20xf32>
    %c1_38 = arith.constant 1 : index
    %c4_39 = arith.constant 4 : index
    %111 = vector.load %arg0[%c1_38, %c4_39] : memref<28x14xf32, #tpu.memory_space<vmem>>, vector<13x1xf32>
    %112 = vector.extract_strided_slice %0 {offsets = [1, 0], sizes = [1, 20], strides = [1, 1]} : vector<4x20xf32> to vector<1x20xf32>
    %113 = vector.broadcast %111 : vector<13x1xf32> to vector<13x20xf32>
    %114 = vector.broadcast %112 : vector<1x20xf32> to vector<13x20xf32>
    %115 = arith.mulf %113, %114 : vector<13x20xf32>
    %116 = arith.addf %110, %115 : vector<13x20xf32>
    %c0_40 = arith.constant 0 : index
    %c5 = arith.constant 5 : index
    %117 = vector.load %arg0[%c0_40, %c5] : memref<28x14xf32, #tpu.memory_space<vmem>>, vector<13x1xf32>
    %118 = vector.extract_strided_slice %0 {offsets = [2, 0], sizes = [1, 20], strides = [1, 1]} : vector<4x20xf32> to vector<1x20xf32>
    %119 = vector.broadcast %117 : vector<13x1xf32> to vector<13x20xf32>
    %120 = vector.broadcast %118 : vector<1x20xf32> to vector<13x20xf32>
    %121 = arith.mulf %119, %120 : vector<13x20xf32>
    %122 = arith.addf %116, %121 : vector<13x20xf32>
    %c1_41 = arith.constant 1 : index
    %c5_42 = arith.constant 5 : index
    %123 = vector.load %arg0[%c1_41, %c5_42] : memref<28x14xf32, #tpu.memory_space<vmem>>, vector<13x1xf32>
    %124 = vector.extract_strided_slice %0 {offsets = [3, 0], sizes = [1, 20], strides = [1, 1]} : vector<4x20xf32> to vector<1x20xf32>
    %125 = vector.broadcast %123 : vector<13x1xf32> to vector<13x20xf32>
    %126 = vector.broadcast %124 : vector<1x20xf32> to vector<13x20xf32>
    %127 = arith.mulf %125, %126 : vector<13x20xf32>
    %128 = arith.addf %122, %127 : vector<13x20xf32>
    %129 = vector.broadcast %1 : vector<1x20xf32> to vector<13x20xf32>
    %130 = arith.addf %128, %129 : vector<13x20xf32>
    %c52 = arith.constant 52 : index
    %c0_43 = arith.constant 0 : index
    %131 = vector.load %arg14[%c52, %c0_43] : memref<338x20xf32, #tpu.memory_space<vmem>>, vector<13x20xf32>
    tpu.vector_store %arg14[%c52, %c0_43], %130 {strides = array<i32>} : memref<338x20xf32, #tpu.memory_space<vmem>>, vector<13x20xf32>,
    %c0_44 = arith.constant 0 : index
    %c5_45 = arith.constant 5 : index
    %132 = vector.load %arg0[%c0_44, %c5_45] : memref<28x14xf32, #tpu.memory_space<vmem>>, vector<13x1xf32>
    %133 = vector.extract_strided_slice %0 {offsets = [0, 0], sizes = [1, 20], strides = [1, 1]} : vector<4x20xf32> to vector<1x20xf32>
    %134 = vector.broadcast %132 : vector<13x1xf32> to vector<13x20xf32>
    %135 = vector.broadcast %133 : vector<1x20xf32> to vector<13x20xf32>
    %136 = arith.mulf %134, %135 : vector<13x20xf32>
    %c1_46 = arith.constant 1 : index
    %c5_47 = arith.constant 5 : index
    %137 = vector.load %arg0[%c1_46, %c5_47] : memref<28x14xf32, #tpu.memory_space<vmem>>, vector<13x1xf32>
    %138 = vector.extract_strided_slice %0 {offsets = [1, 0], sizes = [1, 20], strides = [1, 1]} : vector<4x20xf32> to vector<1x20xf32>
    %139 = vector.broadcast %137 : vector<13x1xf32> to vector<13x20xf32>
    %140 = vector.broadcast %138 : vector<1x20xf32> to vector<13x20xf32>
    %141 = arith.mulf %139, %140 : vector<13x20xf32>
    %142 = arith.addf %136, %141 : vector<13x20xf32>
    %c0_48 = arith.constant 0 : index
    %c6 = arith.constant 6 : index
    %143 = vector.load %arg0[%c0_48, %c6] : memref<28x14xf32, #tpu.memory_space<vmem>>, vector<13x1xf32>
    %144 = vector.extract_strided_slice %0 {offsets = [2, 0], sizes = [1, 20], strides = [1, 1]} : vector<4x20xf32> to vector<1x20xf32>
    %145 = vector.broadcast %143 : vector<13x1xf32> to vector<13x20xf32>
    %146 = vector.broadcast %144 : vector<1x20xf32> to vector<13x20xf32>
    %147 = arith.mulf %145, %146 : vector<13x20xf32>
    %148 = arith.addf %142, %147 : vector<13x20xf32>
    %c1_49 = arith.constant 1 : index
    %c6_50 = arith.constant 6 : index
    %149 = vector.load %arg0[%c1_49, %c6_50] : memref<28x14xf32, #tpu.memory_space<vmem>>, vector<13x1xf32>
    %150 = vector.extract_strided_slice %0 {offsets = [3, 0], sizes = [1, 20], strides = [1, 1]} : vector<4x20xf32> to vector<1x20xf32>
    %151 = vector.broadcast %149 : vector<13x1xf32> to vector<13x20xf32>
    %152 = vector.broadcast %150 : vector<1x20xf32> to vector<13x20xf32>
    %153 = arith.mulf %151, %152 : vector<13x20xf32>
    %154 = arith.addf %148, %153 : vector<13x20xf32>
    %155 = vector.broadcast %1 : vector<1x20xf32> to vector<13x20xf32>
    %156 = arith.addf %154, %155 : vector<13x20xf32>
    %c65 = arith.constant 65 : index
    %c0_51 = arith.constant 0 : index
    %157 = vector.load %arg14[%c65, %c0_51] : memref<338x20xf32, #tpu.memory_space<vmem>>, vector<13x20xf32>
    tpu.vector_store %arg14[%c65, %c0_51], %156 {strides = array<i32>} : memref<338x20xf32, #tpu.memory_space<vmem>>, vector<13x20xf32>,
    %c0_52 = arith.constant 0 : index
    %c6_53 = arith.constant 6 : index
    %158 = vector.load %arg0[%c0_52, %c6_53] : memref<28x14xf32, #tpu.memory_space<vmem>>, vector<13x1xf32>
    %159 = vector.extract_strided_slice %0 {offsets = [0, 0], sizes = [1, 20], strides = [1, 1]} : vector<4x20xf32> to vector<1x20xf32>
    %160 = vector.broadcast %158 : vector<13x1xf32> to vector<13x20xf32>
    %161 = vector.broadcast %159 : vector<1x20xf32> to vector<13x20xf32>
    %162 = arith.mulf %160, %161 : vector<13x20xf32>
    %c1_54 = arith.constant 1 : index
    %c6_55 = arith.constant 6 : index
    %163 = vector.load %arg0[%c1_54, %c6_55] : memref<28x14xf32, #tpu.memory_space<vmem>>, vector<13x1xf32>
    %164 = vector.extract_strided_slice %0 {offsets = [1, 0], sizes = [1, 20], strides = [1, 1]} : vector<4x20xf32> to vector<1x20xf32>
    %165 = vector.broadcast %163 : vector<13x1xf32> to vector<13x20xf32>
    %166 = vector.broadcast %164 : vector<1x20xf32> to vector<13x20xf32>
    %167 = arith.mulf %165, %166 : vector<13x20xf32>
    %168 = arith.addf %162, %167 : vector<13x20xf32>
    %c0_56 = arith.constant 0 : index
    %c7 = arith.constant 7 : index
    %169 = vector.load %arg0[%c0_56, %c7] : memref<28x14xf32, #tpu.memory_space<vmem>>, vector<13x1xf32>
    %170 = vector.extract_strided_slice %0 {offsets = [2, 0], sizes = [1, 20], strides = [1, 1]} : vector<4x20xf32> to vector<1x20xf32>
    %171 = vector.broadcast %169 : vector<13x1xf32> to vector<13x20xf32>
    %172 = vector.broadcast %170 : vector<1x20xf32> to vector<13x20xf32>
    %173 = arith.mulf %171, %172 : vector<13x20xf32>
    %174 = arith.addf %168, %173 : vector<13x20xf32>
    %c1_57 = arith.constant 1 : index
    %c7_58 = arith.constant 7 : index
    %175 = vector.load %arg0[%c1_57, %c7_58] : memref<28x14xf32, #tpu.memory_space<vmem>>, vector<13x1xf32>
    %176 = vector.extract_strided_slice %0 {offsets = [3, 0], sizes = [1, 20], strides = [1, 1]} : vector<4x20xf32> to vector<1x20xf32>
    %177 = vector.broadcast %175 : vector<13x1xf32> to vector<13x20xf32>
    %178 = vector.broadcast %176 : vector<1x20xf32> to vector<13x20xf32>
    %179 = arith.mulf %177, %178 : vector<13x20xf32>
    %180 = arith.addf %174, %179 : vector<13x20xf32>
    %181 = vector.broadcast %1 : vector<1x20xf32> to vector<13x20xf32>
    %182 = arith.addf %180, %181 : vector<13x20xf32>
    %c78 = arith.constant 78 : index
    %c0_59 = arith.constant 0 : index
    %183 = vector.load %arg14[%c78, %c0_59] : memref<338x20xf32, #tpu.memory_space<vmem>>, vector<13x20xf32>
    tpu.vector_store %arg14[%c78, %c0_59], %182 {strides = array<i32>} : memref<338x20xf32, #tpu.memory_space<vmem>>, vector<13x20xf32>,
    %c0_60 = arith.constant 0 : index
    %c7_61 = arith.constant 7 : index
    %184 = vector.load %arg0[%c0_60, %c7_61] : memref<28x14xf32, #tpu.memory_space<vmem>>, vector<13x1xf32>
    %185 = vector.extract_strided_slice %0 {offsets = [0, 0], sizes = [1, 20], strides = [1, 1]} : vector<4x20xf32> to vector<1x20xf32>
    %186 = vector.broadcast %184 : vector<13x1xf32> to vector<13x20xf32>
    %187 = vector.broadcast %185 : vector<1x20xf32> to vector<13x20xf32>
    %188 = arith.mulf %186, %187 : vector<13x20xf32>
    %c1_62 = arith.constant 1 : index
    %c7_63 = arith.constant 7 : index
    %189 = vector.load %arg0[%c1_62, %c7_63] : memref<28x14xf32, #tpu.memory_space<vmem>>, vector<13x1xf32>
    %190 = vector.extract_strided_slice %0 {offsets = [1, 0], sizes = [1, 20], strides = [1, 1]} : vector<4x20xf32> to vector<1x20xf32>
    %191 = vector.broadcast %189 : vector<13x1xf32> to vector<13x20xf32>
    %192 = vector.broadcast %190 : vector<1x20xf32> to vector<13x20xf32>
    %193 = arith.mulf %191, %192 : vector<13x20xf32>
    %194 = arith.addf %188, %193 : vector<13x20xf32>
    %c0_64 = arith.constant 0 : index
    %c8 = arith.constant 8 : index
    %195 = vector.load %arg0[%c0_64, %c8] : memref<28x14xf32, #tpu.memory_space<vmem>>, vector<13x1xf32>
    %196 = vector.extract_strided_slice %0 {offsets = [2, 0], sizes = [1, 20], strides = [1, 1]} : vector<4x20xf32> to vector<1x20xf32>
    %197 = vector.broadcast %195 : vector<13x1xf32> to vector<13x20xf32>
    %198 = vector.broadcast %196 : vector<1x20xf32> to vector<13x20xf32>
    %199 = arith.mulf %197, %198 : vector<13x20xf32>
    %200 = arith.addf %194, %199 : vector<13x20xf32>
    %c1_65 = arith.constant 1 : index
    %c8_66 = arith.constant 8 : index
    %201 = vector.load %arg0[%c1_65, %c8_66] : memref<28x14xf32, #tpu.memory_space<vmem>>, vector<13x1xf32>
    %202 = vector.extract_strided_slice %0 {offsets = [3, 0], sizes = [1, 20], strides = [1, 1]} : vector<4x20xf32> to vector<1x20xf32>
    %203 = vector.broadcast %201 : vector<13x1xf32> to vector<13x20xf32>
    %204 = vector.broadcast %202 : vector<1x20xf32> to vector<13x20xf32>
    %205 = arith.mulf %203, %204 : vector<13x20xf32>
    %206 = arith.addf %200, %205 : vector<13x20xf32>
    %207 = vector.broadcast %1 : vector<1x20xf32> to vector<13x20xf32>
    %208 = arith.addf %206, %207 : vector<13x20xf32>
    %c91 = arith.constant 91 : index
    %c0_67 = arith.constant 0 : index
    %209 = vector.load %arg14[%c91, %c0_67] : memref<338x20xf32, #tpu.memory_space<vmem>>, vector<13x20xf32>
    tpu.vector_store %arg14[%c91, %c0_67], %208 {strides = array<i32>} : memref<338x20xf32, #tpu.memory_space<vmem>>, vector<13x20xf32>,
    %c0_68 = arith.constant 0 : index
    %c8_69 = arith.constant 8 : index
    %210 = vector.load %arg0[%c0_68, %c8_69] : memref<28x14xf32, #tpu.memory_space<vmem>>, vector<13x1xf32>
    %211 = vector.extract_strided_slice %0 {offsets = [0, 0], sizes = [1, 20], strides = [1, 1]} : vector<4x20xf32> to vector<1x20xf32>
    %212 = vector.broadcast %210 : vector<13x1xf32> to vector<13x20xf32>
    %213 = vector.broadcast %211 : vector<1x20xf32> to vector<13x20xf32>
    %214 = arith.mulf %212, %213 : vector<13x20xf32>
    %c1_70 = arith.constant 1 : index
    %c8_71 = arith.constant 8 : index
    %215 = vector.load %arg0[%c1_70, %c8_71] : memref<28x14xf32, #tpu.memory_space<vmem>>, vector<13x1xf32>
    %216 = vector.extract_strided_slice %0 {offsets = [1, 0], sizes = [1, 20], strides = [1, 1]} : vector<4x20xf32> to vector<1x20xf32>
    %217 = vector.broadcast %215 : vector<13x1xf32> to vector<13x20xf32>
    %218 = vector.broadcast %216 : vector<1x20xf32> to vector<13x20xf32>
    %219 = arith.mulf %217, %218 : vector<13x20xf32>
    %220 = arith.addf %214, %219 : vector<13x20xf32>
    %c0_72 = arith.constant 0 : index
    %c9 = arith.constant 9 : index
    %221 = vector.load %arg0[%c0_72, %c9] : memref<28x14xf32, #tpu.memory_space<vmem>>, vector<13x1xf32>
    %222 = vector.extract_strided_slice %0 {offsets = [2, 0], sizes = [1, 20], strides = [1, 1]} : vector<4x20xf32> to vector<1x20xf32>
    %223 = vector.broadcast %221 : vector<13x1xf32> to vector<13x20xf32>
    %224 = vector.broadcast %222 : vector<1x20xf32> to vector<13x20xf32>
    %225 = arith.mulf %223, %224 : vector<13x20xf32>
    %226 = arith.addf %220, %225 : vector<13x20xf32>
    %c1_73 = arith.constant 1 : index
    %c9_74 = arith.constant 9 : index
    %227 = vector.load %arg0[%c1_73, %c9_74] : memref<28x14xf32, #tpu.memory_space<vmem>>, vector<13x1xf32>
    %228 = vector.extract_strided_slice %0 {offsets = [3, 0], sizes = [1, 20], strides = [1, 1]} : vector<4x20xf32> to vector<1x20xf32>
    %229 = vector.broadcast %227 : vector<13x1xf32> to vector<13x20xf32>
    %230 = vector.broadcast %228 : vector<1x20xf32> to vector<13x20xf32>
    %231 = arith.mulf %229, %230 : vector<13x20xf32>
    %232 = arith.addf %226, %231 : vector<13x20xf32>
    %233 = vector.broadcast %1 : vector<1x20xf32> to vector<13x20xf32>
    %234 = arith.addf %232, %233 : vector<13x20xf32>
    %c104 = arith.constant 104 : index
    %c0_75 = arith.constant 0 : index
    %235 = vector.load %arg14[%c104, %c0_75] : memref<338x20xf32, #tpu.memory_space<vmem>>, vector<13x20xf32>
    tpu.vector_store %arg14[%c104, %c0_75], %234 {strides = array<i32>} : memref<338x20xf32, #tpu.memory_space<vmem>>, vector<13x20xf32>,
    %c0_76 = arith.constant 0 : index
    %c9_77 = arith.constant 9 : index
    %236 = vector.load %arg0[%c0_76, %c9_77] : memref<28x14xf32, #tpu.memory_space<vmem>>, vector<13x1xf32>
    %237 = vector.extract_strided_slice %0 {offsets = [0, 0], sizes = [1, 20], strides = [1, 1]} : vector<4x20xf32> to vector<1x20xf32>
    %238 = vector.broadcast %236 : vector<13x1xf32> to vector<13x20xf32>
    %239 = vector.broadcast %237 : vector<1x20xf32> to vector<13x20xf32>
    %240 = arith.mulf %238, %239 : vector<13x20xf32>
    %c1_78 = arith.constant 1 : index
    %c9_79 = arith.constant 9 : index
    %241 = vector.load %arg0[%c1_78, %c9_79] : memref<28x14xf32, #tpu.memory_space<vmem>>, vector<13x1xf32>
    %242 = vector.extract_strided_slice %0 {offsets = [1, 0], sizes = [1, 20], strides = [1, 1]} : vector<4x20xf32> to vector<1x20xf32>
    %243 = vector.broadcast %241 : vector<13x1xf32> to vector<13x20xf32>
    %244 = vector.broadcast %242 : vector<1x20xf32> to vector<13x20xf32>
    %245 = arith.mulf %243, %244 : vector<13x20xf32>
    %246 = arith.addf %240, %245 : vector<13x20xf32>
    %c0_80 = arith.constant 0 : index
    %c10 = arith.constant 10 : index
    %247 = vector.load %arg0[%c0_80, %c10] : memref<28x14xf32, #tpu.memory_space<vmem>>, vector<13x1xf32>
    %248 = vector.extract_strided_slice %0 {offsets = [2, 0], sizes = [1, 20], strides = [1, 1]} : vector<4x20xf32> to vector<1x20xf32>
    %249 = vector.broadcast %247 : vector<13x1xf32> to vector<13x20xf32>
    %250 = vector.broadcast %248 : vector<1x20xf32> to vector<13x20xf32>
    %251 = arith.mulf %249, %250 : vector<13x20xf32>
    %252 = arith.addf %246, %251 : vector<13x20xf32>
    %c1_81 = arith.constant 1 : index
    %c10_82 = arith.constant 10 : index
    %253 = vector.load %arg0[%c1_81, %c10_82] : memref<28x14xf32, #tpu.memory_space<vmem>>, vector<13x1xf32>
    %254 = vector.extract_strided_slice %0 {offsets = [3, 0], sizes = [1, 20], strides = [1, 1]} : vector<4x20xf32> to vector<1x20xf32>
    %255 = vector.broadcast %253 : vector<13x1xf32> to vector<13x20xf32>
    %256 = vector.broadcast %254 : vector<1x20xf32> to vector<13x20xf32>
    %257 = arith.mulf %255, %256 : vector<13x20xf32>
    %258 = arith.addf %252, %257 : vector<13x20xf32>
    %259 = vector.broadcast %1 : vector<1x20xf32> to vector<13x20xf32>
    %260 = arith.addf %258, %259 : vector<13x20xf32>
    %c117 = arith.constant 117 : index
    %c0_83 = arith.constant 0 : index
    %261 = vector.load %arg14[%c117, %c0_83] : memref<338x20xf32, #tpu.memory_space<vmem>>, vector<13x20xf32>
    tpu.vector_store %arg14[%c117, %c0_83], %260 {strides = array<i32>} : memref<338x20xf32, #tpu.memory_space<vmem>>, vector<13x20xf32>,
    %c0_84 = arith.constant 0 : index
    %c10_85 = arith.constant 10 : index
    %262 = vector.load %arg0[%c0_84, %c10_85] : memref<28x14xf32, #tpu.memory_space<vmem>>, vector<13x1xf32>
    %263 = vector.extract_strided_slice %0 {offsets = [0, 0], sizes = [1, 20], strides = [1, 1]} : vector<4x20xf32> to vector<1x20xf32>
    %264 = vector.broadcast %262 : vector<13x1xf32> to vector<13x20xf32>
    %265 = vector.broadcast %263 : vector<1x20xf32> to vector<13x20xf32>
    %266 = arith.mulf %264, %265 : vector<13x20xf32>
    %c1_86 = arith.constant 1 : index
    %c10_87 = arith.constant 10 : index
    %267 = vector.load %arg0[%c1_86, %c10_87] : memref<28x14xf32, #tpu.memory_space<vmem>>, vector<13x1xf32>
    %268 = vector.extract_strided_slice %0 {offsets = [1, 0], sizes = [1, 20], strides = [1, 1]} : vector<4x20xf32> to vector<1x20xf32>
    %269 = vector.broadcast %267 : vector<13x1xf32> to vector<13x20xf32>
    %270 = vector.broadcast %268 : vector<1x20xf32> to vector<13x20xf32>
    %271 = arith.mulf %269, %270 : vector<13x20xf32>
    %272 = arith.addf %266, %271 : vector<13x20xf32>
    %c0_88 = arith.constant 0 : index
    %c11 = arith.constant 11 : index
    %273 = vector.load %arg0[%c0_88, %c11] : memref<28x14xf32, #tpu.memory_space<vmem>>, vector<13x1xf32>
    %274 = vector.extract_strided_slice %0 {offsets = [2, 0], sizes = [1, 20], strides = [1, 1]} : vector<4x20xf32> to vector<1x20xf32>
    %275 = vector.broadcast %273 : vector<13x1xf32> to vector<13x20xf32>
    %276 = vector.broadcast %274 : vector<1x20xf32> to vector<13x20xf32>
    %277 = arith.mulf %275, %276 : vector<13x20xf32>
    %278 = arith.addf %272, %277 : vector<13x20xf32>
    %c1_89 = arith.constant 1 : index
    %c11_90 = arith.constant 11 : index
    %279 = vector.load %arg0[%c1_89, %c11_90] : memref<28x14xf32, #tpu.memory_space<vmem>>, vector<13x1xf32>
    %280 = vector.extract_strided_slice %0 {offsets = [3, 0], sizes = [1, 20], strides = [1, 1]} : vector<4x20xf32> to vector<1x20xf32>
    %281 = vector.broadcast %279 : vector<13x1xf32> to vector<13x20xf32>
    %282 = vector.broadcast %280 : vector<1x20xf32> to vector<13x20xf32>
    %283 = arith.mulf %281, %282 : vector<13x20xf32>
    %284 = arith.addf %278, %283 : vector<13x20xf32>
    %285 = vector.broadcast %1 : vector<1x20xf32> to vector<13x20xf32>
    %286 = arith.addf %284, %285 : vector<13x20xf32>
    %c130 = arith.constant 130 : index
    %c0_91 = arith.constant 0 : index
    %287 = vector.load %arg14[%c130, %c0_91] : memref<338x20xf32, #tpu.memory_space<vmem>>, vector<13x20xf32>
    tpu.vector_store %arg14[%c130, %c0_91], %286 {strides = array<i32>} : memref<338x20xf32, #tpu.memory_space<vmem>>, vector<13x20xf32>,
    %c0_92 = arith.constant 0 : index
    %c11_93 = arith.constant 11 : index
    %288 = vector.load %arg0[%c0_92, %c11_93] : memref<28x14xf32, #tpu.memory_space<vmem>>, vector<13x1xf32>
    %289 = vector.extract_strided_slice %0 {offsets = [0, 0], sizes = [1, 20], strides = [1, 1]} : vector<4x20xf32> to vector<1x20xf32>
    %290 = vector.broadcast %288 : vector<13x1xf32> to vector<13x20xf32>
    %291 = vector.broadcast %289 : vector<1x20xf32> to vector<13x20xf32>
    %292 = arith.mulf %290, %291 : vector<13x20xf32>
    %c1_94 = arith.constant 1 : index
    %c11_95 = arith.constant 11 : index
    %293 = vector.load %arg0[%c1_94, %c11_95] : memref<28x14xf32, #tpu.memory_space<vmem>>, vector<13x1xf32>
    %294 = vector.extract_strided_slice %0 {offsets = [1, 0], sizes = [1, 20], strides = [1, 1]} : vector<4x20xf32> to vector<1x20xf32>
    %295 = vector.broadcast %293 : vector<13x1xf32> to vector<13x20xf32>
    %296 = vector.broadcast %294 : vector<1x20xf32> to vector<13x20xf32>
    %297 = arith.mulf %295, %296 : vector<13x20xf32>
    %298 = arith.addf %292, %297 : vector<13x20xf32>
    %c0_96 = arith.constant 0 : index
    %c12 = arith.constant 12 : index
    %299 = vector.load %arg0[%c0_96, %c12] : memref<28x14xf32, #tpu.memory_space<vmem>>, vector<13x1xf32>
    %300 = vector.extract_strided_slice %0 {offsets = [2, 0], sizes = [1, 20], strides = [1, 1]} : vector<4x20xf32> to vector<1x20xf32>
    %301 = vector.broadcast %299 : vector<13x1xf32> to vector<13x20xf32>
    %302 = vector.broadcast %300 : vector<1x20xf32> to vector<13x20xf32>
    %303 = arith.mulf %301, %302 : vector<13x20xf32>
    %304 = arith.addf %298, %303 : vector<13x20xf32>
    %c1_97 = arith.constant 1 : index
    %c12_98 = arith.constant 12 : index
    %305 = vector.load %arg0[%c1_97, %c12_98] : memref<28x14xf32, #tpu.memory_space<vmem>>, vector<13x1xf32>
    %306 = vector.extract_strided_slice %0 {offsets = [3, 0], sizes = [1, 20], strides = [1, 1]} : vector<4x20xf32> to vector<1x20xf32>
    %307 = vector.broadcast %305 : vector<13x1xf32> to vector<13x20xf32>
    %308 = vector.broadcast %306 : vector<1x20xf32> to vector<13x20xf32>
    %309 = arith.mulf %307, %308 : vector<13x20xf32>
    %310 = arith.addf %304, %309 : vector<13x20xf32>
    %311 = vector.broadcast %1 : vector<1x20xf32> to vector<13x20xf32>
    %312 = arith.addf %310, %311 : vector<13x20xf32>
    %c143 = arith.constant 143 : index
    %c0_99 = arith.constant 0 : index
    %313 = vector.load %arg14[%c143, %c0_99] : memref<338x20xf32, #tpu.memory_space<vmem>>, vector<13x20xf32>
    tpu.vector_store %arg14[%c143, %c0_99], %312 {strides = array<i32>} : memref<338x20xf32, #tpu.memory_space<vmem>>, vector<13x20xf32>,
    %c0_100 = arith.constant 0 : index
    %c12_101 = arith.constant 12 : index
    %314 = vector.load %arg0[%c0_100, %c12_101] : memref<28x14xf32, #tpu.memory_space<vmem>>, vector<13x1xf32>
    %315 = vector.extract_strided_slice %0 {offsets = [0, 0], sizes = [1, 20], strides = [1, 1]} : vector<4x20xf32> to vector<1x20xf32>
    %316 = vector.broadcast %314 : vector<13x1xf32> to vector<13x20xf32>
    %317 = vector.broadcast %315 : vector<1x20xf32> to vector<13x20xf32>
    %318 = arith.mulf %316, %317 : vector<13x20xf32>
    %c1_102 = arith.constant 1 : index
    %c12_103 = arith.constant 12 : index
    %319 = vector.load %arg0[%c1_102, %c12_103] : memref<28x14xf32, #tpu.memory_space<vmem>>, vector<13x1xf32>
    %320 = vector.extract_strided_slice %0 {offsets = [1, 0], sizes = [1, 20], strides = [1, 1]} : vector<4x20xf32> to vector<1x20xf32>
    %321 = vector.broadcast %319 : vector<13x1xf32> to vector<13x20xf32>
    %322 = vector.broadcast %320 : vector<1x20xf32> to vector<13x20xf32>
    %323 = arith.mulf %321, %322 : vector<13x20xf32>
    %324 = arith.addf %318, %323 : vector<13x20xf32>
    %c0_104 = arith.constant 0 : index
    %c13_105 = arith.constant 13 : index
    %325 = vector.load %arg0[%c0_104, %c13_105] : memref<28x14xf32, #tpu.memory_space<vmem>>, vector<13x1xf32>
    %326 = vector.extract_strided_slice %0 {offsets = [2, 0], sizes = [1, 20], strides = [1, 1]} : vector<4x20xf32> to vector<1x20xf32>
    %327 = vector.broadcast %325 : vector<13x1xf32> to vector<13x20xf32>
    %328 = vector.broadcast %326 : vector<1x20xf32> to vector<13x20xf32>
    %329 = arith.mulf %327, %328 : vector<13x20xf32>
    %330 = arith.addf %324, %329 : vector<13x20xf32>
    %c1_106 = arith.constant 1 : index
    %c13_107 = arith.constant 13 : index
    %331 = vector.load %arg0[%c1_106, %c13_107] : memref<28x14xf32, #tpu.memory_space<vmem>>, vector<13x1xf32>
    %332 = vector.extract_strided_slice %0 {offsets = [3, 0], sizes = [1, 20], strides = [1, 1]} : vector<4x20xf32> to vector<1x20xf32>
    %333 = vector.broadcast %331 : vector<13x1xf32> to vector<13x20xf32>
    %334 = vector.broadcast %332 : vector<1x20xf32> to vector<13x20xf32>
    %335 = arith.mulf %333, %334 : vector<13x20xf32>
    %336 = arith.addf %330, %335 : vector<13x20xf32>
    %337 = vector.broadcast %1 : vector<1x20xf32> to vector<13x20xf32>
    %338 = arith.addf %336, %337 : vector<13x20xf32>
    %c156 = arith.constant 156 : index
    %c0_108 = arith.constant 0 : index
    %339 = vector.load %arg14[%c156, %c0_108] : memref<338x20xf32, #tpu.memory_space<vmem>>, vector<13x20xf32>
    tpu.vector_store %arg14[%c156, %c0_108], %338 {strides = array<i32>} : memref<338x20xf32, #tpu.memory_space<vmem>>, vector<13x20xf32>,
    %c14 = arith.constant 14 : index
    %c0_109 = arith.constant 0 : index
    %340 = vector.load %arg0[%c14, %c0_109] : memref<28x14xf32, #tpu.memory_space<vmem>>, vector<13x1xf32>
    %341 = vector.extract_strided_slice %0 {offsets = [0, 0], sizes = [1, 20], strides = [1, 1]} : vector<4x20xf32> to vector<1x20xf32>
    %342 = vector.broadcast %340 : vector<13x1xf32> to vector<13x20xf32>
    %343 = vector.broadcast %341 : vector<1x20xf32> to vector<13x20xf32>
    %344 = arith.mulf %342, %343 : vector<13x20xf32>
    %c15 = arith.constant 15 : index
    %c0_110 = arith.constant 0 : index
    %345 = vector.load %arg0[%c15, %c0_110] : memref<28x14xf32, #tpu.memory_space<vmem>>, vector<13x1xf32>
    %346 = vector.extract_strided_slice %0 {offsets = [1, 0], sizes = [1, 20], strides = [1, 1]} : vector<4x20xf32> to vector<1x20xf32>
    %347 = vector.broadcast %345 : vector<13x1xf32> to vector<13x20xf32>
    %348 = vector.broadcast %346 : vector<1x20xf32> to vector<13x20xf32>
    %349 = arith.mulf %347, %348 : vector<13x20xf32>
    %350 = arith.addf %344, %349 : vector<13x20xf32>
    %c14_111 = arith.constant 14 : index
    %c1_112 = arith.constant 1 : index
    %351 = vector.load %arg0[%c14_111, %c1_112] : memref<28x14xf32, #tpu.memory_space<vmem>>, vector<13x1xf32>
    %352 = vector.extract_strided_slice %0 {offsets = [2, 0], sizes = [1, 20], strides = [1, 1]} : vector<4x20xf32> to vector<1x20xf32>
    %353 = vector.broadcast %351 : vector<13x1xf32> to vector<13x20xf32>
    %354 = vector.broadcast %352 : vector<1x20xf32> to vector<13x20xf32>
    %355 = arith.mulf %353, %354 : vector<13x20xf32>
    %356 = arith.addf %350, %355 : vector<13x20xf32>
    %c15_113 = arith.constant 15 : index
    %c1_114 = arith.constant 1 : index
    %357 = vector.load %arg0[%c15_113, %c1_114] : memref<28x14xf32, #tpu.memory_space<vmem>>, vector<13x1xf32>
    %358 = vector.extract_strided_slice %0 {offsets = [3, 0], sizes = [1, 20], strides = [1, 1]} : vector<4x20xf32> to vector<1x20xf32>
    %359 = vector.broadcast %357 : vector<13x1xf32> to vector<13x20xf32>
    %360 = vector.broadcast %358 : vector<1x20xf32> to vector<13x20xf32>
    %361 = arith.mulf %359, %360 : vector<13x20xf32>
    %362 = arith.addf %356, %361 : vector<13x20xf32>
    %363 = vector.broadcast %1 : vector<1x20xf32> to vector<13x20xf32>
    %364 = arith.addf %362, %363 : vector<13x20xf32>
    %c169 = arith.constant 169 : index
    %c0_115 = arith.constant 0 : index
    %365 = vector.load %arg14[%c169, %c0_115] : memref<338x20xf32, #tpu.memory_space<vmem>>, vector<13x20xf32>
    tpu.vector_store %arg14[%c169, %c0_115], %364 {strides = array<i32>} : memref<338x20xf32, #tpu.memory_space<vmem>>, vector<13x20xf32>,
    %c14_116 = arith.constant 14 : index
    %c1_117 = arith.constant 1 : index
    %366 = vector.load %arg0[%c14_116, %c1_117] : memref<28x14xf32, #tpu.memory_space<vmem>>, vector<13x1xf32>
    %367 = vector.extract_strided_slice %0 {offsets = [0, 0], sizes = [1, 20], strides = [1, 1]} : vector<4x20xf32> to vector<1x20xf32>
    %368 = vector.broadcast %366 : vector<13x1xf32> to vector<13x20xf32>
    %369 = vector.broadcast %367 : vector<1x20xf32> to vector<13x20xf32>
    %370 = arith.mulf %368, %369 : vector<13x20xf32>
    %c15_118 = arith.constant 15 : index
    %c1_119 = arith.constant 1 : index
    %371 = vector.load %arg0[%c15_118, %c1_119] : memref<28x14xf32, #tpu.memory_space<vmem>>, vector<13x1xf32>
    %372 = vector.extract_strided_slice %0 {offsets = [1, 0], sizes = [1, 20], strides = [1, 1]} : vector<4x20xf32> to vector<1x20xf32>
    %373 = vector.broadcast %371 : vector<13x1xf32> to vector<13x20xf32>
    %374 = vector.broadcast %372 : vector<1x20xf32> to vector<13x20xf32>
    %375 = arith.mulf %373, %374 : vector<13x20xf32>
    %376 = arith.addf %370, %375 : vector<13x20xf32>
    %c14_120 = arith.constant 14 : index
    %c2_121 = arith.constant 2 : index
    %377 = vector.load %arg0[%c14_120, %c2_121] : memref<28x14xf32, #tpu.memory_space<vmem>>, vector<13x1xf32>
    %378 = vector.extract_strided_slice %0 {offsets = [2, 0], sizes = [1, 20], strides = [1, 1]} : vector<4x20xf32> to vector<1x20xf32>
    %379 = vector.broadcast %377 : vector<13x1xf32> to vector<13x20xf32>
    %380 = vector.broadcast %378 : vector<1x20xf32> to vector<13x20xf32>
    %381 = arith.mulf %379, %380 : vector<13x20xf32>
    %382 = arith.addf %376, %381 : vector<13x20xf32>
    %c15_122 = arith.constant 15 : index
    %c2_123 = arith.constant 2 : index
    %383 = vector.load %arg0[%c15_122, %c2_123] : memref<28x14xf32, #tpu.memory_space<vmem>>, vector<13x1xf32>
    %384 = vector.extract_strided_slice %0 {offsets = [3, 0], sizes = [1, 20], strides = [1, 1]} : vector<4x20xf32> to vector<1x20xf32>
    %385 = vector.broadcast %383 : vector<13x1xf32> to vector<13x20xf32>
    %386 = vector.broadcast %384 : vector<1x20xf32> to vector<13x20xf32>
    %387 = arith.mulf %385, %386 : vector<13x20xf32>
    %388 = arith.addf %382, %387 : vector<13x20xf32>
    %389 = vector.broadcast %1 : vector<1x20xf32> to vector<13x20xf32>
    %390 = arith.addf %388, %389 : vector<13x20xf32>
    %c182 = arith.constant 182 : index
    %c0_124 = arith.constant 0 : index
    %391 = vector.load %arg14[%c182, %c0_124] : memref<338x20xf32, #tpu.memory_space<vmem>>, vector<13x20xf32>
    tpu.vector_store %arg14[%c182, %c0_124], %390 {strides = array<i32>} : memref<338x20xf32, #tpu.memory_space<vmem>>, vector<13x20xf32>,
    %c14_125 = arith.constant 14 : index
    %c2_126 = arith.constant 2 : index
    %392 = vector.load %arg0[%c14_125, %c2_126] : memref<28x14xf32, #tpu.memory_space<vmem>>, vector<13x1xf32>
    %393 = vector.extract_strided_slice %0 {offsets = [0, 0], sizes = [1, 20], strides = [1, 1]} : vector<4x20xf32> to vector<1x20xf32>
    %394 = vector.broadcast %392 : vector<13x1xf32> to vector<13x20xf32>
    %395 = vector.broadcast %393 : vector<1x20xf32> to vector<13x20xf32>
    %396 = arith.mulf %394, %395 : vector<13x20xf32>
    %c15_127 = arith.constant 15 : index
    %c2_128 = arith.constant 2 : index
    %397 = vector.load %arg0[%c15_127, %c2_128] : memref<28x14xf32, #tpu.memory_space<vmem>>, vector<13x1xf32>
    %398 = vector.extract_strided_slice %0 {offsets = [1, 0], sizes = [1, 20], strides = [1, 1]} : vector<4x20xf32> to vector<1x20xf32>
    %399 = vector.broadcast %397 : vector<13x1xf32> to vector<13x20xf32>
    %400 = vector.broadcast %398 : vector<1x20xf32> to vector<13x20xf32>
    %401 = arith.mulf %399, %400 : vector<13x20xf32>
    %402 = arith.addf %396, %401 : vector<13x20xf32>
    %c14_129 = arith.constant 14 : index
    %c3_130 = arith.constant 3 : index
    %403 = vector.load %arg0[%c14_129, %c3_130] : memref<28x14xf32, #tpu.memory_space<vmem>>, vector<13x1xf32>
    %404 = vector.extract_strided_slice %0 {offsets = [2, 0], sizes = [1, 20], strides = [1, 1]} : vector<4x20xf32> to vector<1x20xf32>
    %405 = vector.broadcast %403 : vector<13x1xf32> to vector<13x20xf32>
    %406 = vector.broadcast %404 : vector<1x20xf32> to vector<13x20xf32>
    %407 = arith.mulf %405, %406 : vector<13x20xf32>
    %408 = arith.addf %402, %407 : vector<13x20xf32>
    %c15_131 = arith.constant 15 : index
    %c3_132 = arith.constant 3 : index
    %409 = vector.load %arg0[%c15_131, %c3_132] : memref<28x14xf32, #tpu.memory_space<vmem>>, vector<13x1xf32>
    %410 = vector.extract_strided_slice %0 {offsets = [3, 0], sizes = [1, 20], strides = [1, 1]} : vector<4x20xf32> to vector<1x20xf32>
    %411 = vector.broadcast %409 : vector<13x1xf32> to vector<13x20xf32>
    %412 = vector.broadcast %410 : vector<1x20xf32> to vector<13x20xf32>
    %413 = arith.mulf %411, %412 : vector<13x20xf32>
    %414 = arith.addf %408, %413 : vector<13x20xf32>
    %415 = vector.broadcast %1 : vector<1x20xf32> to vector<13x20xf32>
    %416 = arith.addf %414, %415 : vector<13x20xf32>
    %c195 = arith.constant 195 : index
    %c0_133 = arith.constant 0 : index
    %417 = vector.load %arg14[%c195, %c0_133] : memref<338x20xf32, #tpu.memory_space<vmem>>, vector<13x20xf32>
    tpu.vector_store %arg14[%c195, %c0_133], %416 {strides = array<i32>} : memref<338x20xf32, #tpu.memory_space<vmem>>, vector<13x20xf32>,
    %c14_134 = arith.constant 14 : index
    %c3_135 = arith.constant 3 : index
    %418 = vector.load %arg0[%c14_134, %c3_135] : memref<28x14xf32, #tpu.memory_space<vmem>>, vector<13x1xf32>
    %419 = vector.extract_strided_slice %0 {offsets = [0, 0], sizes = [1, 20], strides = [1, 1]} : vector<4x20xf32> to vector<1x20xf32>
    %420 = vector.broadcast %418 : vector<13x1xf32> to vector<13x20xf32>
    %421 = vector.broadcast %419 : vector<1x20xf32> to vector<13x20xf32>
    %422 = arith.mulf %420, %421 : vector<13x20xf32>
    %c15_136 = arith.constant 15 : index
    %c3_137 = arith.constant 3 : index
    %423 = vector.load %arg0[%c15_136, %c3_137] : memref<28x14xf32, #tpu.memory_space<vmem>>, vector<13x1xf32>
    %424 = vector.extract_strided_slice %0 {offsets = [1, 0], sizes = [1, 20], strides = [1, 1]} : vector<4x20xf32> to vector<1x20xf32>
    %425 = vector.broadcast %423 : vector<13x1xf32> to vector<13x20xf32>
    %426 = vector.broadcast %424 : vector<1x20xf32> to vector<13x20xf32>
    %427 = arith.mulf %425, %426 : vector<13x20xf32>
    %428 = arith.addf %422, %427 : vector<13x20xf32>
    %c14_138 = arith.constant 14 : index
    %c4_139 = arith.constant 4 : index
    %429 = vector.load %arg0[%c14_138, %c4_139] : memref<28x14xf32, #tpu.memory_space<vmem>>, vector<13x1xf32>
    %430 = vector.extract_strided_slice %0 {offsets = [2, 0], sizes = [1, 20], strides = [1, 1]} : vector<4x20xf32> to vector<1x20xf32>
    %431 = vector.broadcast %429 : vector<13x1xf32> to vector<13x20xf32>
    %432 = vector.broadcast %430 : vector<1x20xf32> to vector<13x20xf32>
    %433 = arith.mulf %431, %432 : vector<13x20xf32>
    %434 = arith.addf %428, %433 : vector<13x20xf32>
    %c15_140 = arith.constant 15 : index
    %c4_141 = arith.constant 4 : index
    %435 = vector.load %arg0[%c15_140, %c4_141] : memref<28x14xf32, #tpu.memory_space<vmem>>, vector<13x1xf32>
    %436 = vector.extract_strided_slice %0 {offsets = [3, 0], sizes = [1, 20], strides = [1, 1]} : vector<4x20xf32> to vector<1x20xf32>
    %437 = vector.broadcast %435 : vector<13x1xf32> to vector<13x20xf32>
    %438 = vector.broadcast %436 : vector<1x20xf32> to vector<13x20xf32>
    %439 = arith.mulf %437, %438 : vector<13x20xf32>
    %440 = arith.addf %434, %439 : vector<13x20xf32>
    %441 = vector.broadcast %1 : vector<1x20xf32> to vector<13x20xf32>
    %442 = arith.addf %440, %441 : vector<13x20xf32>
    %c208 = arith.constant 208 : index
    %c0_142 = arith.constant 0 : index
    %443 = vector.load %arg14[%c208, %c0_142] : memref<338x20xf32, #tpu.memory_space<vmem>>, vector<13x20xf32>
    tpu.vector_store %arg14[%c208, %c0_142], %442 {strides = array<i32>} : memref<338x20xf32, #tpu.memory_space<vmem>>, vector<13x20xf32>,
    %c14_143 = arith.constant 14 : index
    %c4_144 = arith.constant 4 : index
    %444 = vector.load %arg0[%c14_143, %c4_144] : memref<28x14xf32, #tpu.memory_space<vmem>>, vector<13x1xf32>
    %445 = vector.extract_strided_slice %0 {offsets = [0, 0], sizes = [1, 20], strides = [1, 1]} : vector<4x20xf32> to vector<1x20xf32>
    %446 = vector.broadcast %444 : vector<13x1xf32> to vector<13x20xf32>
    %447 = vector.broadcast %445 : vector<1x20xf32> to vector<13x20xf32>
    %448 = arith.mulf %446, %447 : vector<13x20xf32>
    %c15_145 = arith.constant 15 : index
    %c4_146 = arith.constant 4 : index
    %449 = vector.load %arg0[%c15_145, %c4_146] : memref<28x14xf32, #tpu.memory_space<vmem>>, vector<13x1xf32>
    %450 = vector.extract_strided_slice %0 {offsets = [1, 0], sizes = [1, 20], strides = [1, 1]} : vector<4x20xf32> to vector<1x20xf32>
    %451 = vector.broadcast %449 : vector<13x1xf32> to vector<13x20xf32>
    %452 = vector.broadcast %450 : vector<1x20xf32> to vector<13x20xf32>
    %453 = arith.mulf %451, %452 : vector<13x20xf32>
    %454 = arith.addf %448, %453 : vector<13x20xf32>
    %c14_147 = arith.constant 14 : index
    %c5_148 = arith.constant 5 : index
    %455 = vector.load %arg0[%c14_147, %c5_148] : memref<28x14xf32, #tpu.memory_space<vmem>>, vector<13x1xf32>
    %456 = vector.extract_strided_slice %0 {offsets = [2, 0], sizes = [1, 20], strides = [1, 1]} : vector<4x20xf32> to vector<1x20xf32>
    %457 = vector.broadcast %455 : vector<13x1xf32> to vector<13x20xf32>
    %458 = vector.broadcast %456 : vector<1x20xf32> to vector<13x20xf32>
    %459 = arith.mulf %457, %458 : vector<13x20xf32>
    %460 = arith.addf %454, %459 : vector<13x20xf32>
    %c15_149 = arith.constant 15 : index
    %c5_150 = arith.constant 5 : index
    %461 = vector.load %arg0[%c15_149, %c5_150] : memref<28x14xf32, #tpu.memory_space<vmem>>, vector<13x1xf32>
    %462 = vector.extract_strided_slice %0 {offsets = [3, 0], sizes = [1, 20], strides = [1, 1]} : vector<4x20xf32> to vector<1x20xf32>
    %463 = vector.broadcast %461 : vector<13x1xf32> to vector<13x20xf32>
    %464 = vector.broadcast %462 : vector<1x20xf32> to vector<13x20xf32>
    %465 = arith.mulf %463, %464 : vector<13x20xf32>
    %466 = arith.addf %460, %465 : vector<13x20xf32>
    %467 = vector.broadcast %1 : vector<1x20xf32> to vector<13x20xf32>
    %468 = arith.addf %466, %467 : vector<13x20xf32>
    %c221 = arith.constant 221 : index
    %c0_151 = arith.constant 0 : index
    %469 = vector.load %arg14[%c221, %c0_151] : memref<338x20xf32, #tpu.memory_space<vmem>>, vector<13x20xf32>
    tpu.vector_store %arg14[%c221, %c0_151], %468 {strides = array<i32>} : memref<338x20xf32, #tpu.memory_space<vmem>>, vector<13x20xf32>,
    %c14_152 = arith.constant 14 : index
    %c5_153 = arith.constant 5 : index
    %470 = vector.load %arg0[%c14_152, %c5_153] : memref<28x14xf32, #tpu.memory_space<vmem>>, vector<13x1xf32>
    %471 = vector.extract_strided_slice %0 {offsets = [0, 0], sizes = [1, 20], strides = [1, 1]} : vector<4x20xf32> to vector<1x20xf32>
    %472 = vector.broadcast %470 : vector<13x1xf32> to vector<13x20xf32>
    %473 = vector.broadcast %471 : vector<1x20xf32> to vector<13x20xf32>
    %474 = arith.mulf %472, %473 : vector<13x20xf32>
    %c15_154 = arith.constant 15 : index
    %c5_155 = arith.constant 5 : index
    %475 = vector.load %arg0[%c15_154, %c5_155] : memref<28x14xf32, #tpu.memory_space<vmem>>, vector<13x1xf32>
    %476 = vector.extract_strided_slice %0 {offsets = [1, 0], sizes = [1, 20], strides = [1, 1]} : vector<4x20xf32> to vector<1x20xf32>
    %477 = vector.broadcast %475 : vector<13x1xf32> to vector<13x20xf32>
    %478 = vector.broadcast %476 : vector<1x20xf32> to vector<13x20xf32>
    %479 = arith.mulf %477, %478 : vector<13x20xf32>
    %480 = arith.addf %474, %479 : vector<13x20xf32>
    %c14_156 = arith.constant 14 : index
    %c6_157 = arith.constant 6 : index
    %481 = vector.load %arg0[%c14_156, %c6_157] : memref<28x14xf32, #tpu.memory_space<vmem>>, vector<13x1xf32>
    %482 = vector.extract_strided_slice %0 {offsets = [2, 0], sizes = [1, 20], strides = [1, 1]} : vector<4x20xf32> to vector<1x20xf32>
    %483 = vector.broadcast %481 : vector<13x1xf32> to vector<13x20xf32>
    %484 = vector.broadcast %482 : vector<1x20xf32> to vector<13x20xf32>
    %485 = arith.mulf %483, %484 : vector<13x20xf32>
    %486 = arith.addf %480, %485 : vector<13x20xf32>
    %c15_158 = arith.constant 15 : index
    %c6_159 = arith.constant 6 : index
    %487 = vector.load %arg0[%c15_158, %c6_159] : memref<28x14xf32, #tpu.memory_space<vmem>>, vector<13x1xf32>
    %488 = vector.extract_strided_slice %0 {offsets = [3, 0], sizes = [1, 20], strides = [1, 1]} : vector<4x20xf32> to vector<1x20xf32>
    %489 = vector.broadcast %487 : vector<13x1xf32> to vector<13x20xf32>
    %490 = vector.broadcast %488 : vector<1x20xf32> to vector<13x20xf32>
    %491 = arith.mulf %489, %490 : vector<13x20xf32>
    %492 = arith.addf %486, %491 : vector<13x20xf32>
    %493 = vector.broadcast %1 : vector<1x20xf32> to vector<13x20xf32>
    %494 = arith.addf %492, %493 : vector<13x20xf32>
    %c234 = arith.constant 234 : index
    %c0_160 = arith.constant 0 : index
    %495 = vector.load %arg14[%c234, %c0_160] : memref<338x20xf32, #tpu.memory_space<vmem>>, vector<13x20xf32>
    tpu.vector_store %arg14[%c234, %c0_160], %494 {strides = array<i32>} : memref<338x20xf32, #tpu.memory_space<vmem>>, vector<13x20xf32>,
    %c14_161 = arith.constant 14 : index
    %c6_162 = arith.constant 6 : index
    %496 = vector.load %arg0[%c14_161, %c6_162] : memref<28x14xf32, #tpu.memory_space<vmem>>, vector<13x1xf32>
    %497 = vector.extract_strided_slice %0 {offsets = [0, 0], sizes = [1, 20], strides = [1, 1]} : vector<4x20xf32> to vector<1x20xf32>
    %498 = vector.broadcast %496 : vector<13x1xf32> to vector<13x20xf32>
    %499 = vector.broadcast %497 : vector<1x20xf32> to vector<13x20xf32>
    %500 = arith.mulf %498, %499 : vector<13x20xf32>
    %c15_163 = arith.constant 15 : index
    %c6_164 = arith.constant 6 : index
    %501 = vector.load %arg0[%c15_163, %c6_164] : memref<28x14xf32, #tpu.memory_space<vmem>>, vector<13x1xf32>
    %502 = vector.extract_strided_slice %0 {offsets = [1, 0], sizes = [1, 20], strides = [1, 1]} : vector<4x20xf32> to vector<1x20xf32>
    %503 = vector.broadcast %501 : vector<13x1xf32> to vector<13x20xf32>
    %504 = vector.broadcast %502 : vector<1x20xf32> to vector<13x20xf32>
    %505 = arith.mulf %503, %504 : vector<13x20xf32>
    %506 = arith.addf %500, %505 : vector<13x20xf32>
    %c14_165 = arith.constant 14 : index
    %c7_166 = arith.constant 7 : index
    %507 = vector.load %arg0[%c14_165, %c7_166] : memref<28x14xf32, #tpu.memory_space<vmem>>, vector<13x1xf32>
    %508 = vector.extract_strided_slice %0 {offsets = [2, 0], sizes = [1, 20], strides = [1, 1]} : vector<4x20xf32> to vector<1x20xf32>
    %509 = vector.broadcast %507 : vector<13x1xf32> to vector<13x20xf32>
    %510 = vector.broadcast %508 : vector<1x20xf32> to vector<13x20xf32>
    %511 = arith.mulf %509, %510 : vector<13x20xf32>
    %512 = arith.addf %506, %511 : vector<13x20xf32>
    %c15_167 = arith.constant 15 : index
    %c7_168 = arith.constant 7 : index
    %513 = vector.load %arg0[%c15_167, %c7_168] : memref<28x14xf32, #tpu.memory_space<vmem>>, vector<13x1xf32>
    %514 = vector.extract_strided_slice %0 {offsets = [3, 0], sizes = [1, 20], strides = [1, 1]} : vector<4x20xf32> to vector<1x20xf32>
    %515 = vector.broadcast %513 : vector<13x1xf32> to vector<13x20xf32>
    %516 = vector.broadcast %514 : vector<1x20xf32> to vector<13x20xf32>
    %517 = arith.mulf %515, %516 : vector<13x20xf32>
    %518 = arith.addf %512, %517 : vector<13x20xf32>
    %519 = vector.broadcast %1 : vector<1x20xf32> to vector<13x20xf32>
    %520 = arith.addf %518, %519 : vector<13x20xf32>
    %c247 = arith.constant 247 : index
    %c0_169 = arith.constant 0 : index
    %521 = vector.load %arg14[%c247, %c0_169] : memref<338x20xf32, #tpu.memory_space<vmem>>, vector<13x20xf32>
    tpu.vector_store %arg14[%c247, %c0_169], %520 {strides = array<i32>} : memref<338x20xf32, #tpu.memory_space<vmem>>, vector<13x20xf32>,
    %c14_170 = arith.constant 14 : index
    %c7_171 = arith.constant 7 : index
    %522 = vector.load %arg0[%c14_170, %c7_171] : memref<28x14xf32, #tpu.memory_space<vmem>>, vector<13x1xf32>
    %523 = vector.extract_strided_slice %0 {offsets = [0, 0], sizes = [1, 20], strides = [1, 1]} : vector<4x20xf32> to vector<1x20xf32>
    %524 = vector.broadcast %522 : vector<13x1xf32> to vector<13x20xf32>
    %525 = vector.broadcast %523 : vector<1x20xf32> to vector<13x20xf32>
    %526 = arith.mulf %524, %525 : vector<13x20xf32>
    %c15_172 = arith.constant 15 : index
    %c7_173 = arith.constant 7 : index
    %527 = vector.load %arg0[%c15_172, %c7_173] : memref<28x14xf32, #tpu.memory_space<vmem>>, vector<13x1xf32>
    %528 = vector.extract_strided_slice %0 {offsets = [1, 0], sizes = [1, 20], strides = [1, 1]} : vector<4x20xf32> to vector<1x20xf32>
    %529 = vector.broadcast %527 : vector<13x1xf32> to vector<13x20xf32>
    %530 = vector.broadcast %528 : vector<1x20xf32> to vector<13x20xf32>
    %531 = arith.mulf %529, %530 : vector<13x20xf32>
    %532 = arith.addf %526, %531 : vector<13x20xf32>
    %c14_174 = arith.constant 14 : index
    %c8_175 = arith.constant 8 : index
    %533 = vector.load %arg0[%c14_174, %c8_175] : memref<28x14xf32, #tpu.memory_space<vmem>>, vector<13x1xf32>
    %534 = vector.extract_strided_slice %0 {offsets = [2, 0], sizes = [1, 20], strides = [1, 1]} : vector<4x20xf32> to vector<1x20xf32>
    %535 = vector.broadcast %533 : vector<13x1xf32> to vector<13x20xf32>
    %536 = vector.broadcast %534 : vector<1x20xf32> to vector<13x20xf32>
    %537 = arith.mulf %535, %536 : vector<13x20xf32>
    %538 = arith.addf %532, %537 : vector<13x20xf32>
    %c15_176 = arith.constant 15 : index
    %c8_177 = arith.constant 8 : index
    %539 = vector.load %arg0[%c15_176, %c8_177] : memref<28x14xf32, #tpu.memory_space<vmem>>, vector<13x1xf32>
    %540 = vector.extract_strided_slice %0 {offsets = [3, 0], sizes = [1, 20], strides = [1, 1]} : vector<4x20xf32> to vector<1x20xf32>
    %541 = vector.broadcast %539 : vector<13x1xf32> to vector<13x20xf32>
    %542 = vector.broadcast %540 : vector<1x20xf32> to vector<13x20xf32>
    %543 = arith.mulf %541, %542 : vector<13x20xf32>
    %544 = arith.addf %538, %543 : vector<13x20xf32>
    %545 = vector.broadcast %1 : vector<1x20xf32> to vector<13x20xf32>
    %546 = arith.addf %544, %545 : vector<13x20xf32>
    %c260 = arith.constant 260 : index
    %c0_178 = arith.constant 0 : index
    %547 = vector.load %arg14[%c260, %c0_178] : memref<338x20xf32, #tpu.memory_space<vmem>>, vector<13x20xf32>
    tpu.vector_store %arg14[%c260, %c0_178], %546 {strides = array<i32>} : memref<338x20xf32, #tpu.memory_space<vmem>>, vector<13x20xf32>,
    %c14_179 = arith.constant 14 : index
    %c8_180 = arith.constant 8 : index
    %548 = vector.load %arg0[%c14_179, %c8_180] : memref<28x14xf32, #tpu.memory_space<vmem>>, vector<13x1xf32>
    %549 = vector.extract_strided_slice %0 {offsets = [0, 0], sizes = [1, 20], strides = [1, 1]} : vector<4x20xf32> to vector<1x20xf32>
    %550 = vector.broadcast %548 : vector<13x1xf32> to vector<13x20xf32>
    %551 = vector.broadcast %549 : vector<1x20xf32> to vector<13x20xf32>
    %552 = arith.mulf %550, %551 : vector<13x20xf32>
    %c15_181 = arith.constant 15 : index
    %c8_182 = arith.constant 8 : index
    %553 = vector.load %arg0[%c15_181, %c8_182] : memref<28x14xf32, #tpu.memory_space<vmem>>, vector<13x1xf32>
    %554 = vector.extract_strided_slice %0 {offsets = [1, 0], sizes = [1, 20], strides = [1, 1]} : vector<4x20xf32> to vector<1x20xf32>
    %555 = vector.broadcast %553 : vector<13x1xf32> to vector<13x20xf32>
    %556 = vector.broadcast %554 : vector<1x20xf32> to vector<13x20xf32>
    %557 = arith.mulf %555, %556 : vector<13x20xf32>
    %558 = arith.addf %552, %557 : vector<13x20xf32>
    %c14_183 = arith.constant 14 : index
    %c9_184 = arith.constant 9 : index
    %559 = vector.load %arg0[%c14_183, %c9_184] : memref<28x14xf32, #tpu.memory_space<vmem>>, vector<13x1xf32>
    %560 = vector.extract_strided_slice %0 {offsets = [2, 0], sizes = [1, 20], strides = [1, 1]} : vector<4x20xf32> to vector<1x20xf32>
    %561 = vector.broadcast %559 : vector<13x1xf32> to vector<13x20xf32>
    %562 = vector.broadcast %560 : vector<1x20xf32> to vector<13x20xf32>
    %563 = arith.mulf %561, %562 : vector<13x20xf32>
    %564 = arith.addf %558, %563 : vector<13x20xf32>
    %c15_185 = arith.constant 15 : index
    %c9_186 = arith.constant 9 : index
    %565 = vector.load %arg0[%c15_185, %c9_186] : memref<28x14xf32, #tpu.memory_space<vmem>>, vector<13x1xf32>
    %566 = vector.extract_strided_slice %0 {offsets = [3, 0], sizes = [1, 20], strides = [1, 1]} : vector<4x20xf32> to vector<1x20xf32>
    %567 = vector.broadcast %565 : vector<13x1xf32> to vector<13x20xf32>
    %568 = vector.broadcast %566 : vector<1x20xf32> to vector<13x20xf32>
    %569 = arith.mulf %567, %568 : vector<13x20xf32>
    %570 = arith.addf %564, %569 : vector<13x20xf32>
    %571 = vector.broadcast %1 : vector<1x20xf32> to vector<13x20xf32>
    %572 = arith.addf %570, %571 : vector<13x20xf32>
    %c273 = arith.constant 273 : index
    %c0_187 = arith.constant 0 : index
    %573 = vector.load %arg14[%c273, %c0_187] : memref<338x20xf32, #tpu.memory_space<vmem>>, vector<13x20xf32>
    tpu.vector_store %arg14[%c273, %c0_187], %572 {strides = array<i32>} : memref<338x20xf32, #tpu.memory_space<vmem>>, vector<13x20xf32>,
    %c14_188 = arith.constant 14 : index
    %c9_189 = arith.constant 9 : index
    %574 = vector.load %arg0[%c14_188, %c9_189] : memref<28x14xf32, #tpu.memory_space<vmem>>, vector<13x1xf32>
    %575 = vector.extract_strided_slice %0 {offsets = [0, 0], sizes = [1, 20], strides = [1, 1]} : vector<4x20xf32> to vector<1x20xf32>
    %576 = vector.broadcast %574 : vector<13x1xf32> to vector<13x20xf32>
    %577 = vector.broadcast %575 : vector<1x20xf32> to vector<13x20xf32>
    %578 = arith.mulf %576, %577 : vector<13x20xf32>
    %c15_190 = arith.constant 15 : index
    %c9_191 = arith.constant 9 : index
    %579 = vector.load %arg0[%c15_190, %c9_191] : memref<28x14xf32, #tpu.memory_space<vmem>>, vector<13x1xf32>
    %580 = vector.extract_strided_slice %0 {offsets = [1, 0], sizes = [1, 20], strides = [1, 1]} : vector<4x20xf32> to vector<1x20xf32>
    %581 = vector.broadcast %579 : vector<13x1xf32> to vector<13x20xf32>
    %582 = vector.broadcast %580 : vector<1x20xf32> to vector<13x20xf32>
    %583 = arith.mulf %581, %582 : vector<13x20xf32>
    %584 = arith.addf %578, %583 : vector<13x20xf32>
    %c14_192 = arith.constant 14 : index
    %c10_193 = arith.constant 10 : index
    %585 = vector.load %arg0[%c14_192, %c10_193] : memref<28x14xf32, #tpu.memory_space<vmem>>, vector<13x1xf32>
    %586 = vector.extract_strided_slice %0 {offsets = [2, 0], sizes = [1, 20], strides = [1, 1]} : vector<4x20xf32> to vector<1x20xf32>
    %587 = vector.broadcast %585 : vector<13x1xf32> to vector<13x20xf32>
    %588 = vector.broadcast %586 : vector<1x20xf32> to vector<13x20xf32>
    %589 = arith.mulf %587, %588 : vector<13x20xf32>
    %590 = arith.addf %584, %589 : vector<13x20xf32>
    %c15_194 = arith.constant 15 : index
    %c10_195 = arith.constant 10 : index
    %591 = vector.load %arg0[%c15_194, %c10_195] : memref<28x14xf32, #tpu.memory_space<vmem>>, vector<13x1xf32>
    %592 = vector.extract_strided_slice %0 {offsets = [3, 0], sizes = [1, 20], strides = [1, 1]} : vector<4x20xf32> to vector<1x20xf32>
    %593 = vector.broadcast %591 : vector<13x1xf32> to vector<13x20xf32>
    %594 = vector.broadcast %592 : vector<1x20xf32> to vector<13x20xf32>
    %595 = arith.mulf %593, %594 : vector<13x20xf32>
    %596 = arith.addf %590, %595 : vector<13x20xf32>
    %597 = vector.broadcast %1 : vector<1x20xf32> to vector<13x20xf32>
    %598 = arith.addf %596, %597 : vector<13x20xf32>
    %c286 = arith.constant 286 : index
    %c0_196 = arith.constant 0 : index
    %599 = vector.load %arg14[%c286, %c0_196] : memref<338x20xf32, #tpu.memory_space<vmem>>, vector<13x20xf32>
    tpu.vector_store %arg14[%c286, %c0_196], %598 {strides = array<i32>} : memref<338x20xf32, #tpu.memory_space<vmem>>, vector<13x20xf32>,
    %c14_197 = arith.constant 14 : index
    %c10_198 = arith.constant 10 : index
    %600 = vector.load %arg0[%c14_197, %c10_198] : memref<28x14xf32, #tpu.memory_space<vmem>>, vector<13x1xf32>
    %601 = vector.extract_strided_slice %0 {offsets = [0, 0], sizes = [1, 20], strides = [1, 1]} : vector<4x20xf32> to vector<1x20xf32>
    %602 = vector.broadcast %600 : vector<13x1xf32> to vector<13x20xf32>
    %603 = vector.broadcast %601 : vector<1x20xf32> to vector<13x20xf32>
    %604 = arith.mulf %602, %603 : vector<13x20xf32>
    %c15_199 = arith.constant 15 : index
    %c10_200 = arith.constant 10 : index
    %605 = vector.load %arg0[%c15_199, %c10_200] : memref<28x14xf32, #tpu.memory_space<vmem>>, vector<13x1xf32>
    %606 = vector.extract_strided_slice %0 {offsets = [1, 0], sizes = [1, 20], strides = [1, 1]} : vector<4x20xf32> to vector<1x20xf32>
    %607 = vector.broadcast %605 : vector<13x1xf32> to vector<13x20xf32>
    %608 = vector.broadcast %606 : vector<1x20xf32> to vector<13x20xf32>
    %609 = arith.mulf %607, %608 : vector<13x20xf32>
    %610 = arith.addf %604, %609 : vector<13x20xf32>
    %c14_201 = arith.constant 14 : index
    %c11_202 = arith.constant 11 : index
    %611 = vector.load %arg0[%c14_201, %c11_202] : memref<28x14xf32, #tpu.memory_space<vmem>>, vector<13x1xf32>
    %612 = vector.extract_strided_slice %0 {offsets = [2, 0], sizes = [1, 20], strides = [1, 1]} : vector<4x20xf32> to vector<1x20xf32>
    %613 = vector.broadcast %611 : vector<13x1xf32> to vector<13x20xf32>
    %614 = vector.broadcast %612 : vector<1x20xf32> to vector<13x20xf32>
    %615 = arith.mulf %613, %614 : vector<13x20xf32>
    %616 = arith.addf %610, %615 : vector<13x20xf32>
    %c15_203 = arith.constant 15 : index
    %c11_204 = arith.constant 11 : index
    %617 = vector.load %arg0[%c15_203, %c11_204] : memref<28x14xf32, #tpu.memory_space<vmem>>, vector<13x1xf32>
    %618 = vector.extract_strided_slice %0 {offsets = [3, 0], sizes = [1, 20], strides = [1, 1]} : vector<4x20xf32> to vector<1x20xf32>
    %619 = vector.broadcast %617 : vector<13x1xf32> to vector<13x20xf32>
    %620 = vector.broadcast %618 : vector<1x20xf32> to vector<13x20xf32>
    %621 = arith.mulf %619, %620 : vector<13x20xf32>
    %622 = arith.addf %616, %621 : vector<13x20xf32>
    %623 = vector.broadcast %1 : vector<1x20xf32> to vector<13x20xf32>
    %624 = arith.addf %622, %623 : vector<13x20xf32>
    %c299 = arith.constant 299 : index
    %c0_205 = arith.constant 0 : index
    %625 = vector.load %arg14[%c299, %c0_205] : memref<338x20xf32, #tpu.memory_space<vmem>>, vector<13x20xf32>
    tpu.vector_store %arg14[%c299, %c0_205], %624 {strides = array<i32>} : memref<338x20xf32, #tpu.memory_space<vmem>>, vector<13x20xf32>,
    %c14_206 = arith.constant 14 : index
    %c11_207 = arith.constant 11 : index
    %626 = vector.load %arg0[%c14_206, %c11_207] : memref<28x14xf32, #tpu.memory_space<vmem>>, vector<13x1xf32>
    %627 = vector.extract_strided_slice %0 {offsets = [0, 0], sizes = [1, 20], strides = [1, 1]} : vector<4x20xf32> to vector<1x20xf32>
    %628 = vector.broadcast %626 : vector<13x1xf32> to vector<13x20xf32>
    %629 = vector.broadcast %627 : vector<1x20xf32> to vector<13x20xf32>
    %630 = arith.mulf %628, %629 : vector<13x20xf32>
    %c15_208 = arith.constant 15 : index
    %c11_209 = arith.constant 11 : index
    %631 = vector.load %arg0[%c15_208, %c11_209] : memref<28x14xf32, #tpu.memory_space<vmem>>, vector<13x1xf32>
    %632 = vector.extract_strided_slice %0 {offsets = [1, 0], sizes = [1, 20], strides = [1, 1]} : vector<4x20xf32> to vector<1x20xf32>
    %633 = vector.broadcast %631 : vector<13x1xf32> to vector<13x20xf32>
    %634 = vector.broadcast %632 : vector<1x20xf32> to vector<13x20xf32>
    %635 = arith.mulf %633, %634 : vector<13x20xf32>
    %636 = arith.addf %630, %635 : vector<13x20xf32>
    %c14_210 = arith.constant 14 : index
    %c12_211 = arith.constant 12 : index
    %637 = vector.load %arg0[%c14_210, %c12_211] : memref<28x14xf32, #tpu.memory_space<vmem>>, vector<13x1xf32>
    %638 = vector.extract_strided_slice %0 {offsets = [2, 0], sizes = [1, 20], strides = [1, 1]} : vector<4x20xf32> to vector<1x20xf32>
    %639 = vector.broadcast %637 : vector<13x1xf32> to vector<13x20xf32>
    %640 = vector.broadcast %638 : vector<1x20xf32> to vector<13x20xf32>
    %641 = arith.mulf %639, %640 : vector<13x20xf32>
    %642 = arith.addf %636, %641 : vector<13x20xf32>
    %c15_212 = arith.constant 15 : index
    %c12_213 = arith.constant 12 : index
    %643 = vector.load %arg0[%c15_212, %c12_213] : memref<28x14xf32, #tpu.memory_space<vmem>>, vector<13x1xf32>
    %644 = vector.extract_strided_slice %0 {offsets = [3, 0], sizes = [1, 20], strides = [1, 1]} : vector<4x20xf32> to vector<1x20xf32>
    %645 = vector.broadcast %643 : vector<13x1xf32> to vector<13x20xf32>
    %646 = vector.broadcast %644 : vector<1x20xf32> to vector<13x20xf32>
    %647 = arith.mulf %645, %646 : vector<13x20xf32>
    %648 = arith.addf %642, %647 : vector<13x20xf32>
    %649 = vector.broadcast %1 : vector<1x20xf32> to vector<13x20xf32>
    %650 = arith.addf %648, %649 : vector<13x20xf32>
    %c312 = arith.constant 312 : index
    %c0_214 = arith.constant 0 : index
    %651 = vector.load %arg14[%c312, %c0_214] : memref<338x20xf32, #tpu.memory_space<vmem>>, vector<13x20xf32>
    tpu.vector_store %arg14[%c312, %c0_214], %650 {strides = array<i32>} : memref<338x20xf32, #tpu.memory_space<vmem>>, vector<13x20xf32>,
    %c14_215 = arith.constant 14 : index
    %c12_216 = arith.constant 12 : index
    %652 = vector.load %arg0[%c14_215, %c12_216] : memref<28x14xf32, #tpu.memory_space<vmem>>, vector<13x1xf32>
    %653 = vector.extract_strided_slice %0 {offsets = [0, 0], sizes = [1, 20], strides = [1, 1]} : vector<4x20xf32> to vector<1x20xf32>
    %654 = vector.broadcast %652 : vector<13x1xf32> to vector<13x20xf32>
    %655 = vector.broadcast %653 : vector<1x20xf32> to vector<13x20xf32>
    %656 = arith.mulf %654, %655 : vector<13x20xf32>
    %c15_217 = arith.constant 15 : index
    %c12_218 = arith.constant 12 : index
    %657 = vector.load %arg0[%c15_217, %c12_218] : memref<28x14xf32, #tpu.memory_space<vmem>>, vector<13x1xf32>
    %658 = vector.extract_strided_slice %0 {offsets = [1, 0], sizes = [1, 20], strides = [1, 1]} : vector<4x20xf32> to vector<1x20xf32>
    %659 = vector.broadcast %657 : vector<13x1xf32> to vector<13x20xf32>
    %660 = vector.broadcast %658 : vector<1x20xf32> to vector<13x20xf32>
    %661 = arith.mulf %659, %660 : vector<13x20xf32>
    %662 = arith.addf %656, %661 : vector<13x20xf32>
    %c14_219 = arith.constant 14 : index
    %c13_220 = arith.constant 13 : index
    %663 = vector.load %arg0[%c14_219, %c13_220] : memref<28x14xf32, #tpu.memory_space<vmem>>, vector<13x1xf32>
    %664 = vector.extract_strided_slice %0 {offsets = [2, 0], sizes = [1, 20], strides = [1, 1]} : vector<4x20xf32> to vector<1x20xf32>
    %665 = vector.broadcast %663 : vector<13x1xf32> to vector<13x20xf32>
    %666 = vector.broadcast %664 : vector<1x20xf32> to vector<13x20xf32>
    %667 = arith.mulf %665, %666 : vector<13x20xf32>
    %668 = arith.addf %662, %667 : vector<13x20xf32>
    %c15_221 = arith.constant 15 : index
    %c13_222 = arith.constant 13 : index
    %669 = vector.load %arg0[%c15_221, %c13_222] : memref<28x14xf32, #tpu.memory_space<vmem>>, vector<13x1xf32>
    %670 = vector.extract_strided_slice %0 {offsets = [3, 0], sizes = [1, 20], strides = [1, 1]} : vector<4x20xf32> to vector<1x20xf32>
    %671 = vector.broadcast %669 : vector<13x1xf32> to vector<13x20xf32>
    %672 = vector.broadcast %670 : vector<1x20xf32> to vector<13x20xf32>
    %673 = arith.mulf %671, %672 : vector<13x20xf32>
    %674 = arith.addf %668, %673 : vector<13x20xf32>
    %675 = vector.broadcast %1 : vector<1x20xf32> to vector<13x20xf32>
    %676 = arith.addf %674, %675 : vector<13x20xf32>
    %c325 = arith.constant 325 : index
    %c0_223 = arith.constant 0 : index
    %677 = vector.load %arg14[%c325, %c0_223] : memref<338x20xf32, #tpu.memory_space<vmem>>, vector<13x20xf32>
    tpu.vector_store %arg14[%c325, %c0_223], %676 {strides = array<i32>} : memref<338x20xf32, #tpu.memory_space<vmem>>, vector<13x20xf32>,
    %c0_224 = arith.constant 0 : index
    %c0_225 = arith.constant 0 : index
    %678 = vector.load %arg14[%c0_224, %c0_225] : memref<338x20xf32, #tpu.memory_space<vmem>>, vector<338x20xf32>
    %cst = arith.constant dense<0.000000e+00> : vector<20xf32>
    %679 = vector.multi_reduction <add>, %678, %cst [0] : vector<338x20xf32> to vector<20xf32>
    %680 = vector.shape_cast %679 : vector<20xf32> to vector<1x20xf32>
    %681 = arith.mulf %678, %678 : vector<338x20xf32>
    %cst_226 = arith.constant dense<0.000000e+00> : vector<20xf32>
    %682 = vector.multi_reduction <add>, %681, %cst_226 [0] : vector<338x20xf32> to vector<20xf32>
    %683 = vector.shape_cast %682 : vector<20xf32> to vector<1x20xf32>
    %cst_227 = arith.constant 2.958580e-03 : f32
    %684 = vector.broadcast %cst_227 : f32 to vector<1x20xf32>
    %685 = arith.mulf %680, %684 : vector<1x20xf32>
    %cst_228 = arith.constant 2.958580e-03 : f32
    %686 = vector.broadcast %cst_228 : f32 to vector<1x20xf32>
    %687 = arith.mulf %683, %686 : vector<1x20xf32>
    %688 = arith.mulf %685, %685 : vector<1x20xf32>
    %689 = arith.subf %687, %688 : vector<1x20xf32>
    %c0_229 = arith.constant 0 : index
    %c0_230 = arith.constant 0 : index
    %690 = vector.load %arg3[%c0_229, %c0_230] : memref<1x20xf32, #tpu.memory_space<vmem>>, vector<1x20xf32>
    %cst_231 = arith.constant 9.99999974E-6 : f32
    %691 = vector.broadcast %cst_231 : f32 to vector<1x20xf32>
    %692 = arith.addf %689, %691 : vector<1x20xf32>
    %693 = math.rsqrt %692 : vector<1x20xf32>
    %694 = arith.mulf %690, %693 : vector<1x20xf32>
    %c0_232 = arith.constant 0 : index
    %c0_233 = arith.constant 0 : index
    %695 = vector.load %arg4[%c0_232, %c0_233] : memref<1x20xf32, #tpu.memory_space<vmem>>, vector<1x20xf32>
    %696 = arith.mulf %685, %694 : vector<1x20xf32>
    %697 = arith.subf %695, %696 : vector<1x20xf32>
    %698 = vector.broadcast %694 : vector<1x20xf32> to vector<338x20xf32>
    %699 = arith.mulf %678, %698 : vector<338x20xf32>
    %700 = vector.broadcast %697 : vector<1x20xf32> to vector<338x20xf32>
    %701 = arith.addf %699, %700 : vector<338x20xf32>
    %cst_234 = arith.constant 0.000000e+00 : f32
    %702 = vector.broadcast %cst_234 : f32 to vector<338x20xf32>
    %703 = arith.maximumf %701, %702 : vector<338x20xf32>
    %c0_235 = arith.constant 0 : index
    %c0_236 = arith.constant 0 : index
    %704 = vector.load %arg14[%c0_235, %c0_236] : memref<338x20xf32, #tpu.memory_space<vmem>>, vector<338x20xf32>
    tpu.vector_store %arg14[%c0_235, %c0_236], %703 {strides = array<i32>} : memref<338x20xf32, #tpu.memory_space<vmem>>, vector<338x20xf32>,
    %cst_237 = arith.constant 0.000000e+00 : f32
    %705 = vector.broadcast %cst_237 : f32 to vector<128x20xf32>
    %c0_238 = arith.constant 0 : index
    %c0_239 = arith.constant 0 : index
    %706 = vector.load %arg15[%c0_238, %c0_239] : memref<128x20xf32, #tpu.memory_space<vmem>>, vector<128x20xf32>
    tpu.vector_store %arg15[%c0_238, %c0_239], %705 {strides = array<i32>} : memref<128x20xf32, #tpu.memory_space<vmem>>, vector<128x20xf32>,
    %c0_240 = arith.constant 0 : index
    %c0_241 = arith.constant 0 : index
    %707 = tpu.strided_load %arg14[%c0_240, %c0_241] {strides = array<i32: 2, 1>} : memref<338x20xf32, #tpu.memory_space<vmem>>, vector<6x20xf32>
    %c1_242 = arith.constant 1 : index
    %c0_243 = arith.constant 0 : index
    %708 = tpu.strided_load %arg14[%c1_242, %c0_243] {strides = array<i32: 2, 1>} : memref<338x20xf32, #tpu.memory_space<vmem>>, vector<6x20xf32>
    %709 = arith.maximumf %707, %708 : vector<6x20xf32>
    %c13_244 = arith.constant 13 : index
    %c0_245 = arith.constant 0 : index
    %710 = tpu.strided_load %arg14[%c13_244, %c0_245] {strides = array<i32: 2, 1>} : memref<338x20xf32, #tpu.memory_space<vmem>>, vector<6x20xf32>
    %c14_246 = arith.constant 14 : index
    %c0_247 = arith.constant 0 : index
    %711 = tpu.strided_load %arg14[%c14_246, %c0_247] {strides = array<i32: 2, 1>} : memref<338x20xf32, #tpu.memory_space<vmem>>, vector<6x20xf32>
    %712 = arith.maximumf %710, %711 : vector<6x20xf32>
    %713 = arith.maximumf %709, %712 : vector<6x20xf32>
    %c9_248 = arith.constant 9 : index
    %c0_249 = arith.constant 0 : index
    %714 = vector.load %arg15[%c9_248, %c0_249] : memref<128x20xf32, #tpu.memory_space<vmem>>, vector<6x20xf32>
    tpu.vector_store %arg15[%c9_248, %c0_249], %713 {strides = array<i32>} : memref<128x20xf32, #tpu.memory_space<vmem>>, vector<6x20xf32>,
    %c26_250 = arith.constant 26 : index
    %c0_251 = arith.constant 0 : index
    %715 = tpu.strided_load %arg14[%c26_250, %c0_251] {strides = array<i32: 2, 1>} : memref<338x20xf32, #tpu.memory_space<vmem>>, vector<6x20xf32>
    %c27 = arith.constant 27 : index
    %c0_252 = arith.constant 0 : index
    %716 = tpu.strided_load %arg14[%c27, %c0_252] {strides = array<i32: 2, 1>} : memref<338x20xf32, #tpu.memory_space<vmem>>, vector<6x20xf32>
    %717 = arith.maximumf %715, %716 : vector<6x20xf32>
    %c39_253 = arith.constant 39 : index
    %c0_254 = arith.constant 0 : index
    %718 = tpu.strided_load %arg14[%c39_253, %c0_254] {strides = array<i32: 2, 1>} : memref<338x20xf32, #tpu.memory_space<vmem>>, vector<6x20xf32>
    %c40 = arith.constant 40 : index
    %c0_255 = arith.constant 0 : index
    %719 = tpu.strided_load %arg14[%c40, %c0_255] {strides = array<i32: 2, 1>} : memref<338x20xf32, #tpu.memory_space<vmem>>, vector<6x20xf32>
    %720 = arith.maximumf %718, %719 : vector<6x20xf32>
    %721 = arith.maximumf %717, %720 : vector<6x20xf32>
    %c17 = arith.constant 17 : index
    %c0_256 = arith.constant 0 : index
    %722 = vector.load %arg15[%c17, %c0_256] : memref<128x20xf32, #tpu.memory_space<vmem>>, vector<6x20xf32>
    tpu.vector_store %arg15[%c17, %c0_256], %721 {strides = array<i32>} : memref<128x20xf32, #tpu.memory_space<vmem>>, vector<6x20xf32>,
    %c52_257 = arith.constant 52 : index
    %c0_258 = arith.constant 0 : index
    %723 = tpu.strided_load %arg14[%c52_257, %c0_258] {strides = array<i32: 2, 1>} : memref<338x20xf32, #tpu.memory_space<vmem>>, vector<6x20xf32>
    %c53 = arith.constant 53 : index
    %c0_259 = arith.constant 0 : index
    %724 = tpu.strided_load %arg14[%c53, %c0_259] {strides = array<i32: 2, 1>} : memref<338x20xf32, #tpu.memory_space<vmem>>, vector<6x20xf32>
    %725 = arith.maximumf %723, %724 : vector<6x20xf32>
    %c65_260 = arith.constant 65 : index
    %c0_261 = arith.constant 0 : index
    %726 = tpu.strided_load %arg14[%c65_260, %c0_261] {strides = array<i32: 2, 1>} : memref<338x20xf32, #tpu.memory_space<vmem>>, vector<6x20xf32>
    %c66 = arith.constant 66 : index
    %c0_262 = arith.constant 0 : index
    %727 = tpu.strided_load %arg14[%c66, %c0_262] {strides = array<i32: 2, 1>} : memref<338x20xf32, #tpu.memory_space<vmem>>, vector<6x20xf32>
    %728 = arith.maximumf %726, %727 : vector<6x20xf32>
    %729 = arith.maximumf %725, %728 : vector<6x20xf32>
    %c25 = arith.constant 25 : index
    %c0_263 = arith.constant 0 : index
    %730 = vector.load %arg15[%c25, %c0_263] : memref<128x20xf32, #tpu.memory_space<vmem>>, vector<6x20xf32>
    tpu.vector_store %arg15[%c25, %c0_263], %729 {strides = array<i32>} : memref<128x20xf32, #tpu.memory_space<vmem>>, vector<6x20xf32>,
    %c78_264 = arith.constant 78 : index
    %c0_265 = arith.constant 0 : index
    %731 = tpu.strided_load %arg14[%c78_264, %c0_265] {strides = array<i32: 2, 1>} : memref<338x20xf32, #tpu.memory_space<vmem>>, vector<6x20xf32>
    %c79 = arith.constant 79 : index
    %c0_266 = arith.constant 0 : index
    %732 = tpu.strided_load %arg14[%c79, %c0_266] {strides = array<i32: 2, 1>} : memref<338x20xf32, #tpu.memory_space<vmem>>, vector<6x20xf32>
    %733 = arith.maximumf %731, %732 : vector<6x20xf32>
    %c91_267 = arith.constant 91 : index
    %c0_268 = arith.constant 0 : index
    %734 = tpu.strided_load %arg14[%c91_267, %c0_268] {strides = array<i32: 2, 1>} : memref<338x20xf32, #tpu.memory_space<vmem>>, vector<6x20xf32>
    %c92 = arith.constant 92 : index
    %c0_269 = arith.constant 0 : index
    %735 = tpu.strided_load %arg14[%c92, %c0_269] {strides = array<i32: 2, 1>} : memref<338x20xf32, #tpu.memory_space<vmem>>, vector<6x20xf32>
    %736 = arith.maximumf %734, %735 : vector<6x20xf32>
    %737 = arith.maximumf %733, %736 : vector<6x20xf32>
    %c33 = arith.constant 33 : index
    %c0_270 = arith.constant 0 : index
    %738 = vector.load %arg15[%c33, %c0_270] : memref<128x20xf32, #tpu.memory_space<vmem>>, vector<6x20xf32>
    tpu.vector_store %arg15[%c33, %c0_270], %737 {strides = array<i32>} : memref<128x20xf32, #tpu.memory_space<vmem>>, vector<6x20xf32>,
    %c104_271 = arith.constant 104 : index
    %c0_272 = arith.constant 0 : index
    %739 = tpu.strided_load %arg14[%c104_271, %c0_272] {strides = array<i32: 2, 1>} : memref<338x20xf32, #tpu.memory_space<vmem>>, vector<6x20xf32>
    %c105 = arith.constant 105 : index
    %c0_273 = arith.constant 0 : index
    %740 = tpu.strided_load %arg14[%c105, %c0_273] {strides = array<i32: 2, 1>} : memref<338x20xf32, #tpu.memory_space<vmem>>, vector<6x20xf32>
    %741 = arith.maximumf %739, %740 : vector<6x20xf32>
    %c117_274 = arith.constant 117 : index
    %c0_275 = arith.constant 0 : index
    %742 = tpu.strided_load %arg14[%c117_274, %c0_275] {strides = array<i32: 2, 1>} : memref<338x20xf32, #tpu.memory_space<vmem>>, vector<6x20xf32>
    %c118 = arith.constant 118 : index
    %c0_276 = arith.constant 0 : index
    %743 = tpu.strided_load %arg14[%c118, %c0_276] {strides = array<i32: 2, 1>} : memref<338x20xf32, #tpu.memory_space<vmem>>, vector<6x20xf32>
    %744 = arith.maximumf %742, %743 : vector<6x20xf32>
    %745 = arith.maximumf %741, %744 : vector<6x20xf32>
    %c41 = arith.constant 41 : index
    %c0_277 = arith.constant 0 : index
    %746 = vector.load %arg15[%c41, %c0_277] : memref<128x20xf32, #tpu.memory_space<vmem>>, vector<6x20xf32>
    tpu.vector_store %arg15[%c41, %c0_277], %745 {strides = array<i32>} : memref<128x20xf32, #tpu.memory_space<vmem>>, vector<6x20xf32>,
    %c130_278 = arith.constant 130 : index
    %c0_279 = arith.constant 0 : index
    %747 = tpu.strided_load %arg14[%c130_278, %c0_279] {strides = array<i32: 2, 1>} : memref<338x20xf32, #tpu.memory_space<vmem>>, vector<6x20xf32>
    %c131 = arith.constant 131 : index
    %c0_280 = arith.constant 0 : index
    %748 = tpu.strided_load %arg14[%c131, %c0_280] {strides = array<i32: 2, 1>} : memref<338x20xf32, #tpu.memory_space<vmem>>, vector<6x20xf32>
    %749 = arith.maximumf %747, %748 : vector<6x20xf32>
    %c143_281 = arith.constant 143 : index
    %c0_282 = arith.constant 0 : index
    %750 = tpu.strided_load %arg14[%c143_281, %c0_282] {strides = array<i32: 2, 1>} : memref<338x20xf32, #tpu.memory_space<vmem>>, vector<6x20xf32>
    %c144 = arith.constant 144 : index
    %c0_283 = arith.constant 0 : index
    %751 = tpu.strided_load %arg14[%c144, %c0_283] {strides = array<i32: 2, 1>} : memref<338x20xf32, #tpu.memory_space<vmem>>, vector<6x20xf32>
    %752 = arith.maximumf %750, %751 : vector<6x20xf32>
    %753 = arith.maximumf %749, %752 : vector<6x20xf32>
    %c49 = arith.constant 49 : index
    %c0_284 = arith.constant 0 : index
    %754 = vector.load %arg15[%c49, %c0_284] : memref<128x20xf32, #tpu.memory_space<vmem>>, vector<6x20xf32>
    tpu.vector_store %arg15[%c49, %c0_284], %753 {strides = array<i32>} : memref<128x20xf32, #tpu.memory_space<vmem>>, vector<6x20xf32>,
    %c169_285 = arith.constant 169 : index
    %c0_286 = arith.constant 0 : index
    %755 = tpu.strided_load %arg14[%c169_285, %c0_286] {strides = array<i32: 2, 1>} : memref<338x20xf32, #tpu.memory_space<vmem>>, vector<6x20xf32>
    %c170 = arith.constant 170 : index
    %c0_287 = arith.constant 0 : index
    %756 = tpu.strided_load %arg14[%c170, %c0_287] {strides = array<i32: 2, 1>} : memref<338x20xf32, #tpu.memory_space<vmem>>, vector<6x20xf32>
    %757 = arith.maximumf %755, %756 : vector<6x20xf32>
    %c182_288 = arith.constant 182 : index
    %c0_289 = arith.constant 0 : index
    %758 = tpu.strided_load %arg14[%c182_288, %c0_289] {strides = array<i32: 2, 1>} : memref<338x20xf32, #tpu.memory_space<vmem>>, vector<6x20xf32>
    %c183 = arith.constant 183 : index
    %c0_290 = arith.constant 0 : index
    %759 = tpu.strided_load %arg14[%c183, %c0_290] {strides = array<i32: 2, 1>} : memref<338x20xf32, #tpu.memory_space<vmem>>, vector<6x20xf32>
    %760 = arith.maximumf %758, %759 : vector<6x20xf32>
    %761 = arith.maximumf %757, %760 : vector<6x20xf32>
    %c73 = arith.constant 73 : index
    %c0_291 = arith.constant 0 : index
    %762 = vector.load %arg15[%c73, %c0_291] : memref<128x20xf32, #tpu.memory_space<vmem>>, vector<6x20xf32>
    tpu.vector_store %arg15[%c73, %c0_291], %761 {strides = array<i32>} : memref<128x20xf32, #tpu.memory_space<vmem>>, vector<6x20xf32>,
    %c195_292 = arith.constant 195 : index
    %c0_293 = arith.constant 0 : index
    %763 = tpu.strided_load %arg14[%c195_292, %c0_293] {strides = array<i32: 2, 1>} : memref<338x20xf32, #tpu.memory_space<vmem>>, vector<6x20xf32>
    %c196 = arith.constant 196 : index
    %c0_294 = arith.constant 0 : index
    %764 = tpu.strided_load %arg14[%c196, %c0_294] {strides = array<i32: 2, 1>} : memref<338x20xf32, #tpu.memory_space<vmem>>, vector<6x20xf32>
    %765 = arith.maximumf %763, %764 : vector<6x20xf32>
    %c208_295 = arith.constant 208 : index
    %c0_296 = arith.constant 0 : index
    %766 = tpu.strided_load %arg14[%c208_295, %c0_296] {strides = array<i32: 2, 1>} : memref<338x20xf32, #tpu.memory_space<vmem>>, vector<6x20xf32>
    %c209 = arith.constant 209 : index
    %c0_297 = arith.constant 0 : index
    %767 = tpu.strided_load %arg14[%c209, %c0_297] {strides = array<i32: 2, 1>} : memref<338x20xf32, #tpu.memory_space<vmem>>, vector<6x20xf32>
    %768 = arith.maximumf %766, %767 : vector<6x20xf32>
    %769 = arith.maximumf %765, %768 : vector<6x20xf32>
    %c81 = arith.constant 81 : index
    %c0_298 = arith.constant 0 : index
    %770 = vector.load %arg15[%c81, %c0_298] : memref<128x20xf32, #tpu.memory_space<vmem>>, vector<6x20xf32>
    tpu.vector_store %arg15[%c81, %c0_298], %769 {strides = array<i32>} : memref<128x20xf32, #tpu.memory_space<vmem>>, vector<6x20xf32>,
    %c221_299 = arith.constant 221 : index
    %c0_300 = arith.constant 0 : index
    %771 = tpu.strided_load %arg14[%c221_299, %c0_300] {strides = array<i32: 2, 1>} : memref<338x20xf32, #tpu.memory_space<vmem>>, vector<6x20xf32>
    %c222 = arith.constant 222 : index
    %c0_301 = arith.constant 0 : index
    %772 = tpu.strided_load %arg14[%c222, %c0_301] {strides = array<i32: 2, 1>} : memref<338x20xf32, #tpu.memory_space<vmem>>, vector<6x20xf32>
    %773 = arith.maximumf %771, %772 : vector<6x20xf32>
    %c234_302 = arith.constant 234 : index
    %c0_303 = arith.constant 0 : index
    %774 = tpu.strided_load %arg14[%c234_302, %c0_303] {strides = array<i32: 2, 1>} : memref<338x20xf32, #tpu.memory_space<vmem>>, vector<6x20xf32>
    %c235 = arith.constant 235 : index
    %c0_304 = arith.constant 0 : index
    %775 = tpu.strided_load %arg14[%c235, %c0_304] {strides = array<i32: 2, 1>} : memref<338x20xf32, #tpu.memory_space<vmem>>, vector<6x20xf32>
    %776 = arith.maximumf %774, %775 : vector<6x20xf32>
    %777 = arith.maximumf %773, %776 : vector<6x20xf32>
    %c89 = arith.constant 89 : index
    %c0_305 = arith.constant 0 : index
    %778 = vector.load %arg15[%c89, %c0_305] : memref<128x20xf32, #tpu.memory_space<vmem>>, vector<6x20xf32>
    tpu.vector_store %arg15[%c89, %c0_305], %777 {strides = array<i32>} : memref<128x20xf32, #tpu.memory_space<vmem>>, vector<6x20xf32>,
    %c247_306 = arith.constant 247 : index
    %c0_307 = arith.constant 0 : index
    %779 = tpu.strided_load %arg14[%c247_306, %c0_307] {strides = array<i32: 2, 1>} : memref<338x20xf32, #tpu.memory_space<vmem>>, vector<6x20xf32>
    %c248 = arith.constant 248 : index
    %c0_308 = arith.constant 0 : index
    %780 = tpu.strided_load %arg14[%c248, %c0_308] {strides = array<i32: 2, 1>} : memref<338x20xf32, #tpu.memory_space<vmem>>, vector<6x20xf32>
    %781 = arith.maximumf %779, %780 : vector<6x20xf32>
    %c260_309 = arith.constant 260 : index
    %c0_310 = arith.constant 0 : index
    %782 = tpu.strided_load %arg14[%c260_309, %c0_310] {strides = array<i32: 2, 1>} : memref<338x20xf32, #tpu.memory_space<vmem>>, vector<6x20xf32>
    %c261 = arith.constant 261 : index
    %c0_311 = arith.constant 0 : index
    %783 = tpu.strided_load %arg14[%c261, %c0_311] {strides = array<i32: 2, 1>} : memref<338x20xf32, #tpu.memory_space<vmem>>, vector<6x20xf32>
    %784 = arith.maximumf %782, %783 : vector<6x20xf32>
    %785 = arith.maximumf %781, %784 : vector<6x20xf32>
    %c97 = arith.constant 97 : index
    %c0_312 = arith.constant 0 : index
    %786 = vector.load %arg15[%c97, %c0_312] : memref<128x20xf32, #tpu.memory_space<vmem>>, vector<6x20xf32>
    tpu.vector_store %arg15[%c97, %c0_312], %785 {strides = array<i32>} : memref<128x20xf32, #tpu.memory_space<vmem>>, vector<6x20xf32>,
    %c273_313 = arith.constant 273 : index
    %c0_314 = arith.constant 0 : index
    %787 = tpu.strided_load %arg14[%c273_313, %c0_314] {strides = array<i32: 2, 1>} : memref<338x20xf32, #tpu.memory_space<vmem>>, vector<6x20xf32>
    %c274 = arith.constant 274 : index
    %c0_315 = arith.constant 0 : index
    %788 = tpu.strided_load %arg14[%c274, %c0_315] {strides = array<i32: 2, 1>} : memref<338x20xf32, #tpu.memory_space<vmem>>, vector<6x20xf32>
    %789 = arith.maximumf %787, %788 : vector<6x20xf32>
    %c286_316 = arith.constant 286 : index
    %c0_317 = arith.constant 0 : index
    %790 = tpu.strided_load %arg14[%c286_316, %c0_317] {strides = array<i32: 2, 1>} : memref<338x20xf32, #tpu.memory_space<vmem>>, vector<6x20xf32>
    %c287 = arith.constant 287 : index
    %c0_318 = arith.constant 0 : index
    %791 = tpu.strided_load %arg14[%c287, %c0_318] {strides = array<i32: 2, 1>} : memref<338x20xf32, #tpu.memory_space<vmem>>, vector<6x20xf32>
    %792 = arith.maximumf %790, %791 : vector<6x20xf32>
    %793 = arith.maximumf %789, %792 : vector<6x20xf32>
    %c105_319 = arith.constant 105 : index
    %c0_320 = arith.constant 0 : index
    %794 = vector.load %arg15[%c105_319, %c0_320] : memref<128x20xf32, #tpu.memory_space<vmem>>, vector<6x20xf32>
    tpu.vector_store %arg15[%c105_319, %c0_320], %793 {strides = array<i32>} : memref<128x20xf32, #tpu.memory_space<vmem>>, vector<6x20xf32>,
    %c299_321 = arith.constant 299 : index
    %c0_322 = arith.constant 0 : index
    %795 = tpu.strided_load %arg14[%c299_321, %c0_322] {strides = array<i32: 2, 1>} : memref<338x20xf32, #tpu.memory_space<vmem>>, vector<6x20xf32>
    %c300 = arith.constant 300 : index
    %c0_323 = arith.constant 0 : index
    %796 = tpu.strided_load %arg14[%c300, %c0_323] {strides = array<i32: 2, 1>} : memref<338x20xf32, #tpu.memory_space<vmem>>, vector<6x20xf32>
    %797 = arith.maximumf %795, %796 : vector<6x20xf32>
    %c312_324 = arith.constant 312 : index
    %c0_325 = arith.constant 0 : index
    %798 = tpu.strided_load %arg14[%c312_324, %c0_325] {strides = array<i32: 2, 1>} : memref<338x20xf32, #tpu.memory_space<vmem>>, vector<6x20xf32>
    %c313 = arith.constant 313 : index
    %c0_326 = arith.constant 0 : index
    %799 = tpu.strided_load %arg14[%c313, %c0_326] {strides = array<i32: 2, 1>} : memref<338x20xf32, #tpu.memory_space<vmem>>, vector<6x20xf32>
    %800 = arith.maximumf %798, %799 : vector<6x20xf32>
    %801 = arith.maximumf %797, %800 : vector<6x20xf32>
    %c113 = arith.constant 113 : index
    %c0_327 = arith.constant 0 : index
    %802 = vector.load %arg15[%c113, %c0_327] : memref<128x20xf32, #tpu.memory_space<vmem>>, vector<6x20xf32>
    tpu.vector_store %arg15[%c113, %c0_327], %801 {strides = array<i32>} : memref<128x20xf32, #tpu.memory_space<vmem>>, vector<6x20xf32>,
    %c0_328 = arith.constant 0 : index
    %c0_329 = arith.constant 0 : index
    %803 = vector.load %arg15[%c0_328, %c0_329] : memref<128x20xf32, #tpu.memory_space<vmem>>, vector<6x20xf32>
    %c1_330 = arith.constant 1 : index
    %c0_331 = arith.constant 0 : index
    %804 = vector.load %arg15[%c1_330, %c0_331] : memref<128x20xf32, #tpu.memory_space<vmem>>, vector<6x20xf32>
    %c2_332 = arith.constant 2 : index
    %c0_333 = arith.constant 0 : index
    %805 = vector.load %arg15[%c2_332, %c0_333] : memref<128x20xf32, #tpu.memory_space<vmem>>, vector<6x20xf32>
    %c8_334 = arith.constant 8 : index
    %c0_335 = arith.constant 0 : index
    %806 = vector.load %arg15[%c8_334, %c0_335] : memref<128x20xf32, #tpu.memory_space<vmem>>, vector<6x20xf32>
    %c9_336 = arith.constant 9 : index
    %c0_337 = arith.constant 0 : index
    %807 = vector.load %arg15[%c9_336, %c0_337] : memref<128x20xf32, #tpu.memory_space<vmem>>, vector<6x20xf32>
    %c10_338 = arith.constant 10 : index
    %c0_339 = arith.constant 0 : index
    %808 = vector.load %arg15[%c10_338, %c0_339] : memref<128x20xf32, #tpu.memory_space<vmem>>, vector<6x20xf32>
    %c16 = arith.constant 16 : index
    %c0_340 = arith.constant 0 : index
    %809 = vector.load %arg15[%c16, %c0_340] : memref<128x20xf32, #tpu.memory_space<vmem>>, vector<6x20xf32>
    %c17_341 = arith.constant 17 : index
    %c0_342 = arith.constant 0 : index
    %810 = vector.load %arg15[%c17_341, %c0_342] : memref<128x20xf32, #tpu.memory_space<vmem>>, vector<6x20xf32>
    %c18 = arith.constant 18 : index
    %c0_343 = arith.constant 0 : index
    %811 = vector.load %arg15[%c18, %c0_343] : memref<128x20xf32, #tpu.memory_space<vmem>>, vector<6x20xf32>
    %812 = tpu.concatenate %803, %804, %805, %806, %807, %808, %809, %810, %811 in 1 : vector<6x20xf32>, vector<6x20xf32>, vector<6x20xf32>, vector<6x20xf32>, vector<6x20xf32>, vector<6x20xf32>, vector<6x20xf32>, vector<6x20xf32>, vector<6x20xf32> -> vector<6x180xf32>
    %c8_344 = arith.constant 8 : index
    %c0_345 = arith.constant 0 : index
    %813 = vector.load %arg15[%c8_344, %c0_345] : memref<128x20xf32, #tpu.memory_space<vmem>>, vector<6x20xf32>
    %c9_346 = arith.constant 9 : index
    %c0_347 = arith.constant 0 : index
    %814 = vector.load %arg15[%c9_346, %c0_347] : memref<128x20xf32, #tpu.memory_space<vmem>>, vector<6x20xf32>
    %c10_348 = arith.constant 10 : index
    %c0_349 = arith.constant 0 : index
    %815 = vector.load %arg15[%c10_348, %c0_349] : memref<128x20xf32, #tpu.memory_space<vmem>>, vector<6x20xf32>
    %c16_350 = arith.constant 16 : index
    %c0_351 = arith.constant 0 : index
    %816 = vector.load %arg15[%c16_350, %c0_351] : memref<128x20xf32, #tpu.memory_space<vmem>>, vector<6x20xf32>
    %c17_352 = arith.constant 17 : index
    %c0_353 = arith.constant 0 : index
    %817 = vector.load %arg15[%c17_352, %c0_353] : memref<128x20xf32, #tpu.memory_space<vmem>>, vector<6x20xf32>
    %c18_354 = arith.constant 18 : index
    %c0_355 = arith.constant 0 : index
    %818 = vector.load %arg15[%c18_354, %c0_355] : memref<128x20xf32, #tpu.memory_space<vmem>>, vector<6x20xf32>
    %c24 = arith.constant 24 : index
    %c0_356 = arith.constant 0 : index
    %819 = vector.load %arg15[%c24, %c0_356] : memref<128x20xf32, #tpu.memory_space<vmem>>, vector<6x20xf32>
    %c25_357 = arith.constant 25 : index
    %c0_358 = arith.constant 0 : index
    %820 = vector.load %arg15[%c25_357, %c0_358] : memref<128x20xf32, #tpu.memory_space<vmem>>, vector<6x20xf32>
    %c26_359 = arith.constant 26 : index
    %c0_360 = arith.constant 0 : index
    %821 = vector.load %arg15[%c26_359, %c0_360] : memref<128x20xf32, #tpu.memory_space<vmem>>, vector<6x20xf32>
    %822 = tpu.concatenate %813, %814, %815, %816, %817, %818, %819, %820, %821 in 1 : vector<6x20xf32>, vector<6x20xf32>, vector<6x20xf32>, vector<6x20xf32>, vector<6x20xf32>, vector<6x20xf32>, vector<6x20xf32>, vector<6x20xf32>, vector<6x20xf32> -> vector<6x180xf32>
    %c16_361 = arith.constant 16 : index
    %c0_362 = arith.constant 0 : index
    %823 = vector.load %arg15[%c16_361, %c0_362] : memref<128x20xf32, #tpu.memory_space<vmem>>, vector<6x20xf32>
    %c17_363 = arith.constant 17 : index
    %c0_364 = arith.constant 0 : index
    %824 = vector.load %arg15[%c17_363, %c0_364] : memref<128x20xf32, #tpu.memory_space<vmem>>, vector<6x20xf32>
    %c18_365 = arith.constant 18 : index
    %c0_366 = arith.constant 0 : index
    %825 = vector.load %arg15[%c18_365, %c0_366] : memref<128x20xf32, #tpu.memory_space<vmem>>, vector<6x20xf32>
    %c24_367 = arith.constant 24 : index
    %c0_368 = arith.constant 0 : index
    %826 = vector.load %arg15[%c24_367, %c0_368] : memref<128x20xf32, #tpu.memory_space<vmem>>, vector<6x20xf32>
    %c25_369 = arith.constant 25 : index
    %c0_370 = arith.constant 0 : index
    %827 = vector.load %arg15[%c25_369, %c0_370] : memref<128x20xf32, #tpu.memory_space<vmem>>, vector<6x20xf32>
    %c26_371 = arith.constant 26 : index
    %c0_372 = arith.constant 0 : index
    %828 = vector.load %arg15[%c26_371, %c0_372] : memref<128x20xf32, #tpu.memory_space<vmem>>, vector<6x20xf32>
    %c32 = arith.constant 32 : index
    %c0_373 = arith.constant 0 : index
    %829 = vector.load %arg15[%c32, %c0_373] : memref<128x20xf32, #tpu.memory_space<vmem>>, vector<6x20xf32>
    %c33_374 = arith.constant 33 : index
    %c0_375 = arith.constant 0 : index
    %830 = vector.load %arg15[%c33_374, %c0_375] : memref<128x20xf32, #tpu.memory_space<vmem>>, vector<6x20xf32>
    %c34 = arith.constant 34 : index
    %c0_376 = arith.constant 0 : index
    %831 = vector.load %arg15[%c34, %c0_376] : memref<128x20xf32, #tpu.memory_space<vmem>>, vector<6x20xf32>
    %832 = tpu.concatenate %823, %824, %825, %826, %827, %828, %829, %830, %831 in 1 : vector<6x20xf32>, vector<6x20xf32>, vector<6x20xf32>, vector<6x20xf32>, vector<6x20xf32>, vector<6x20xf32>, vector<6x20xf32>, vector<6x20xf32>, vector<6x20xf32> -> vector<6x180xf32>
    %c24_377 = arith.constant 24 : index
    %c0_378 = arith.constant 0 : index
    %833 = vector.load %arg15[%c24_377, %c0_378] : memref<128x20xf32, #tpu.memory_space<vmem>>, vector<6x20xf32>
    %c25_379 = arith.constant 25 : index
    %c0_380 = arith.constant 0 : index
    %834 = vector.load %arg15[%c25_379, %c0_380] : memref<128x20xf32, #tpu.memory_space<vmem>>, vector<6x20xf32>
    %c26_381 = arith.constant 26 : index
    %c0_382 = arith.constant 0 : index
    %835 = vector.load %arg15[%c26_381, %c0_382] : memref<128x20xf32, #tpu.memory_space<vmem>>, vector<6x20xf32>
    %c32_383 = arith.constant 32 : index
    %c0_384 = arith.constant 0 : index
    %836 = vector.load %arg15[%c32_383, %c0_384] : memref<128x20xf32, #tpu.memory_space<vmem>>, vector<6x20xf32>
    %c33_385 = arith.constant 33 : index
    %c0_386 = arith.constant 0 : index
    %837 = vector.load %arg15[%c33_385, %c0_386] : memref<128x20xf32, #tpu.memory_space<vmem>>, vector<6x20xf32>
    %c34_387 = arith.constant 34 : index
    %c0_388 = arith.constant 0 : index
    %838 = vector.load %arg15[%c34_387, %c0_388] : memref<128x20xf32, #tpu.memory_space<vmem>>, vector<6x20xf32>
    %c40_389 = arith.constant 40 : index
    %c0_390 = arith.constant 0 : index
    %839 = vector.load %arg15[%c40_389, %c0_390] : memref<128x20xf32, #tpu.memory_space<vmem>>, vector<6x20xf32>
    %c41_391 = arith.constant 41 : index
    %c0_392 = arith.constant 0 : index
    %840 = vector.load %arg15[%c41_391, %c0_392] : memref<128x20xf32, #tpu.memory_space<vmem>>, vector<6x20xf32>
    %c42 = arith.constant 42 : index
    %c0_393 = arith.constant 0 : index
    %841 = vector.load %arg15[%c42, %c0_393] : memref<128x20xf32, #tpu.memory_space<vmem>>, vector<6x20xf32>
    %842 = tpu.concatenate %833, %834, %835, %836, %837, %838, %839, %840, %841 in 1 : vector<6x20xf32>, vector<6x20xf32>, vector<6x20xf32>, vector<6x20xf32>, vector<6x20xf32>, vector<6x20xf32>, vector<6x20xf32>, vector<6x20xf32>, vector<6x20xf32> -> vector<6x180xf32>
    %c32_394 = arith.constant 32 : index
    %c0_395 = arith.constant 0 : index
    %843 = vector.load %arg15[%c32_394, %c0_395] : memref<128x20xf32, #tpu.memory_space<vmem>>, vector<6x20xf32>
    %c33_396 = arith.constant 33 : index
    %c0_397 = arith.constant 0 : index
    %844 = vector.load %arg15[%c33_396, %c0_397] : memref<128x20xf32, #tpu.memory_space<vmem>>, vector<6x20xf32>
    %c34_398 = arith.constant 34 : index
    %c0_399 = arith.constant 0 : index
    %845 = vector.load %arg15[%c34_398, %c0_399] : memref<128x20xf32, #tpu.memory_space<vmem>>, vector<6x20xf32>
    %c40_400 = arith.constant 40 : index
    %c0_401 = arith.constant 0 : index
    %846 = vector.load %arg15[%c40_400, %c0_401] : memref<128x20xf32, #tpu.memory_space<vmem>>, vector<6x20xf32>
    %c41_402 = arith.constant 41 : index
    %c0_403 = arith.constant 0 : index
    %847 = vector.load %arg15[%c41_402, %c0_403] : memref<128x20xf32, #tpu.memory_space<vmem>>, vector<6x20xf32>
    %c42_404 = arith.constant 42 : index
    %c0_405 = arith.constant 0 : index
    %848 = vector.load %arg15[%c42_404, %c0_405] : memref<128x20xf32, #tpu.memory_space<vmem>>, vector<6x20xf32>
    %c48 = arith.constant 48 : index
    %c0_406 = arith.constant 0 : index
    %849 = vector.load %arg15[%c48, %c0_406] : memref<128x20xf32, #tpu.memory_space<vmem>>, vector<6x20xf32>
    %c49_407 = arith.constant 49 : index
    %c0_408 = arith.constant 0 : index
    %850 = vector.load %arg15[%c49_407, %c0_408] : memref<128x20xf32, #tpu.memory_space<vmem>>, vector<6x20xf32>
    %c50 = arith.constant 50 : index
    %c0_409 = arith.constant 0 : index
    %851 = vector.load %arg15[%c50, %c0_409] : memref<128x20xf32, #tpu.memory_space<vmem>>, vector<6x20xf32>
    %852 = tpu.concatenate %843, %844, %845, %846, %847, %848, %849, %850, %851 in 1 : vector<6x20xf32>, vector<6x20xf32>, vector<6x20xf32>, vector<6x20xf32>, vector<6x20xf32>, vector<6x20xf32>, vector<6x20xf32>, vector<6x20xf32>, vector<6x20xf32> -> vector<6x180xf32>
    %c40_410 = arith.constant 40 : index
    %c0_411 = arith.constant 0 : index
    %853 = vector.load %arg15[%c40_410, %c0_411] : memref<128x20xf32, #tpu.memory_space<vmem>>, vector<6x20xf32>
    %c41_412 = arith.constant 41 : index
    %c0_413 = arith.constant 0 : index
    %854 = vector.load %arg15[%c41_412, %c0_413] : memref<128x20xf32, #tpu.memory_space<vmem>>, vector<6x20xf32>
    %c42_414 = arith.constant 42 : index
    %c0_415 = arith.constant 0 : index
    %855 = vector.load %arg15[%c42_414, %c0_415] : memref<128x20xf32, #tpu.memory_space<vmem>>, vector<6x20xf32>
    %c48_416 = arith.constant 48 : index
    %c0_417 = arith.constant 0 : index
    %856 = vector.load %arg15[%c48_416, %c0_417] : memref<128x20xf32, #tpu.memory_space<vmem>>, vector<6x20xf32>
    %c49_418 = arith.constant 49 : index
    %c0_419 = arith.constant 0 : index
    %857 = vector.load %arg15[%c49_418, %c0_419] : memref<128x20xf32, #tpu.memory_space<vmem>>, vector<6x20xf32>
    %c50_420 = arith.constant 50 : index
    %c0_421 = arith.constant 0 : index
    %858 = vector.load %arg15[%c50_420, %c0_421] : memref<128x20xf32, #tpu.memory_space<vmem>>, vector<6x20xf32>
    %c56 = arith.constant 56 : index
    %c0_422 = arith.constant 0 : index
    %859 = vector.load %arg15[%c56, %c0_422] : memref<128x20xf32, #tpu.memory_space<vmem>>, vector<6x20xf32>
    %c57 = arith.constant 57 : index
    %c0_423 = arith.constant 0 : index
    %860 = vector.load %arg15[%c57, %c0_423] : memref<128x20xf32, #tpu.memory_space<vmem>>, vector<6x20xf32>
    %c58 = arith.constant 58 : index
    %c0_424 = arith.constant 0 : index
    %861 = vector.load %arg15[%c58, %c0_424] : memref<128x20xf32, #tpu.memory_space<vmem>>, vector<6x20xf32>
    %862 = tpu.concatenate %853, %854, %855, %856, %857, %858, %859, %860, %861 in 1 : vector<6x20xf32>, vector<6x20xf32>, vector<6x20xf32>, vector<6x20xf32>, vector<6x20xf32>, vector<6x20xf32>, vector<6x20xf32>, vector<6x20xf32>, vector<6x20xf32> -> vector<6x180xf32>
    %c64 = arith.constant 64 : index
    %c0_425 = arith.constant 0 : index
    %863 = vector.load %arg15[%c64, %c0_425] : memref<128x20xf32, #tpu.memory_space<vmem>>, vector<6x20xf32>
    %c65_426 = arith.constant 65 : index
    %c0_427 = arith.constant 0 : index
    %864 = vector.load %arg15[%c65_426, %c0_427] : memref<128x20xf32, #tpu.memory_space<vmem>>, vector<6x20xf32>
    %c66_428 = arith.constant 66 : index
    %c0_429 = arith.constant 0 : index
    %865 = vector.load %arg15[%c66_428, %c0_429] : memref<128x20xf32, #tpu.memory_space<vmem>>, vector<6x20xf32>
    %c72 = arith.constant 72 : index
    %c0_430 = arith.constant 0 : index
    %866 = vector.load %arg15[%c72, %c0_430] : memref<128x20xf32, #tpu.memory_space<vmem>>, vector<6x20xf32>
    %c73_431 = arith.constant 73 : index
    %c0_432 = arith.constant 0 : index
    %867 = vector.load %arg15[%c73_431, %c0_432] : memref<128x20xf32, #tpu.memory_space<vmem>>, vector<6x20xf32>
    %c74 = arith.constant 74 : index
    %c0_433 = arith.constant 0 : index
    %868 = vector.load %arg15[%c74, %c0_433] : memref<128x20xf32, #tpu.memory_space<vmem>>, vector<6x20xf32>
    %c80 = arith.constant 80 : index
    %c0_434 = arith.constant 0 : index
    %869 = vector.load %arg15[%c80, %c0_434] : memref<128x20xf32, #tpu.memory_space<vmem>>, vector<6x20xf32>
    %c81_435 = arith.constant 81 : index
    %c0_436 = arith.constant 0 : index
    %870 = vector.load %arg15[%c81_435, %c0_436] : memref<128x20xf32, #tpu.memory_space<vmem>>, vector<6x20xf32>
    %c82 = arith.constant 82 : index
    %c0_437 = arith.constant 0 : index
    %871 = vector.load %arg15[%c82, %c0_437] : memref<128x20xf32, #tpu.memory_space<vmem>>, vector<6x20xf32>
    %872 = tpu.concatenate %863, %864, %865, %866, %867, %868, %869, %870, %871 in 1 : vector<6x20xf32>, vector<6x20xf32>, vector<6x20xf32>, vector<6x20xf32>, vector<6x20xf32>, vector<6x20xf32>, vector<6x20xf32>, vector<6x20xf32>, vector<6x20xf32> -> vector<6x180xf32>
    %c72_438 = arith.constant 72 : index
    %c0_439 = arith.constant 0 : index
    %873 = vector.load %arg15[%c72_438, %c0_439] : memref<128x20xf32, #tpu.memory_space<vmem>>, vector<6x20xf32>
    %c73_440 = arith.constant 73 : index
    %c0_441 = arith.constant 0 : index
    %874 = vector.load %arg15[%c73_440, %c0_441] : memref<128x20xf32, #tpu.memory_space<vmem>>, vector<6x20xf32>
    %c74_442 = arith.constant 74 : index
    %c0_443 = arith.constant 0 : index
    %875 = vector.load %arg15[%c74_442, %c0_443] : memref<128x20xf32, #tpu.memory_space<vmem>>, vector<6x20xf32>
    %c80_444 = arith.constant 80 : index
    %c0_445 = arith.constant 0 : index
    %876 = vector.load %arg15[%c80_444, %c0_445] : memref<128x20xf32, #tpu.memory_space<vmem>>, vector<6x20xf32>
    %c81_446 = arith.constant 81 : index
    %c0_447 = arith.constant 0 : index
    %877 = vector.load %arg15[%c81_446, %c0_447] : memref<128x20xf32, #tpu.memory_space<vmem>>, vector<6x20xf32>
    %c82_448 = arith.constant 82 : index
    %c0_449 = arith.constant 0 : index
    %878 = vector.load %arg15[%c82_448, %c0_449] : memref<128x20xf32, #tpu.memory_space<vmem>>, vector<6x20xf32>
    %c88 = arith.constant 88 : index
    %c0_450 = arith.constant 0 : index
    %879 = vector.load %arg15[%c88, %c0_450] : memref<128x20xf32, #tpu.memory_space<vmem>>, vector<6x20xf32>
    %c89_451 = arith.constant 89 : index
    %c0_452 = arith.constant 0 : index
    %880 = vector.load %arg15[%c89_451, %c0_452] : memref<128x20xf32, #tpu.memory_space<vmem>>, vector<6x20xf32>
    %c90 = arith.constant 90 : index
    %c0_453 = arith.constant 0 : index
    %881 = vector.load %arg15[%c90, %c0_453] : memref<128x20xf32, #tpu.memory_space<vmem>>, vector<6x20xf32>
    %882 = tpu.concatenate %873, %874, %875, %876, %877, %878, %879, %880, %881 in 1 : vector<6x20xf32>, vector<6x20xf32>, vector<6x20xf32>, vector<6x20xf32>, vector<6x20xf32>, vector<6x20xf32>, vector<6x20xf32>, vector<6x20xf32>, vector<6x20xf32> -> vector<6x180xf32>
    %c80_454 = arith.constant 80 : index
    %c0_455 = arith.constant 0 : index
    %883 = vector.load %arg15[%c80_454, %c0_455] : memref<128x20xf32, #tpu.memory_space<vmem>>, vector<6x20xf32>
    %c81_456 = arith.constant 81 : index
    %c0_457 = arith.constant 0 : index
    %884 = vector.load %arg15[%c81_456, %c0_457] : memref<128x20xf32, #tpu.memory_space<vmem>>, vector<6x20xf32>
    %c82_458 = arith.constant 82 : index
    %c0_459 = arith.constant 0 : index
    %885 = vector.load %arg15[%c82_458, %c0_459] : memref<128x20xf32, #tpu.memory_space<vmem>>, vector<6x20xf32>
    %c88_460 = arith.constant 88 : index
    %c0_461 = arith.constant 0 : index
    %886 = vector.load %arg15[%c88_460, %c0_461] : memref<128x20xf32, #tpu.memory_space<vmem>>, vector<6x20xf32>
    %c89_462 = arith.constant 89 : index
    %c0_463 = arith.constant 0 : index
    %887 = vector.load %arg15[%c89_462, %c0_463] : memref<128x20xf32, #tpu.memory_space<vmem>>, vector<6x20xf32>
    %c90_464 = arith.constant 90 : index
    %c0_465 = arith.constant 0 : index
    %888 = vector.load %arg15[%c90_464, %c0_465] : memref<128x20xf32, #tpu.memory_space<vmem>>, vector<6x20xf32>
    %c96 = arith.constant 96 : index
    %c0_466 = arith.constant 0 : index
    %889 = vector.load %arg15[%c96, %c0_466] : memref<128x20xf32, #tpu.memory_space<vmem>>, vector<6x20xf32>
    %c97_467 = arith.constant 97 : index
    %c0_468 = arith.constant 0 : index
    %890 = vector.load %arg15[%c97_467, %c0_468] : memref<128x20xf32, #tpu.memory_space<vmem>>, vector<6x20xf32>
    %c98 = arith.constant 98 : index
    %c0_469 = arith.constant 0 : index
    %891 = vector.load %arg15[%c98, %c0_469] : memref<128x20xf32, #tpu.memory_space<vmem>>, vector<6x20xf32>
    %892 = tpu.concatenate %883, %884, %885, %886, %887, %888, %889, %890, %891 in 1 : vector<6x20xf32>, vector<6x20xf32>, vector<6x20xf32>, vector<6x20xf32>, vector<6x20xf32>, vector<6x20xf32>, vector<6x20xf32>, vector<6x20xf32>, vector<6x20xf32> -> vector<6x180xf32>
    %c88_470 = arith.constant 88 : index
    %c0_471 = arith.constant 0 : index
    %893 = vector.load %arg15[%c88_470, %c0_471] : memref<128x20xf32, #tpu.memory_space<vmem>>, vector<6x20xf32>
    %c89_472 = arith.constant 89 : index
    %c0_473 = arith.constant 0 : index
    %894 = vector.load %arg15[%c89_472, %c0_473] : memref<128x20xf32, #tpu.memory_space<vmem>>, vector<6x20xf32>
    %c90_474 = arith.constant 90 : index
    %c0_475 = arith.constant 0 : index
    %895 = vector.load %arg15[%c90_474, %c0_475] : memref<128x20xf32, #tpu.memory_space<vmem>>, vector<6x20xf32>
    %c96_476 = arith.constant 96 : index
    %c0_477 = arith.constant 0 : index
    %896 = vector.load %arg15[%c96_476, %c0_477] : memref<128x20xf32, #tpu.memory_space<vmem>>, vector<6x20xf32>
    %c97_478 = arith.constant 97 : index
    %c0_479 = arith.constant 0 : index
    %897 = vector.load %arg15[%c97_478, %c0_479] : memref<128x20xf32, #tpu.memory_space<vmem>>, vector<6x20xf32>
    %c98_480 = arith.constant 98 : index
    %c0_481 = arith.constant 0 : index
    %898 = vector.load %arg15[%c98_480, %c0_481] : memref<128x20xf32, #tpu.memory_space<vmem>>, vector<6x20xf32>
    %c104_482 = arith.constant 104 : index
    %c0_483 = arith.constant 0 : index
    %899 = vector.load %arg15[%c104_482, %c0_483] : memref<128x20xf32, #tpu.memory_space<vmem>>, vector<6x20xf32>
    %c105_484 = arith.constant 105 : index
    %c0_485 = arith.constant 0 : index
    %900 = vector.load %arg15[%c105_484, %c0_485] : memref<128x20xf32, #tpu.memory_space<vmem>>, vector<6x20xf32>
    %c106 = arith.constant 106 : index
    %c0_486 = arith.constant 0 : index
    %901 = vector.load %arg15[%c106, %c0_486] : memref<128x20xf32, #tpu.memory_space<vmem>>, vector<6x20xf32>
    %902 = tpu.concatenate %893, %894, %895, %896, %897, %898, %899, %900, %901 in 1 : vector<6x20xf32>, vector<6x20xf32>, vector<6x20xf32>, vector<6x20xf32>, vector<6x20xf32>, vector<6x20xf32>, vector<6x20xf32>, vector<6x20xf32>, vector<6x20xf32> -> vector<6x180xf32>
    %c96_487 = arith.constant 96 : index
    %c0_488 = arith.constant 0 : index
    %903 = vector.load %arg15[%c96_487, %c0_488] : memref<128x20xf32, #tpu.memory_space<vmem>>, vector<6x20xf32>
    %c97_489 = arith.constant 97 : index
    %c0_490 = arith.constant 0 : index
    %904 = vector.load %arg15[%c97_489, %c0_490] : memref<128x20xf32, #tpu.memory_space<vmem>>, vector<6x20xf32>
    %c98_491 = arith.constant 98 : index
    %c0_492 = arith.constant 0 : index
    %905 = vector.load %arg15[%c98_491, %c0_492] : memref<128x20xf32, #tpu.memory_space<vmem>>, vector<6x20xf32>
    %c104_493 = arith.constant 104 : index
    %c0_494 = arith.constant 0 : index
    %906 = vector.load %arg15[%c104_493, %c0_494] : memref<128x20xf32, #tpu.memory_space<vmem>>, vector<6x20xf32>
    %c105_495 = arith.constant 105 : index
    %c0_496 = arith.constant 0 : index
    %907 = vector.load %arg15[%c105_495, %c0_496] : memref<128x20xf32, #tpu.memory_space<vmem>>, vector<6x20xf32>
    %c106_497 = arith.constant 106 : index
    %c0_498 = arith.constant 0 : index
    %908 = vector.load %arg15[%c106_497, %c0_498] : memref<128x20xf32, #tpu.memory_space<vmem>>, vector<6x20xf32>
    %c112 = arith.constant 112 : index
    %c0_499 = arith.constant 0 : index
    %909 = vector.load %arg15[%c112, %c0_499] : memref<128x20xf32, #tpu.memory_space<vmem>>, vector<6x20xf32>
    %c113_500 = arith.constant 113 : index
    %c0_501 = arith.constant 0 : index
    %910 = vector.load %arg15[%c113_500, %c0_501] : memref<128x20xf32, #tpu.memory_space<vmem>>, vector<6x20xf32>
    %c114 = arith.constant 114 : index
    %c0_502 = arith.constant 0 : index
    %911 = vector.load %arg15[%c114, %c0_502] : memref<128x20xf32, #tpu.memory_space<vmem>>, vector<6x20xf32>
    %912 = tpu.concatenate %903, %904, %905, %906, %907, %908, %909, %910, %911 in 1 : vector<6x20xf32>, vector<6x20xf32>, vector<6x20xf32>, vector<6x20xf32>, vector<6x20xf32>, vector<6x20xf32>, vector<6x20xf32>, vector<6x20xf32>, vector<6x20xf32> -> vector<6x180xf32>
    %c104_503 = arith.constant 104 : index
    %c0_504 = arith.constant 0 : index
    %913 = vector.load %arg15[%c104_503, %c0_504] : memref<128x20xf32, #tpu.memory_space<vmem>>, vector<6x20xf32>
    %c105_505 = arith.constant 105 : index
    %c0_506 = arith.constant 0 : index
    %914 = vector.load %arg15[%c105_505, %c0_506] : memref<128x20xf32, #tpu.memory_space<vmem>>, vector<6x20xf32>
    %c106_507 = arith.constant 106 : index
    %c0_508 = arith.constant 0 : index
    %915 = vector.load %arg15[%c106_507, %c0_508] : memref<128x20xf32, #tpu.memory_space<vmem>>, vector<6x20xf32>
    %c112_509 = arith.constant 112 : index
    %c0_510 = arith.constant 0 : index
    %916 = vector.load %arg15[%c112_509, %c0_510] : memref<128x20xf32, #tpu.memory_space<vmem>>, vector<6x20xf32>
    %c113_511 = arith.constant 113 : index
    %c0_512 = arith.constant 0 : index
    %917 = vector.load %arg15[%c113_511, %c0_512] : memref<128x20xf32, #tpu.memory_space<vmem>>, vector<6x20xf32>
    %c114_513 = arith.constant 114 : index
    %c0_514 = arith.constant 0 : index
    %918 = vector.load %arg15[%c114_513, %c0_514] : memref<128x20xf32, #tpu.memory_space<vmem>>, vector<6x20xf32>
    %c120 = arith.constant 120 : index
    %c0_515 = arith.constant 0 : index
    %919 = vector.load %arg15[%c120, %c0_515] : memref<128x20xf32, #tpu.memory_space<vmem>>, vector<6x20xf32>
    %c121 = arith.constant 121 : index
    %c0_516 = arith.constant 0 : index
    %920 = vector.load %arg15[%c121, %c0_516] : memref<128x20xf32, #tpu.memory_space<vmem>>, vector<6x20xf32>
    %c122 = arith.constant 122 : index
    %c0_517 = arith.constant 0 : index
    %921 = vector.load %arg15[%c122, %c0_517] : memref<128x20xf32, #tpu.memory_space<vmem>>, vector<6x20xf32>
    %922 = tpu.concatenate %913, %914, %915, %916, %917, %918, %919, %920, %921 in 1 : vector<6x20xf32>, vector<6x20xf32>, vector<6x20xf32>, vector<6x20xf32>, vector<6x20xf32>, vector<6x20xf32>, vector<6x20xf32>, vector<6x20xf32>, vector<6x20xf32> -> vector<6x180xf32>
    %923 = tpu.concatenate %812, %822, %832, %842, %852, %862, %872, %882, %892, %902, %912, %922 in 0 : vector<6x180xf32>, vector<6x180xf32>, vector<6x180xf32>, vector<6x180xf32>, vector<6x180xf32>, vector<6x180xf32>, vector<6x180xf32>, vector<6x180xf32>, vector<6x180xf32>, vector<6x180xf32>, vector<6x180xf32>, vector<6x180xf32> -> vector<72x180xf32>
    %c0_518 = arith.constant 0 : index
    %c0_519 = arith.constant 0 : index
    %924 = vector.load %arg5[%c0_518, %c0_519] : memref<180x40xf32, #tpu.memory_space<vmem>>, vector<180x40xf32>
    %cst_520 = arith.constant dense<0.000000e+00> : vector<72x40xf32>
    %925 = tpu.matmul %923, %924, %cst_520 {dimension_numbers = #tpu.dot_dimension_numbers<[1], [0], [0], [1], [0, 0, 1, 1], [], []>} : vector<72x180xf32>, vector<180x40xf32>, vector<72x40xf32> -> vector<72x40xf32>
    %c0_521 = arith.constant 0 : index
    %c0_522 = arith.constant 0 : index
    %926 = vector.load %arg6[%c0_521, %c0_522] : memref<1x40xf32, #tpu.memory_space<vmem>>, vector<1x40xf32>
    %927 = vector.broadcast %926 : vector<1x40xf32> to vector<72x40xf32>
    %928 = arith.addf %925, %927 : vector<72x40xf32>
    %cst_523 = arith.constant dense<0.000000e+00> : vector<40xf32>
    %929 = vector.multi_reduction <add>, %928, %cst_523 [0] : vector<72x40xf32> to vector<40xf32>
    %930 = vector.shape_cast %929 : vector<40xf32> to vector<1x40xf32>
    %931 = arith.mulf %928, %928 : vector<72x40xf32>
    %cst_524 = arith.constant dense<0.000000e+00> : vector<40xf32>
    %932 = vector.multi_reduction <add>, %931, %cst_524 [0] : vector<72x40xf32> to vector<40xf32>
    %933 = vector.shape_cast %932 : vector<40xf32> to vector<1x40xf32>
    %cst_525 = arith.constant 0.013888889 : f32
    %934 = vector.broadcast %cst_525 : f32 to vector<1x40xf32>
    %935 = arith.mulf %930, %934 : vector<1x40xf32>
    %cst_526 = arith.constant 0.013888889 : f32
    %936 = vector.broadcast %cst_526 : f32 to vector<1x40xf32>
    %937 = arith.mulf %933, %936 : vector<1x40xf32>
    %938 = arith.mulf %935, %935 : vector<1x40xf32>
    %939 = arith.subf %937, %938 : vector<1x40xf32>
    %c0_527 = arith.constant 0 : index
    %c0_528 = arith.constant 0 : index
    %940 = vector.load %arg7[%c0_527, %c0_528] : memref<1x40xf32, #tpu.memory_space<vmem>>, vector<1x40xf32>
    %cst_529 = arith.constant 9.99999974E-6 : f32
    %941 = vector.broadcast %cst_529 : f32 to vector<1x40xf32>
    %942 = arith.addf %939, %941 : vector<1x40xf32>
    %943 = math.rsqrt %942 : vector<1x40xf32>
    %944 = arith.mulf %940, %943 : vector<1x40xf32>
    %c0_530 = arith.constant 0 : index
    %c0_531 = arith.constant 0 : index
    %945 = vector.load %arg8[%c0_530, %c0_531] : memref<1x40xf32, #tpu.memory_space<vmem>>, vector<1x40xf32>
    %946 = arith.mulf %935, %944 : vector<1x40xf32>
    %947 = arith.subf %945, %946 : vector<1x40xf32>
    %948 = vector.broadcast %944 : vector<1x40xf32> to vector<72x40xf32>
    %949 = arith.mulf %928, %948 : vector<72x40xf32>
    %950 = vector.broadcast %947 : vector<1x40xf32> to vector<72x40xf32>
    %951 = arith.addf %949, %950 : vector<72x40xf32>
    %cst_532 = arith.constant 0.000000e+00 : f32
    %952 = vector.broadcast %cst_532 : f32 to vector<72x40xf32>
    %953 = arith.maximumf %951, %952 : vector<72x40xf32>
    %c0_533 = arith.constant 0 : index
    %c0_534 = arith.constant 0 : index
    %954 = vector.load %arg16[%c0_533, %c0_534] : memref<72x40xf32, #tpu.memory_space<vmem>>, vector<72x40xf32>
    tpu.vector_store %arg16[%c0_533, %c0_534], %953 {strides = array<i32>} : memref<72x40xf32, #tpu.memory_space<vmem>>, vector<72x40xf32>,
    %c0_535 = arith.constant 0 : index
    %c0_536 = arith.constant 0 : index
    %955 = tpu.strided_load %arg16[%c0_535, %c0_536] {strides = array<i32: 2, 1>} : memref<72x40xf32, #tpu.memory_space<vmem>>, vector<3x40xf32>
    %c1_537 = arith.constant 1 : index
    %c0_538 = arith.constant 0 : index
    %956 = tpu.strided_load %arg16[%c1_537, %c0_538] {strides = array<i32: 2, 1>} : memref<72x40xf32, #tpu.memory_space<vmem>>, vector<3x40xf32>
    %957 = arith.maximumf %955, %956 : vector<3x40xf32>
    %c6_539 = arith.constant 6 : index
    %c0_540 = arith.constant 0 : index
    %958 = tpu.strided_load %arg16[%c6_539, %c0_540] {strides = array<i32: 2, 1>} : memref<72x40xf32, #tpu.memory_space<vmem>>, vector<3x40xf32>
    %c7_541 = arith.constant 7 : index
    %c0_542 = arith.constant 0 : index
    %959 = tpu.strided_load %arg16[%c7_541, %c0_542] {strides = array<i32: 2, 1>} : memref<72x40xf32, #tpu.memory_space<vmem>>, vector<3x40xf32>
    %960 = arith.maximumf %958, %959 : vector<3x40xf32>
    %961 = arith.maximumf %957, %960 : vector<3x40xf32>
    %962 = vector.extract_strided_slice %961 {offsets = [0, 0], sizes = [1, 40], strides = [1, 1]} : vector<3x40xf32> to vector<1x40xf32>
    %c0_543 = arith.constant 0 : index
    %c0_544 = arith.constant 0 : index
    %963 = vector.load %arg17[%c0_543, %c0_544] : memref<2x360xf32, #tpu.memory_space<vmem>>, vector<1x40xf32>
    tpu.vector_store %arg17[%c0_543, %c0_544], %962 {strides = array<i32>} : memref<2x360xf32, #tpu.memory_space<vmem>>, vector<1x40xf32>,
    %964 = vector.extract_strided_slice %961 {offsets = [1, 0], sizes = [1, 40], strides = [1, 1]} : vector<3x40xf32> to vector<1x40xf32>
    %c0_545 = arith.constant 0 : index
    %c40_546 = arith.constant 40 : index
    %965 = vector.load %arg17[%c0_545, %c40_546] : memref<2x360xf32, #tpu.memory_space<vmem>>, vector<1x40xf32>
    tpu.vector_store %arg17[%c0_545, %c40_546], %964 {strides = array<i32>} : memref<2x360xf32, #tpu.memory_space<vmem>>, vector<1x40xf32>,
    %966 = vector.extract_strided_slice %961 {offsets = [2, 0], sizes = [1, 40], strides = [1, 1]} : vector<3x40xf32> to vector<1x40xf32>
    %c0_547 = arith.constant 0 : index
    %c80_548 = arith.constant 80 : index
    %967 = vector.load %arg17[%c0_547, %c80_548] : memref<2x360xf32, #tpu.memory_space<vmem>>, vector<1x40xf32>
    tpu.vector_store %arg17[%c0_547, %c80_548], %966 {strides = array<i32>} : memref<2x360xf32, #tpu.memory_space<vmem>>, vector<1x40xf32>,
    %c12_549 = arith.constant 12 : index
    %c0_550 = arith.constant 0 : index
    %968 = tpu.strided_load %arg16[%c12_549, %c0_550] {strides = array<i32: 2, 1>} : memref<72x40xf32, #tpu.memory_space<vmem>>, vector<3x40xf32>
    %c13_551 = arith.constant 13 : index
    %c0_552 = arith.constant 0 : index
    %969 = tpu.strided_load %arg16[%c13_551, %c0_552] {strides = array<i32: 2, 1>} : memref<72x40xf32, #tpu.memory_space<vmem>>, vector<3x40xf32>
    %970 = arith.maximumf %968, %969 : vector<3x40xf32>
    %c18_553 = arith.constant 18 : index
    %c0_554 = arith.constant 0 : index
    %971 = tpu.strided_load %arg16[%c18_553, %c0_554] {strides = array<i32: 2, 1>} : memref<72x40xf32, #tpu.memory_space<vmem>>, vector<3x40xf32>
    %c19 = arith.constant 19 : index
    %c0_555 = arith.constant 0 : index
    %972 = tpu.strided_load %arg16[%c19, %c0_555] {strides = array<i32: 2, 1>} : memref<72x40xf32, #tpu.memory_space<vmem>>, vector<3x40xf32>
    %973 = arith.maximumf %971, %972 : vector<3x40xf32>
    %974 = arith.maximumf %970, %973 : vector<3x40xf32>
    %975 = vector.extract_strided_slice %974 {offsets = [0, 0], sizes = [1, 40], strides = [1, 1]} : vector<3x40xf32> to vector<1x40xf32>
    %c0_556 = arith.constant 0 : index
    %c120_557 = arith.constant 120 : index
    %976 = vector.load %arg17[%c0_556, %c120_557] : memref<2x360xf32, #tpu.memory_space<vmem>>, vector<1x40xf32>
    tpu.vector_store %arg17[%c0_556, %c120_557], %975 {strides = array<i32>} : memref<2x360xf32, #tpu.memory_space<vmem>>, vector<1x40xf32>,
    %977 = vector.extract_strided_slice %974 {offsets = [1, 0], sizes = [1, 40], strides = [1, 1]} : vector<3x40xf32> to vector<1x40xf32>
    %c0_558 = arith.constant 0 : index
    %c160 = arith.constant 160 : index
    %978 = vector.load %arg17[%c0_558, %c160] : memref<2x360xf32, #tpu.memory_space<vmem>>, vector<1x40xf32>
    tpu.vector_store %arg17[%c0_558, %c160], %977 {strides = array<i32>} : memref<2x360xf32, #tpu.memory_space<vmem>>, vector<1x40xf32>,
    %979 = vector.extract_strided_slice %974 {offsets = [2, 0], sizes = [1, 40], strides = [1, 1]} : vector<3x40xf32> to vector<1x40xf32>
    %c0_559 = arith.constant 0 : index
    %c200 = arith.constant 200 : index
    %980 = vector.load %arg17[%c0_559, %c200] : memref<2x360xf32, #tpu.memory_space<vmem>>, vector<1x40xf32>
    tpu.vector_store %arg17[%c0_559, %c200], %979 {strides = array<i32>} : memref<2x360xf32, #tpu.memory_space<vmem>>, vector<1x40xf32>,
    %c24_560 = arith.constant 24 : index
    %c0_561 = arith.constant 0 : index
    %981 = tpu.strided_load %arg16[%c24_560, %c0_561] {strides = array<i32: 2, 1>} : memref<72x40xf32, #tpu.memory_space<vmem>>, vector<3x40xf32>
    %c25_562 = arith.constant 25 : index
    %c0_563 = arith.constant 0 : index
    %982 = tpu.strided_load %arg16[%c25_562, %c0_563] {strides = array<i32: 2, 1>} : memref<72x40xf32, #tpu.memory_space<vmem>>, vector<3x40xf32>
    %983 = arith.maximumf %981, %982 : vector<3x40xf32>
    %c30 = arith.constant 30 : index
    %c0_564 = arith.constant 0 : index
    %984 = tpu.strided_load %arg16[%c30, %c0_564] {strides = array<i32: 2, 1>} : memref<72x40xf32, #tpu.memory_space<vmem>>, vector<3x40xf32>
    %c31 = arith.constant 31 : index
    %c0_565 = arith.constant 0 : index
    %985 = tpu.strided_load %arg16[%c31, %c0_565] {strides = array<i32: 2, 1>} : memref<72x40xf32, #tpu.memory_space<vmem>>, vector<3x40xf32>
    %986 = arith.maximumf %984, %985 : vector<3x40xf32>
    %987 = arith.maximumf %983, %986 : vector<3x40xf32>
    %988 = vector.extract_strided_slice %987 {offsets = [0, 0], sizes = [1, 40], strides = [1, 1]} : vector<3x40xf32> to vector<1x40xf32>
    %c0_566 = arith.constant 0 : index
    %c240 = arith.constant 240 : index
    %989 = vector.load %arg17[%c0_566, %c240] : memref<2x360xf32, #tpu.memory_space<vmem>>, vector<1x40xf32>
    tpu.vector_store %arg17[%c0_566, %c240], %988 {strides = array<i32>} : memref<2x360xf32, #tpu.memory_space<vmem>>, vector<1x40xf32>,
    %990 = vector.extract_strided_slice %987 {offsets = [1, 0], sizes = [1, 40], strides = [1, 1]} : vector<3x40xf32> to vector<1x40xf32>
    %c0_567 = arith.constant 0 : index
    %c280 = arith.constant 280 : index
    %991 = vector.load %arg17[%c0_567, %c280] : memref<2x360xf32, #tpu.memory_space<vmem>>, vector<1x40xf32>
    tpu.vector_store %arg17[%c0_567, %c280], %990 {strides = array<i32>} : memref<2x360xf32, #tpu.memory_space<vmem>>, vector<1x40xf32>,
    %992 = vector.extract_strided_slice %987 {offsets = [2, 0], sizes = [1, 40], strides = [1, 1]} : vector<3x40xf32> to vector<1x40xf32>
    %c0_568 = arith.constant 0 : index
    %c320 = arith.constant 320 : index
    %993 = vector.load %arg17[%c0_568, %c320] : memref<2x360xf32, #tpu.memory_space<vmem>>, vector<1x40xf32>
    tpu.vector_store %arg17[%c0_568, %c320], %992 {strides = array<i32>} : memref<2x360xf32, #tpu.memory_space<vmem>>, vector<1x40xf32>,
    %c36 = arith.constant 36 : index
    %c0_569 = arith.constant 0 : index
    %994 = tpu.strided_load %arg16[%c36, %c0_569] {strides = array<i32: 2, 1>} : memref<72x40xf32, #tpu.memory_space<vmem>>, vector<3x40xf32>
    %c37 = arith.constant 37 : index
    %c0_570 = arith.constant 0 : index
    %995 = tpu.strided_load %arg16[%c37, %c0_570] {strides = array<i32: 2, 1>} : memref<72x40xf32, #tpu.memory_space<vmem>>, vector<3x40xf32>
    %996 = arith.maximumf %994, %995 : vector<3x40xf32>
    %c42_571 = arith.constant 42 : index
    %c0_572 = arith.constant 0 : index
    %997 = tpu.strided_load %arg16[%c42_571, %c0_572] {strides = array<i32: 2, 1>} : memref<72x40xf32, #tpu.memory_space<vmem>>, vector<3x40xf32>
    %c43 = arith.constant 43 : index
    %c0_573 = arith.constant 0 : index
    %998 = tpu.strided_load %arg16[%c43, %c0_573] {strides = array<i32: 2, 1>} : memref<72x40xf32, #tpu.memory_space<vmem>>, vector<3x40xf32>
    %999 = arith.maximumf %997, %998 : vector<3x40xf32>
    %1000 = arith.maximumf %996, %999 : vector<3x40xf32>
    %1001 = vector.extract_strided_slice %1000 {offsets = [0, 0], sizes = [1, 40], strides = [1, 1]} : vector<3x40xf32> to vector<1x40xf32>
    %c1_574 = arith.constant 1 : index
    %c0_575 = arith.constant 0 : index
    %1002 = vector.load %arg17[%c1_574, %c0_575] : memref<2x360xf32, #tpu.memory_space<vmem>>, vector<1x40xf32>
    tpu.vector_store %arg17[%c1_574, %c0_575], %1001 {strides = array<i32>} : memref<2x360xf32, #tpu.memory_space<vmem>>, vector<1x40xf32>,
    %1003 = vector.extract_strided_slice %1000 {offsets = [1, 0], sizes = [1, 40], strides = [1, 1]} : vector<3x40xf32> to vector<1x40xf32>
    %c1_576 = arith.constant 1 : index
    %c40_577 = arith.constant 40 : index
    %1004 = vector.load %arg17[%c1_576, %c40_577] : memref<2x360xf32, #tpu.memory_space<vmem>>, vector<1x40xf32>
    tpu.vector_store %arg17[%c1_576, %c40_577], %1003 {strides = array<i32>} : memref<2x360xf32, #tpu.memory_space<vmem>>, vector<1x40xf32>,
    %1005 = vector.extract_strided_slice %1000 {offsets = [2, 0], sizes = [1, 40], strides = [1, 1]} : vector<3x40xf32> to vector<1x40xf32>
    %c1_578 = arith.constant 1 : index
    %c80_579 = arith.constant 80 : index
    %1006 = vector.load %arg17[%c1_578, %c80_579] : memref<2x360xf32, #tpu.memory_space<vmem>>, vector<1x40xf32>
    tpu.vector_store %arg17[%c1_578, %c80_579], %1005 {strides = array<i32>} : memref<2x360xf32, #tpu.memory_space<vmem>>, vector<1x40xf32>,
    %c48_580 = arith.constant 48 : index
    %c0_581 = arith.constant 0 : index
    %1007 = tpu.strided_load %arg16[%c48_580, %c0_581] {strides = array<i32: 2, 1>} : memref<72x40xf32, #tpu.memory_space<vmem>>, vector<3x40xf32>
    %c49_582 = arith.constant 49 : index
    %c0_583 = arith.constant 0 : index
    %1008 = tpu.strided_load %arg16[%c49_582, %c0_583] {strides = array<i32: 2, 1>} : memref<72x40xf32, #tpu.memory_space<vmem>>, vector<3x40xf32>
    %1009 = arith.maximumf %1007, %1008 : vector<3x40xf32>
    %c54 = arith.constant 54 : index
    %c0_584 = arith.constant 0 : index
    %1010 = tpu.strided_load %arg16[%c54, %c0_584] {strides = array<i32: 2, 1>} : memref<72x40xf32, #tpu.memory_space<vmem>>, vector<3x40xf32>
    %c55 = arith.constant 55 : index
    %c0_585 = arith.constant 0 : index
    %1011 = tpu.strided_load %arg16[%c55, %c0_585] {strides = array<i32: 2, 1>} : memref<72x40xf32, #tpu.memory_space<vmem>>, vector<3x40xf32>
    %1012 = arith.maximumf %1010, %1011 : vector<3x40xf32>
    %1013 = arith.maximumf %1009, %1012 : vector<3x40xf32>
    %1014 = vector.extract_strided_slice %1013 {offsets = [0, 0], sizes = [1, 40], strides = [1, 1]} : vector<3x40xf32> to vector<1x40xf32>
    %c1_586 = arith.constant 1 : index
    %c120_587 = arith.constant 120 : index
    %1015 = vector.load %arg17[%c1_586, %c120_587] : memref<2x360xf32, #tpu.memory_space<vmem>>, vector<1x40xf32>
    tpu.vector_store %arg17[%c1_586, %c120_587], %1014 {strides = array<i32>} : memref<2x360xf32, #tpu.memory_space<vmem>>, vector<1x40xf32>,
    %1016 = vector.extract_strided_slice %1013 {offsets = [1, 0], sizes = [1, 40], strides = [1, 1]} : vector<3x40xf32> to vector<1x40xf32>
    %c1_588 = arith.constant 1 : index
    %c160_589 = arith.constant 160 : index
    %1017 = vector.load %arg17[%c1_588, %c160_589] : memref<2x360xf32, #tpu.memory_space<vmem>>, vector<1x40xf32>
    tpu.vector_store %arg17[%c1_588, %c160_589], %1016 {strides = array<i32>} : memref<2x360xf32, #tpu.memory_space<vmem>>, vector<1x40xf32>,
    %1018 = vector.extract_strided_slice %1013 {offsets = [2, 0], sizes = [1, 40], strides = [1, 1]} : vector<3x40xf32> to vector<1x40xf32>
    %c1_590 = arith.constant 1 : index
    %c200_591 = arith.constant 200 : index
    %1019 = vector.load %arg17[%c1_590, %c200_591] : memref<2x360xf32, #tpu.memory_space<vmem>>, vector<1x40xf32>
    tpu.vector_store %arg17[%c1_590, %c200_591], %1018 {strides = array<i32>} : memref<2x360xf32, #tpu.memory_space<vmem>>, vector<1x40xf32>,
    %c60 = arith.constant 60 : index
    %c0_592 = arith.constant 0 : index
    %1020 = tpu.strided_load %arg16[%c60, %c0_592] {strides = array<i32: 2, 1>} : memref<72x40xf32, #tpu.memory_space<vmem>>, vector<3x40xf32>
    %c61 = arith.constant 61 : index
    %c0_593 = arith.constant 0 : index
    %1021 = tpu.strided_load %arg16[%c61, %c0_593] {strides = array<i32: 2, 1>} : memref<72x40xf32, #tpu.memory_space<vmem>>, vector<3x40xf32>
    %1022 = arith.maximumf %1020, %1021 : vector<3x40xf32>
    %c66_594 = arith.constant 66 : index
    %c0_595 = arith.constant 0 : index
    %1023 = tpu.strided_load %arg16[%c66_594, %c0_595] {strides = array<i32: 2, 1>} : memref<72x40xf32, #tpu.memory_space<vmem>>, vector<3x40xf32>
    %c67 = arith.constant 67 : index
    %c0_596 = arith.constant 0 : index
    %1024 = tpu.strided_load %arg16[%c67, %c0_596] {strides = array<i32: 2, 1>} : memref<72x40xf32, #tpu.memory_space<vmem>>, vector<3x40xf32>
    %1025 = arith.maximumf %1023, %1024 : vector<3x40xf32>
    %1026 = arith.maximumf %1022, %1025 : vector<3x40xf32>
    %1027 = vector.extract_strided_slice %1026 {offsets = [0, 0], sizes = [1, 40], strides = [1, 1]} : vector<3x40xf32> to vector<1x40xf32>
    %c1_597 = arith.constant 1 : index
    %c240_598 = arith.constant 240 : index
    %1028 = vector.load %arg17[%c1_597, %c240_598] : memref<2x360xf32, #tpu.memory_space<vmem>>, vector<1x40xf32>
    tpu.vector_store %arg17[%c1_597, %c240_598], %1027 {strides = array<i32>} : memref<2x360xf32, #tpu.memory_space<vmem>>, vector<1x40xf32>,
    %1029 = vector.extract_strided_slice %1026 {offsets = [1, 0], sizes = [1, 40], strides = [1, 1]} : vector<3x40xf32> to vector<1x40xf32>
    %c1_599 = arith.constant 1 : index
    %c280_600 = arith.constant 280 : index
    %1030 = vector.load %arg17[%c1_599, %c280_600] : memref<2x360xf32, #tpu.memory_space<vmem>>, vector<1x40xf32>
    tpu.vector_store %arg17[%c1_599, %c280_600], %1029 {strides = array<i32>} : memref<2x360xf32, #tpu.memory_space<vmem>>, vector<1x40xf32>,
    %1031 = vector.extract_strided_slice %1026 {offsets = [2, 0], sizes = [1, 40], strides = [1, 1]} : vector<3x40xf32> to vector<1x40xf32>
    %c1_601 = arith.constant 1 : index
    %c320_602 = arith.constant 320 : index
    %1032 = vector.load %arg17[%c1_601, %c320_602] : memref<2x360xf32, #tpu.memory_space<vmem>>, vector<1x40xf32>
    tpu.vector_store %arg17[%c1_601, %c320_602], %1031 {strides = array<i32>} : memref<2x360xf32, #tpu.memory_space<vmem>>, vector<1x40xf32>,
    %c0_603 = arith.constant 0 : index
    %c0_604 = arith.constant 0 : index
    %1033 = vector.load %arg17[%c0_603, %c0_604] : memref<2x360xf32, #tpu.memory_space<vmem>>, vector<2x360xf32>
    %c0_605 = arith.constant 0 : index
    %c0_606 = arith.constant 0 : index
    %1034 = vector.load %arg9[%c0_605, %c0_606] : memref<360x150xf32, #tpu.memory_space<vmem>>, vector<360x150xf32>
    %cst_607 = arith.constant dense<0.000000e+00> : vector<2x150xf32>
    %1035 = tpu.matmul %1033, %1034, %cst_607 {dimension_numbers = #tpu.dot_dimension_numbers<[1], [0], [0], [1], [0, 0, 1, 1], [], []>} : vector<2x360xf32>, vector<360x150xf32>, vector<2x150xf32> -> vector<2x150xf32>
    %c0_608 = arith.constant 0 : index
    %c0_609 = arith.constant 0 : index
    %1036 = vector.load %arg10[%c0_608, %c0_609] : memref<1x150xf32, #tpu.memory_space<vmem>>, vector<1x150xf32>
    %1037 = vector.broadcast %1036 : vector<1x150xf32> to vector<2x150xf32>
    %1038 = arith.addf %1035, %1037 : vector<2x150xf32>
    %c0_610 = arith.constant 0 : index
    %c0_611 = arith.constant 0 : index
    %1039 = vector.load %arg11[%c0_610, %c0_611] : memref<150x10xf32, #tpu.memory_space<vmem>>, vector<150x10xf32>
    %cst_612 = arith.constant dense<0.000000e+00> : vector<2x10xf32>
    %1040 = tpu.matmul %1038, %1039, %cst_612 {dimension_numbers = #tpu.dot_dimension_numbers<[1], [0], [0], [1], [0, 0, 1, 1], [], []>} : vector<2x150xf32>, vector<150x10xf32>, vector<2x10xf32> -> vector<2x10xf32>
    %c0_613 = arith.constant 0 : index
    %c0_614 = arith.constant 0 : index
    %1041 = vector.load %arg12[%c0_613, %c0_614] : memref<1x10xf32, #tpu.memory_space<vmem>>, vector<1x10xf32>
    %1042 = vector.broadcast %1041 : vector<1x10xf32> to vector<2x10xf32>
    %1043 = arith.addf %1040, %1042 : vector<2x10xf32>
    %cst_615 = arith.constant dense<0xFF800000> : vector<2xf32>
    %1044 = vector.multi_reduction <maximumf>, %1043, %cst_615 [1] : vector<2x10xf32> to vector<2xf32>
    %1045 = vector.shape_cast %1044 : vector<2xf32> to vector<2x1xf32>
    %1046 = vector.broadcast %1045 : vector<2x1xf32> to vector<2x10xf32>
    %1047 = arith.subf %1043, %1046 : vector<2x10xf32>
    %1048 = math.exp %1047 : vector<2x10xf32>
    %cst_616 = arith.constant dense<0.000000e+00> : vector<2xf32>
    %1049 = vector.multi_reduction <add>, %1048, %cst_616 [1] : vector<2x10xf32> to vector<2xf32>
    %1050 = vector.shape_cast %1049 : vector<2xf32> to vector<2x1xf32>
    %1051 = tpu.reciprocal %1050 {approx = true} : vector<2x1xf32> -> vector<2x1xf32>
    %1052 = vector.broadcast %1051 : vector<2x1xf32> to vector<2x10xf32>
    %1053 = arith.mulf %1048, %1052 : vector<2x10xf32>
    %c0_617 = arith.constant 0 : index
    %c0_618 = arith.constant 0 : index
    %1054 = vector.load %arg13[%c0_617, %c0_618] : memref<2x10xf32, #tpu.memory_space<vmem>>, vector<2x10xf32>
    tpu.vector_store %arg13[%c0_617, %c0_618], %1053 {strides = array<i32>} : memref<2x10xf32, #tpu.memory_space<vmem>>, vector<2x10xf32>,
    return
  }
}

</mosaic_0001>

<bundles_post_ra>
// kernel: cnn12x12_forward.1
= control target key start
LH: loop header
LB: loop body
LE: loop exit
PB: predicated region body
PF: predicated region fallthrough
CT: control target
= control target key end

     0   :  { %v6652_v2 = vmov 11   ;;  %v6656_v3 = vmov 0   ;;  %s6627_s0 = inlined_call_operand.vmem [shape: f32[28,14], index: 0, kind: input, shape index: {}]   ;;  %s6628_s1 = inlined_call_operand.vmem [shape: f32[4,20], index: 1, kind: input, shape index: {}]   ;;  %s6629_s2 = inlined_call_operand.vmem [shape: f32[1,20], index: 2, kind: input, shape index: {}]   ;;  %s6630_s3 = inlined_call_operand.vmem [shape: f32[1,20], index: 3, kind: input, shape index: {}]   ;;  %s6631_s4 = inlined_call_operand.vmem [shape: f32[1,20], index: 4, kind: input, shape index: {}]   ;;  %s6632_s5 = inlined_call_operand.vmem [shape: f32[180,40], index: 5, kind: input, shape index: {}]   ;;  %s6633_s6 = inlined_call_operand.vmem [shape: f32[1,40], index: 6, kind: input, shape index: {}]   ;;  %s6634_s7 = inlined_call_operand.vmem [shape: f32[1,40], index: 7, kind: input, shape index: {}]   ;;  %s6635_s8 = inlined_call_operand.vmem [shape: f32[1,40], index: 8, kind: input, shape index: {}]   ;;  %s6636_s9 = inlined_call_operand.vmem [shape: f32[360,150], index: 9, kind: input, shape index: {}]   ;;  %s6637_s10 = inlined_call_operand.vmem [shape: f32[1,150], index: 10, kind: input, shape index: {}]   ;;  %s6638_s11 = inlined_call_operand.vmem [shape: f32[150,10], index: 11, kind: input, shape index: {}]   ;;  %s6639_s12 = inlined_call_operand.vmem [shape: f32[1,10], index: 12, kind: input, shape index: {}]   ;;  %s6640_s13 = inlined_call_operand.hbm [shape: f32[2,10], index: 13, kind: output, shape index: {}]  }
   0x1   :  { %v4202_v0 = vld [vmem:[%s6627_s0] sm:$0xff]  ;;  %3881 = vset.pattern.permute.xlu0 %v6652_v2  ;;  %3868 = vset.pattern.permute.xlu1 %v6656_v3  ;;  %v4216_v4 = vld [vmem:[%s6627_s0 + $0x8] sm:$0x1f] }
   0x2   :  { %v4207_v1 = vld [vmem:[%s6627_s0 + $0x1] sm:$0xff]  ;;  %682 = vperm.xlu0 %3881, %v4202_v0   ;;  %v66_v5 = vld [vmem:[%s6627_s0 + $0x9] sm:$0x1f] }
   0x3   :  { %69 = vperm.xlu1 %3868, %v4207_v1   ;;  %v4225_v6 = vld [vmem:[%s6627_s0 + $0x8] sm:$0x1f] }
   0x6   :  { %686 = vperm.xlu0 %3881, %v4216_v4  }
   0x7   :  { %74 = vperm.xlu1 %3868, %v66_v5  }
   0x8   :  { %18 = vsyncpa [#allocation7], 0  ;;  %v6648_v7 = vmov 1   ;;  %v6658_v8 = vmov 12   ;;  %v130_v9 = vld [vmem:[%s6627_s0 + $0x8] sm:$0x1f]  ;;  %v59_v59 = vlaneseq }
   0x9   :  { %v6644_v10 = vmov 2   ;;  %v4243_v11 = vld [vmem:[%s6627_s0 + $0x8] sm:$0x1f]  ;;  %v6660_v12 = vmov 13   ;;  %v4263_v15 = vld [vmem:[%s6627_s0 + $0xe] sm:$0xff]  ;;  %v6643_v18 = vmov 3  }
   0xa   :  { %718 = vperm.xlu0 %3881, %v4225_v6   ;;  %v48_v13 = vld [vmem:[%s6627_s0 + $0x8] sm:$0x1f]  ;;  %v826_v17 = vld [vmem:[%s6627_s0 + $0x16] sm:$0x1f]  ;;  %v6642_v21 = vmov 4   ;;  %v6641_v25 = vmov 5  }
   0xb   :  { %3869 = vset.pattern.permute.xlu1 %v6648_v7  ;;  %v144_v14 = vld [vmem:[%s6627_s0 + $0x9] sm:$0x1f]  ;;  %v4290_v22 = vld [vmem:[%s6627_s0 + $0x16] sm:$0x1f]  ;;  %v6651_v30 = vmov 6   ;;  %v6666_v32 = vmov 7  }
   0xc   :  { %147 = vperm.xlu1 %3869, %v4207_v1   ;;  %v202_v16 = vld [vmem:[%s6627_s0 + $0x9] sm:$0x1f]  ;;  %v4314_v27 = vld [vmem:[%s6627_s0 + $0xf] sm:$0xff]  ;;  %v4347_v35 = vld [vmem:[%s6627_s0 + $0x17] sm:$0x1f]  ;;  %v6649_v44 = vmov 8  }
   0xd   :  { %v260_v19 = vld [vmem:[%s6627_s0 + $0x9] sm:$0x1f]  ;;  %v4325_v29 = vld [vmem:[%s6627_s0 + $0x16] sm:$0x1f]  ;;  %v6646_v57 = vmov 9   ;;  %v4415_v62 = vshrl.u32 %v59_v59, 7 }
   0xe   :  { %3883 = vset.pattern.permute.xlu0 %v6658_v8  ;;  %v246_v20 = vld [vmem:[%s6627_s0 + $0x8] sm:$0x1f]  ;;  %v1014_v38 = vld [vmem:[%s6627_s0 + $0x17] sm:$0x1f]  ;;  %vm125_vm0 = vcmask 162816   ;;  %vm127_vm1 = vcmask 159744  }
   0xf   :  { %740 = vperm.xlu0 %3883, %v4202_v0   ;;  %v4297_v23 = vld [vmem:[%s6627_s0 + $0x9] sm:$0x1f]  ;;  %v4405_v55 = vld [vmem:[%s6627_s0 + $0x17] sm:$0x1f]  ;;  %6675 = vst [vmem:[#allocation11_spill] sm:$0xff] %v4415_v62  ;;  %vm1705_vm2 = vcmask 156672  }
  0x10   :  { %86 = vperm.xlu1 %3869, %v4202_v0   ;;  %v304_v24 = vld [vmem:[%s6627_s0 + $0x8] sm:$0x1f]  ;;  %vm2069_vm3 = vcmask 160768   ;;  %s4116_s18 = smov 80   ;;  %s4117_s19 = smov 60   ;;  %vm2745_vm4 = vcmask 1043456  }
  0x11   :  { %v188_v26 = vld [vmem:[%s6627_s0 + $0x8] sm:$0x1f]  ;;  %s4120_s28 = smov 120   ;;  %s4121_s15 = smov 32   ;;  %vm2245_vm5 = vcmask 326656   ;;  %vm2247_vm6 = vcmask 490496  }
  0x12   :  { %v362_v28 = vld [vmem:[%s6627_s0 + $0x8] sm:$0x1f]  ;;  %s4122_s16 = smov 100   ;;  %vm2249_vm7 = vcmask 654336   ;;  %vm2251_vm8 = vcmask 818176   ;;  %vm2255_vm9 = vcmask 97280  }
  0x13   :  { %752 = vperm.xlu0 %3883, %v4207_v1   ;;  %v420_v31 = vld [vmem:[%s6627_s0 + $0x8] sm:$0x1f]  ;;  %vm2253_vm10 = vcmask 982016   ;;  %vm2257_vm11 = vcmask 261120   ;;  %vm2742_vm12 = vcmask 1045504   ;;  %vm2793_vm13 = vcmask 424960  }
  0x14   :  { %138 = vperm.xlu1 %3869, %v130_v9   ;;  %v4362_v39 = vld [vmem:[%s6627_s0 + $0x8] sm:$0x1f]  ;;  %vm2748_vm14 = vcmask 1041408   ;;  %vm3058_vm15 = vcmask 319488  }
  0x15   :  { %v4388_v49 = vld [vmem:[%s6627_s0 + $0x9] sm:$0x1f] }
  0x16   :  { %v550_v52 = vld [vmem:[%s6627_s0 + $0x9] sm:$0x1f] }
  0x17   :  { %785 = vperm.xlu0 %3883, %v4207_v1  }
  0x18   :  { %3870 = vset.pattern.permute.xlu1 %v6644_v10 }
  0x19   :  { %160 = vperm.xlu1 %3870, %v4202_v0  }
  0x1b   :  { %776 = vperm.xlu0 %3883, %v4243_v11  }
  0x1d   :  { %3871 = vset.pattern.permute.xlu1 %v6648_v7 }
  0x1e   :  { %106 = vperm.xlu1 %3871, %v66_v5  }
  0x1f   :  { %3885 = vset.pattern.permute.xlu0 %v6660_v12 }
  0x20   :  { %798 = vperm.xlu0 %3885, %v4202_v0  }
  0x22   :  { %3872 = vset.pattern.permute.xlu1 %v6644_v10 }
  0x23   :  { %172 = vperm.xlu1 %3872, %v4207_v1  }
  0x24   :  { %3886 = vset.pattern.permute.xlu0 %v6656_v3 }
  0x25   :  { %51 = vperm.xlu0 %3886, %v4202_v0  }
  0x27   :  { %191 = vperm.xlu1 %3872, %v4202_v0  }
  0x29   :  { %56 = vperm.xlu0 %3886, %v48_v13  }
  0x2b   :  { %176 = vperm.xlu1 %3872, %v144_v14  }
  0x2d   :  { %829 = vperm.xlu0 %3886, %v4263_v15  }
  0x2f   :  { %210 = vperm.xlu1 %3872, %v202_v16  }
  0x31   :  { %834 = vperm.xlu0 %3886, %v826_v17  }
  0x33   :  { %3873 = vset.pattern.permute.xlu1 %v6643_v18 }
  0x34   :  { %249 = vperm.xlu1 %3873, %v4202_v0  }
  0x35   :  { %3890 = vset.pattern.permute.xlu0 %v6648_v7 }
  0x36   :  { %133 = vperm.xlu0 %3890, %v4202_v0  }
  0x38   :  { %263 = vperm.xlu1 %3873, %v4207_v1  }
  0x3a   :  { %90 = vperm.xlu0 %3890, %v48_v13   ;;  %v6645_v13 = vsub.s32 1, %v4415_v62 }
  0x3c   :  { %230 = vperm.xlu1 %3873, %v4207_v1  }
  0x3e   :  { %152 = vperm.xlu0 %3890, %v144_v14   ;;  %v4429_v14 = vsub.s32 0, %v4415_v62 }
  0x40   :  { %268 = vperm.xlu1 %3873, %v260_v19   ;;  %6676 = vst [vmem:[#allocation12_spill] sm:$0xff] %v4429_v14 }
  0x42   :  { %102 = vperm.xlu0 %3890, %v4207_v1  }
  0x44   :  { %234 = vperm.xlu1 %3873, %v202_v16  }
  0x46   :  { %856 = vperm.xlu0 %3890, %v4263_v15  }
  0x48   :  { %3874 = vset.pattern.permute.xlu1 %v6642_v21 }
  0x49   :  { %280 = vperm.xlu1 %3874, %v246_v20  }
  0x4a   :  { %860 = vperm.xlu0 %3890, %v826_v17   ;;  %v45_v17 = vld [vmem:[%s6628_s1] sm:$0xf]  ;;  %s4124_s1 = smov 112  }
  0x4d   :  { %307 = vperm.xlu1 %3874, %v4202_v0  }
  0x4e   :  { %892 = vperm.xlu0 %3890, %v4290_v22  }
  0x51   :  { %292 = vperm.xlu1 %3874, %v260_v19   ;;  %v95_v19 = vsub.s32 2, %v4415_v62 }
  0x52   :  { %3893 = vset.pattern.permute.xlu0 %v6644_v10 }
  0x53   :  { %164 = vperm.xlu0 %3893, %v130_v9   ;;  %v608_v9 = vld [vmem:[%s6627_s0 + $0x9] sm:$0x1f] }
  0x55   :  { %326 = vperm.xlu1 %3874, %v4297_v23  }
  0x57   :  { %205 = vperm.xlu0 %3893, %v4207_v1  }
  0x59   :  { %3875 = vset.pattern.permute.xlu1 %v6641_v25 }
  0x5a   :  { %338 = vperm.xlu1 %3875, %v304_v24  }
  0x5b   :  { %196 = vperm.xlu0 %3893, %v188_v26  }
  0x5e   :  { %346 = vperm.xlu1 %3875, %v4207_v1  }
  0x5f   :  { %914 = vperm.xlu0 %3893, %v4263_v15  }
  0x62   :  { %379 = vperm.xlu1 %3875, %v4207_v1  }
  0x63   :  { %926 = vperm.xlu0 %3893, %v4314_v27  }
  0x66   :  { %370 = vperm.xlu1 %3875, %v362_v28  }
  0x67   :  { %959 = vperm.xlu0 %3893, %v4314_v27  }
  0x6a   :  { %3876 = vset.pattern.permute.xlu1 %v6651_v30 }
  0x6b   :  { %392 = vperm.xlu1 %3876, %v4202_v0   ;;  %950 = vperm.xlu0 %3893, %v4325_v29  }
  0x6f   :  { %437 = vperm.xlu1 %3876, %v4207_v1   ;;  %3895 = vset.pattern.permute.xlu0 %v6643_v18 }
  0x70   :  { %218 = vperm.xlu0 %3895, %v4202_v0  }
  0x73   :  { %396 = vperm.xlu1 %3876, %v362_v28   ;;  %v4446_v28 = vrot.slane %v45_v17, %v4429_v14  ;;  %v6678_v14 = vmov 13  }
  0x74   :  { %222 = vperm.xlu0 %3895, %v188_v26   ;;  %v4443_v26 = vrot.slane %v45_v17, %v6645_v13  ;;  %v4461_v13 = vld [vmem:[%s6627_s0 + $0x9] sm:$0x1f] }
  0x77   :  { %428 = vperm.xlu1 %3876, %v420_v31  }
  0x78   :  { %254 = vperm.xlu0 %3895, %v246_v20  }
  0x7b   :  { %3877 = vset.pattern.permute.xlu1 %v6666_v32 }
  0x7c   :  { %450 = vperm.xlu1 %3877, %v4202_v0   ;;  %972 = vperm.xlu0 %3895, %v4263_v15  }
  0x80   :  { %454 = vperm.xlu1 %3877, %v420_v31   ;;  %1003 = vperm.xlu0 %3895, %v4263_v15   ;;  %v4448_v31 = vrot.slane %v45_v17, %v95_v19 }
  0x81   :  { %v4342_v34 = vpop.permute.xlu0 %682 }
  0x82   :  { %v4340_v33 = vpop.permute.xlu1 %69  ;;  %6673 = vst [vmem:[#allocation9_spill] sm:$0xff] %v4342_v34 }
  0x84   :  { %481 = vperm.xlu1 %3877, %v4202_v0   ;;  %988 = vperm.xlu0 %3895, %v4347_v35  }
  0x85   :  { %v4353_v37 = vpop.permute.xlu0 %686 }
  0x86   :  { %v4351_v36 = vpop.permute.xlu1 %74  ;;  %6674 = vst [vmem:[#allocation10_spill] sm:$0xff] %v4353_v37 }
  0x88   :  { %495 = vperm.xlu1 %3877, %v4207_v1   ;;  %1022 = vperm.xlu0 %3895, %v1014_v38  }
  0x89   :  { %v4364_v40 = vpop.permute.xlu0 %718 }
  0x8b   :  { %v148_v41 = vpop.permute.xlu1 %147 }
  0x8c   :  { %486 = vperm.xlu1 %3877, %v4362_v39   ;;  %3897 = vset.pattern.permute.xlu0 %v6642_v21  ;;  %v155_v59 = vmul.f32 %v148_v41, %v4443_v26  ;;  %v82_v41 = vmul.f32 %v4443_v26, %v4351_v36 }
  0x8d   :  { %276 = vperm.xlu0 %3897, %v4202_v0  }
  0x8e   :  { %v4371_v43 = vpop.permute.xlu0 %740 }
  0x8f   :  { %v4369_v42 = vpop.permute.xlu1 %86 }
  0x90   :  { %3878 = vset.pattern.permute.xlu1 %v6649_v44 }
  0x91   :  { %508 = vperm.xlu1 %3878, %v4202_v0   ;;  %288 = vperm.xlu0 %3897, %v4207_v1  }
  0x92   :  { %v4378_v46 = vpop.permute.xlu0 %752 }
  0x93   :  { %v4376_v45 = vpop.permute.xlu1 %138 }
  0x95   :  { %520 = vperm.xlu1 %3878, %v4207_v1   ;;  %321 = vperm.xlu0 %3897, %v4207_v1  }
  0x96   :  { %v4382_v47 = vpop.permute.xlu0 %785 }
  0x98   :  { %v161_v48 = vpop.permute.xlu1 %160 }
  0x99   :  { %539 = vperm.xlu1 %3878, %v4202_v0   ;;  %312 = vperm.xlu0 %3897, %v304_v24   ;;  %v111_v24 = vsub.s32 3, %v4415_v62 }
  0x9a   :  { %v4390_v50 = vpop.permute.xlu0 %776 }
  0x9b   :  { %v4456_v10 = vrot.slane %v45_v17, %v111_v24 }
  0x9d   :  { %524 = vperm.xlu1 %3878, %v4388_v49   ;;  %v4393_v51 = vpop.permute.xlu1 %106  ;;  %1061 = vperm.xlu0 %3897, %v4263_v15  }
  0x9f   :  { %v4399_v53 = vpop.permute.xlu0 %798 }
  0xa1   :  { %558 = vperm.xlu1 %3878, %v550_v52   ;;  %1042 = vperm.xlu0 %3897, %v4314_v27  }
  0xa2   :  { %v173_v54 = vpop.permute.xlu1 %172 }
  0xa3   :  { %v179_v19 = vmul.f32 %v173_v54, %v4456_v10 }
  0xa4   :  { %v52_v56 = vpop.permute.xlu0 %51 }
  0xa5   :  { %3879 = vset.pattern.permute.xlu1 %v6646_v57  ;;  %1080 = vperm.xlu0 %3897, %v4405_v55   ;;  %v63_v17 = vmul.f32 %v4446_v28, %v52_v56 }
  0xa6   :  { %597 = vperm.xlu1 %3879, %v4202_v0   ;;  %v4410_v58 = vpop.permute.xlu1 %191 }
  0xa8   :  { %v57_v60 = vpop.permute.xlu0 %56 }
  0xa9   :  { %1046 = vperm.xlu0 %3897, %v1014_v38  }
  0xaa   :  { %611 = vperm.xlu1 %3879, %v4207_v1   ;;  %v4413_v61 = vpop.permute.xlu1 %176 }
  0xac   :  { %v4417_v63 = vpop.permute.xlu0 %829 }
  0xad   :  { %3900 = vset.pattern.permute.xlu0 %v6641_v25  ;;  %v64_v25 = vmul.f32 %v4446_v28, %v57_v60  ;;  %v167_v60 = vmul.f32 %v161_v48, %v4448_v31  ;;  %v81_v48 = vmul.f32 %v4443_v26, %v4340_v33  ;;  %v97_v33 = vmul.f32 %v4448_v31, %v4369_v42  ;;  %v666_v42 = vld [vmem:[%s6627_s0 + $0x9] sm:$0x1f] }
  0xae   :  { %578 = vperm.xlu1 %3879, %v4207_v1   ;;  %v4421_v5 = vpop.permute.xlu1 %210  ;;  %334 = vperm.xlu0 %3900, %v4202_v0  }
  0xaf   :  { %v84_v57 = vadd.f32 %v82_v41, %v64_v25  ;;  %v114_v25 = vmul.f32 %v4456_v10, %v4393_v51  ;;  %v83_v41 = vadd.f32 %v81_v48, %v63_v17  ;;  %v1130_v17 = vld [vmem:[%s6627_s0 + $0x17] sm:$0x1f] }
  0xb0   :  { %v4431_v16 = vpop.permute.xlu0 %834 }
  0xb1   :  { %v99_v51 = vadd.f32 %v97_v33, %v83_v41  ;;  %v434_v33 = vld [vmem:[%s6627_s0 + $0x9] sm:$0x1f] }
  0xb2   :  { %616 = vperm.xlu1 %3879, %v608_v9   ;;  %365 = vperm.xlu0 %3900, %v4202_v0  }
  0xb3   :  { %v4438_v20 = vpop.permute.xlu1 %249 }
  0xb5   :  { %v134_v38 = vpop.permute.xlu0 %133 }
  0xb6   :  { %582 = vperm.xlu1 %3879, %v550_v52   ;;  %v141_v21 = vmul.f32 %v134_v38, %v4446_v28  ;;  %350 = vperm.xlu0 %3900, %v4297_v23   ;;  %v4466_v52 = vld [vmem:[%s6627_s0 + $0x8] sm:$0x1f]  ;;  %v6654_v38 = vmov 10  }
  0xb7   :  { %v4454_v18 = vpop.permute.xlu1 %263 }
  0xb8   :  { %v157_v23 = vadd.f32 %v155_v59, %v141_v21  ;;  %v4482_v21 = vld [vmem:[%s6629_s2] ss:$0 sm:$0xff] }
  0xb9   :  { %v91_v24 = vpop.permute.xlu0 %90 }
  0xba   :  { %3880 = vset.pattern.permute.xlu1 %v6654_v38  ;;  %v169_v7 = vadd.f32 %v167_v60, %v157_v23  ;;  %v98_v44 = vmul.f32 %v4448_v31, %v91_v24  ;;  %384 = vperm.xlu0 %3900, %v4461_v13  }
  0xbb   :  { %628 = vperm.xlu1 %3880, %v4466_v52   ;;  %v4477_v36 = vpop.permute.xlu1 %230 }
  0xbc   :  { %v181_v54 = vadd.f32 %v179_v19, %v169_v7  ;;  %v100_v56 = vadd.f32 %v98_v44, %v84_v57  ;;  %v237_v37 = vmul.f32 %v4477_v36, %v4456_v10 }
  0xbd   :  { %v153_v59 = vpop.permute.xlu0 %152 }
  0xbe   :  { %v183_v60 = vadd.f32 %v4482_v21, %v181_v54  ;;  %v116_v23 = vadd.f32 %v114_v25, %v100_v56  ;;  %1100 = vperm.xlu0 %3900, %v4314_v27  }
  0xbf   :  { %655 = vperm.xlu1 %3880, %v4202_v0   ;;  %v4491_v24 = vpop.permute.xlu1 %268 }
  0xc0   :  { %185 = vst.msk [vmem:[#allocation2 + $0xd] sm:$0xff] %vm125_vm0, %v183_v60  ;;  %v124_v7 = vadd.f32 %v4482_v21, %v116_v23  ;;  %v156_v60 = vmul.f32 %v153_v59, %v4443_v26 }
  0xc1   :  { %v103_v44 = vpop.permute.xlu0 %102 }
  0xc2   :  { %128 = vst.msk [vmem:[#allocation2 + $0x8] sm:$0x1f] %vm127_vm1, %v124_v7  ;;  %v113_v57 = vmul.f32 %v4456_v10, %v103_v44  ;;  %1104 = vperm.xlu0 %3900, %v4405_v55   ;;  %v142_v7 = vmul.f32 %v4376_v45, %v4446_v28 }
  0xc3   :  { %640 = vperm.xlu1 %3880, %v608_v9   ;;  %v4500_v19 = vpop.permute.xlu1 %234 }
  0xc4   :  { %v115_v48 = vadd.f32 %v113_v57, %v99_v51  ;;  %v158_v51 = vadd.f32 %v156_v60, %v142_v7 }
  0xc5   :  { %v4508_v25 = vpop.permute.xlu0 %856 }
  0xc6   :  { %v123_v54 = vadd.f32 %v4482_v21, %v115_v48  ;;  %1138 = vperm.xlu0 %3900, %v1130_v17   ;;  %v724_v48 = vld [vmem:[%s6627_s0 + $0x9] sm:$0x1f] }
  0xc7   :  { %674 = vperm.xlu1 %3880, %v666_v42  }
  0xc8   :  { %v4511_v56 = vpop.permute.xlu1 %280  ;;  %126 = vst.msk [vmem:[#allocation2] sm:$0xff] %vm125_vm0, %v123_v54  ;;  %v180_v54 = vmul.f32 %v4413_v61, %v4456_v10  ;;  %v1188_v61 = vld [vmem:[%s6627_s0 + $0x17] sm:$0x1f] }
  0xc9   :  { %v4514_v55 = vpop.permute.xlu0 %860 }
  0xca   :  { %3901 = vset.pattern.permute.xlu0 %v6651_v30 }
  0xcb   :  { %3882 = vset.pattern.permute.xlu1 %v6652_v2  ;;  %423 = vperm.xlu0 %3901, %v4202_v0  }
  0xcc   :  { %713 = vperm.xlu1 %3882, %v4202_v0   ;;  %v4520_v9 = vpop.permute.xlu1 %307 }
  0xcd   :  { %v4522_v41 = vpop.permute.xlu0 %892 }
  0xcf   :  { %404 = vperm.xlu0 %3901, %v4207_v1  }
  0xd0   :  { %727 = vperm.xlu1 %3882, %v4207_v1   ;;  %v4527_v23 = vpop.permute.xlu1 %292 }
  0xd2   :  { %v165_v44 = vpop.permute.xlu0 %164 }
  0xd3   :  { %v168_v57 = vmul.f32 %v165_v44, %v4448_v31  ;;  %442 = vperm.xlu0 %3901, %v434_v33  }
  0xd4   :  { %694 = vperm.xlu1 %3882, %v4207_v1   ;;  %v4536_v59 = vpop.permute.xlu1 %326 }
  0xd5   :  { %v170_v30 = vadd.f32 %v168_v57, %v158_v51 }
  0xd6   :  { %v206_v2 = vpop.permute.xlu0 %205 }
  0xd7   :  { %v182_v38 = vadd.f32 %v180_v54, %v170_v30  ;;  %408 = vperm.xlu0 %3901, %v4461_v13   ;;  %v213_v54 = vmul.f32 %v206_v2, %v4443_v26 }
  0xd8   :  { %732 = vperm.xlu1 %3882, %v724_v48  }
  0xd9   :  { %v4544_v45 = vpop.permute.xlu1 %338  ;;  %v184_v60 = vadd.f32 %v4482_v21, %v182_v38 }
  0xda   :  { %v197_v7 = vpop.permute.xlu0 %196 }
  0xdb   :  { %186 = vst.msk [vmem:[#allocation2 + $0x15] sm:$0x1f] %vm127_vm1, %v184_v60  ;;  %1177 = vperm.xlu0 %3901, %v4263_v15   ;;  %v200_v12 = vmul.f32 %v197_v7, %v4446_v28 }
  0xdc   :  { %698 = vperm.xlu1 %3882, %v666_v42  }
  0xdd   :  { %v4549_v44 = vpop.permute.xlu1 %346 }
  0xde   :  { %v4551_v3 = vpop.permute.xlu0 %914 }
  0xdf   :  { %1158 = vperm.xlu0 %3901, %v4314_v27  }
  0xe0   :  { %3884 = vset.pattern.permute.xlu1 %v6658_v8 }
  0xe1   :  { %744 = vperm.xlu1 %3884, %v4225_v6   ;;  %v4556_v30 = vpop.permute.xlu1 %379  ;;  %v782_v6 = vld [vmem:[%s6627_s0 + $0x9] sm:$0x1f] }
  0xe2   :  { %v4561_v13 = vpop.permute.xlu0 %926 }
  0xe3   :  { %1196 = vperm.xlu0 %3901, %v1188_v61  }
  0xe5   :  { %771 = vperm.xlu1 %3884, %v4202_v0   ;;  %v4564_v38 = vpop.permute.xlu1 %370 }
  0xe6   :  { %v4566_v42 = vpop.permute.xlu0 %959 }
  0xe7   :  { %1162 = vperm.xlu0 %3901, %v1130_v17   ;;  %v199_v17 = vmul.f32 %v4410_v58, %v4446_v28 }
  0xe9   :  { %756 = vperm.xlu1 %3884, %v724_v48   ;;  %v215_v8 = vadd.f32 %v213_v54, %v199_v17 }
  0xea   :  { %v4568_v51 = vpop.permute.xlu1 %392  ;;  %v4573_v57 = vpop.permute.xlu0 %950 }
  0xeb   :  { %6677 = vst [vmem:[#allocation13_spill] sm:$0xff] %v4573_v57  ;;  %3904 = vset.pattern.permute.xlu0 %v6666_v32  ;;  %v214_v32 = vmul.f32 %v4421_v5, %v4443_v26 }
  0xec   :  { %462 = vperm.xlu0 %3904, %v4207_v1  }
  0xed   :  { %790 = vperm.xlu1 %3884, %v782_v6   ;;  %v216_v54 = vadd.f32 %v214_v32, %v200_v12 }
  0xee   :  { %v4578_v60 = vpop.permute.xlu1 %437 }
  0xef   :  { %v219_v48 = vpop.permute.xlu0 %218 }
  0xf0   :  { %v225_v62 = vmul.f32 %v219_v48, %v4448_v31  ;;  %466 = vperm.xlu0 %3904, %v434_v33  }
  0xf1   :  { %3887 = vset.pattern.permute.xlu1 %v6678_v14 }
  0xf2   :  { %802 = vperm.xlu1 %3887, %v4243_v11   ;;  %v4586_v2 = vpop.permute.xlu1 %396  ;;  %v227_v58 = vadd.f32 %v225_v62, %v215_v8  ;;  %v238_v11 = vmul.f32 %v4500_v19, %v4456_v10  ;;  %v272_v8 = vmul.f32 %v4491_v24, %v4443_v26  ;;  %v296_v19 = vmul.f32 %v4527_v23, %v4456_v10  ;;  %v840_v23 = vld [vmem:[%s6627_s0 + $0x17] sm:$0x1f] }
  0xf3   :  { %v223_v34 = vpop.permute.xlu0 %222 }
  0xf4   :  { %v239_v17 = vadd.f32 %v237_v37, %v227_v58  ;;  %v226_v7 = vmul.f32 %v223_v34, %v4448_v31  ;;  %500 = vperm.xlu0 %3904, %v4388_v49   ;;  %v6679_v34 = vmov 0   ;;  %v284_v37 = vmul.f32 %v4511_v56, %v4448_v31  ;;  %v4620_v56 = vld [vmem:[%s6627_s0 + $0x17] sm:$0x1f] }
  0xf6   :  { %810 = vperm.xlu1 %3887, %v4207_v1   ;;  %v4595_v33 = vpop.permute.xlu1 %428  ;;  %v241_v5 = vadd.f32 %v4482_v21, %v239_v17  ;;  %v228_v48 = vadd.f32 %v226_v7, %v216_v54 }
  0xf7   :  { %v255_v57 = vpop.permute.xlu0 %254 }
  0xf8   :  { %243 = vst.msk [vmem:[#allocation2 + $0x1a] sm:$0xff] %vm125_vm0, %v241_v5  ;;  %v240_v12 = vadd.f32 %v238_v11, %v228_v48  ;;  %v258_v32 = vmul.f32 %v255_v57, %v4446_v28  ;;  %1216 = vperm.xlu0 %3904, %v4314_v27   ;;  %v6682_v5 = vmov 8  }
  0xfa   :  { %3888 = vset.pattern.permute.xlu1 %v6679_v34  ;;  %v242_v49 = vadd.f32 %v4482_v21, %v240_v12  ;;  %v274_v62 = vadd.f32 %v272_v8, %v258_v32  ;;  %v6684_v8 = vmov 1   ;;  %v536_v32 = vld [vmem:[%s6627_s0 + $0x8] sm:$0x1f] }
  0xfb   :  { %843 = vperm.xlu1 %3888, %v4314_v27   ;;  %v4610_v36 = vpop.permute.xlu1 %450  ;;  %v4612_v24 = vpop.permute.xlu0 %972 }
  0xfc   :  { %244 = vst.msk [vmem:[#allocation2 + $0x22] sm:$0x1f] %vm127_vm1, %v242_v49  ;;  %v286_v57 = vadd.f32 %v284_v37, %v274_v62  ;;  %1220 = vperm.xlu0 %3904, %v1188_v61  }
  0xfe   :  { %v298_v58 = vadd.f32 %v296_v19, %v286_v57  ;;  %v4658_v19 = vld [vmem:[%s6627_s0 + $0x16] sm:$0x1f] }
  0xff   :  { %3889 = vset.pattern.permute.xlu1 %v6678_v14  ;;  %v4623_v54 = vpop.permute.xlu1 %454  ;;  %v4625_v17 = vpop.permute.xlu0 %1003 }
 0x100   :  { %814 = vperm.xlu1 %3889, %v782_v6   ;;  %6680 = vst [vmem:[#allocation14_spill] sm:$0xff] %v4625_v17  ;;  %v300_v7 = vadd.f32 %v4482_v21, %v298_v58  ;;  %1254 = vperm.xlu0 %3904, %v4620_v56  }
 0x102   :  { %302 = vst.msk [vmem:[#allocation2 + $0x2f] sm:$0x1f] %vm127_vm1, %v300_v7 }
 0x103   :  { %v482_v61 = vpop.permute.xlu1 %481  ;;  %v4634_v11 = vpop.permute.xlu0 %988 }
 0x104   :  { %3891 = vset.pattern.permute.xlu1 %v6679_v34  ;;  %6681 = vst [vmem:[#allocation15_spill] sm:$0xff] %v4634_v11  ;;  %3905 = vset.pattern.permute.xlu0 %v6682_v5  ;;  %v271_v34 = vmul.f32 %v4454_v18, %v4443_v26  ;;  %v489_v18 = vmul.f32 %v482_v61, %v4446_v28 }
 0x105   :  { %848 = vperm.xlu1 %3891, %v840_v23   ;;  %512 = vperm.xlu0 %3905, %v4362_v39   ;;  %v257_v39 = vmul.f32 %v4438_v20, %v4446_v28 }
 0x107   :  { %v496_v6 = vpop.permute.xlu1 %495  ;;  %v4638_v48 = vpop.permute.xlu0 %1022  ;;  %v273_v57 = vadd.f32 %v271_v34, %v257_v39 }
 0x108   :  { %6683 = vst [vmem:[#allocation16_spill] sm:$0xff] %v4638_v48  ;;  %v503_v62 = vmul.f32 %v496_v6, %v4443_v26  ;;  %v898_v48 = vld [vmem:[%s6627_s0 + $0x17] sm:$0x1f] }
 0x109   :  { %3892 = vset.pattern.permute.xlu1 %v6684_v8  ;;  %553 = vperm.xlu0 %3905, %v4207_v1  }
 0x10a   :  { %887 = vperm.xlu1 %3892, %v4263_v15   ;;  %v505_v6 = vadd.f32 %v503_v62, %v489_v18  ;;  %v1290_v62 = vld [vmem:[%s6627_s0 + $0x16] sm:$0x1f] }
 0x10b   :  { %v4643_v12 = vpop.permute.xlu1 %486 }
 0x10c   :  { %v277_v37 = vpop.permute.xlu0 %276 }
 0x10d   :  { %v283_v49 = vmul.f32 %v277_v37, %v4448_v31  ;;  %544 = vperm.xlu0 %3905, %v536_v32  }
 0x10e   :  { %901 = vperm.xlu1 %3892, %v4314_v27  }
 0x10f   :  { %v285_v20 = vadd.f32 %v283_v49, %v273_v57 }
 0x110   :  { %v509_v58 = vpop.permute.xlu1 %508  ;;  %v289_v8 = vpop.permute.xlu0 %288 }
 0x111   :  { %v515_v7 = vmul.f32 %v509_v58, %v4448_v31  ;;  %v295_v37 = vmul.f32 %v289_v8, %v4456_v10  ;;  %1266 = vperm.xlu0 %3905, %v4658_v19  }
 0x112   :  { %868 = vperm.xlu1 %3892, %v4314_v27  }
 0x113   :  { %v297_v17 = vadd.f32 %v295_v37, %v285_v20  ;;  %v517_v39 = vadd.f32 %v515_v7, %v505_v6  ;;  %v6686_v20 = vmov 9   ;;  %v6687_v37 = vmov 2  }
 0x114   :  { %v521_v34 = vpop.permute.xlu1 %520  ;;  %v322_v11 = vpop.permute.xlu0 %321 }
 0x115   :  { %v527_v61 = vmul.f32 %v521_v34, %v4456_v10  ;;  %v299_v58 = vadd.f32 %v4482_v21, %v297_v17  ;;  %1307 = vperm.xlu0 %3905, %v4314_v27  }
 0x116   :  { %906 = vperm.xlu1 %3892, %v898_v48  }
 0x117   :  { %v529_v49 = vadd.f32 %v527_v61, %v517_v39  ;;  %301 = vst.msk [vmem:[#allocation2 + $0x27] sm:$0xff] %vm125_vm0, %v299_v58 }
 0x118   :  { %v4675_v57 = vpop.permute.xlu1 %539  ;;  %v313_v7 = vpop.permute.xlu0 %312 }
 0x119   :  { %v531_v18 = vadd.f32 %v4482_v21, %v529_v49  ;;  %1298 = vperm.xlu0 %3905, %v1290_v62  }
 0x11a   :  { %872 = vperm.xlu1 %3892, %v840_v23  }
 0x11b   :  { %533 = vst.msk [vmem:[#allocation2 + $0x5b] sm:$0xff] %vm125_vm0, %v531_v18 }
 0x11c   :  { %v4679_v17 = vpop.permute.xlu1 %524  ;;  %v4681_v8 = vpop.permute.xlu0 %1061 }
 0x11d   :  { %6685 = vst [vmem:[#allocation17_spill] sm:$0xff] %v4681_v8  ;;  %3907 = vset.pattern.permute.xlu0 %v6686_v20 }
 0x11e   :  { %3894 = vset.pattern.permute.xlu1 %v6687_v37  ;;  %566 = vperm.xlu0 %3907, %v4202_v0  }
 0x11f   :  { %918 = vperm.xlu1 %3894, %v4290_v22   ;;  %v329_v22 = vmul.f32 %v322_v11, %v4443_v26  ;;  %v353_v11 = vmul.f32 %v4549_v44, %v4456_v10 }
 0x120   :  { %v4687_v6 = vpop.permute.xlu1 %558  ;;  %v4689_v34 = vpop.permute.xlu0 %1042 }
 0x121   :  { %6688 = vst [vmem:[#allocation18_spill] sm:$0xff] %v4689_v34  ;;  %v6701_v34 = vmov 5  }
 0x122   :  { %570 = vperm.xlu0 %3907, %v536_v32   ;;  %v315_v32 = vmul.f32 %v4520_v9, %v4446_v28  ;;  %v330_v9 = vmul.f32 %v4536_v59, %v4443_v26 }
 0x123   :  { %945 = vperm.xlu1 %3894, %v4263_v15  }
 0x124   :  { %v4694_v39 = vpop.permute.xlu0 %1080  ;;  %v331_v37 = vadd.f32 %v329_v22, %v315_v32 }
 0x125   :  { %v4692_v23 = vpop.permute.xlu1 %597  ;;  %6690 = vst [vmem:[#allocation20_spill] sm:$0xff] %v4694_v39  ;;  %v6692_v39 = vmov 3  }
 0x126   :  { %6689 = vst [vmem:[#allocation19_spill] sm:$0xff] %v4692_v23  ;;  %602 = vperm.xlu0 %3907, %v4466_v52   ;;  %v316_v52 = vmul.f32 %v313_v7, %v4446_v28 }
 0x127   :  { %930 = vperm.xlu1 %3894, %v898_v48  }
 0x128   :  { %v4699_v58 = vpop.permute.xlu0 %1046 }
 0x129   :  { %v4697_v61 = vpop.permute.xlu1 %611  ;;  %6691 = vst [vmem:[#allocation21_spill] sm:$0xff] %v4699_v58 }
 0x12a   :  { %1320 = vperm.xlu0 %3907, %v4263_v15  }
 0x12b   :  { %964 = vperm.xlu1 %3894, %v4347_v35   ;;  %v4715_v35 = vld [vmem:[%s6627_s0 + $0x16] sm:$0x1f] }
 0x12c   :  { %6693 = vst [vmem:[#allocation22_spill] sm:$0xff] %v4715_v35 }
 0x12d   :  { %v4706_v49 = vpop.permute.xlu1 %578  ;;  %v335_v18 = vpop.permute.xlu0 %334 }
 0x12e   :  { %v341_v48 = vmul.f32 %v335_v18, %v4448_v31  ;;  %1324 = vperm.xlu0 %3907, %v1290_v62   ;;  %v332_v62 = vadd.f32 %v330_v9, %v316_v52 }
 0x12f   :  { %3896 = vset.pattern.permute.xlu1 %v6692_v39 }
 0x130   :  { %976 = vperm.xlu1 %3896, %v4325_v29   ;;  %v343_v22 = vadd.f32 %v341_v48, %v331_v37  ;;  %v342_v29 = vmul.f32 %v4544_v45, %v4448_v31  ;;  %v6694_v48 = vmov 10   ;;  %v1000_v45 = vld [vmem:[%s6627_s0 + $0x16] sm:$0x1f] }
 0x131   :  { %v4721_v7 = vpop.permute.xlu1 %616  ;;  %v366_v32 = vpop.permute.xlu0 %365 }
 0x132   :  { %v355_v18 = vadd.f32 %v353_v11, %v343_v22  ;;  %1356 = vperm.xlu0 %3907, %v4715_v35   ;;  %v344_v44 = vadd.f32 %v342_v29, %v332_v62 }
 0x134   :  { %984 = vperm.xlu1 %3896, %v4314_v27   ;;  %v357_v39 = vadd.f32 %v4482_v21, %v355_v18  ;;  %v6697_v18 = vmov 4  }
 0x135   :  { %v4728_v8 = vpop.permute.xlu1 %582  ;;  %v351_v59 = vpop.permute.xlu0 %350 }
 0x136   :  { %359 = vst.msk [vmem:[#allocation2 + $0x34] sm:$0xff] %vm125_vm0, %v357_v39  ;;  %v354_v37 = vmul.f32 %v351_v59, %v4456_v10  ;;  %3909 = vset.pattern.permute.xlu0 %v6694_v48 }
 0x137   :  { %624 = vperm.xlu0 %3909, %v4202_v0  }
 0x138   :  { %1017 = vperm.xlu1 %3896, %v4314_v27   ;;  %v356_v52 = vadd.f32 %v354_v37, %v344_v44  ;;  %v373_v37 = vmul.f32 %v366_v32, %v4446_v28  ;;  %v4775_v32 = vld [vmem:[%s6627_s0 + $0xf] sm:$0xff] }
 0x139   :  { %v385_v9 = vpop.permute.xlu0 %384 }
 0x13a   :  { %v4738_v11 = vpop.permute.xlu1 %628  ;;  %v358_v22 = vadd.f32 %v4482_v21, %v356_v52  ;;  %v387_v52 = vmul.f32 %v4556_v30, %v4443_v26  ;;  %v388_v58 = vmul.f32 %v385_v9, %v4443_v26  ;;  %v374_v9 = vmul.f32 %v4564_v38, %v4446_v28 }
 0x13b   :  { %636 = vperm.xlu0 %3909, %v4207_v1  }
 0x13c   :  { %1008 = vperm.xlu1 %3896, %v1000_v45   ;;  %360 = vst.msk [vmem:[#allocation2 + $0x3c] sm:$0x1f] %vm127_vm1, %v358_v22  ;;  %v389_v22 = vadd.f32 %v387_v52, %v373_v37 }
 0x13d   :  { %v4745_v0 = vpop.permute.xlu0 %1100 }
 0x13e   :  { %v4743_v62 = vpop.permute.xlu1 %655  ;;  %6696 = vst [vmem:[#allocation24_spill] sm:$0xff] %v4745_v0 }
 0x13f   :  { %6695 = vst [vmem:[#allocation23_spill] sm:$0xff] %v4743_v62  ;;  %669 = vperm.xlu0 %3909, %v4207_v1   ;;  %v4764_v1 = vld [vmem:[%s6627_s0 + $0xe] sm:$0xff]  ;;  %v390_v62 = vadd.f32 %v388_v58, %v374_v9  ;;  %v6702_v58 = vmov 11   ;;  %v4827_v9 = vld [vmem:[%s6627_s0 + $0x17] sm:$0x1f] }
 0x140   :  { %3898 = vset.pattern.permute.xlu1 %v6697_v18 }
 0x141   :  { %1030 = vperm.xlu1 %3898, %v4263_v15   ;;  %v4752_v39 = vpop.permute.xlu0 %1104 }
 0x142   :  { %v4750_v29 = vpop.permute.xlu1 %640  ;;  %6698 = vst [vmem:[#allocation25_spill] sm:$0xff] %v4752_v39  ;;  %v399_v39 = vmul.f32 %v4568_v51, %v4448_v31  ;;  %v4789_v51 = vld [vmem:[%s6627_s0 + $0x16] sm:$0x1f] }
 0x143   :  { %660 = vperm.xlu0 %3909, %v4216_v4   ;;  %v1058_v4 = vld [vmem:[%s6627_s0 + $0x16] sm:$0x1f] }
 0x145   :  { %1075 = vperm.xlu1 %3898, %v4314_v27   ;;  %v4758_v44 = vpop.permute.xlu0 %1138 }
 0x146   :  { %v4756_v59 = vpop.permute.xlu1 %674  ;;  %6700 = vst [vmem:[#allocation27_spill] sm:$0xff] %v4758_v44 }
 0x147   :  { %6699 = vst [vmem:[#allocation26_spill] sm:$0xff] %v4756_v59  ;;  %1378 = vperm.xlu0 %3909, %v4764_v1  }
 0x149   :  { %1034 = vperm.xlu1 %3898, %v1000_v45   ;;  %v401_v45 = vadd.f32 %v399_v39, %v389_v22  ;;  %v747_v39 = vmul.f32 %v4371_v43, %v4448_v31  ;;  %v400_v43 = vmul.f32 %v4586_v2, %v4448_v31 }
 0x14a   :  { %v424_v18 = vpop.permute.xlu0 %423 }
 0x14b   :  { %v714_v44 = vpop.permute.xlu1 %713  ;;  %1390 = vperm.xlu0 %3909, %v4775_v32  }
 0x14c   :  { %v721_v37 = vmul.f32 %v714_v44, %v4446_v28 }
 0x14d   :  { %1066 = vperm.xlu1 %3898, %v1058_v4  }
 0x14e   :  { %v405_v30 = vpop.permute.xlu0 %404 }
 0x14f   :  { %v728_v0 = vpop.permute.xlu1 %727  ;;  %v411_v52 = vmul.f32 %v405_v30, %v4456_v10  ;;  %1423 = vperm.xlu0 %3909, %v4775_v32  }
 0x150   :  { %v735_v59 = vmul.f32 %v728_v0, %v4443_v26 }
 0x151   :  { %3899 = vset.pattern.permute.xlu1 %v6701_v34  ;;  %v413_v44 = vadd.f32 %v411_v52, %v401_v45  ;;  %v759_v34 = vmul.f32 %v4378_v46, %v4456_v10 }
 0x152   :  { %v737_v22 = vadd.f32 %v735_v59, %v721_v37  ;;  %1088 = vperm.xlu1 %3899, %v4263_v15   ;;  %v443_v0 = vpop.permute.xlu0 %442  ;;  %v402_v37 = vadd.f32 %v400_v43, %v390_v62 }
 0x153   :  { %v4796_v30 = vpop.permute.xlu1 %694  ;;  %v415_v23 = vadd.f32 %v4482_v21, %v413_v44  ;;  %1414 = vperm.xlu0 %3909, %v4789_v51   ;;  %v1478_v44 = vld [vmem:[%s6627_s0 + $0x17] sm:$0x1f] }
 0x154   :  { %v749_v35 = vadd.f32 %v747_v39, %v737_v22 }
 0x155   :  { %417 = vst.msk [vmem:[#allocation2 + $0x41] sm:$0xff] %vm125_vm0, %v415_v23 }
 0x156   :  { %v761_v38 = vadd.f32 %v759_v34, %v749_v35  ;;  %1092 = vperm.xlu1 %3899, %v1058_v4   ;;  %v409_v15 = vpop.permute.xlu0 %408  ;;  %v1116_v4 = vld [vmem:[%s6627_s0 + $0x16] sm:$0x1f] }
 0x157   :  { %v733_v59 = vpop.permute.xlu1 %732  ;;  %v412_v46 = vmul.f32 %v409_v15, %v4456_v10  ;;  %3911 = vset.pattern.permute.xlu0 %v6702_v58  ;;  %v431_v15 = vmul.f32 %v424_v18, %v4446_v28 }
 0x158   :  { %v763_v45 = vadd.f32 %v4482_v21, %v761_v38  ;;  %1436 = vperm.xlu0 %3911, %v4764_v1   ;;  %v736_v22 = vmul.f32 %v733_v59, %v4443_v26  ;;  %v722_v38 = vmul.f32 %v4364_v40, %v4446_v28 }
 0x159   :  { %v414_v52 = vadd.f32 %v412_v46, %v402_v37  ;;  %v6706_v37 = vmov 6   ;;  %v445_v46 = vmul.f32 %v4578_v60, %v4443_v26  ;;  %v457_v60 = vmul.f32 %v4610_v36, %v4448_v31 }
 0x15a   :  { %765 = vst.msk [vmem:[#allocation2 + $0x8f] sm:$0xff] %vm125_vm0, %v763_v45  ;;  %1119 = vperm.xlu1 %3899, %v4764_v1   ;;  %v4813_v23 = vpop.permute.xlu0 %1177 }
 0x15b   :  { %v4811_v2 = vpop.permute.xlu1 %698  ;;  %6703 = vst [vmem:[#allocation28_spill] sm:$0xff] %v4813_v23  ;;  %v416_v35 = vadd.f32 %v4482_v21, %v414_v52  ;;  %v738_v52 = vadd.f32 %v736_v22, %v722_v38  ;;  %v446_v23 = vmul.f32 %v443_v0, %v4443_v26 }
 0x15c   :  { %1467 = vperm.xlu0 %3911, %v4764_v1  }
 0x15d   :  { %418 = vst.msk [vmem:[#allocation2 + $0x49] sm:$0x1f] %vm127_vm1, %v416_v35 }
 0x15e   :  { %1133 = vperm.xlu1 %3899, %v4314_v27   ;;  %v4819_v62 = vpop.permute.xlu0 %1158 }
 0x15f   :  { %6704 = vst [vmem:[#allocation29_spill] sm:$0xff] %v4819_v62  ;;  %v6707_v62 = vmov 12  }
 0x160   :  { %v745_v39 = vpop.permute.xlu1 %744  ;;  %1452 = vperm.xlu0 %3911, %v4827_v9  }
 0x161   :  { %v748_v45 = vmul.f32 %v745_v39, %v4448_v31  ;;  %v432_v39 = vmul.f32 %v4595_v33, %v4446_v28  ;;  %v458_v33 = vmul.f32 %v4623_v54, %v4448_v31 }
 0x162   :  { %1124 = vperm.xlu1 %3899, %v1116_v4   ;;  %v4834_v34 = vpop.permute.xlu0 %1196 }
 0x163   :  { %6705 = vst [vmem:[#allocation30_spill] sm:$0xff] %v4834_v34  ;;  %v447_v34 = vadd.f32 %v445_v46, %v431_v15  ;;  %v750_v40 = vadd.f32 %v748_v45, %v738_v52 }
 0x164   :  { %v772_v43 = vpop.permute.xlu1 %771  ;;  %1486 = vperm.xlu0 %3911, %v1478_v44  }
 0x165   :  { %v459_v45 = vadd.f32 %v457_v60, %v447_v34  ;;  %v779_v52 = vmul.f32 %v772_v43, %v4446_v28  ;;  %v1174_v43 = vld [vmem:[%s6627_s0 + $0x16] sm:$0x1f] }
 0x166   :  { %3902 = vset.pattern.permute.xlu1 %v6706_v37  ;;  %v4844_v59 = vpop.permute.xlu0 %1162  ;;  %v448_v37 = vadd.f32 %v446_v23, %v432_v39  ;;  %v793_v23 = vmul.f32 %v4382_v47, %v4443_v26  ;;  %v805_v47 = vmul.f32 %v4399_v53, %v4448_v31 }
 0x167   :  { %1146 = vperm.xlu1 %3902, %v4764_v1  }
 0x168   :  { %v757_v35 = vpop.permute.xlu1 %756  ;;  %3914 = vset.pattern.permute.xlu0 %v6707_v62  ;;  %v460_v54 = vadd.f32 %v458_v33, %v448_v37 }
 0x169   :  { %v760_v18 = vmul.f32 %v757_v35, %v4456_v10  ;;  %1525 = vperm.xlu0 %3914, %v4764_v1  }
 0x16b   :  { %v762_v22 = vadd.f32 %v760_v18, %v750_v40  ;;  %1191 = vperm.xlu1 %3902, %v4314_v27   ;;  %v463_v38 = vpop.permute.xlu0 %462  ;;  %v4865_v27 = vld [vmem:[%s6627_s0 + $0x17] sm:$0x1f] }
 0x16c   :  { %v791_v15 = vpop.permute.xlu1 %790  ;;  %v469_v46 = vmul.f32 %v463_v38, %v4456_v10 }
 0x16d   :  { %v764_v0 = vadd.f32 %v4482_v21, %v762_v22  ;;  %1506 = vperm.xlu0 %3914, %v4775_v32   ;;  %v794_v53 = vmul.f32 %v791_v15, %v4443_v26 }
 0x16e   :  { %v471_v36 = vadd.f32 %v469_v46, %v459_v45  ;;  %v6708_v45 = vmov 7  }
 0x16f   :  { %766 = vst.msk [vmem:[#allocation2 + $0x97] sm:$0x1f] %vm127_vm1, %v764_v0  ;;  %1150 = vperm.xlu1 %3902, %v1116_v4   ;;  %v467_v34 = vpop.permute.xlu0 %466  ;;  %v795_v4 = vadd.f32 %v793_v23, %v779_v52  ;;  %v4071_v52 = vld [vmem:[%s6627_s0 + $0xe] sm:$0xff] }
 0x170   :  { %v473_v35 = vadd.f32 %v4482_v21, %v471_v36  ;;  %v470_v40 = vmul.f32 %v467_v34, %v4456_v10 }
 0x171   :  { %v803_v18 = vpop.permute.xlu1 %802  ;;  %1544 = vperm.xlu0 %3914, %v4865_v27   ;;  %v807_v0 = vadd.f32 %v805_v47, %v795_v4 }
 0x172   :  { %475 = vst.msk [vmem:[#allocation2 + $0x4e] sm:$0xff] %vm125_vm0, %v473_v35  ;;  %v472_v39 = vadd.f32 %v470_v40, %v460_v54  ;;  %v806_v34 = vmul.f32 %v803_v18, %v4448_v31 }
 0x173   :  { %1182 = vperm.xlu1 %3902, %v1174_v43   ;;  %v501_v60 = vpop.permute.xlu0 %500 }
 0x174   :  { %v474_v22 = vadd.f32 %v4482_v21, %v472_v39  ;;  %v504_v47 = vmul.f32 %v501_v60, %v4443_v26 }
 0x175   :  { %v811_v38 = vpop.permute.xlu1 %810  ;;  %1510 = vperm.xlu0 %3914, %v1478_v44   ;;  %v780_v44 = vmul.f32 %v4390_v50, %v4446_v28  ;;  %v490_v50 = vmul.f32 %v4643_v12, %v4446_v28 }
 0x176   :  { %v817_v37 = vmul.f32 %v811_v38, %v4456_v10  ;;  %476 = vst.msk [vmem:[#allocation2 + $0x56] sm:$0x1f] %vm127_vm1, %v474_v22 }
 0x177   :  { %3903 = vset.pattern.permute.xlu1 %v6708_v45  ;;  %v4885_v33 = vpop.permute.xlu0 %1216  ;;  %v796_v54 = vadd.f32 %v794_v53, %v780_v44  ;;  %v528_v45 = vmul.f32 %v4679_v17, %v4456_v10  ;;  %v837_v44 = vmul.f32 %v4417_v63, %v4446_v28  ;;  %v921_v63 = vmul.f32 %v4551_v3, %v4448_v31 }
 0x178   :  { %v819_v46 = vadd.f32 %v817_v37, %v807_v0  ;;  %1204 = vperm.xlu1 %3903, %v4071_v52   ;;  %v506_v0 = vadd.f32 %v504_v47, %v490_v50 }
 0x179   :  { %3916 = vset.pattern.permute.xlu0 %v6678_v14  ;;  %v808_v15 = vadd.f32 %v806_v34, %v796_v54 }
 0x17a   :  { %v821_v36 = vadd.f32 %v4482_v21, %v819_v46  ;;  %v844_v23 = vpop.permute.xlu1 %843  ;;  %1564 = vperm.xlu0 %3916, %v4775_v32  }
 0x17b   :  { %v4895_v35 = vpop.permute.xlu0 %1220  ;;  %v851_v12 = vmul.f32 %v844_v23, %v4443_v26  ;;  %v863_v23 = vmul.f32 %v4508_v25, %v4448_v31  ;;  %v838_v25 = vmul.f32 %v4431_v16, %v4446_v28 }
 0x17c   :  { %823 = vst.msk [vmem:[#allocation2 + $0x9c] sm:$0xff] %vm125_vm0, %v821_v36  ;;  %1208 = vperm.xlu1 %3903, %v1174_v43  }
 0x17d   :  { %v853_v17 = vadd.f32 %v851_v12, %v837_v44 }
 0x17f   :  { %v815_v40 = vpop.permute.xlu1 %814  ;;  %v4899_v39 = vpop.permute.xlu0 %1254 }
 0x180   :  { %v818_v4 = vmul.f32 %v815_v40, %v4456_v10  ;;  %1235 = vperm.xlu1 %3903, %v4764_v1  }
 0x182   :  { %v820_v22 = vadd.f32 %v818_v4, %v808_v15 }
 0x184   :  { %v822_v18 = vadd.f32 %v4482_v21, %v820_v22  ;;  %1249 = vperm.xlu1 %3903, %v4775_v32   ;;  %v849_v43 = vpop.permute.xlu1 %848  ;;  %v513_v38 = vpop.permute.xlu0 %512 }
 0x185   :  { %v516_v37 = vmul.f32 %v513_v38, %v4448_v31  ;;  %v852_v50 = vmul.f32 %v849_v43, %v4443_v26  ;;  %v865_v38 = vadd.f32 %v863_v23, %v853_v17  ;;  %v864_v43 = vmul.f32 %v4514_v55, %v4448_v31 }
 0x186   :  { %824 = vst.msk [vmem:[#allocation2 + $0xa4] sm:$0x1f] %vm127_vm1, %v822_v18  ;;  %v547_v17 = vmul.f32 %v4675_v57, %v4446_v28 }
 0x187   :  { %v518_v46 = vadd.f32 %v516_v37, %v506_v0 }
 0x188   :  { %1240 = vperm.xlu1 %3903, %v4658_v19   ;;  %v554_v60 = vpop.permute.xlu0 %553 }
 0x189   :  { %v888_v53 = vpop.permute.xlu1 %887  ;;  %v530_v36 = vadd.f32 %v528_v45, %v518_v46 }
 0x18a   :  { %v895_v19 = vmul.f32 %v888_v53, %v4446_v28 }
 0x18b   :  { %v532_v34 = vadd.f32 %v4482_v21, %v530_v36 }
 0x18c   :  { %3906 = vset.pattern.permute.xlu1 %v6682_v5  ;;  %v545_v54 = vpop.permute.xlu0 %544  ;;  %v933_v5 = vmul.f32 %v4561_v13, %v4456_v10  ;;  %v854_v13 = vadd.f32 %v852_v50, %v838_v25  ;;  %v896_v50 = vmul.f32 %v4522_v41, %v4446_v28  ;;  %v620_v41 = vmul.f32 %v4721_v7, %v4443_v26  ;;  %v4072_v7 = vld [vmem:[%s6627_s0 + $0xf] sm:$0xff] }
 0x18d   :  { %1262 = vperm.xlu1 %3906, %v4764_v1   ;;  %v902_v40 = vpop.permute.xlu1 %901  ;;  %534 = vst.msk [vmem:[#allocation2 + $0x63] sm:$0x1f] %vm127_vm1, %v532_v34  ;;  %v4948_v34 = vld [vmem:[%s6627_s0 + $0x17] sm:$0x1f] }
 0x18e   :  { %v909_v15 = vmul.f32 %v902_v40, %v4443_v26  ;;  %v561_v40 = vmul.f32 %v554_v60, %v4443_v26  ;;  %v562_v60 = vmul.f32 %v4687_v6, %v4443_v26 }
 0x190   :  { %v911_v4 = vadd.f32 %v909_v15, %v895_v19  ;;  %v4927_v22 = vpop.permute.xlu0 %1266  ;;  %v563_v23 = vadd.f32 %v561_v40, %v547_v17 }
 0x191   :  { %1274 = vperm.xlu1 %3906, %v4775_v32   ;;  %v869_v47 = vpop.permute.xlu1 %868 }
 0x192   :  { %v923_v18 = vadd.f32 %v921_v63, %v911_v4  ;;  %v875_v0 = vmul.f32 %v869_v47, %v4456_v10  ;;  %v548_v63 = vmul.f32 %v545_v54, %v4446_v28 }
 0x194   :  { %v935_v37 = vadd.f32 %v933_v5, %v923_v18  ;;  %v877_v3 = vadd.f32 %v875_v0, %v865_v38  ;;  %v4933_v46 = vpop.permute.xlu0 %1307  ;;  %v585_v5 = vmul.f32 %v4706_v49, %v4456_v10  ;;  %v564_v38 = vadd.f32 %v562_v60, %v548_v63 }
 0x195   :  { %1293 = vperm.xlu1 %3906, %v4071_v52   ;;  %v907_v45 = vpop.permute.xlu1 %906  ;;  %v866_v52 = vadd.f32 %v864_v43, %v854_v13  ;;  %v586_v49 = vmul.f32 %v4728_v8, %v4456_v10  ;;  %v632_v8 = vmul.f32 %v4738_v11, %v4448_v31  ;;  %v967_v60 = vmul.f32 %v4566_v42, %v4443_v26  ;;  %v6710_v42 = vld [vmem:[#allocation15_spill] sm:$0xff] }
 0x196   :  { %v937_v53 = vadd.f32 %v4482_v21, %v935_v37  ;;  %v879_v12 = vadd.f32 %v4482_v21, %v877_v3  ;;  %v910_v57 = vmul.f32 %v907_v45, %v4443_v26 }
 0x198   :  { %939 = vst.msk [vmem:[#allocation2 + $0xb6] sm:$0xff] %vm125_vm0, %v937_v53  ;;  %881 = vst.msk [vmem:[#allocation2 + $0xa9] sm:$0xff] %vm125_vm0, %v879_v12  ;;  %v4942_v36 = vpop.permute.xlu0 %1298  ;;  %v912_v37 = vadd.f32 %v910_v57, %v896_v50 }
 0x199   :  { %1278 = vperm.xlu1 %3906, %v4620_v56   ;;  %v873_v16 = vpop.permute.xlu1 %872 }
 0x19a   :  { %v876_v44 = vmul.f32 %v873_v16, %v4456_v10 }
 0x19c   :  { %v878_v55 = vadd.f32 %v876_v44, %v866_v52 }
 0x19d   :  { %1312 = vperm.xlu1 %3906, %v4948_v34   ;;  %v567_v19 = vpop.permute.xlu0 %566 }
 0x19e   :  { %v880_v56 = vadd.f32 %v4482_v21, %v878_v55  ;;  %v919_v15 = vpop.permute.xlu1 %918  ;;  %v573_v4 = vmul.f32 %v567_v19, %v4448_v31 }
 0x19f   :  { %v922_v25 = vmul.f32 %v919_v15, %v4448_v31  ;;  %v1362_v15 = vld [vmem:[%s6627_s0 + $0x17] sm:$0x1f] }
 0x1a0   :  { %882 = vst.msk [vmem:[#allocation2 + $0xb1] sm:$0x1f] %vm127_vm1, %v880_v56  ;;  %v575_v47 = vadd.f32 %v573_v4, %v563_v23  ;;  %v644_v56 = vmul.f32 %v4750_v29, %v4456_v10  ;;  %v6709_v29 = vld [vmem:[#allocation13_spill] sm:$0xff] }
 0x1a1   :  { %3908 = vset.pattern.permute.xlu1 %v6686_v20  ;;  %v571_v18 = vpop.permute.xlu0 %570  ;;  %v924_v53 = vadd.f32 %v922_v25, %v912_v37  ;;  %v992_v25 = vmul.f32 %v6710_v42, %v4456_v10 }
 0x1a2   :  { %1351 = vperm.xlu1 %3908, %v4764_v1   ;;  %v946_v54 = vpop.permute.xlu1 %945  ;;  %v587_v0 = vadd.f32 %v585_v5, %v575_v47  ;;  %v574_v6 = vmul.f32 %v571_v18, %v4448_v31  ;;  %v954_v5 = vmul.f32 %v6709_v29, %v4446_v28  ;;  %v6714_v29 = vld [vmem:[#allocation23_spill] sm:$0xff] }
 0x1a3   :  { %v953_v23 = vmul.f32 %v946_v54, %v4446_v28 }
 0x1a4   :  { %v589_v3 = vadd.f32 %v4482_v21, %v587_v0  ;;  %v576_v20 = vadd.f32 %v574_v6, %v564_v38  ;;  %v979_v0 = vmul.f32 %v4612_v24, %v4448_v31  ;;  %v5018_v24 = vld [vmem:[%s6629_s2] ss:$0 sm:$0xff] }
 0x1a5   :  { %v603_v45 = vpop.permute.xlu0 %602  ;;  %v969_v18 = vadd.f32 %v967_v60, %v953_v23 }
 0x1a6   :  { %1365 = vperm.xlu1 %3908, %v4775_v32   ;;  %v931_v13 = vpop.permute.xlu1 %930  ;;  %591 = vst.msk [vmem:[#allocation2 + $0x68] sm:$0xff] %vm125_vm0, %v589_v3  ;;  %v588_v12 = vadd.f32 %v586_v49, %v576_v20  ;;  %v606_v43 = vmul.f32 %v603_v45, %v4446_v28 }
 0x1a7   :  { %v934_v16 = vmul.f32 %v931_v13, %v4456_v10  ;;  %v981_v3 = vadd.f32 %v979_v0, %v969_v18  ;;  %v6715_v18 = vld [vmem:[#allocation9_spill] sm:$0xff] }
 0x1a8   :  { %v590_v52 = vadd.f32 %v4482_v21, %v588_v12  ;;  %v622_v44 = vadd.f32 %v620_v41, %v606_v43  ;;  %v619_v41 = vmul.f32 %v4697_v61, %v4443_v26  ;;  %v6712_v43 = vld [vmem:[#allocation19_spill] sm:$0xff] }
 0x1a9   :  { %v936_v40 = vadd.f32 %v934_v16, %v924_v53  ;;  %v4984_v17 = vpop.permute.xlu0 %1320  ;;  %v6711_v53 = vld [vmem:[#allocation22_spill] sm:$0xff]  ;;  %v605_v16 = vmul.f32 %v6712_v43, %v4446_v28  ;;  %v6719_v43 = vld [vmem:[#allocation16_spill] sm:$0xff] }
 0x1aa   :  { %1332 = vperm.xlu1 %3908, %v4072_v7   ;;  %v965_v55 = vpop.permute.xlu1 %964  ;;  %592 = vst.msk [vmem:[#allocation2 + $0x70] sm:$0x1f] %vm127_vm1, %v590_v52  ;;  %v634_v19 = vadd.f32 %v632_v8, %v622_v44 }
 0x1ab   :  { %v938_v11 = vadd.f32 %v4482_v21, %v936_v40  ;;  %v968_v63 = vmul.f32 %v965_v55, %v4443_v26  ;;  %v621_v52 = vadd.f32 %v619_v41, %v605_v16 }
 0x1ac   :  { %v646_v4 = vadd.f32 %v644_v56, %v634_v19  ;;  %v6713_v19 = vld [vmem:[#allocation14_spill] sm:$0xff] }
 0x1ad   :  { %940 = vst.msk [vmem:[#allocation2 + $0xbe] sm:$0x1f] %vm127_vm1, %v938_v11  ;;  %v5000_v57 = vpop.permute.xlu0 %1324  ;;  %v970_v38 = vadd.f32 %v968_v63, %v954_v5  ;;  %v1011_v11 = vmul.f32 %v6713_v19, %v4446_v28  ;;  %v663_v5 = vmul.f32 %v6714_v29, %v4446_v28  ;;  %v1464_v29 = vld [vmem:[%s6627_s0 + $0x16] sm:$0x1f] }
 0x1ae   :  { %1370 = vperm.xlu1 %3908, %v1362_v15   ;;  %v648_v47 = vadd.f32 %v4482_v21, %v646_v4 }
 0x1af   :  { %v977_v50 = vpop.permute.xlu1 %976 }
 0x1b0   :  { %v980_v54 = vmul.f32 %v977_v50, %v4448_v31  ;;  %650 = vst.msk [vmem:[#allocation2 + $0x7d] sm:$0x1f] %vm127_vm1, %v648_v47 }
 0x1b1   :  { %v5010_v49 = vpop.permute.xlu0 %1356 }
 0x1b2   :  { %v982_v6 = vadd.f32 %v980_v54, %v970_v38  ;;  %1336 = vperm.xlu1 %3908, %v4948_v34   ;;  %v689_v38 = vmul.f32 %v6715_v18, %v4448_v31  ;;  %v6716_v54 = vld [vmem:[#allocation18_spill] sm:$0xff]  ;;  %v6722_v18 = vld [vmem:[#allocation20_spill] sm:$0xff] }
 0x1b3   :  { %v985_v37 = vpop.permute.xlu1 %984  ;;  %v1049_v0 = vmul.f32 %v6716_v54, %v4456_v10  ;;  %v6723_v54 = vld [vmem:[#allocation24_spill] sm:$0xff] }
 0x1b4   :  { %v994_v21 = vadd.f32 %v992_v25, %v982_v6  ;;  %v991_v20 = vmul.f32 %v985_v37, %v4456_v10  ;;  %v6717_v6 = vld [vmem:[#allocation26_spill] sm:$0xff] }
 0x1b5   :  { %v678_v37 = vmul.f32 %v6717_v6, %v4443_v26 }
 0x1b6   :  { %v996_v45 = vadd.f32 %v5018_v24, %v994_v21  ;;  %v993_v13 = vadd.f32 %v991_v20, %v981_v3  ;;  %3910 = vset.pattern.permute.xlu1 %v6694_v48  ;;  %v625_v34 = vpop.permute.xlu0 %624  ;;  %v701_v20 = vmul.f32 %v4796_v30, %v4456_v10 }
 0x1b7   :  { %1382 = vperm.xlu1 %3910, %v6711_v53   ;;  %v1018_v12 = vpop.permute.xlu1 %1017  ;;  %v631_v8 = vmul.f32 %v625_v34, %v4448_v31  ;;  %v6718_v34 = vld [vmem:[#allocation10_spill] sm:$0xff] }
 0x1b8   :  { %998 = vst.msk [vmem:[#allocation2 + $0xcb] sm:$0x1f] %vm127_vm1, %v996_v45  ;;  %v995_v61 = vadd.f32 %v5018_v24, %v993_v13  ;;  %v1025_v55 = vmul.f32 %v1018_v12, %v4443_v26  ;;  %v690_v53 = vmul.f32 %v6718_v34, %v4448_v31 }
 0x1b9   :  { %v633_v40 = vadd.f32 %v631_v8, %v621_v52  ;;  %v702_v52 = vmul.f32 %v4811_v2, %v4456_v10 }
 0x1ba   :  { %997 = vst.msk [vmem:[#allocation2 + $0xc3] sm:$0xff] %vm125_vm0, %v995_v61  ;;  %v637_v44 = vpop.permute.xlu0 %636  ;;  %v1027_v47 = vadd.f32 %v1025_v55, %v1011_v11 }
 0x1bb   :  { %1409 = vperm.xlu1 %3910, %v4764_v1   ;;  %v1009_v48 = vpop.permute.xlu1 %1008  ;;  %v643_v7 = vmul.f32 %v637_v44, %v4456_v10 }
 0x1bc   :  { %v1012_v41 = vmul.f32 %v1009_v48, %v4446_v28 }
 0x1bd   :  { %v645_v56 = vadd.f32 %v643_v7, %v633_v40  ;;  %v6720_v7 = vld [vmem:[#allocation21_spill] sm:$0xff] }
 0x1be   :  { %v670_v23 = vpop.permute.xlu0 %669  ;;  %v1050_v55 = vmul.f32 %v6720_v7, %v4456_v10  ;;  %v6726_v7 = vld [vmem:[#allocation27_spill] sm:$0xff] }
 0x1bf   :  { %1394 = vperm.xlu1 %3910, %v1362_v15   ;;  %v647_v63 = vadd.f32 %v5018_v24, %v645_v56  ;;  %v677_v4 = vmul.f32 %v670_v23, %v4443_v26 }
 0x1c0   :  { %v1031_v60 = vpop.permute.xlu1 %1030 }
 0x1c1   :  { %v1037_v50 = vmul.f32 %v1031_v60, %v4448_v31  ;;  %649 = vst.msk [vmem:[#allocation2 + $0x75] sm:$0xff] %vm125_vm0, %v647_v63  ;;  %v679_v15 = vadd.f32 %v677_v4, %v663_v5  ;;  %v6721_v63 = vld [vmem:[#allocation17_spill] sm:$0xff] }
 0x1c2   :  { %v661_v25 = vpop.permute.xlu0 %660  ;;  %v1069_v4 = vmul.f32 %v6721_v63, %v4446_v28 }
 0x1c3   :  { %v1039_v42 = vadd.f32 %v1037_v50, %v1027_v47  ;;  %1428 = vperm.xlu1 %3910, %v4827_v9   ;;  %v664_v21 = vmul.f32 %v661_v25, %v4446_v28  ;;  %v691_v45 = vadd.f32 %v689_v38, %v679_v15  ;;  %v1026_v9 = vmul.f32 %v6719_v43, %v4443_v26  ;;  %v1522_v43 = vld [vmem:[%s6627_s0 + $0x16] sm:$0x1f]  ;;  %s4119_s0 = smov 12  }
 0x1c4   :  { %v1076_v3 = vpop.permute.xlu1 %1075  ;;  %v1084_v38 = vmul.f32 %v6722_v18, %v4443_v26  ;;  %v1223_v18 = vmul.f32 %v4885_v33, %v4456_v10 }
 0x1c5   :  { %v1051_v13 = vadd.f32 %v1049_v0, %v1039_v42  ;;  %v680_v12 = vadd.f32 %v678_v37, %v664_v21  ;;  %v703_v16 = vadd.f32 %v701_v20, %v691_v45  ;;  %v1028_v44 = vadd.f32 %v1026_v9, %v1012_v41  ;;  %v6724_v21 = vld [vmem:[#allocation25_spill] sm:$0xff] }
 0x1c6   :  { %v1083_v11 = vmul.f32 %v1076_v3, %v4443_v26  ;;  %v1107_v0 = vmul.f32 %v6723_v54, %v4456_v10  ;;  %v1108_v3 = vmul.f32 %v6724_v21, %v4456_v10 }
 0x1c7   :  { %v1053_v61 = vadd.f32 %v5018_v24, %v1051_v13  ;;  %3912 = vset.pattern.permute.xlu1 %v6702_v58  ;;  %v692_v8 = vadd.f32 %v690_v53, %v680_v12  ;;  %v705_v48 = vadd.f32 %v5018_v24, %v703_v16 }
 0x1c8   :  { %1440 = vperm.xlu1 %3912, %v4789_v51   ;;  %v1035_v30 = vpop.permute.xlu1 %1034  ;;  %v1085_v5 = vadd.f32 %v1083_v11, %v1069_v4  ;;  %v6727_v4 = vld [vmem:[#allocation28_spill] sm:$0xff] }
 0x1c9   :  { %1055 = vst.msk [vmem:[#allocation2 + $0xd0] sm:$0xff] %vm125_vm0, %v1053_v61  ;;  %v1038_v40 = vmul.f32 %v1035_v30, %v4448_v31  ;;  %707 = vst.msk [vmem:[#allocation2 + $0x82] sm:$0xff] %vm125_vm0, %v705_v48  ;;  %v704_v58 = vadd.f32 %v702_v52, %v692_v8 }
 0x1cb   :  { %v1040_v56 = vadd.f32 %v1038_v40, %v1028_v44  ;;  %v706_v19 = vadd.f32 %v5018_v24, %v704_v58 }
 0x1cc   :  { %1448 = vperm.xlu1 %3912, %v4775_v32   ;;  %v1067_v51 = vpop.permute.xlu1 %1066 }
 0x1cd   :  { %v1052_v2 = vadd.f32 %v1050_v55, %v1040_v56  ;;  %708 = vst.msk [vmem:[#allocation2 + $0x8a] sm:$0x1f] %vm127_vm1, %v706_v19  ;;  %v1070_v47 = vmul.f32 %v1067_v51, %v4446_v28  ;;  %v1142_v55 = vmul.f32 %v6726_v7, %v4443_v26 }
 0x1cf   :  { %v1054_v23 = vadd.f32 %v5018_v24, %v1052_v2  ;;  %v1086_v25 = vadd.f32 %v1084_v38, %v1070_v47 }
 0x1d0   :  { %1481 = vperm.xlu1 %3912, %v4775_v32  }
 0x1d1   :  { %1056 = vst.msk [vmem:[#allocation2 + $0xd8] sm:$0x1f] %vm127_vm1, %v1054_v23  ;;  %v1089_v60 = vpop.permute.xlu1 %1088 }
 0x1d2   :  { %v1095_v50 = vmul.f32 %v1089_v60, %v4448_v31  ;;  %v1185_v60 = vmul.f32 %v6727_v4, %v4446_v28 }
 0x1d4   :  { %v1097_v15 = vadd.f32 %v1095_v50, %v1085_v5  ;;  %1472 = vperm.xlu1 %3912, %v1464_v29   ;;  %v6728_v50 = vld [vmem:[#allocation30_spill] sm:$0xff] }
 0x1d5   :  { %v1093_v42 = vpop.permute.xlu1 %1092 }
 0x1d6   :  { %v1109_v6 = vadd.f32 %v1107_v0, %v1097_v15  ;;  %v1096_v37 = vmul.f32 %v1093_v42, %v4448_v31 }
 0x1d8   :  { %v1111_v20 = vadd.f32 %v5018_v24, %v1109_v6  ;;  %v1098_v41 = vadd.f32 %v1096_v37, %v1086_v25  ;;  %3913 = vset.pattern.permute.xlu1 %v6707_v62  ;;  %v1224_v25 = vmul.f32 %v4895_v35, %v4456_v10  ;;  %v5136_v35 = vld [vmem:[#allocation2 + $0x10] sm:$0xff] }
 0x1d9   :  { %1494 = vperm.xlu1 %3913, %v4764_v1   ;;  %v1120_v45 = vpop.permute.xlu1 %1119 }
 0x1da   :  { %1113 = vst.msk [vmem:[#allocation2 + $0xdd] sm:$0xff] %vm125_vm0, %v1111_v20  ;;  %v1110_v13 = vadd.f32 %v1108_v3, %v1098_v41  ;;  %v1127_v9 = vmul.f32 %v1120_v45, %v4446_v28  ;;  %v5131_v45 = vld [vmem:[#allocation2] sm:$0xff] }
 0x1dc   :  { %v1112_v34 = vadd.f32 %v5018_v24, %v1110_v13 }
 0x1dd   :  { %1539 = vperm.xlu1 %3913, %v4775_v32   ;;  %v1134_v53 = vpop.permute.xlu1 %1133  ;;  %v6725_v32 = vld [vmem:[#allocation29_spill] sm:$0xff] }
 0x1de   :  { %1114 = vst.msk [vmem:[#allocation2 + $0xe5] sm:$0x1f] %vm127_vm1, %v1112_v34  ;;  %v1141_v62 = vmul.f32 %v1134_v53, %v4443_v26  ;;  %v1165_v30 = vmul.f32 %v6725_v32, %v4456_v10  ;;  %v5134_v53 = vld [vmem:[#allocation2 + $0x8] sm:$0xff]  ;;  %v1716_v32 = vmul.f32 %v5136_v35, %v5136_v35 }
 0x1df   :  { %v1623_v7 = vsel %vm125_vm0, %v5134_v53, 0.0 }
 0x1e0   :  { %v1143_v61 = vadd.f32 %v1141_v62, %v1127_v9  ;;  %v1714_v62 = vmul.f32 %v5131_v45, %v5131_v45  ;;  %v5142_v9 = vld [vmem:[#allocation2 + $0x18] sm:$0xff] }
 0x1e1   :  { %1498 = vperm.xlu1 %3913, %v1464_v29   ;;  %v1125_v12 = vpop.permute.xlu1 %1124 }
 0x1e2   :  { %v1128_v48 = vmul.f32 %v1125_v12, %v4446_v28 }
 0x1e4   :  { %v1144_v51 = vadd.f32 %v1142_v55, %v1128_v48  ;;  %v1757_v55 = vsel %vm125_vm0, %v1714_v62, 0.0  ;;  %v5196_v62 = vld [vmem:[#allocation2 + $0x48] sm:$0xff] }
 0x1e5   :  { %1530 = vperm.xlu1 %3913, %v1522_v43  }
 0x1e6   :  { %v1147_v16 = vpop.permute.xlu1 %1146 }
 0x1e7   :  { %v1153_v8 = vmul.f32 %v1147_v16, %v4448_v31 }
 0x1e9   :  { %v1155_v52 = vadd.f32 %v1153_v8, %v1143_v61  ;;  %3915 = vset.pattern.permute.xlu1 %v6678_v14  ;;  %v1166_v14 = vmul.f32 %v4844_v59, %v4456_v10  ;;  %v1622_v61 = vsel %vm125_vm0, %v5131_v45, 0.0  ;;  %v1715_v8 = vmul.f32 %v5134_v53, %v5134_v53 }
 0x1ea   :  { %1552 = vperm.xlu1 %3915, %v4764_v1   ;;  %v1192_v44 = vpop.permute.xlu1 %1191 }
 0x1eb   :  { %v1167_v40 = vadd.f32 %v1165_v30, %v1155_v52  ;;  %v1199_v23 = vmul.f32 %v1192_v44, %v4443_v26  ;;  %v5150_v52 = vld [vmem:[#allocation2 + $0x20] sm:$0xff] }
 0x1ed   :  { %v1169_v58 = vadd.f32 %v5018_v24, %v1167_v40  ;;  %v1201_v5 = vadd.f32 %v1199_v23, %v1185_v60  ;;  %v1718_v23 = vmul.f32 %v5150_v52, %v5150_v52 }
 0x1ee   :  { %1556 = vperm.xlu1 %3915, %v1522_v43   ;;  %v1151_v56 = vpop.permute.xlu1 %1150 }
 0x1ef   :  { %1171 = vst.msk [vmem:[#allocation2 + $0xea] sm:$0xff] %vm125_vm0, %v1169_v58  ;;  %v1154_v19 = vmul.f32 %v1151_v56, %v4448_v31  ;;  %v1625_v58 = vsel %vm125_vm0, %v5136_v35, 0.0  ;;  %v1717_v56 = vmul.f32 %v5142_v9, %v5142_v9 }
 0x1f1   :  { %v1156_v1 = vadd.f32 %v1154_v19, %v1144_v51  ;;  %v1624_v51 = vadd.f32 %v1623_v7, %v1622_v61  ;;  %v1258_v19 = vmul.f32 %v4899_v39, %v4443_v26  ;;  %v1629_v39 = vsel %vm125_vm0, %v5150_v52, 0.0 }
 0x1f2   :  { %1568 = vperm.xlu1 %3915, %v4865_v27   ;;  %v1183_v2 = vpop.permute.xlu1 %1182  ;;  %v1200_v27 = vmul.f32 %v6728_v50, %v4443_v26 }
 0x1f3   :  { %v1168_v11 = vadd.f32 %v1166_v14, %v1156_v1  ;;  %v1186_v47 = vmul.f32 %v1183_v2, %v4446_v28  ;;  %v1758_v1 = vsel %vm125_vm0, %v1715_v8, 0.0  ;;  %v1760_v2 = vsel %vm125_vm0, %v1716_v32, 0.0 }
 0x1f4   :  { %v1759_v4 = vadd.f32 %v1758_v1, %v1757_v55  ;;  %v1626_v60 = vadd.f32 %v1625_v58, %v1624_v51  ;;  %v1723_v58 = vmul.f32 %v5196_v62, %v5196_v62 }
 0x1f5   :  { %v1170_v63 = vadd.f32 %v5018_v24, %v1168_v11  ;;  %v1202_v0 = vadd.f32 %v1200_v27, %v1186_v47  ;;  %v1627_v11 = vsel %vm125_vm0, %v5142_v9, 0.0  ;;  %v1762_v47 = vsel %vm125_vm0, %v1717_v56, 0.0  ;;  %v5173_v27 = vld [vmem:[#allocation2 + $0x28] sm:$0xff] }
 0x1f6   :  { %v1628_v50 = vadd.f32 %v1627_v11, %v1626_v60  ;;  %v1639_v11 = vsel %vm125_vm0, %v5196_v62, 0.0 }
 0x1f7   :  { %1172 = vst.msk [vmem:[#allocation2 + $0xf2] sm:$0x1f] %vm127_vm1, %v1170_v63  ;;  %v1205_v29 = vpop.permute.xlu1 %1204 }
 0x1f8   :  { %v1211_v59 = vmul.f32 %v1205_v29, %v4448_v31 }
 0x1fa   :  { %v1213_v38 = vadd.f32 %v1211_v59, %v1201_v5  ;;  %v1761_v59 = vadd.f32 %v1760_v2, %v1759_v4 }
 0x1fb   :  { %v1209_v54 = vpop.permute.xlu1 %1208 }
 0x1fc   :  { %v1225_v15 = vadd.f32 %v1223_v18, %v1213_v38  ;;  %v1212_v42 = vmul.f32 %v1209_v54, %v4448_v31  ;;  %v5175_v18 = vld [vmem:[#allocation2 + $0x30] sm:$0xff]  ;;  %v1270_v38 = vmul.f32 %v4927_v22, %v4448_v31  ;;  %v1764_v54 = vsel %vm125_vm0, %v1718_v23, 0.0  ;;  %v5188_v22 = vld [vmem:[#allocation2 + $0x40] sm:$0xff] }
 0x1fd   :  { %v1637_v55 = vsel %vm125_vm0, %v5188_v22, 0.0 }
 0x1fe   :  { %v1227_v6 = vadd.f32 %v5018_v24, %v1225_v15  ;;  %v1214_v37 = vadd.f32 %v1212_v42, %v1202_v0  ;;  %v1763_v15 = vadd.f32 %v1762_v47, %v1761_v59  ;;  %v1630_v42 = vadd.f32 %v1629_v39, %v1628_v50  ;;  %v5224_v39 = vld [vmem:[#allocation2 + $0x60] sm:$0xff] }
 0x1ff   :  { %v1236_v21 = vpop.permute.xlu1 %1235  ;;  %v1774_v47 = vsel %vm125_vm0, %v1723_v58, 0.0  ;;  %v1315_v59 = vmul.f32 %v4933_v46, %v4443_v26  ;;  %v1726_v46 = vmul.f32 %v5224_v39, %v5224_v39 }
 0x200   :  { %1229 = vst.msk [vmem:[#allocation2 + $0xf7] sm:$0xff] %vm125_vm0, %v1227_v6  ;;  %v1226_v3 = vadd.f32 %v1224_v25, %v1214_v37  ;;  %v1243_v12 = vmul.f32 %v1236_v21, %v4446_v28  ;;  %v5181_v25 = vld [vmem:[#allocation2 + $0x38] sm:$0xff]  ;;  %v1719_v21 = vmul.f32 %v5173_v27, %v5173_v27 }
 0x201   :  { %v1635_v32 = vsel %vm125_vm0, %v5181_v25, 0.0 }
 0x202   :  { %v1228_v20 = vadd.f32 %v5018_v24, %v1226_v3  ;;  %v1720_v3 = vmul.f32 %v5175_v18, %v5175_v18  ;;  %v1766_v61 = vsel %vm125_vm0, %v1719_v21, 0.0 }
 0x203   :  { %v1250_v41 = vpop.permute.xlu1 %1249 }
 0x204   :  { %1230 = vst.msk [vmem:[#allocation2 + $0xff] sm:$0x1f] %vm127_vm1, %v1228_v20  ;;  %v1257_v13 = vmul.f32 %v1250_v41, %v4443_v26  ;;  %v1765_v20 = vadd.f32 %v1764_v54, %v1763_v15  ;;  %v1768_v8 = vsel %vm125_vm0, %v1720_v3, 0.0 }
 0x206   :  { %v1259_v16 = vadd.f32 %v1257_v13, %v1243_v12  ;;  %v1633_v13 = vsel %vm125_vm0, %v5175_v18, 0.0 }
 0x207   :  { %v1241_v33 = vpop.permute.xlu1 %1240 }
 0x208   :  { %v1244_v44 = vmul.f32 %v1241_v33, %v4446_v28  ;;  %v1631_v33 = vsel %vm125_vm0, %v5173_v27, 0.0 }
 0x20a   :  { %v1260_v29 = vadd.f32 %v1258_v19, %v1244_v44  ;;  %v5205_v44 = vld [vmem:[#allocation2 + $0x50] sm:$0xff] }
 0x20b   :  { %v1724_v19 = vmul.f32 %v5205_v44, %v5205_v44 }
 0x20c   :  { %v1263_v34 = vpop.permute.xlu1 %1262  ;;  %v1272_v6 = vadd.f32 %v1270_v38, %v1260_v29  ;;  %v5219_v29 = vld [vmem:[#allocation2 + $0x58] sm:$0xff] }
 0x20d   :  { %v1269_v43 = vmul.f32 %v1263_v34, %v4448_v31  ;;  %v1721_v34 = vmul.f32 %v5181_v25, %v5181_v25  ;;  %v1776_v54 = vsel %vm125_vm0, %v1724_v19, 0.0  ;;  %v1725_v3 = vmul.f32 %v5219_v29, %v5219_v29 }
 0x20f   :  { %v1271_v48 = vadd.f32 %v1269_v43, %v1259_v16  ;;  %v1632_v43 = vadd.f32 %v1631_v33, %v1630_v42  ;;  %v1770_v7 = vsel %vm125_vm0, %v1721_v34, 0.0  ;;  %v1327_v33 = vmul.f32 %v4984_v17, %v4448_v31 }
 0x210   :  { %v1275_v30 = vpop.permute.xlu1 %1274  ;;  %v1778_v58 = vsel %vm125_vm0, %v1725_v3, 0.0 }
 0x211   :  { %v1281_v40 = vmul.f32 %v1275_v30, %v4456_v10  ;;  %v1722_v30 = vmul.f32 %v5188_v22, %v5188_v22 }
 0x213   :  { %v1283_v14 = vadd.f32 %v1281_v40, %v1271_v48  ;;  %v1767_v48 = vadd.f32 %v1766_v61, %v1765_v20  ;;  %v1634_v40 = vadd.f32 %v1633_v13, %v1632_v43  ;;  %v1772_v2 = vsel %vm125_vm0, %v1722_v30, 0.0 }
 0x214   :  { %v1294_v63 = vpop.permute.xlu1 %1293  ;;  %v1643_v43 = vsel %vm125_vm0, %v5219_v29, 0.0  ;;  %v1645_v61 = vsel %vm125_vm0, %v5224_v39, 0.0 }
 0x215   :  { %v1285_v5 = vadd.f32 %v5018_v24, %v1283_v14  ;;  %v1636_v56 = vadd.f32 %v1635_v32, %v1634_v40  ;;  %v1769_v51 = vadd.f32 %v1768_v8, %v1767_v48  ;;  %v1379_v14 = vpop.permute.xlu0 %1378  ;;  %v1301_v23 = vmul.f32 %v1294_v63, %v4446_v28  ;;  %v5229_v63 = vld [vmem:[#allocation2 + $0x68] sm:$0xff]  ;;  %v5247_v32 = vld [vmem:[#allocation2 + $0x70] sm:$0xff] }
 0x216   :  { %v1385_v42 = vmul.f32 %v1379_v14, %v4448_v31  ;;  %v1727_v8 = vmul.f32 %v5229_v63, %v5229_v63  ;;  %v1647_v19 = vsel %vm125_vm0, %v5229_v63, 0.0  ;;  %v1728_v14 = vmul.f32 %v5247_v32, %v5247_v32 }
 0x217   :  { %1287 = vst.msk [vmem:[#allocation2 + $0x104] sm:$0xff] %vm125_vm0, %v1285_v5  ;;  %v1771_v4 = vadd.f32 %v1770_v7, %v1769_v51  ;;  %v1638_v60 = vadd.f32 %v1637_v55, %v1636_v56  ;;  %v1641_v5 = vsel %vm125_vm0, %v5205_v44, 0.0  ;;  %v1317_v15 = vadd.f32 %v1315_v59, %v1301_v23 }
 0x218   :  { %v1279_v0 = vpop.permute.xlu1 %1278  ;;  %v1302_v56 = vmul.f32 %v4942_v36, %v4446_v28  ;;  %v1780_v51 = vsel %vm125_vm0, %v1726_v46, 0.0  ;;  %v1782_v23 = vsel %vm125_vm0, %v1727_v8, 0.0 }
 0x219   :  { %v1282_v37 = vmul.f32 %v1279_v0, %v4456_v10  ;;  %v1773_v50 = vadd.f32 %v1772_v2, %v1771_v4  ;;  %v1640_v38 = vadd.f32 %v1639_v11, %v1638_v60  ;;  %v1329_v17 = vadd.f32 %v1327_v33, %v1317_v15 }
 0x21a   :  { %v1649_v60 = vsel %vm125_vm0, %v5247_v32, 0.0  ;;  %v1328_v15 = vmul.f32 %v5000_v57, %v4448_v31 }
 0x21b   :  { %v1284_v41 = vadd.f32 %v1282_v37, %v1272_v6  ;;  %v1642_v21 = vadd.f32 %v1641_v5, %v1640_v38  ;;  %v1775_v20 = vadd.f32 %v1774_v47, %v1773_v50 }
 0x21c   :  { %v1313_v12 = vpop.permute.xlu1 %1312 }
 0x21d   :  { %v1286_v16 = vadd.f32 %v5018_v24, %v1284_v41  ;;  %v1391_v41 = vpop.permute.xlu0 %1390  ;;  %v1316_v48 = vmul.f32 %v1313_v12, %v4443_v26  ;;  %v1644_v55 = vadd.f32 %v1643_v43, %v1642_v21  ;;  %v5275_v21 = vld [vmem:[#allocation2 + $0x88] sm:$0xff] }
 0x21e   :  { %v1397_v13 = vmul.f32 %v1391_v41, %v4456_v10  ;;  %v1731_v43 = vmul.f32 %v5275_v21, %v5275_v21 }
 0x21f   :  { %1288 = vst.msk [vmem:[#allocation2 + $0x10c] sm:$0x1f] %vm127_vm1, %v1286_v16  ;;  %v1777_v16 = vadd.f32 %v1776_v54, %v1775_v20  ;;  %v1646_v11 = vadd.f32 %v1645_v61, %v1644_v55  ;;  %v1318_v5 = vadd.f32 %v1316_v48, %v1302_v56  ;;  %v5266_v54 = vld [vmem:[#allocation2 + $0x78] sm:$0xff]  ;;  %v5295_v55 = vld [vmem:[#allocation2 + $0x90] sm:$0xff] }
 0x220   :  { %v1729_v20 = vmul.f32 %v5266_v54, %v5266_v54 }
 0x221   :  { %v1352_v1 = vpop.permute.xlu1 %1351  ;;  %v1779_v2 = vadd.f32 %v1778_v58, %v1777_v16  ;;  %v5263_v47 = vpop.permute.xlu0 %1423  ;;  %v1648_v50 = vadd.f32 %v1647_v19, %v1646_v11  ;;  %v1330_v41 = vadd.f32 %v1328_v15, %v1318_v5 }
 0x222   :  { %v1359_v6 = vmul.f32 %v1352_v1, %v4446_v28 }
 0x223   :  { %v1781_v38 = vadd.f32 %v1780_v51, %v1779_v2  ;;  %v1790_v51 = vsel %vm125_vm0, %v1731_v43, 0.0  ;;  %v1732_v2 = vmul.f32 %v5295_v55, %v5295_v55 }
 0x225   :  { %v1366_v0 = vpop.permute.xlu1 %1365  ;;  %v5288_v16 = vpop.permute.xlu0 %1414 }
 0x226   :  { %v1373_v37 = vmul.f32 %v1366_v0, %v4443_v26  ;;  %v5268_v0 = vld [vmem:[#allocation2 + $0x80] sm:$0xff] }
 0x227   :  { %v1730_v46 = vmul.f32 %v5268_v0, %v5268_v0 }
 0x228   :  { %v1375_v34 = vadd.f32 %v1373_v37, %v1359_v6  ;;  %v1783_v6 = vadd.f32 %v1782_v23, %v1781_v38  ;;  %v1650_v37 = vadd.f32 %v1649_v60, %v1648_v50  ;;  %v6668_v23 = vmov 0.0  }
 0x229   :  { %v1333_v30 = vpop.permute.xlu1 %1332  ;;  %v1788_v48 = vsel %vm125_vm0, %v1730_v46, 0.0  ;;  %v1437_v19 = vpop.permute.xlu0 %1436  ;;  %2043 = vst.msk [vmem:[#allocation3] sm:$0xff] %vm125_vm0, %v6668_v23  ;;  %2044 = vst.msk [vmem:[#allocation3 + $0x8] sm:$0xff] %vm125_vm0, %v6668_v23  ;;  %v1360_v60 = vmul.f32 %v5010_v49, %v4446_v28 }
 0x22a   :  { %v1387_v40 = vadd.f32 %v1385_v42, %v1375_v34  ;;  %v1339_v7 = vmul.f32 %v1333_v30, %v4456_v10  ;;  %v1784_v42 = vsel %vm125_vm0, %v1728_v14, 0.0  ;;  %v1653_v34 = vsel %vm125_vm0, %v5268_v0, 0.0  ;;  %2045 = vst.msk [vmem:[#allocation3 + $0x10] sm:$0xff] %vm125_vm0, %v6668_v23  ;;  %2046 = vst.msk [vmem:[#allocation3 + $0x18] sm:$0xff] %vm125_vm0, %v6668_v23 }
 0x22b   :  { %v1785_v33 = vadd.f32 %v1784_v42, %v1783_v6  ;;  %v1786_v30 = vsel %vm125_vm0, %v1729_v20, 0.0  ;;  %2047 = vst.msk [vmem:[#allocation3 + $0x20] sm:$0xff] %vm125_vm0, %v6668_v23  ;;  %2048 = vst.msk [vmem:[#allocation3 + $0x28] sm:$0xff] %vm125_vm0, %v6668_v23  ;;  %v1792_v42 = vsel %vm125_vm0, %v1732_v2, 0.0  ;;  %v5371_v2 = vld [vmem:[#allocation2 + $0xb0] sm:$0xff] }
 0x22c   :  { %v1399_v1 = vadd.f32 %v1397_v13, %v1387_v40  ;;  %v1341_v12 = vadd.f32 %v1339_v7, %v1329_v17  ;;  %v1651_v13 = vsel %vm125_vm0, %v5266_v54, 0.0  ;;  %v1655_v40 = vsel %vm125_vm0, %v5275_v21, 0.0  ;;  %2049 = vst.msk [vmem:[#allocation3 + $0x30] sm:$0xff] %vm125_vm0, %v6668_v23  ;;  %2050 = vst.msk [vmem:[#allocation3 + $0x38] sm:$0xff] %vm125_vm0, %v6668_v23 }
 0x22d   :  { %v1371_v4 = vpop.permute.xlu1 %1370  ;;  %v1652_v8 = vadd.f32 %v1651_v13, %v1650_v37  ;;  %v1787_v58 = vadd.f32 %v1786_v30, %v1785_v33  ;;  %2051 = vst.msk [vmem:[#allocation3 + $0x40] sm:$0xff] %vm125_vm0, %v6668_v23  ;;  %2052 = vst.msk [vmem:[#allocation3 + $0x48] sm:$0xff] %vm125_vm0, %v6668_v23  ;;  %v5341_v50 = vpop.permute.xlu0 %1467 }
 0x22e   :  { %v1401_v36 = vadd.f32 %v5018_v24, %v1399_v1  ;;  %v1343_v59 = vadd.f32 %v5018_v24, %v1341_v12  ;;  %v1374_v12 = vmul.f32 %v1371_v4, %v4443_v26  ;;  %2053 = vst.msk [vmem:[#allocation3 + $0x50] sm:$0xff] %vm125_vm0, %v6668_v23  ;;  %2054 = vst.msk [vmem:[#allocation3 + $0x58] sm:$0xff] %vm125_vm0, %v6668_v23  ;;  %v5334_v4 = vld [vmem:[#allocation2 + $0x98] sm:$0xff] }
 0x22f   :  { %v1654_v56 = vadd.f32 %v1653_v34, %v1652_v8  ;;  %v1789_v14 = vadd.f32 %v1788_v48, %v1787_v58  ;;  %2055 = vst.msk [vmem:[#allocation3 + $0x60] sm:$0xff] %vm125_vm0, %v6668_v23  ;;  %2056 = vst.msk [vmem:[#allocation3 + $0x68] sm:$0xff] %vm125_vm0, %v6668_v23  ;;  %v1733_v6 = vmul.f32 %v5334_v4, %v5334_v4  ;;  %v5354_v8 = vld [vmem:[#allocation2 + $0xa8] sm:$0xff] }
 0x230   :  { %1403 = vst.msk [vmem:[#allocation2 + $0x11e] sm:$0xff] %vm125_vm0, %v1401_v36  ;;  %1345 = vst.msk [vmem:[#allocation2 + $0x111] sm:$0xff] %vm125_vm0, %v1343_v59  ;;  %v1657_v59 = vsel %vm125_vm0, %v5295_v55, 0.0  ;;  %v1376_v15 = vadd.f32 %v1374_v12, %v1360_v60  ;;  %v1663_v12 = vsel %vm125_vm0, %v5354_v8, 0.0  ;;  %v1443_v60 = vmul.f32 %v1437_v19, %v4448_v31 }
 0x231   :  { %v1337_v3 = vpop.permute.xlu1 %1336  ;;  %v1656_v1 = vadd.f32 %v1655_v40, %v1654_v56  ;;  %2057 = vst.msk [vmem:[#allocation3 + $0x70] sm:$0xff] %vm125_vm0, %v6668_v23  ;;  %2058 = vst.msk [vmem:[#allocation3 + $0x78] sm:$0xff] %vm125_vm0, %v6668_v23  ;;  %v1791_v5 = vadd.f32 %v1790_v51, %v1789_v14  ;;  %v1794_v13 = vsel %vm125_vm0, %v1733_v6, 0.0  ;;  %v1735_v51 = vmul.f32 %v5354_v8, %v5354_v8 }
 0x232   :  { %v1340_v57 = vmul.f32 %v1337_v3, %v4456_v10  ;;  %v5346_v3 = vld [vmem:[#allocation2 + $0xa0] sm:$0xff]  ;;  %v1431_v14 = vmul.f32 %v5263_v47, %v4443_v26  ;;  %v1665_v19 = vsel %vm125_vm0, %v5371_v2, 0.0 }
 0x233   :  { %v1658_v38 = vadd.f32 %v1657_v59, %v1656_v1  ;;  %v1793_v20 = vadd.f32 %v1792_v42, %v1791_v5  ;;  %v1734_v34 = vmul.f32 %v5346_v3, %v5346_v3  ;;  %v1661_v40 = vsel %vm125_vm0, %v5346_v3, 0.0 }
 0x234   :  { %v1342_v61 = vadd.f32 %v1340_v57, %v1330_v41  ;;  %v1659_v41 = vsel %vm125_vm0, %v5334_v4, 0.0  ;;  %v1418_v1 = vmul.f32 %v5288_v16, %v4446_v28  ;;  %v1798_v6 = vsel %vm125_vm0, %v1735_v51, 0.0 }
 0x235   :  { %v1660_v57 = vadd.f32 %v1659_v41, %v1658_v38  ;;  %v1795_v30 = vadd.f32 %v1794_v13, %v1793_v20  ;;  %v1796_v56 = vsel %vm125_vm0, %v1734_v34, 0.0  ;;  %v1736_v16 = vmul.f32 %v5371_v2, %v5371_v2  ;;  %v5379_v20 = vld [vmem:[#allocation2 + $0xb8] sm:$0xff] }
 0x236   :  { %v1344_v17 = vadd.f32 %v5018_v24, %v1342_v61  ;;  %v1383_v7 = vpop.permute.xlu1 %1382  ;;  %v1453_v61 = vpop.permute.xlu0 %1452 }
 0x237   :  { %v1386_v36 = vmul.f32 %v1383_v7, %v4448_v31  ;;  %v1662_v58 = vadd.f32 %v1661_v40, %v1660_v57  ;;  %v1800_v34 = vsel %vm125_vm0, %v1736_v16, 0.0  ;;  %v5390_v40 = vld [vmem:[#allocation2 + $0xc0] sm:$0xff] }
 0x238   :  { %1346 = vst.msk [vmem:[#allocation2 + $0x119] sm:$0x1f] %vm127_vm1, %v1344_v17 }
 0x239   :  { %v1388_v49 = vadd.f32 %v1386_v36, %v1376_v15  ;;  %v1456_v15 = vmul.f32 %v1453_v61, %v4456_v10  ;;  %v1664_v47 = vadd.f32 %v1663_v12, %v1662_v58  ;;  %v1667_v58 = vsel %vm125_vm0, %v5379_v20, 0.0  ;;  %v5400_v12 = vld [vmem:[#allocation2 + $0xc8] sm:$0xff] }
 0x23a   :  { %v1410_v11 = vpop.permute.xlu1 %1409  ;;  %v1487_v42 = vpop.permute.xlu0 %1486 }
 0x23b   :  { %v1417_v17 = vmul.f32 %v1410_v11, %v4446_v28  ;;  %v1797_v11 = vadd.f32 %v1796_v56, %v1795_v30  ;;  %v1666_v13 = vadd.f32 %v1665_v19, %v1664_v47 }
 0x23d   :  { %v1433_v36 = vadd.f32 %v1431_v14, %v1417_v17  ;;  %v1668_v51 = vadd.f32 %v1667_v58, %v1666_v13 }
 0x23e   :  { %v1395_v37 = vpop.permute.xlu1 %1394 }
 0x23f   :  { %v1398_v46 = vmul.f32 %v1395_v37, %v4456_v10  ;;  %v1445_v41 = vadd.f32 %v1443_v60, %v1433_v36 }
 0x241   :  { %v1400_v33 = vadd.f32 %v1398_v46, %v1388_v49  ;;  %v1799_v49 = vadd.f32 %v1798_v6, %v1797_v11  ;;  %v5408_v6 = vld [vmem:[#allocation2 + $0xd0] sm:$0xff] }
 0x242   :  { %v1429_v43 = vpop.permute.xlu1 %1428 }
 0x243   :  { %v1402_v48 = vadd.f32 %v5018_v24, %v1400_v33  ;;  %v1432_v7 = vmul.f32 %v1429_v43, %v4443_v26  ;;  %v1737_v43 = vmul.f32 %v5379_v20, %v5379_v20  ;;  %v1801_v17 = vadd.f32 %v1800_v34, %v1799_v49 }
 0x244   :  { %v1671_v49 = vsel %vm125_vm0, %v5400_v12, 0.0  ;;  %v1740_v34 = vmul.f32 %v5408_v6, %v5408_v6 }
 0x245   :  { %1404 = vst.msk [vmem:[#allocation2 + $0x126] sm:$0x1f] %vm127_vm1, %v1402_v48  ;;  %v1434_v59 = vadd.f32 %v1432_v7, %v1418_v1  ;;  %v5388_v48 = vpop.permute.xlu0 %1525  ;;  %v1802_v14 = vsel %vm125_vm0, %v1737_v43, 0.0  ;;  %v1738_v1 = vmul.f32 %v5390_v40, %v5390_v40 }
 0x246   :  { %v1803_v11 = vadd.f32 %v1802_v14, %v1801_v17  ;;  %v1673_v17 = vsel %vm125_vm0, %v5408_v6, 0.0  ;;  %v1808_v14 = vsel %vm125_vm0, %v1740_v34, 0.0 }
 0x247   :  { %v1441_v5 = vpop.permute.xlu1 %1440  ;;  %v1804_v47 = vsel %vm125_vm0, %v1738_v1, 0.0 }
 0x248   :  { %v1444_v38 = vmul.f32 %v1441_v5, %v4448_v31  ;;  %v1669_v5 = vsel %vm125_vm0, %v5390_v40, 0.0  ;;  %v1805_v16 = vadd.f32 %v1804_v47, %v1803_v11  ;;  %v5429_v11 = vld [vmem:[#allocation2 + $0xe0] sm:$0xff] }
 0x249   :  { %v1507_v36 = vpop.permute.xlu0 %1506 }
 0x24a   :  { %v1446_v37 = vadd.f32 %v1444_v38, %v1434_v59  ;;  %v1670_v59 = vadd.f32 %v1669_v5, %v1668_v51 }
 0x24b   :  { %v1449_v46 = vpop.permute.xlu1 %1448 }
 0x24c   :  { %v1458_v57 = vadd.f32 %v1456_v15, %v1446_v37  ;;  %v1455_v33 = vmul.f32 %v1449_v46, %v4456_v10  ;;  %v1739_v15 = vmul.f32 %v5400_v12, %v5400_v12  ;;  %v1475_v37 = vmul.f32 %v5341_v50, %v4446_v28 }
 0x24d   :  { %v1672_v19 = vadd.f32 %v1671_v49, %v1670_v59  ;;  %v5419_v43 = vpop.permute.xlu0 %1544  ;;  %v1490_v59 = vmul.f32 %v1487_v42, %v4443_v26  ;;  %v5439_v49 = vld [vmem:[#allocation2 + $0xf0] sm:$0xff] }
 0x24e   :  { %v1460_v61 = vadd.f32 %v5018_v24, %v1458_v57  ;;  %v1457_v30 = vadd.f32 %v1455_v33, %v1445_v41  ;;  %v1513_v57 = vmul.f32 %v1507_v36, %v4456_v10  ;;  %v1806_v13 = vsel %vm125_vm0, %v1739_v15, 0.0  ;;  %v5431_v36 = vld [vmem:[#allocation2 + $0xe8] sm:$0xff] }
 0x24f   :  { %v1482_v7 = vpop.permute.xlu1 %1481  ;;  %v1807_v50 = vadd.f32 %v1806_v13, %v1805_v16  ;;  %v1674_v58 = vadd.f32 %v1673_v17, %v1672_v19  ;;  %v1744_v17 = vmul.f32 %v5439_v49, %v5439_v49 }
 0x250   :  { %1462 = vst.msk [vmem:[#allocation2 + $0x133] sm:$0x1f] %vm127_vm1, %v1460_v61  ;;  %v1459_v56 = vadd.f32 %v5018_v24, %v1457_v30  ;;  %v1489_v38 = vmul.f32 %v1482_v7, %v4443_v26  ;;  %v5421_v61 = vld [vmem:[#allocation2 + $0xd8] sm:$0xff] }
 0x251   :  { %v1741_v1 = vmul.f32 %v5421_v61, %v5421_v61  ;;  %v1809_v5 = vadd.f32 %v1808_v14, %v1807_v50  ;;  %v1675_v15 = vsel %vm125_vm0, %v5421_v61, 0.0  ;;  %v1511_v47 = vpop.permute.xlu0 %1510  ;;  %v1677_v50 = vsel %vm125_vm0, %v5429_v11, 0.0 }
 0x252   :  { %1461 = vst.msk [vmem:[#allocation2 + $0x12b] sm:$0xff] %vm125_vm0, %v1459_v56  ;;  %v1491_v41 = vadd.f32 %v1489_v38, %v1475_v37  ;;  %v1676_v16 = vadd.f32 %v1675_v15, %v1674_v58  ;;  %v1742_v37 = vmul.f32 %v5429_v11, %v5429_v11  ;;  %v1514_v13 = vmul.f32 %v1511_v47, %v4456_v10 }
 0x253   :  { %v1473_v60 = vpop.permute.xlu1 %1472  ;;  %v1810_v42 = vsel %vm125_vm0, %v1741_v1, 0.0  ;;  %v5458_v1 = vld [vmem:[#allocation2 + $0x100] sm:$0xff]  ;;  %v1533_v15 = vmul.f32 %v5388_v48, %v4446_v28 }
 0x254   :  { %v1476_v56 = vmul.f32 %v1473_v60, %v4446_v28  ;;  %6729 = vst [vmem:[#allocation13_spill] sm:$0xff] %v5458_v1 }
 0x258   :  { %v1495_v46 = vpop.permute.xlu1 %1494 }
 0x259   :  { %v1501_v33 = vmul.f32 %v1495_v46, %v4448_v31  ;;  %v1492_v46 = vadd.f32 %v1490_v59, %v1476_v56  ;;  %v1678_v56 = vadd.f32 %v1677_v50, %v1676_v16 }
 0x25b   :  { %v1503_v30 = vadd.f32 %v1501_v33, %v1491_v41  ;;  %v1743_v41 = vmul.f32 %v5431_v36, %v5431_v36  ;;  %v1811_v33 = vadd.f32 %v1810_v42, %v1809_v5 }
 0x25c   :  { %v1540_v7 = vpop.permute.xlu1 %1539 }
 0x25d   :  { %v1515_v51 = vadd.f32 %v1513_v57, %v1503_v30  ;;  %v5446_v57 = vld [vmem:[#allocation2 + $0xf8] sm:$0xff]  ;;  %v1679_v30 = vsel %vm125_vm0, %v5431_v36, 0.0  ;;  %v1814_v59 = vsel %vm125_vm0, %v1743_v41, 0.0  ;;  %v1547_v47 = vmul.f32 %v1540_v7, %v4443_v26 }
 0x25e   :  { %v1745_v14 = vmul.f32 %v5446_v57, %v5446_v57  ;;  %v1683_v42 = vsel %vm125_vm0, %v5446_v57, 0.0  ;;  %v1746_v41 = vmul.f32 %v5458_v1, %v5458_v1 }
 0x25f   :  { %v1517_v38 = vadd.f32 %v5018_v24, %v1515_v51  ;;  %v1812_v51 = vsel %vm125_vm0, %v1742_v37, 0.0  ;;  %v5466_v37 = vld [vmem:[#allocation2 + $0x108] sm:$0xff] }
 0x260   :  { %v1499_v60 = vpop.permute.xlu1 %1498  ;;  %v1813_v16 = vadd.f32 %v1812_v51, %v1811_v33  ;;  %v1818_v7 = vsel %vm125_vm0, %v1745_v14, 0.0  ;;  %v5483_v51 = vld [vmem:[#allocation2 + $0x118] sm:$0xff] }
 0x261   :  { %1519 = vst.msk [vmem:[#allocation2 + $0x138] sm:$0xff] %vm125_vm0, %v1517_v38  ;;  %v1502_v19 = vmul.f32 %v1499_v60, %v4448_v31  ;;  %v1681_v38 = vsel %vm125_vm0, %v5439_v49, 0.0  ;;  %v1565_v60 = vpop.permute.xlu0 %1564 }
 0x262   :  { %v1815_v48 = vadd.f32 %v1814_v59, %v1813_v16 }
 0x263   :  { %v1504_v34 = vadd.f32 %v1502_v19, %v1492_v46  ;;  %v1680_v46 = vadd.f32 %v1679_v30, %v1678_v56  ;;  %v1571_v30 = vmul.f32 %v1565_v60, %v4456_v10  ;;  %v1747_v56 = vmul.f32 %v5466_v37, %v5466_v37 }
 0x264   :  { %v1531_v58 = vpop.permute.xlu1 %1530  ;;  %v1687_v60 = vsel %vm125_vm0, %v5466_v37, 0.0 }
 0x265   :  { %v1516_v5 = vadd.f32 %v1514_v13, %v1504_v34  ;;  %v1816_v13 = vsel %vm125_vm0, %v1744_v17, 0.0  ;;  %v5474_v34 = vld [vmem:[#allocation2 + $0x110] sm:$0xff]  ;;  %v1682_v50 = vadd.f32 %v1681_v38, %v1680_v46  ;;  %v1549_v17 = vadd.f32 %v1547_v47, %v1533_v15  ;;  %v5494_v47 = vld [vmem:[#allocation2 + $0x120] sm:$0xff] }
 0x266   :  { %v1817_v16 = vadd.f32 %v1816_v13, %v1815_v48  ;;  %v1748_v14 = vmul.f32 %v5474_v34, %v5474_v34  ;;  %v1820_v38 = vsel %vm125_vm0, %v1746_v41, 0.0  ;;  %v1534_v46 = vmul.f32 %v1531_v58, %v4446_v28 }
 0x267   :  { %v1518_v19 = vadd.f32 %v5018_v24, %v1516_v5  ;;  %v1685_v24 = vsel %vm125_vm0, %v5458_v1, 0.0  ;;  %v1684_v59 = vadd.f32 %v1683_v42, %v1682_v50  ;;  %v1749_v15 = vmul.f32 %v5483_v51, %v5483_v51 }
 0x268   :  { %v1819_v1 = vadd.f32 %v1818_v7, %v1817_v16  ;;  %v1548_v42 = vmul.f32 %v5419_v43, %v4443_v26  ;;  %v1822_v48 = vsel %vm125_vm0, %v1747_v56, 0.0  ;;  %v1689_v41 = vsel %vm125_vm0, %v5474_v34, 0.0  ;;  %v4074_v56 = vld [vmem:[%s6629_s2] ss:$0 sm:$0xff] }
 0x269   :  { %1520 = vst.msk [vmem:[#allocation2 + $0x140] sm:$0x1f] %vm127_vm1, %v1518_v19  ;;  %v1553_v33 = vpop.permute.xlu1 %1552  ;;  %v1686_v23 = vadd.f32 %v1685_v24, %v1684_v59  ;;  %v1824_v7 = vsel %vm125_vm0, %v1748_v14, 0.0  ;;  %v5503_v24 = vld [vmem:[#allocation2 + $0x128] sm:$0xff]  ;;  %v1750_v26 = vmul.f32 %v5494_v47, %v5494_v47  ;;  %v1693_v59 = vsel %vm125_vm0, %v5494_v47, 0.0 }
 0x26a   :  { %v1559_v5 = vmul.f32 %v1553_v33, %v4448_v31  ;;  %v1821_v58 = vadd.f32 %v1820_v38, %v1819_v1  ;;  %v1550_v43 = vadd.f32 %v1548_v42, %v1534_v46  ;;  %v1751_v16 = vmul.f32 %v5503_v24, %v5503_v24 }
 0x26b   :  { %v1688_v33 = vadd.f32 %v1687_v60, %v1686_v23  ;;  %v1826_v23 = vsel %vm125_vm0, %v1749_v15, 0.0  ;;  %v1695_v42 = vsel %vm125_vm0, %v5503_v24, 0.0 }
 0x26c   :  { %v1561_v19 = vadd.f32 %v1559_v5, %v1549_v17  ;;  %v1691_v17 = vsel %vm125_vm0, %v5483_v51, 0.0  ;;  %v1823_v5 = vadd.f32 %v1822_v48, %v1821_v58  ;;  %v1830_v58 = vsel %vm125_vm0, %v1751_v16, 0.0 }
 0x26d   :  { %v1557_v13 = vpop.permute.xlu1 %1556 }
 0x26e   :  { %v1573_v50 = vadd.f32 %v1571_v30, %v1561_v19  ;;  %v1560_v28 = vmul.f32 %v1557_v13, %v4448_v31  ;;  %v1690_v31 = vadd.f32 %v1689_v41, %v1688_v33  ;;  %v1825_v60 = vadd.f32 %v1824_v7, %v1823_v5  ;;  %v5522_v41 = vld [vmem:[#allocation2 + $0x130] sm:$0xff] }
 0x26f   :  { %v1828_v19 = vsel %vm125_vm0, %v1750_v26, 0.0 }
 0x270   :  { %v1575_v30 = vadd.f32 %v4074_v56, %v1573_v50  ;;  %v1562_v14 = vadd.f32 %v1560_v28, %v1550_v43  ;;  %v1692_v46 = vadd.f32 %v1691_v17, %v1690_v31  ;;  %v1827_v48 = vadd.f32 %v1826_v23, %v1825_v60  ;;  %v5524_v50 = vld [vmem:[#allocation2 + $0x138] sm:$0xff] }
 0x271   :  { %v1569_v1 = vpop.permute.xlu1 %1568  ;;  %6730 = vst [vmem:[#allocation15_spill] sm:$0xff] %v5524_v50  ;;  %v1753_v7 = vmul.f32 %v5524_v50, %v5524_v50  ;;  %v1699_v5 = vsel %vm125_vm0, %v5524_v50, 0.0 }
 0x272   :  { %1577 = vst.msk [vmem:[#allocation2 + $0x145] sm:$0xff] %vm125_vm0, %v1575_v30  ;;  %v1572_v38 = vmul.f32 %v1569_v1, %v4456_v10  ;;  %v1694_v13 = vadd.f32 %v1693_v59, %v1692_v46  ;;  %v1829_v28 = vadd.f32 %v1828_v19, %v1827_v48  ;;  %v1752_v10 = vmul.f32 %v5522_v41, %v5522_v41 }
 0x273   :  { %v1697_v30 = vsel %vm125_vm0, %v5522_v41, 0.0  ;;  %v1834_v1 = vsel %vm125_vm0, %v1753_v7, 0.0 }
 0x274   :  { %v1574_v15 = vadd.f32 %v1572_v38, %v1562_v14  ;;  %v1696_v43 = vadd.f32 %v1695_v42, %v1694_v13  ;;  %v1831_v17 = vadd.f32 %v1830_v58, %v1829_v28  ;;  %v1832_v23 = vsel %vm125_vm0, %v1752_v10, 0.0 }
 0x276   :  { %v1576_v33 = vadd.f32 %v4074_v56, %v1574_v15  ;;  %v1698_v31 = vadd.f32 %v1697_v30, %v1696_v43  ;;  %v1833_v14 = vadd.f32 %v1832_v23, %v1831_v17 }
 0x278   :  { %1578 = vst.msk [vmem:[#allocation2 + $0x14d] sm:$0x1f] %vm127_vm1, %v1576_v33  ;;  %v1700_v16 = vadd.f32 %v1699_v5, %v1698_v31  ;;  %v1835_v42 = vadd.f32 %v1834_v1, %v1833_v14  ;;  %vm3105_vm1 = vcmask 1041344  }
 0x279   :  { %v5532_v26 = vld [vmem:[#allocation2 + $0x140] sm:$0xff] }
 0x27a   :  { %6731 = vst [vmem:[#allocation22_spill] sm:$0xff] %v5532_v26  ;;  %v1754_v56 = vmul.f32 %v5532_v26, %v5532_v26  ;;  %v1701_v59 = vsel %vm125_vm0, %v5532_v26, 0.0 }
 0x27b   :  { %v1702_v19 = vadd.f32 %v1701_v59, %v1700_v16 }
 0x27c   :  { %v1836_v38 = vsel %vm125_vm0, %v1754_v56, 0.0 }
 0x27d   :  { %v1837_v33 = vadd.f32 %v1836_v38, %v1835_v42 }
 0x27f   :  { %v1620_v60 = vld [vmem:[#allocation2 + $0x148] sm:$0xff]  ;;  %v1621_v46 = vld [vmem:[#allocation2 + $0x150] sm:$0x3] }
 0x280   :  { %v1703_v15 = vsel %vm125_vm0, %v1620_v60, 0.0  ;;  %v1755_v13 = vmul.f32 %v1620_v60, %v1620_v60  ;;  %v1756_v48 = vmul.f32 %v1621_v46, %v1621_v46  ;;  %v1706_v28 = vsel %vm1705_vm2, %v1621_v46, 0.0 }
 0x281   :  { %v1704_v58 = vadd.f32 %v1703_v15, %v1702_v19 }
 0x282   :  { %v1838_v43 = vsel %vm125_vm0, %v1755_v13, 0.0  ;;  %v1840_v17 = vsel %vm1705_vm2, %v1756_v48, 0.0  ;;  %v1852_v48 = vld [vmem:[%s6630_s3] sm:$0x1]  ;;  %s4114_s3 = smov 40  }
 0x283   :  { %v1707_v10 = vadd.f32 %v1706_v28, %v1704_v58  ;;  %v1839_v7 = vadd.f32 %v1838_v43, %v1837_v33 }
 0x285   :  { %v1708_v30 = vrot.slane %v1707_v10, 4  ;;  %v1841_v5 = vadd.f32 %v1840_v17, %v1839_v7  ;;  %v6732_v17 = vld [vmem:[#allocation12_spill] sm:$0xff] }
 0x287   :  { %v1709_v56 = vadd.f32 %v1708_v30, %v1707_v10  ;;  %v1842_v31 = vrot.slane %v1841_v5, 4  ;;  %v1856_v10 = vld [vmem:[%s6631_s4] sm:$0x1]  ;;  %s4115_s4 = smov 20  }
 0x289   :  { %v1710_v23 = vrot.slane %v1709_v56, 2  ;;  %v1843_v1 = vadd.f32 %v1842_v31, %v1841_v5 }
 0x28b   :  { %v1711_v59 = vadd.f32 %v1710_v23, %v1709_v56  ;;  %v1844_v16 = vrot.slane %v1843_v1, 2 }
 0x28d   :  { %v1712_v14 = vrot.slane %v1711_v59, 1  ;;  %v1845_v26 = vadd.f32 %v1844_v16, %v1843_v1 }
 0x28f   :  { %v1713_v19 = vadd.f32 %v1712_v14, %v1711_v59  ;;  %v1846_v38 = vrot.slane %v1845_v26, 1 }
 0x291   :  { %v1847_v42 = vadd.f32 %v1846_v38, %v1845_v26  ;;  %v1848_v15 = vmul.f32 0.00295858, %v1713_v19 }
 0x293   :  { %v1849_v50 = vmul.f32 0.00295858, %v1847_v42  ;;  %v1850_v13 = vmul.f32 %v1848_v15, %v1848_v15 }
 0x295   :  { %v1851_v58 = vsub.f32 %v1849_v50, %v1850_v13 }
 0x297   :  { %v1853_v33 = vadd.f32 1e-05, %v1851_v58 }
 0x299   :  { %4063 = vrsqrt.f32 %v1853_v33  ;;  %v6733_v33 = vld [vmem:[#allocation13_spill] sm:$0xff] }
 0x2a3   :  { %v4064_v28 = vpop.eup %4063 }
 0x2a4   :  { %v1855_v43 = vmul.f32 %v4064_v28, %v1852_v48  ;;  %v6734_v28 = vld [vmem:[#allocation15_spill] sm:$0xff] }
 0x2a6   :  { %v1857_v7 = vmul.f32 %v1855_v43, %v1848_v15  ;;  %v1863_v30 = vrot.slane %v1855_v43, %v6732_v17 }
 0x2a8   :  { %v1858_v26 = vsub.f32 %v1856_v10, %v1857_v7  ;;  %v1906_v5 = vmul.f32 %v1863_v30, %v1620_v60  ;;  %v1907_v56 = vmul.f32 %v1863_v30, %v1621_v46  ;;  %v1865_v31 = vmul.f32 %v1863_v30, %v5131_v45 }
 0x2a9   :  { %v1866_v23 = vmul.f32 %v1863_v30, %v5134_v53  ;;  %v1867_v1 = vmul.f32 %v1863_v30, %v5136_v35  ;;  %v1868_v59 = vmul.f32 %v1863_v30, %v5142_v9  ;;  %v1869_v16 = vmul.f32 %v1863_v30, %v5150_v52 }
 0x2aa   :  { %v5557_v50 = vrot.slane %v1858_v26, %v6732_v17  ;;  %v1870_v14 = vmul.f32 %v1863_v30, %v5173_v27  ;;  %v1871_v19 = vmul.f32 %v1863_v30, %v5175_v18  ;;  %v1872_v38 = vmul.f32 %v1863_v30, %v5181_v25 }
 0x2ab   :  { %v1873_v45 = vmul.f32 %v1863_v30, %v5188_v22  ;;  %v1874_v53 = vmul.f32 %v1863_v30, %v5196_v62  ;;  %v1875_v35 = vmul.f32 %v1863_v30, %v5205_v44  ;;  %v1876_v9 = vmul.f32 %v1863_v30, %v5219_v29 }
 0x2ac   :  { %v1955_v60 = vadd.f32 %v5557_v50, %v1906_v5  ;;  %v1956_v46 = vadd.f32 %v5557_v50, %v1907_v56  ;;  %v1877_v52 = vmul.f32 %v1863_v30, %v5224_v39  ;;  %v1878_v18 = vmul.f32 %v1863_v30, %v5229_v63 }
 0x2ad   :  { %v1879_v15 = vmul.f32 %v1863_v30, %v5247_v32  ;;  %v1880_v13 = vmul.f32 %v1863_v30, %v5266_v54  ;;  %v1881_v25 = vmul.f32 %v1863_v30, %v5268_v0  ;;  %v1882_v22 = vmul.f32 %v1863_v30, %v5275_v21 }
 0x2ae   :  { %v1998_v42 = vmax.f32 %v1955_v60, 0.0  ;;  %v1999_v27 = vmax.f32 %v1956_v46, 0.0  ;;  %v1883_v62 = vmul.f32 %v1863_v30, %v5295_v55  ;;  %v1884_v44 = vmul.f32 %v1863_v30, %v5334_v4 }
 0x2af   :  { %v1885_v29 = vmul.f32 %v1863_v30, %v5346_v3  ;;  %v1886_v39 = vmul.f32 %v1863_v30, %v5354_v8  ;;  %v1887_v63 = vmul.f32 %v1863_v30, %v5371_v2  ;;  %v1888_v32 = vmul.f32 %v1863_v30, %v5379_v20 }
 0x2b0   :  { %2041 = vst.msk [vmem:[#allocation2 + $0x148] sm:$0xff] %vm125_vm0, %v1998_v42  ;;  %v1889_v54 = vmul.f32 %v1863_v30, %v5390_v40  ;;  %v1890_v0 = vmul.f32 %v1863_v30, %v5400_v12  ;;  %v1891_v21 = vmul.f32 %v1863_v30, %v5408_v6  ;;  %v1892_v55 = vmul.f32 %v1863_v30, %v5421_v61 }
 0x2b1   :  { %2042 = vst.msk [vmem:[#allocation2 + $0x150] sm:$0x3] %vm1705_vm2, %v1999_v27  ;;  %v1893_v58 = vmul.f32 %v1863_v30, %v5429_v11  ;;  %v1894_v4 = vmul.f32 %v1863_v30, %v5431_v36  ;;  %v1895_v3 = vmul.f32 %v1863_v30, %v5439_v49  ;;  %v1896_v8 = vmul.f32 %v1863_v30, %v5446_v57 }
 0x2b2   :  { %v1897_v2 = vmul.f32 %v1863_v30, %v6733_v33  ;;  %v1898_v20 = vmul.f32 %v1863_v30, %v5466_v37  ;;  %v1899_v40 = vmul.f32 %v1863_v30, %v5474_v34  ;;  %v1900_v12 = vmul.f32 %v1863_v30, %v5483_v51  ;;  %v6735_v51 = vld [vmem:[#allocation22_spill] sm:$0xff] }
 0x2b3   :  { %v1914_v6 = vadd.f32 %v5557_v50, %v1865_v31  ;;  %v1915_v61 = vadd.f32 %v5557_v50, %v1866_v23  ;;  %v1916_v11 = vadd.f32 %v5557_v50, %v1867_v1  ;;  %v1901_v36 = vmul.f32 %v1863_v30, %v5494_v47 }
 0x2b4   :  { %v1902_v49 = vmul.f32 %v1863_v30, %v5503_v24  ;;  %v1903_v57 = vmul.f32 %v1863_v30, %v5522_v41  ;;  %v1917_v48 = vadd.f32 %v5557_v50, %v1868_v59  ;;  %v1904_v37 = vmul.f32 %v1863_v30, %v6734_v28 }
 0x2b5   :  { %v1957_v43 = vmax.f32 %v1914_v6, 0.0  ;;  %v1958_v34 = vmax.f32 %v1915_v61, 0.0  ;;  %v1959_v10 = vmax.f32 %v1916_v11, 0.0  ;;  %v1905_v7 = vmul.f32 %v1863_v30, %v6735_v51 }
 0x2b6   :  { %v1960_v26 = vmax.f32 %v1917_v48, 0.0  ;;  %v1918_v5 = vadd.f32 %v5557_v50, %v1869_v16  ;;  %v1919_v56 = vadd.f32 %v5557_v50, %v1870_v14  ;;  %v1920_v47 = vadd.f32 %v5557_v50, %v1871_v19 }
 0x2b7   :  { %2000 = vst.msk [vmem:[#allocation2] sm:$0xff] %vm125_vm0, %v1957_v43  ;;  %2001 = vst.msk [vmem:[#allocation2 + $0x8] sm:$0xff] %vm125_vm0, %v1958_v34  ;;  %v1921_v24 = vadd.f32 %v5557_v50, %v1872_v38  ;;  %v1922_v41 = vadd.f32 %v5557_v50, %v1873_v45  ;;  %v1923_v31 = vadd.f32 %v5557_v50, %v1874_v53  ;;  %vm3106_vm2 = vcmask 256002  }
 0x2b8   :  { %2002 = vst.msk [vmem:[#allocation2 + $0x10] sm:$0xff] %vm125_vm0, %v1959_v10  ;;  %2003 = vst.msk [vmem:[#allocation2 + $0x18] sm:$0xff] %vm125_vm0, %v1960_v26  ;;  %v1924_v30 = vadd.f32 %v5557_v50, %v1875_v35  ;;  %v5620_v23 = vadd.f32 %v5557_v50, %v1876_v9  ;;  %v5623_v1 = vadd.f32 %v5557_v50, %v1877_v52 }
 0x2b9   :  { %v5626_v59 = vadd.f32 %v5557_v50, %v1878_v18  ;;  %v5629_v16 = vadd.f32 %v5557_v50, %v1879_v15  ;;  %v5632_v14 = vadd.f32 %v5557_v50, %v1880_v13  ;;  %v5635_v19 = vadd.f32 %v5557_v50, %v1881_v25 }
 0x2ba   :  { %v5638_v60 = vadd.f32 %v5557_v50, %v1882_v22  ;;  %v5641_v46 = vadd.f32 %v5557_v50, %v1883_v62  ;;  %v5644_v38 = vadd.f32 %v5557_v50, %v1884_v44  ;;  %v5647_v45 = vadd.f32 %v5557_v50, %v1885_v29 }
 0x2bb   :  { %v5650_v53 = vadd.f32 %v5557_v50, %v1886_v39  ;;  %v5653_v35 = vadd.f32 %v5557_v50, %v1887_v63  ;;  %v5656_v9 = vadd.f32 %v5557_v50, %v1888_v32  ;;  %v5659_v52 = vadd.f32 %v5557_v50, %v1889_v54 }
 0x2bc   :  { %v5662_v42 = vadd.f32 %v5557_v50, %v1890_v0  ;;  %v5665_v27 = vadd.f32 %v5557_v50, %v1891_v21  ;;  %v5668_v18 = vadd.f32 %v5557_v50, %v1892_v55  ;;  %v5671_v15 = vadd.f32 %v5557_v50, %v1893_v58 }
 0x2bd   :  { %v5674_v13 = vadd.f32 %v5557_v50, %v1894_v4  ;;  %v5677_v25 = vadd.f32 %v5557_v50, %v1895_v3  ;;  %v5680_v22 = vadd.f32 %v5557_v50, %v1896_v8  ;;  %v5683_v62 = vadd.f32 %v5557_v50, %v1897_v2 }
 0x2be   :  { %v5686_v44 = vadd.f32 %v5557_v50, %v1898_v20  ;;  %v2059_v29 = vld [vmem:[#allocation2] ss:$2 sm:$0x3f]  ;;  %v2061_v39 = vld [vmem:[#allocation2 + $0x1] ss:$2 sm:$0x3f]  ;;  %v5689_v63 = vadd.f32 %v5557_v50, %v1899_v40  ;;  %v5692_v32 = vadd.f32 %v5557_v50, %v1900_v12  ;;  %v5695_v54 = vadd.f32 %v5557_v50, %v1901_v36 }
 0x2bf   :  { %v5698_v0 = vadd.f32 %v5557_v50, %v1902_v49  ;;  %v2062_v21 = vmax.f32 %v2059_v29, %v2061_v39  ;;  %v2064_v55 = vld [vmem:[#allocation2 + $0xd] ss:$2 sm:$0x3f]  ;;  %v2066_v58 = vld [vmem:[#allocation2 + $0xe] ss:$2 sm:$0x3f]  ;;  %v5701_v4 = vadd.f32 %v5557_v50, %v1903_v57  ;;  %v5704_v3 = vadd.f32 %v5557_v50, %v1904_v37 }
 0x2c0   :  { %v5707_v8 = vadd.f32 %v5557_v50, %v1905_v7  ;;  %v2067_v33 = vmax.f32 %v2064_v55, %v2066_v58  ;;  %v1961_v2 = vmax.f32 %v1918_v5, 0.0  ;;  %v1962_v20 = vmax.f32 %v1919_v56, 0.0 }
 0x2c1   :  { %v1963_v40 = vmax.f32 %v1920_v47, 0.0  ;;  %v1964_v12 = vmax.f32 %v1921_v24, 0.0  ;;  %v1965_v6 = vmax.f32 %v1922_v41, 0.0  ;;  %v1966_v61 = vmax.f32 %v1923_v31, 0.0 }
 0x2c2   :  { %v1967_v11 = vmax.f32 %v1924_v30, 0.0  ;;  %v2068_v36 = vmax.f32 %v2062_v21, %v2067_v33  ;;  %v1968_v49 = vmax.f32 %v5620_v23, 0.0  ;;  %v1969_v57 = vmax.f32 %v5623_v1, 0.0  ;;  %2004 = vst.msk [vmem:[#allocation2 + $0x20] sm:$0xff] %vm125_vm0, %v1961_v2  ;;  %2005 = vst.msk [vmem:[#allocation2 + $0x28] sm:$0xff] %vm125_vm0, %v1962_v20 }
 0x2c3   :  { %v1970_v48 = vmax.f32 %v5626_v59, 0.0  ;;  %2006 = vst.msk [vmem:[#allocation2 + $0x30] sm:$0xff] %vm125_vm0, %v1963_v40  ;;  %v1971_v50 = vmax.f32 %v5629_v16, 0.0  ;;  %v1972_v28 = vmax.f32 %v5632_v14, 0.0  ;;  %v1973_v37 = vmax.f32 %v5635_v19, 0.0  ;;  %2007 = vst.msk [vmem:[#allocation2 + $0x38] sm:$0xff] %vm125_vm0, %v1964_v12 }
 0x2c4   :  { %v1974_v43 = vmax.f32 %v5638_v60, 0.0  ;;  %2008 = vst.msk [vmem:[#allocation2 + $0x40] sm:$0xff] %vm125_vm0, %v1965_v6  ;;  %2009 = vst.msk [vmem:[#allocation2 + $0x48] sm:$0xff] %vm125_vm0, %v1966_v61  ;;  %v1975_v34 = vmax.f32 %v5641_v46, 0.0  ;;  %v1976_v10 = vmax.f32 %v5644_v38, 0.0  ;;  %v1977_v51 = vmax.f32 %v5647_v45, 0.0 }
 0x2c5   :  { %2010 = vst.msk [vmem:[#allocation2 + $0x50] sm:$0xff] %vm125_vm0, %v1967_v11  ;;  %v1978_v7 = vmax.f32 %v5650_v53, 0.0  ;;  %2011 = vst.msk [vmem:[#allocation2 + $0x58] sm:$0xff] %vm125_vm0, %v1968_v49  ;;  %v1979_v26 = vmax.f32 %v5653_v35, 0.0  ;;  %v1980_v5 = vmax.f32 %v5656_v9, 0.0  ;;  %v1981_v56 = vmax.f32 %v5659_v52, 0.0 }
 0x2c6   :  { %2070 = vst.msk [vmem:[#allocation3 + $0x9] sm:$0x3f] %vm2069_vm3, %v2068_v36  ;;  %v1982_v47 = vmax.f32 %v5662_v42, 0.0  ;;  %v1983_v24 = vmax.f32 %v5665_v27, 0.0  ;;  %v1984_v41 = vmax.f32 %v5668_v18, 0.0  ;;  %v1985_v31 = vmax.f32 %v5671_v15, 0.0 }
 0x2c7   :  { %2012 = vst.msk [vmem:[#allocation2 + $0x60] sm:$0xff] %vm125_vm0, %v1969_v57  ;;  %2013 = vst.msk [vmem:[#allocation2 + $0x68] sm:$0xff] %vm125_vm0, %v1970_v48  ;;  %v1986_v30 = vmax.f32 %v5674_v13, 0.0  ;;  %v2205_v23 = vld [vmem:[#allocation3 + $0x2] sm:$0x3f]  ;;  %v1987_v1 = vmax.f32 %v5677_v25, 0.0 }
 0x2c8   :  { %2014 = vst.msk [vmem:[#allocation2 + $0x70] sm:$0xff] %vm125_vm0, %v1971_v50  ;;  %2015 = vst.msk [vmem:[#allocation2 + $0x78] sm:$0xff] %vm125_vm0, %v1972_v28  ;;  %v1988_v59 = vmax.f32 %v5680_v22, 0.0  ;;  %v1989_v16 = vmax.f32 %v5683_v62, 0.0  ;;  %v1990_v14 = vmax.f32 %v5686_v44, 0.0  ;;  %v1991_v60 = vmax.f32 %v5689_v63, 0.0 }
 0x2c9   :  { %2016 = vst.msk [vmem:[#allocation2 + $0x80] sm:$0xff] %vm125_vm0, %v1973_v37  ;;  %2017 = vst.msk [vmem:[#allocation2 + $0x88] sm:$0xff] %vm125_vm0, %v1974_v43  ;;  %v2204_v19 = vld [vmem:[#allocation3 + $0x1] sm:$0x3f]  ;;  %v1992_v46 = vmax.f32 %v5692_v32, 0.0  ;;  %v1993_v38 = vmax.f32 %v5695_v54, 0.0 }
 0x2ca   :  { %2018 = vst.msk [vmem:[#allocation2 + $0x90] sm:$0xff] %vm125_vm0, %v1975_v34  ;;  %2019 = vst.msk [vmem:[#allocation2 + $0x98] sm:$0xff] %vm125_vm0, %v1976_v10  ;;  %v1994_v45 = vmax.f32 %v5698_v0, 0.0  ;;  %v1995_v53 = vmax.f32 %v5701_v4, 0.0  ;;  %v1996_v35 = vmax.f32 %v5704_v3, 0.0  ;;  %v1997_v9 = vmax.f32 %v5707_v8, 0.0 }
 0x2cb   :  { %2020 = vst.msk [vmem:[#allocation2 + $0xa0] sm:$0xff] %vm125_vm0, %v1977_v51  ;;  %2021 = vst.msk [vmem:[#allocation2 + $0xa8] sm:$0xff] %vm125_vm0, %v1978_v7  ;;  %v2072_v52 = vld [vmem:[#allocation2 + $0x1a] ss:$2 sm:$0x3f] }
 0x2cc   :  { %2022 = vst.msk [vmem:[#allocation2 + $0xb0] sm:$0xff] %vm125_vm0, %v1979_v26  ;;  %2023 = vst.msk [vmem:[#allocation2 + $0xb8] sm:$0xff] %vm125_vm0, %v1980_v5  ;;  %v2074_v42 = vld [vmem:[#allocation2 + $0x1b] ss:$2 sm:$0x3f] }
 0x2cd   :  { %2024 = vst.msk [vmem:[#allocation2 + $0xc0] sm:$0xff] %vm125_vm0, %v1981_v56  ;;  %2025 = vst.msk [vmem:[#allocation2 + $0xc8] sm:$0xff] %vm125_vm0, %v1982_v47  ;;  %v2077_v27 = vld [vmem:[#allocation2 + $0x27] ss:$2 sm:$0x3f]  ;;  %v2075_v13 = vmax.f32 %v2072_v52, %v2074_v42 }
 0x2ce   :  { %2026 = vst.msk [vmem:[#allocation2 + $0xd0] sm:$0xff] %vm125_vm0, %v1983_v24  ;;  %2027 = vst.msk [vmem:[#allocation2 + $0xd8] sm:$0xff] %vm125_vm0, %v1984_v41  ;;  %v5774_v18 = vld [vmem:[#allocation3 + $0xa] sm:$0x3f] }
 0x2cf   :  { %2028 = vst.msk [vmem:[#allocation2 + $0xe0] sm:$0xff] %vm125_vm0, %v1985_v31  ;;  %2029 = vst.msk [vmem:[#allocation2 + $0xe8] sm:$0xff] %vm125_vm0, %v1986_v30  ;;  %v5776_v15 = vld [vmem:[#allocation3 + $0x9] sm:$0x3f]  ;;  %v3922_v25 = vpack.i.bf16 %v2205_v23, %v5774_v18 }
 0x2d0   :  { %2030 = vst.msk [vmem:[#allocation2 + $0xf0] sm:$0xff] %vm125_vm0, %v1987_v1  ;;  %2031 = vst.msk [vmem:[#allocation2 + $0xf8] sm:$0xff] %vm125_vm0, %v1988_v59  ;;  %v3917_v22 = vpack.i.bf16 %v2204_v19, %v5776_v15  ;;  %v2079_v62 = vld [vmem:[#allocation2 + $0x28] ss:$2 sm:$0x3f]  ;;  %v2763_v51 = vld [vmem:[%s6632_s5] sm:$0xff] }
 0x2d1   :  { %2032 = vst.msk [vmem:[#allocation2 + $0x100] sm:$0xff] %vm125_vm0, %v1989_v16  ;;  %2033 = vst.msk [vmem:[#allocation2 + $0x108] sm:$0xff] %vm125_vm0, %v1990_v14  ;;  %v2080_v44 = vmax.f32 %v2077_v27, %v2079_v62  ;;  %3923 = vrot.lane.b32.xlu0 %v3922_v25, %s4114_s3  ;;  %v2096_v21 = vld [vmem:[#allocation2 + $0x4e] ss:$2 sm:$0x3f] }
 0x2d2   :  { %2034 = vst.msk [vmem:[#allocation2 + $0x110] sm:$0xff] %vm125_vm0, %v1991_v60  ;;  %2035 = vst.msk [vmem:[#allocation2 + $0x118] sm:$0xff] %vm125_vm0, %v1992_v46  ;;  %3918 = vrot.lane.b32.xlu1 %v3917_v22, %s4115_s4  ;;  %v2098_v55 = vld [vmem:[#allocation2 + $0x4f] ss:$2 sm:$0x3f] }
 0x2d3   :  { %2036 = vst.msk [vmem:[#allocation2 + $0x120] sm:$0xff] %vm125_vm0, %v1993_v38  ;;  %2037 = vst.msk [vmem:[#allocation2 + $0x128] sm:$0xff] %vm125_vm0, %v1994_v45  ;;  %v2081_v29 = vmax.f32 %v2075_v13, %v2080_v44  ;;  %v5786_v61 = vld [vmem:[#allocation3 + $0x8] sm:$0x3f]  ;;  %v2099_v10 = vmax.f32 %v2096_v21, %v2098_v55  ;;  %v2764_v1 = vld [vmem:[%s6632_s5 + $0x8] sm:$0xff] }
 0x2d4   :  { %2038 = vst.msk [vmem:[#allocation2 + $0x130] sm:$0xff] %vm125_vm0, %v1995_v53  ;;  %2039 = vst.msk [vmem:[#allocation2 + $0x138] sm:$0xff] %vm125_vm0, %v1996_v35  ;;  %v2144_v39 = vld [vmem:[#allocation2 + $0xc3] ss:$2 sm:$0x3f]  ;;  %v3687_v42 = vpack.c.bf16 %v2764_v1, %v2763_v51 }
 0x2d5   :  { %2040 = vst.msk [vmem:[#allocation2 + $0x140] sm:$0xff] %vm125_vm0, %v1997_v9  ;;  %v2146_v63 = vld [vmem:[#allocation2 + $0xc4] ss:$2 sm:$0x3f] }
 0x2d6   :  { %v2149_v32 = vld [vmem:[#allocation2 + $0xd0] ss:$2 sm:$0x3f]  ;;  %v2151_v54 = vld [vmem:[#allocation2 + $0xd1] ss:$2 sm:$0x3f]  ;;  %v2147_v0 = vmax.f32 %v2144_v39, %v2146_v63 }
 0x2d7   :  { %2082 = vst.msk [vmem:[#allocation3 + $0x11] sm:$0x3f] %vm2069_vm3, %v2081_v29  ;;  %v2152_v3 = vmax.f32 %v2149_v32, %v2151_v54  ;;  %v2084_v57 = vld [vmem:[#allocation2 + $0x34] ss:$2 sm:$0x3f]  ;;  %v4118_v32 = vmov 0.0|0.0  }
 0x2d8   :  { %v2168_v58 = vld [vmem:[#allocation2 + $0xf7] ss:$2 sm:$0x3f]  ;;  %v2170_v4 = vld [vmem:[#allocation2 + $0xf8] ss:$2 sm:$0x3f]  ;;  %3686 = vmatprep.subr.bf16.mxu0 %v4118_v32 }
 0x2d9   :  { %v2173_v8 = vld [vmem:[#allocation2 + $0x104] ss:$2 sm:$0x3f]  ;;  %v2175_v33 = vld [vmem:[#allocation2 + $0x105] ss:$2 sm:$0x3f]  ;;  %v2171_v2 = vmax.f32 %v2168_v58, %v2170_v4  ;;  %v2153_v12 = vmax.f32 %v2147_v0, %v2152_v3  ;;  %3688 = vmatpush1.bf16.msra.mxu0 %v3687_v42 }
 0x2da   :  { %v2176_v6 = vmax.f32 %v2173_v8, %v2175_v33  ;;  %v2086_v48 = vld [vmem:[#allocation2 + $0x35] ss:$2 sm:$0x3f]  ;;  %v2089_v43 = vld [vmem:[#allocation2 + $0x41] ss:$2 sm:$0x3f]  ;;  %3689 = vmatprep.subr.bf16.mxu0 %v4118_v32 }
 0x2db   :  { %v2192_v20 = vld [vmem:[#allocation2 + $0x12b] ss:$2 sm:$0x3f]  ;;  %v2194_v40 = vld [vmem:[#allocation2 + $0x12c] ss:$2 sm:$0x3f]  ;;  %v2087_v37 = vmax.f32 %v2084_v57, %v2086_v48 }
 0x2dc   :  { %v2197_v11 = vld [vmem:[#allocation2 + $0x138] ss:$2 sm:$0x3f]  ;;  %v2199_v36 = vld [vmem:[#allocation2 + $0x139] ss:$2 sm:$0x3f]  ;;  %v2195_v49 = vmax.f32 %v2192_v20, %v2194_v40  ;;  %v2177_v50 = vmax.f32 %v2171_v2, %v2176_v6 }
 0x2dd   :  { %2154 = vst.msk [vmem:[#allocation3 + $0x51] sm:$0x3f] %vm2069_vm3, %v2153_v12  ;;  %v2200_v28 = vmax.f32 %v2197_v11, %v2199_v36  ;;  %v2091_v34 = vld [vmem:[#allocation2 + $0x42] ss:$2 sm:$0x3f]  ;;  %v2765_v29 = vld [vmem:[%s6632_s5 + $0x10] sm:$0xff] }
 0x2de   :  { %v2137_v7 = vld [vmem:[#allocation2 + $0xb6] ss:$2 sm:$0x3f]  ;;  %v2139_v26 = vld [vmem:[#allocation2 + $0xb7] ss:$2 sm:$0x3f]  ;;  %v2092_v5 = vmax.f32 %v2089_v43, %v2091_v34 }
 0x2df   :  { %v2101_v56 = vld [vmem:[#allocation2 + $0x5b] ss:$2 sm:$0x3f]  ;;  %v2103_v47 = vld [vmem:[#allocation2 + $0x5c] ss:$2 sm:$0x3f]  ;;  %v2201_v24 = vmax.f32 %v2195_v49, %v2200_v28  ;;  %v2140_v25 = vmax.f32 %v2137_v7, %v2139_v26 }
 0x2e0   :  { %2178 = vst.msk [vmem:[#allocation3 + $0x61] sm:$0x3f] %vm2069_vm3, %v2177_v50  ;;  %v5793_v41 = vld [vmem:[#allocation3 + $0x11] sm:$0x3f]  ;;  %v2104_v23 = vmax.f32 %v2101_v56, %v2103_v47  ;;  %v2093_v14 = vmax.f32 %v2087_v37, %v2092_v5  ;;  %v2766_v39 = vld [vmem:[%s6632_s5 + $0x18] sm:$0xff]  ;;  %v2767_v2 = vld [vmem:[%s6632_s5 + $0x20] sm:$0xff] }
 0x2e1   :  { %v5795_v31 = vld [vmem:[#allocation3 + $0x10] sm:$0x3f]  ;;  %v2127_v30 = vld [vmem:[#allocation2 + $0x90] ss:$2 sm:$0x3f]  ;;  %v3932_v59 = vpack.i.bf16 %v5776_v15, %v5793_v41  ;;  %v3690_v8 = vpack.c.bf16 %v2766_v39, %v2765_v29  ;;  %v2771_v5 = vld [vmem:[%s6632_s5 + $0x40] sm:$0xff] }
 0x2e2   :  { %v3927_v16 = vpack.i.bf16 %v5786_v61, %v5795_v31  ;;  %v2108_v19 = vld [vmem:[#allocation2 + $0x68] ss:$2 sm:$0x3f]  ;;  %v2110_v60 = vld [vmem:[#allocation2 + $0x69] ss:$2 sm:$0x3f]  ;;  %v2105_v46 = vmax.f32 %v2099_v10, %v2104_v23 }
 0x2e3   :  { %2202 = vst.msk [vmem:[#allocation3 + $0x71] sm:$0x3f] %vm2069_vm3, %v2201_v24  ;;  %v2111_v38 = vmax.f32 %v2108_v19, %v2110_v60  ;;  %v2113_v45 = vld [vmem:[#allocation2 + $0x75] ss:$2 sm:$0x3f]  ;;  %3933 = vrot.lane.b32.xlu0 %v3932_v59, %s4116_s18  ;;  %v2768_v20 = vld [vmem:[%s6632_s5 + $0x28] sm:$0xff]  ;;  %3691 = vmatpush1.bf16.msra.mxu0 %v3690_v8 }
 0x2e4   :  { %v2115_v53 = vld [vmem:[#allocation2 + $0x76] ss:$2 sm:$0x3f]  ;;  %3928 = vrot.lane.b32.xlu1 %v3927_v16, %s4117_s19  ;;  %2094 = vst.msk [vmem:[#allocation3 + $0x19] sm:$0x3f] %vm2069_vm3, %v2093_v14  ;;  %v3693_v50 = vpack.c.bf16 %v2768_v20, %v2767_v2  ;;  %3692 = vmatprep.subr.bf16.mxu0 %v4118_v32  ;;  %v2772_v56 = vld [vmem:[%s6632_s5 + $0x48] sm:$0xff] }
 0x2e5   :  { %v2116_v35 = vmax.f32 %v2113_v45, %v2115_v53  ;;  %v2120_v9 = vld [vmem:[#allocation2 + $0x82] ss:$2 sm:$0x3f]  ;;  %v2122_v52 = vld [vmem:[#allocation2 + $0x83] ss:$2 sm:$0x3f]  ;;  %v3699_v47 = vpack.c.bf16 %v2772_v56, %v2771_v5 }
 0x2e6   :  { %2106 = vst.msk [vmem:[#allocation3 + $0x21] sm:$0x3f] %vm2069_vm3, %v2105_v46  ;;  %v2123_v27 = vmax.f32 %v2120_v9, %v2122_v52  ;;  %v2125_v15 = vld [vmem:[#allocation2 + $0x8f] ss:$2 sm:$0x3f]  ;;  %v2775_v14 = vld [vmem:[%s6632_s5 + $0x60] sm:$0xff] }
 0x2e7   :  { %v2132_v13 = vld [vmem:[#allocation2 + $0xa9] ss:$2 sm:$0x3f]  ;;  %v2117_v22 = vmax.f32 %v2111_v38, %v2116_v35  ;;  %v2128_v62 = vmax.f32 %v2125_v15, %v2127_v30  ;;  %v2134_v44 = vld [vmem:[#allocation2 + $0xaa] ss:$2 sm:$0x3f]  ;;  %3694 = vmatpush1.bf16.msra.mxu0 %v3693_v50 }
 0x2e8   :  { %v2135_v63 = vmax.f32 %v2132_v13, %v2134_v44  ;;  %v2156_v0 = vld [vmem:[#allocation2 + $0xdd] ss:$2 sm:$0x3f]  ;;  %v2158_v21 = vld [vmem:[#allocation2 + $0xde] ss:$2 sm:$0x3f]  ;;  %3695 = vmatprep.subr.bf16.mxu0 %v4118_v32 }
 0x2e9   :  { %2118 = vst.msk [vmem:[#allocation3 + $0x29] sm:$0x3f] %vm2069_vm3, %v2117_v22  ;;  %v2129_v54 = vmax.f32 %v2123_v27, %v2128_v62  ;;  %v2159_v58 = vmax.f32 %v2156_v0, %v2158_v21  ;;  %v2161_v4 = vld [vmem:[#allocation2 + $0xea] ss:$2 sm:$0x3f]  ;;  %v2770_v49 = vld [vmem:[%s6632_s5 + $0x38] sm:$0xff] }
 0x2ea   :  { %v2141_v55 = vmax.f32 %v2135_v63, %v2140_v25  ;;  %v2163_v3 = vld [vmem:[#allocation2 + $0xeb] ss:$2 sm:$0x3f]  ;;  %v2182_v48 = vld [vmem:[#allocation2 + $0x112] ss:$2 sm:$0x3f] }
 0x2eb   :  { %2130 = vst.msk [vmem:[#allocation3 + $0x31] sm:$0x3f] %vm2069_vm3, %v2129_v54  ;;  %v2164_v33 = vmax.f32 %v2161_v4, %v2163_v3  ;;  %v5825_v40 = vld [vmem:[#allocation3 + $0x19] sm:$0x3f]  ;;  %v2211_v6 = vld [vmem:[#allocation3 + $0x12] sm:$0x3f] }
 0x2ec   :  { %v5827_v12 = vld [vmem:[#allocation3 + $0x18] sm:$0x3f]  ;;  %2142 = vst.msk [vmem:[#allocation3 + $0x49] sm:$0x3f] %vm2069_vm3, %v2141_v55  ;;  %2282 = vrot.lane.b32.xlu0 %v5825_v40, %s4119_s0  ;;  %v3937_v28 = vpack.i.bf16 %v5774_v18, %v2211_v6  ;;  %v3942_v18 = vpack.i.bf16 %v5825_v40, %v5793_v41  ;;  %v2774_v23 = vld [vmem:[%s6632_s5 + $0x58] sm:$0xff]  ;;  %v2776_v19 = vld [vmem:[%s6632_s5 + $0x68] sm:$0xff] }
 0x2ed   :  { %2278 = vrot.lane.b32.xlu1 %v5827_v12, %s4120_s28  ;;  %v2165_v11 = vmax.f32 %v2159_v58, %v2164_v33  ;;  %v2769_v36 = vld [vmem:[%s6632_s5 + $0x30] sm:$0xff]  ;;  %v2185_v43 = vld [vmem:[#allocation2 + $0x11e] ss:$2 sm:$0x3f]  ;;  %v5865_v1 = vld [vmem:[#allocation3 + $0x20] sm:$0x3f] }
 0x2ee   :  { %v2180_v57 = vld [vmem:[#allocation2 + $0x111] ss:$2 sm:$0x3f]  ;;  %v2187_v34 = vld [vmem:[#allocation2 + $0x11f] ss:$2 sm:$0x3f]  ;;  %v3696_v26 = vpack.c.bf16 %v2770_v49, %v2769_v36  ;;  %v3952_v16 = vpack.i.bf16 %v5865_v1, %v5827_v12 }
 0x2ef   :  { %2166 = vst.msk [vmem:[#allocation3 + $0x59] sm:$0x3f] %vm2069_vm3, %v2165_v11  ;;  %v2183_v37 = vmax.f32 %v2180_v57, %v2182_v48  ;;  %v2261_v10 = vld [vmem:[#allocation3 + $0x1a] sm:$0x3f]  ;;  %v2188_v51 = vmax.f32 %v2185_v43, %v2187_v34  ;;  %v2298_v60 = vld [vmem:[#allocation3 + $0x21] sm:$0x3f] }
 0x2f0   :  { %2286 = vrot.lane.b32.xlu0 %v2261_v10, %s4121_s15  ;;  %3697 = vmatpush1.bf16.msra.mxu0 %v3696_v26  ;;  %v3947_v24 = vpack.i.bf16 %v2261_v10, %v2211_v6  ;;  %v2773_v30 = vld [vmem:[%s6632_s5 + $0x50] sm:$0xff]  ;;  %v3957_v46 = vpack.i.bf16 %v2298_v60, %v5825_v40  ;;  %v2778_v45 = vld [vmem:[%s6632_s5 + $0x78] sm:$0xff]  ;;  %v2779_v52 = vld [vmem:[%s6632_s5 + $0x80] sm:$0xff]  ;;  %v6736_v3 = vmov 0.0  }
 0x2f1   :  { %3938 = vrot.lane.b32.xlu1 %v3937_v28, %s4122_s16  ;;  %v2189_v7 = vmax.f32 %v2183_v37, %v2188_v51  ;;  %3698 = vmatprep.subr.bf16.mxu0 %v4118_v32  ;;  %v3702_v59 = vpack.c.bf16 %v2774_v23, %v2773_v30  ;;  %v2777_v38 = vld [vmem:[%s6632_s5 + $0x70] sm:$0xff]  ;;  %v2299_v53 = vld [vmem:[#allocation3 + $0x22] sm:$0x3f]  ;;  %v2780_v42 = vld [vmem:[%s6632_s5 + $0x88] sm:$0xff] }
 0x2f2   :  { %v3708_v35 = vpack.c.bf16 %v2778_v45, %v2777_v38  ;;  %v3962_v9 = vpack.i.bf16 %v2299_v53, %v2261_v10  ;;  %v3711_v27 = vpack.c.bf16 %v2780_v42, %v2779_v52  ;;  %v2781_v15 = vld [vmem:[%s6632_s5 + $0x90] sm:$0xff]  ;;  %v2782_v13 = vld [vmem:[%s6632_s5 + $0x98] sm:$0xff]  ;;  %v5908_v25 = vld [vmem:[#allocation3 + $0x28] sm:$0x3f] }
 0x2f3   :  { %2190 = vst.msk [vmem:[#allocation3 + $0x69] sm:$0x3f] %vm2069_vm3, %v2189_v7  ;;  %v3714_v22 = vpack.c.bf16 %v2782_v13, %v2781_v15  ;;  %v2783_v62 = vld [vmem:[%s6632_s5 + $0xa0] sm:$0xff]  ;;  %v2784_v44 = vld [vmem:[%s6632_s5 + $0xa8] sm:$0xff]  ;;  %v2785_v8 = vld [vmem:[%s6632_s5 + $0xb0] sm:$0xf] }
 0x2f4   :  { %2233 = vrot.lane.b32.xlu0 %v5795_v31, %s4120_s28  ;;  %3700 = vmatpush1.bf16.msra.mxu0 %v3699_v47  ;;  %v2337_v29 = vld [vmem:[#allocation3 + $0x2a] sm:$0x3f]  ;;  %v3717_v63 = vpack.c.bf16 %v2784_v44, %v2783_v62  ;;  %v2373_v21 = vld [vmem:[#allocation3 + $0x30] sm:$0x3f]  ;;  %v2412_v33 = vld [vmem:[#allocation3 + $0x39] sm:$0x3f] }
 0x2f5   :  { %3943 = vrot.lane.b32.xlu1 %v3942_v18, %s4115_s4  ;;  %3701 = vmatprep.subr.bf16.mxu0 %v4118_v32  ;;  %v2336_v39 = vld [vmem:[#allocation3 + $0x29] sm:$0x3f]  ;;  %v3972_v54 = vpack.i.bf16 %v2299_v53, %v2337_v29  ;;  %v2374_v55 = vld [vmem:[#allocation3 + $0x31] sm:$0x3f]  ;;  %v3977_v58 = vpack.i.bf16 %v5908_v25, %v2373_v21  ;;  %v2411_v2 = vld [vmem:[#allocation3 + $0x38] sm:$0x3f] }
 0x2f6   :  { %v3967_v0 = vpack.i.bf16 %v2298_v60, %v2336_v39  ;;  %v3982_v4 = vpack.i.bf16 %v2336_v39, %v2374_v55  ;;  %v2375_v20 = vld [vmem:[#allocation3 + $0x32] sm:$0x3f]  ;;  %v2413_v40 = vld [vmem:[#allocation3 + $0x3a] sm:$0x3f]  ;;  %v2450_v11 = vld [vmem:[#allocation3 + $0x41] sm:$0x3f] }
 0x2f7   :  { %v2453_v36 = vld [vmem:[#allocation3 + $0x49] sm:$0x3f]  ;;  %v2451_v57 = vld [vmem:[#allocation3 + $0x42] sm:$0x3f]  ;;  %v5942_v37 = vld [vmem:[#allocation3 + $0x50] sm:$0x3f] }
 0x2f8   :  { %3948 = vrot.lane.b32.xlu0 %v3947_v24, %s4114_s3  ;;  %3703 = vmatpush1.bf16.msra.mxu0 %v3702_v59  ;;  %v3992_v49 = vpack.i.bf16 %v2453_v36, %v2450_v11  ;;  %v2454_v48 = vld [vmem:[#allocation3 + $0x4a] sm:$0x3f]  ;;  %v2456_v34 = vld [vmem:[#allocation3 + $0x51] sm:$0x3f]  ;;  %v5955_v26 = vld [vmem:[#allocation3 + $0x58] sm:$0x3f] }
 0x2f9   :  { %2237 = vrot.lane.b32.xlu1 %v5793_v41, %s4119_s0  ;;  %v3705_v41 = vpack.c.bf16 %v2776_v19, %v2775_v14  ;;  %3704 = vmatprep.subr.bf16.mxu0 %v4118_v32  ;;  %v3997_v50 = vpack.i.bf16 %v2454_v48, %v2451_v57  ;;  %v5940_v28 = vld [vmem:[#allocation3 + $0x48] sm:$0x3f]  ;;  %v4007_v10 = vpack.i.bf16 %v2456_v34, %v2453_v36  ;;  %v2457_v51 = vld [vmem:[#allocation3 + $0x52] sm:$0x3f]  ;;  %v2500_v18 = vld [vmem:[#allocation3 + $0x5a] sm:$0x3f] }
 0x2fa   :  { %v4002_v43 = vpack.i.bf16 %v5942_v37, %v5940_v28  ;;  %v4012_v7 = vpack.i.bf16 %v2457_v51, %v2454_v48  ;;  %v2499_v5 = vld [vmem:[#allocation3 + $0x59] sm:$0x3f]  ;;  %v4022_v56 = vpack.i.bf16 %v2457_v51, %v2500_v18  ;;  %v5962_v24 = vld [vmem:[#allocation3 + $0x60] sm:$0x3f]  ;;  %v2575_v14 = vld [vmem:[#allocation3 + $0x69] sm:$0x3f] }
 0x2fb   :  { %v4017_v47 = vpack.i.bf16 %v2456_v34, %v2499_v5  ;;  %v2537_v30 = vld [vmem:[#allocation3 + $0x61] sm:$0x3f]  ;;  %v4027_v23 = vpack.i.bf16 %v5955_v26, %v5962_v24  ;;  %v5970_v19 = vld [vmem:[#allocation3 + $0x68] sm:$0x3f]  ;;  %v2612_v45 = vld [vmem:[#allocation3 + $0x70] sm:$0x3f] }
 0x2fc   :  { %3953 = vrot.lane.b32.xlu0 %v3952_v16, %s4117_s19  ;;  %3706 = vmatpush1.bf16.msra.mxu0 %v3705_v41  ;;  %v4032_v59 = vpack.i.bf16 %v2499_v5, %v2537_v30  ;;  %v2538_v16 = vld [vmem:[#allocation3 + $0x62] sm:$0x3f]  ;;  %v2576_v41 = vld [vmem:[#allocation3 + $0x6a] sm:$0x3f]  ;;  %v2613_v52 = vld [vmem:[#allocation3 + $0x71] sm:$0x3f] }
 0x2fd   :  { %2241 = vrot.lane.b32.xlu1 %v2211_v6, %s4121_s15  ;;  %3707 = vmatprep.subr.bf16.mxu0 %v4118_v32  ;;  %v3987_v6 = vpack.i.bf16 %v2337_v29, %v2375_v20  ;;  %v4047_v38 = vpack.i.bf16 %v2576_v41, %v2538_v16  ;;  %v4057_v42 = vpack.i.bf16 %v2613_v52, %v2575_v14  ;;  %v2652_v11 = vld [vmem:[#allocation3 + $0x7a] sm:$0x3f]  ;;  %vm3079_vm3 = vcmask 975488  }
 0x300   :  { %2316 = vrot.lane.b32.xlu0 %v5865_v1, %s4120_s28  ;;  %3709 = vmatpush1.bf16.msra.mxu0 %v3708_v35 }
 0x301   :  { %3958 = vrot.lane.b32.xlu1 %v3957_v46, %s4116_s18  ;;  %3710 = vmatprep.subr.bf16.mxu0 %v4118_v32  ;;  %v4042_v46 = vpack.i.bf16 %v2575_v14, %v2537_v30 }
 0x304   :  { %3963 = vrot.lane.b32.xlu0 %v3962_v9, %s4122_s16  ;;  %3712 = vmatpush1.bf16.msra.mxu0 %v3711_v27 }
 0x305   :  { %2320 = vrot.lane.b32.xlu1 %v2298_v60, %s4119_s0  ;;  %3713 = vmatprep.subr.bf16.mxu0 %v4118_v32  ;;  %v4037_v60 = vpack.i.bf16 %v2500_v18, %v2538_v16 }
 0x308   :  { %2354 = vrot.lane.b32.xlu0 %v5908_v25, %s4120_s28  ;;  %3715 = vmatpush1.bf16.msra.mxu0 %v3714_v22  ;;  %v2650_v22 = vld [vmem:[#allocation3 + $0x78] sm:$0x3f] }
 0x309   :  { %2324 = vrot.lane.b32.xlu1 %v2299_v53, %s4121_s15  ;;  %3716 = vmatprep.subr.bf16.mxu0 %v4118_v32  ;;  %v4052_v53 = vpack.i.bf16 %v2612_v45, %v5970_v19 }
 0x30c   :  { %2362 = vrot.lane.b32.xlu0 %v2337_v29, %s4121_s15  ;;  %3718 = vmatpush1.bf16.msra.mxu0 %v3717_v63 }
 0x30d   :  { %2358 = vrot.lane.b32.xlu1 %v2336_v39, %s4119_s0  ;;  %2868 = vmatprep.subr.mxu0 %v6736_v3 }
 0x310   :  { %3973 = vrot.lane.b32.xlu0 %v3972_v54, %s4114_s3  ;;  %3666 = vmatpush1.msk.msra.mxu0 %vm2745_vm4, %v2785_v8 }
 0x311   :  { %3968 = vrot.lane.b32.xlu1 %v3967_v0, %s4115_s4  ;;  %3807 = vmatprep.subr.bf16.mxu0 %v4118_v32  ;;  %v2614_v0 = vld [vmem:[#allocation3 + $0x72] sm:$0x3f] }
 0x314   :  { %3983 = vrot.lane.b32.xlu0 %v3982_v4, %s4116_s18 }
 0x315   :  { %3978 = vrot.lane.b32.xlu1 %v3977_v58, %s4117_s19 }
 0x318   :  { %2434 = vrot.lane.b32.xlu0 %v2412_v33, %s4119_s0 }
 0x319   :  { %2430 = vrot.lane.b32.xlu1 %v2411_v2, %s4120_s28 }
 0x31c   :  { %2438 = vrot.lane.b32.xlu0 %v2413_v40, %s4121_s15 }
 0x31d   :  { %3988 = vrot.lane.b32.xlu1 %v3987_v6, %s4122_s16 }
 0x320   :  { %2392 = vrot.lane.b32.xlu0 %v2373_v21, %s4120_s28  ;;  %v2203_v21 = vld [vmem:[#allocation3] sm:$0x3f] }
 0x321   :  { %3993 = vrot.lane.b32.xlu1 %v3992_v49, %s4115_s4 }
 0x324   :  { %3998 = vrot.lane.b32.xlu0 %v3997_v50, %s4114_s3 }
 0x325   :  { %2396 = vrot.lane.b32.xlu1 %v2374_v55, %s4119_s0  ;;  %v2651_v55 = vld [vmem:[#allocation3 + $0x79] sm:$0x3f] }
 0x328   :  { %4003 = vrot.lane.b32.xlu0 %v4002_v43, %s4117_s19 }
 0x329   :  { %2400 = vrot.lane.b32.xlu1 %v2375_v20, %s4121_s15 }
 0x32c   :  { %2479 = vrot.lane.b32.xlu0 %v5942_v37, %s4120_s28 }
 0x32d   :  { %4008 = vrot.lane.b32.xlu1 %v4007_v10, %s4116_s18 }
 0x330   :  { %4013 = vrot.lane.b32.xlu0 %v4012_v7, %s4122_s16 }
 0x331   :  { %2483 = vrot.lane.b32.xlu1 %v2456_v34, %s4119_s0 }
 0x334   :  { %2517 = vrot.lane.b32.xlu0 %v5955_v26, %s4120_s28 }
 0x335   :  { %2487 = vrot.lane.b32.xlu1 %v2457_v51, %s4121_s15 }
 0x338   :  { %2525 = vrot.lane.b32.xlu0 %v2500_v18, %s4121_s15 }
 0x339   :  { %2521 = vrot.lane.b32.xlu1 %v2499_v5, %s4119_s0 }
 0x33c   :  { %4023 = vrot.lane.b32.xlu0 %v4022_v56, %s4114_s3 }
 0x33d   :  { %4018 = vrot.lane.b32.xlu1 %v4017_v47, %s4115_s4 }
 0x340   :  { %4033 = vrot.lane.b32.xlu0 %v4032_v59, %s4116_s18 }
 0x341   :  { %4028 = vrot.lane.b32.xlu1 %v4027_v23, %s4117_s19 }
 0x343   :  { %v3924_v35 = vpop.permute.xlu0 %3923 }
 0x344   :  { %2597 = vrot.lane.b32.xlu0 %v2575_v14, %s4119_s0  ;;  %v3919_v9 = vpop.permute.xlu1 %3918  ;;  %v3925_v62 = vunpack.i.l.bf16 %v3924_v35  ;;  %v3926_v58 = vunpack.i.h.bf16 %v3924_v35 }
 0x345   :  { %2593 = vrot.lane.b32.xlu1 %v5970_v19, %s4120_s28  ;;  %v3920_v13 = vunpack.i.l.bf16 %v3919_v9  ;;  %v3921_v39 = vunpack.i.h.bf16 %v3919_v9 }
 0x347   :  { %v2289_v63 = vsel %vm125_vm0, %v5786_v61, %v3920_v13  ;;  %v2244_v20 = vsel %vm125_vm0, %v2203_v21, %v3921_v39 }
 0x348   :  { %2601 = vrot.lane.b32.xlu0 %v2576_v41, %s4121_s15  ;;  %v2290_v8 = vsel %vm2245_vm5, %v2289_v63, %v3925_v62  ;;  %v2246_v49 = vsel %vm2245_vm5, %v2244_v20, %v3926_v58 }
 0x349   :  { %4038 = vrot.lane.b32.xlu1 %v4037_v60, %s4122_s16 }
 0x34c   :  { %2555 = vrot.lane.b32.xlu0 %v5962_v24, %s4120_s28 }
 0x34d   :  { %4043 = vrot.lane.b32.xlu1 %v4042_v46, %s4115_s4 }
 0x350   :  { %4048 = vrot.lane.b32.xlu0 %v4047_v38, %s4114_s3 }
 0x351   :  { %2559 = vrot.lane.b32.xlu1 %v2537_v30, %s4119_s0 }
 0x354   :  { %4053 = vrot.lane.b32.xlu0 %v4052_v53, %s4117_s19 }
 0x355   :  { %2563 = vrot.lane.b32.xlu1 %v2538_v16, %s4121_s15  ;;  %v3934_v27 = vpop.permute.xlu0 %3933 }
 0x356   :  { %v3929_v15 = vpop.permute.xlu1 %3928  ;;  %v3935_v4 = vunpack.i.l.bf16 %v3934_v27  ;;  %v3936_v36 = vunpack.i.h.bf16 %v3934_v27 }
 0x357   :  { %v3930_v54 = vunpack.i.l.bf16 %v3929_v15  ;;  %v3931_v61 = vunpack.i.h.bf16 %v3929_v15 }
 0x358   :  { %2631 = vrot.lane.b32.xlu0 %v2612_v45, %s4120_s28 }
 0x359   :  { %4058 = vrot.lane.b32.xlu1 %v4057_v42, %s4116_s18  ;;  %v2291_v40 = vsel %vm2247_vm6, %v2290_v8, %v3930_v54  ;;  %v2248_v43 = vsel %vm2247_vm6, %v2246_v49, %v3931_v61 }
 0x35a   :  { %v2292_v57 = vsel %vm2249_vm7, %v2291_v40, %v3935_v4  ;;  %v2250_v7 = vsel %vm2249_vm7, %v2248_v43, %v3936_v36 }
 0x35c   :  { %2627 = vrot.lane.b32.xlu0 %v2576_v41, %s4122_s16 }
 0x35d   :  { %2635 = vrot.lane.b32.xlu1 %v2613_v52, %s4119_s0 }
 0x35e   :  { %v2283_v44 = vpop.permute.xlu0 %2282 }
 0x35f   :  { %v2279_v29 = vpop.permute.xlu1 %2278 }
 0x360   :  { %2669 = vrot.lane.b32.xlu0 %v2650_v22, %s4120_s28  ;;  %v2295_v51 = vsel %vm2255_vm9, %v2279_v29, %v2283_v44 }
 0x361   :  { %2639 = vrot.lane.b32.xlu1 %v2614_v0, %s4121_s15 }
 0x362   :  { %v2287_v33 = vpop.permute.xlu0 %2286 }
 0x363   :  { %v3939_v2 = vpop.permute.xlu1 %3938  ;;  %v2296_v47 = vsel %vm2257_vm11, %v2295_v51, %v2287_v33 }
 0x364   :  { %v3940_v6 = vunpack.i.l.bf16 %v3939_v2  ;;  %2665 = vrot.lane.b32.xlu0 %v2614_v0, %s4122_s16  ;;  %v3941_v34 = vunpack.i.h.bf16 %v3939_v2  ;;  %v2691_v59 = vrot.slane %v2296_v47, 2 }
 0x365   :  { %2673 = vrot.lane.b32.xlu1 %v2651_v55, %s4119_s0  ;;  %s4126_s0 = smov 24  }
 0x366   :  { %v2234_v48 = vpop.permute.xlu0 %2233  ;;  %v2293_v10 = vsel %vm2251_vm8, %v2292_v57, %v3940_v6  ;;  %v2252_v30 = vsel %vm2251_vm8, %v2250_v7, %v3941_v34 }
 0x367   :  { %v3944_v50 = vpop.permute.xlu1 %3943  ;;  %v2294_v56 = vsel %vm2253_vm10, %v2293_v10, %v2279_v29  ;;  %v2254_v16 = vsel %vm2253_vm10, %v2252_v30, %v2234_v48 }
 0x368   :  { %v2690_v23 = vrot.slane %v2294_v56, 2  ;;  %v3945_v45 = vunpack.i.l.bf16 %v3944_v50  ;;  %v3946_v42 = vunpack.i.h.bf16 %v3944_v50 }
 0x369   :  { %2677 = vrot.lane.b32.xlu1 %v2652_v11, %s4121_s15 }
 0x36a   :  { %v3949_v18 = vpop.permute.xlu0 %3948  ;;  %v2743_v53 = vsel %vm2742_vm12, %v2254_v16, %v2690_v23  ;;  %v2327_v22 = vsel %vm125_vm0, %v5795_v31, %v3945_v45  ;;  %v2365_v54 = vsel %vm125_vm0, %v5827_v12, %v3946_v42 }
 0x36b   :  { %v2238_v5 = vpop.permute.xlu1 %2237  ;;  %v3950_v35 = vunpack.i.l.bf16 %v3949_v18  ;;  %v3951_v15 = vunpack.i.h.bf16 %v3949_v18 }
 0x36c   :  { %v2256_v14 = vsel %vm2255_vm9, %v2234_v48, %v2238_v5 }
 0x36d   :  { %v2328_v44 = vsel %vm2245_vm5, %v2327_v22, %v3950_v35  ;;  %v2366_v58 = vsel %vm2245_vm5, %v2365_v54, %v3951_v15 }
 0x36e   :  { %v3954_v60 = vpop.permute.xlu0 %3953 }
 0x36f   :  { %v2242_v41 = vpop.permute.xlu1 %2241  ;;  %v3955_v27 = vunpack.i.l.bf16 %v3954_v60  ;;  %v3956_v62 = vunpack.i.h.bf16 %v3954_v60 }
 0x370   :  { %v2258_v46 = vsel %vm2257_vm11, %v2256_v14, %v2242_v41 }
 0x371   :  { %v2744_v38 = vsel %vm2742_vm12, %v2258_v46, %v2691_v59  ;;  %v2329_v0 = vsel %vm2247_vm6, %v2328_v44, %v3955_v27  ;;  %v2367_v8 = vsel %vm2247_vm6, %v2366_v58, %v3956_v62 }
 0x372   :  { %3667 = vmatprep.mubr.msk.f32.mxu0 %vm2793_vm13, %v2744_v38  ;;  %v2317_v9 = vpop.permute.xlu0 %2316 }
 0x373   :  { %v3959_v52 = vpop.permute.xlu1 %3958  ;;  %2889 = vmatmul.mubr.f32.vlgmr.msra.gmra.mrb[0].mxu0 %v2743_v53 }
 0x374   :  { %v3960_v13 = vunpack.i.l.bf16 %v3959_v52  ;;  %v3961_v29 = vunpack.i.h.bf16 %v3959_v52 }
 0x376   :  { %v3964_v39 = vpop.permute.xlu0 %3963  ;;  %v2330_v4 = vsel %vm2249_vm7, %v2329_v0, %v3960_v13  ;;  %v2368_v20 = vsel %vm2249_vm7, %v2367_v8, %v3961_v29 }
 0x377   :  { %v2321_v63 = vpop.permute.xlu1 %2320  ;;  %v3966_v21 = vunpack.i.h.bf16 %v3964_v39  ;;  %v3965_v55 = vunpack.i.l.bf16 %v3964_v39 }
 0x378   :  { %v2333_v33 = vsel %vm2255_vm9, %v2317_v9, %v2321_v63 }
 0x379   :  { %v2331_v31 = vsel %vm2251_vm8, %v2330_v4, %v3965_v55  ;;  %v2369_v40 = vsel %vm2251_vm8, %v2368_v20, %v3966_v21 }
 0x37a   :  { %v2355_v2 = vpop.permute.xlu0 %2354  ;;  %v2332_v12 = vsel %vm2253_vm10, %v2331_v31, %v2317_v9 }
 0x37b   :  { %v2325_v61 = vpop.permute.xlu1 %2324  ;;  %v2696_v11 = vrot.slane %v2332_v12, 4  ;;  %v2370_v49 = vsel %vm2253_vm10, %v2369_v40, %v2355_v2 }
 0x37c   :  { %v2334_v6 = vsel %vm2257_vm11, %v2333_v33, %v2325_v61  ;;  %v2702_v51 = vrot.slane %v2370_v49, 6  ;;  %v2449_v49 = vld [vmem:[#allocation3 + $0x40] sm:$0x3f] }
 0x37d   :  { %v2697_v36 = vrot.slane %v2334_v6, 4  ;;  %v2746_v34 = vsel %vm2745_vm4, %v2690_v23, %v2696_v11 }
 0x37e   :  { %v2363_v57 = vpop.permute.xlu0 %2362  ;;  %v2749_v47 = vsel %vm2748_vm14, %v2696_v11, %v2702_v51 }
 0x37f   :  { %v2359_v48 = vpop.permute.xlu1 %2358  ;;  %v2747_v50 = vsel %vm2745_vm4, %v2691_v59, %v2697_v36 }
 0x380   :  { %v2371_v43 = vsel %vm2255_vm9, %v2355_v2, %v2359_v48  ;;  %3668 = vmatprep.mubr.msk.f32.mxu0 %vm2793_vm13, %v2747_v50 }
 0x381   :  { %v2372_v10 = vsel %vm2257_vm11, %v2371_v43, %v2363_v57  ;;  %2894 = vmatmul.mubr.f32.gmra.mrb[2].mxu0 %v2746_v34 }
 0x382   :  { %v2703_v7 = vrot.slane %v2372_v10, 6  ;;  %v3974_v18 = vpop.permute.xlu0 %3973 }
 0x383   :  { %v3969_v5 = vpop.permute.xlu1 %3968  ;;  %v3975_v14 = vunpack.i.l.bf16 %v3974_v18  ;;  %v3976_v45 = vunpack.i.h.bf16 %v3974_v18 }
 0x384   :  { %v2750_v56 = vsel %vm2748_vm14, %v2697_v36, %v2703_v7  ;;  %v3970_v16 = vunpack.i.l.bf16 %v3969_v5  ;;  %v3971_v41 = vunpack.i.h.bf16 %v3969_v5 }
 0x385   :  { %3669 = vmatprep.mubr.msk.f32.mxu0 %vm2793_vm13, %v2750_v56 }
 0x386   :  { %2899 = vmatmul.mubr.f32.gmra.mrb[4].mxu0 %v2749_v47  ;;  %v3984_v30 = vpop.permute.xlu0 %3983  ;;  %v2441_v46 = vsel %vm125_vm0, %v5908_v25, %v3970_v16  ;;  %v2403_v42 = vsel %vm125_vm0, %v5865_v1, %v3971_v41 }
 0x387   :  { %v3979_v59 = vpop.permute.xlu1 %3978  ;;  %v3985_v53 = vunpack.i.l.bf16 %v3984_v30  ;;  %v2442_v35 = vsel %vm2245_vm5, %v2441_v46, %v3975_v14  ;;  %v3986_v22 = vunpack.i.h.bf16 %v3984_v30  ;;  %v2404_v62 = vsel %vm2245_vm5, %v2403_v42, %v3976_v45 }
 0x388   :  { %v3980_v38 = vunpack.i.l.bf16 %v3979_v59  ;;  %v3981_v27 = vunpack.i.h.bf16 %v3979_v59 }
 0x38a   :  { %v2435_v23 = vpop.permute.xlu0 %2434  ;;  %v2443_v15 = vsel %vm2247_vm6, %v2442_v35, %v3980_v38  ;;  %v2405_v39 = vsel %vm2247_vm6, %v2404_v62, %v3981_v27 }
 0x38b   :  { %v2431_v60 = vpop.permute.xlu1 %2430  ;;  %v2444_v44 = vsel %vm2249_vm7, %v2443_v15, %v3985_v53  ;;  %v2406_v1 = vsel %vm2249_vm7, %v2405_v39, %v3986_v22 }
 0x38c   :  { %v2447_v0 = vsel %vm2255_vm9, %v2431_v60, %v2435_v23 }
 0x38e   :  { %v2439_v9 = vpop.permute.xlu0 %2438 }
 0x38f   :  { %v3989_v52 = vpop.permute.xlu1 %3988  ;;  %v2448_v4 = vsel %vm2257_vm11, %v2447_v0, %v2439_v9 }
 0x390   :  { %v3990_v13 = vunpack.i.l.bf16 %v3989_v52  ;;  %v3991_v63 = vunpack.i.h.bf16 %v3989_v52  ;;  %v2709_v33 = vrot.slane %v2448_v4, 2 }
 0x392   :  { %v2393_v25 = vpop.permute.xlu0 %2392  ;;  %v2445_v54 = vsel %vm2251_vm8, %v2444_v44, %v3990_v13  ;;  %v2407_v8 = vsel %vm2251_vm8, %v2406_v1, %v3991_v63 }
 0x393   :  { %v3994_v29 = vpop.permute.xlu1 %3993  ;;  %v2446_v58 = vsel %vm2253_vm10, %v2445_v54, %v2431_v60  ;;  %v2408_v2 = vsel %vm2253_vm10, %v2407_v8, %v2393_v25 }
 0x394   :  { %v2708_v31 = vrot.slane %v2446_v58, 2  ;;  %v3995_v11 = vunpack.i.l.bf16 %v3994_v29  ;;  %v3996_v43 = vunpack.i.h.bf16 %v3994_v29 }
 0x396   :  { %v3999_v21 = vpop.permute.xlu0 %3998  ;;  %v2751_v36 = vsel %vm2742_vm12, %v2408_v2, %v2708_v31  ;;  %v2490_v7 = vsel %vm125_vm0, %v2449_v49, %v3995_v11  ;;  %v2528_v59 = vsel %vm125_vm0, %v5940_v28, %v3996_v43 }
 0x397   :  { %v2397_v55 = vpop.permute.xlu1 %2396  ;;  %v4000_v57 = vunpack.i.l.bf16 %v3999_v21  ;;  %v4001_v10 = vunpack.i.h.bf16 %v3999_v21 }
 0x398   :  { %v2409_v20 = vsel %vm2255_vm9, %v2393_v25, %v2397_v55 }
 0x399   :  { %v2491_v5 = vsel %vm2245_vm5, %v2490_v7, %v4000_v57  ;;  %v2529_v60 = vsel %vm2245_vm5, %v2528_v59, %v4001_v10 }
 0x39a   :  { %v4004_v61 = vpop.permute.xlu0 %4003 }
 0x39b   :  { %v2401_v12 = vpop.permute.xlu1 %2400  ;;  %v4005_v34 = vunpack.i.l.bf16 %v4004_v61  ;;  %v4006_v18 = vunpack.i.h.bf16 %v4004_v61 }
 0x39c   :  { %v2410_v40 = vsel %vm2257_vm11, %v2409_v20, %v2401_v12 }
 0x39d   :  { %v2752_v6 = vsel %vm2742_vm12, %v2410_v40, %v2709_v33  ;;  %v2492_v16 = vsel %vm2247_vm6, %v2491_v5, %v4005_v34  ;;  %v2530_v46 = vsel %vm2247_vm6, %v2529_v60, %v4006_v18 }
 0x39e   :  { %3670 = vmatprep.mubr.msk.f32.mxu0 %vm2793_vm13, %v2752_v6  ;;  %v2480_v48 = vpop.permute.xlu0 %2479 }
 0x39f   :  { %v4009_v50 = vpop.permute.xlu1 %4008  ;;  %2904 = vmatmul.mubr.f32.gmra.mrb[6].mxu0 %v2751_v36 }
 0x3a0   :  { %v4010_v51 = vunpack.i.l.bf16 %v4009_v50  ;;  %v4011_v56 = vunpack.i.h.bf16 %v4009_v50 }
 0x3a2   :  { %v4014_v47 = vpop.permute.xlu0 %4013  ;;  %v2493_v41 = vsel %vm2249_vm7, %v2492_v16, %v4010_v51  ;;  %v2531_v35 = vsel %vm2249_vm7, %v2530_v46, %v4011_v56 }
 0x3a3   :  { %v2484_v30 = vpop.permute.xlu1 %2483  ;;  %v4016_v14 = vunpack.i.h.bf16 %v4014_v47  ;;  %v4015_v23 = vunpack.i.l.bf16 %v4014_v47 }
 0x3a4   :  { %v2496_v45 = vsel %vm2255_vm9, %v2480_v48, %v2484_v30 }
 0x3a5   :  { %v2494_v38 = vsel %vm2251_vm8, %v2493_v41, %v4015_v23  ;;  %v2532_v52 = vsel %vm2251_vm8, %v2531_v35, %v4016_v14 }
 0x3a6   :  { %v2518_v53 = vpop.permute.xlu0 %2517  ;;  %v2495_v28 = vsel %vm2253_vm10, %v2494_v38, %v2480_v48 }
 0x3a7   :  { %v2488_v9 = vpop.permute.xlu1 %2487  ;;  %v2714_v27 = vrot.slane %v2495_v28, 4  ;;  %v2533_v13 = vsel %vm2253_vm10, %v2532_v52, %v2518_v53 }
 0x3a8   :  { %v2497_v42 = vsel %vm2257_vm11, %v2496_v45, %v2488_v9  ;;  %v2720_v63 = vrot.slane %v2533_v13, 6 }
 0x3a9   :  { %v2715_v15 = vrot.slane %v2497_v42, 4  ;;  %v2753_v29 = vsel %vm2745_vm4, %v2708_v31, %v2714_v27 }
 0x3aa   :  { %v2526_v22 = vpop.permute.xlu0 %2525  ;;  %v2755_v55 = vsel %vm2748_vm14, %v2714_v27, %v2720_v63 }
 0x3ab   :  { %v2522_v62 = vpop.permute.xlu1 %2521  ;;  %v2754_v44 = vsel %vm2745_vm4, %v2709_v33, %v2715_v15 }
 0x3ac   :  { %v2534_v25 = vsel %vm2255_vm9, %v2518_v53, %v2522_v62  ;;  %3671 = vmatprep.mubr.msk.f32.mxu0 %vm2793_vm13, %v2754_v44 }
 0x3ad   :  { %v2535_v39 = vsel %vm2257_vm11, %v2534_v25, %v2526_v22  ;;  %2909 = vmatmul.mubr.f32.gmra.mrb[8].mxu0 %v2753_v29 }
 0x3ae   :  { %v2721_v54 = vrot.slane %v2535_v39, 6  ;;  %v4024_v0 = vpop.permute.xlu0 %4023 }
 0x3af   :  { %v4019_v1 = vpop.permute.xlu1 %4018  ;;  %v4025_v33 = vunpack.i.l.bf16 %v4024_v0  ;;  %v4026_v40 = vunpack.i.h.bf16 %v4024_v0 }
 0x3b0   :  { %v2756_v21 = vsel %vm2748_vm14, %v2715_v15, %v2721_v54  ;;  %v4020_v8 = vunpack.i.l.bf16 %v4019_v1  ;;  %v4021_v20 = vunpack.i.h.bf16 %v4019_v1 }
 0x3b1   :  { %3672 = vmatprep.mubr.msk.f32.mxu0 %vm2793_vm13, %v2756_v21 }
 0x3b2   :  { %2914 = vmatmul.mubr.f32.gmra.mrb[10].mxu0 %v2755_v55  ;;  %v4034_v58 = vpop.permute.xlu0 %4033  ;;  %v2604_v61 = vsel %vm125_vm0, %v5955_v26, %v4020_v8  ;;  %v2566_v57 = vsel %vm125_vm0, %v5942_v37, %v4021_v20 }
 0x3b3   :  { %v4029_v4 = vpop.permute.xlu1 %4028  ;;  %v4035_v6 = vunpack.i.l.bf16 %v4034_v58  ;;  %v2605_v11 = vsel %vm2245_vm5, %v2604_v61, %v4025_v33  ;;  %v4036_v34 = vunpack.i.h.bf16 %v4034_v58  ;;  %v2567_v10 = vsel %vm2245_vm5, %v2566_v57, %v4026_v40 }
 0x3b4   :  { %v4030_v12 = vunpack.i.l.bf16 %v4029_v4  ;;  %v4031_v48 = vunpack.i.h.bf16 %v4029_v4 }
 0x3b6   :  { %v2598_v2 = vpop.permute.xlu0 %2597  ;;  %v2606_v50 = vsel %vm2247_vm6, %v2605_v11, %v4030_v12  ;;  %v2568_v18 = vsel %vm2247_vm6, %v2567_v10, %v4031_v48 }
 0x3b7   :  { %v2594_v31 = vpop.permute.xlu1 %2593  ;;  %v2607_v51 = vsel %vm2249_vm7, %v2606_v50, %v4035_v6  ;;  %v2569_v37 = vsel %vm2249_vm7, %v2568_v18, %v4036_v34 }
 0x3b8   :  { %v2610_v47 = vsel %vm2255_vm9, %v2594_v31, %v2598_v2 }
 0x3ba   :  { %v2602_v36 = vpop.permute.xlu0 %2601 }
 0x3bb   :  { %v4039_v49 = vpop.permute.xlu1 %4038  ;;  %v2611_v14 = vsel %vm2257_vm11, %v2610_v47, %v2602_v36 }
 0x3bc   :  { %v4040_v43 = vunpack.i.l.bf16 %v4039_v49  ;;  %v4041_v5 = vunpack.i.h.bf16 %v4039_v49  ;;  %v2727_v41 = vrot.slane %v2611_v14, 2 }
 0x3be   :  { %v2556_v26 = vpop.permute.xlu0 %2555  ;;  %v2608_v56 = vsel %vm2251_vm8, %v2607_v51, %v4040_v43  ;;  %v2570_v23 = vsel %vm2251_vm8, %v2569_v37, %v4041_v5  ;;  %v6130_v5 = vld [vmem:[%s6633_s6] ss:$0 sm:$0xff] }
 0x3bf   :  { %v4044_v7 = vpop.permute.xlu1 %4043  ;;  %v2609_v16 = vsel %vm2253_vm10, %v2608_v56, %v2594_v31  ;;  %v2571_v46 = vsel %vm2253_vm10, %v2570_v23, %v2556_v26 }
 0x3c0   :  { %v2726_v60 = vrot.slane %v2609_v16, 2  ;;  %v4045_v38 = vunpack.i.l.bf16 %v4044_v7  ;;  %v4046_v54 = vunpack.i.h.bf16 %v4044_v7 }
 0x3c2   :  { %v4049_v30 = vpop.permute.xlu0 %4048  ;;  %v2757_v27 = vsel %vm2742_vm12, %v2571_v46, %v2726_v60  ;;  %v2642_v15 = vsel %vm125_vm0, %v5962_v24, %v4045_v38  ;;  %v2680_v33 = vsel %vm125_vm0, %v5970_v19, %v4046_v54  ;;  %vm3073_vm0 = vcmask 647488  }
 0x3c3   :  { %v2560_v59 = vpop.permute.xlu1 %2559  ;;  %v4050_v9 = vunpack.i.l.bf16 %v4049_v30  ;;  %v4051_v1 = vunpack.i.h.bf16 %v4049_v30 }
 0x3c4   :  { %v2572_v45 = vsel %vm2255_vm9, %v2556_v26, %v2560_v59 }
 0x3c5   :  { %v2643_v62 = vsel %vm2245_vm5, %v2642_v15, %v4050_v9  ;;  %v2681_v20 = vsel %vm2245_vm5, %v2680_v33, %v4051_v1 }
 0x3c6   :  { %v4054_v53 = vpop.permute.xlu0 %4053 }
 0x3c7   :  { %v2564_v35 = vpop.permute.xlu1 %2563  ;;  %v4055_v52 = vunpack.i.l.bf16 %v4054_v53  ;;  %v4056_v55 = vunpack.i.h.bf16 %v4054_v53 }
 0x3c8   :  { %v2573_v28 = vsel %vm2257_vm11, %v2572_v45, %v2564_v35 }
 0x3c9   :  { %v2758_v42 = vsel %vm2742_vm12, %v2573_v28, %v2727_v41  ;;  %v2644_v25 = vsel %vm2247_vm6, %v2643_v62, %v4055_v52  ;;  %v2682_v12 = vsel %vm2247_vm6, %v2681_v20, %v4056_v55  ;;  %vm3147_vm6 = vcmask 1041280  }
 0x3ca   :  { %3673 = vmatprep.mubr.msk.f32.mxu0 %vm2793_vm13, %v2758_v42  ;;  %v2632_v13 = vpop.permute.xlu0 %2631 }
 0x3cb   :  { %v4059_v22 = vpop.permute.xlu1 %4058  ;;  %2919 = vmatmul.mubr.f32.gmra.mrb[12].mxu0 %v2757_v27 }
 0x3cc   :  { %v4060_v44 = vunpack.i.l.bf16 %v4059_v22  ;;  %v4061_v24 = vunpack.i.h.bf16 %v4059_v22 }
 0x3ce   :  { %v2645_v29 = vsel %vm2249_vm7, %v2644_v25, %v4060_v44  ;;  %v2628_v39 = vpop.permute.xlu0 %2627  ;;  %v2683_v6 = vsel %vm2249_vm7, %v2682_v12, %v4061_v24  ;;  %vm3148_vm7 = vcmask 190466  }
 0x3cf   :  { %v2636_v63 = vpop.permute.xlu1 %2635  ;;  %v2646_v0 = vsel %vm2251_vm8, %v2645_v29, %v2628_v39 }
 0x3d0   :  { %v2647_v21 = vsel %vm2253_vm10, %v2646_v0, %v2632_v13  ;;  %v2648_v58 = vsel %vm2255_vm9, %v2632_v13, %v2636_v63 }
 0x3d1   :  { %v2732_v2 = vrot.slane %v2647_v21, 4 }
 0x3d2   :  { %v2670_v4 = vpop.permute.xlu0 %2669 }
 0x3d3   :  { %v2640_v8 = vpop.permute.xlu1 %2639  ;;  %v2759_v19 = vsel %vm2745_vm4, %v2726_v60, %v2732_v2 }
 0x3d4   :  { %v2649_v31 = vsel %vm2257_vm11, %v2648_v58, %v2640_v8 }
 0x3d5   :  { %v2733_v61 = vrot.slane %v2649_v31, 4 }
 0x3d6   :  { %v2666_v40 = vpop.permute.xlu0 %2665 }
 0x3d7   :  { %v2674_v11 = vpop.permute.xlu1 %2673  ;;  %v2760_v36 = vsel %vm2745_vm4, %v2727_v41, %v2733_v61  ;;  %v2684_v49 = vsel %vm2251_vm8, %v2683_v6, %v2666_v40  ;;  %v3269_v40 = vld [vmem:[%s6636_s9 + $0x8] sm:$0xff]  ;;  %v3271_v6 = vld [vmem:[%s6636_s9 + $0x18] sm:$0xff]  ;;  %vm3107_vm4 = vmor %vm3106_vm2, %vm3105_vm1  ;;  %vm3144_vm8 = vcmask 916480  }
 0x3d8   :  { %3674 = vmatprep.mubr.msk.f32.mxu0 %vm2793_vm13, %v2760_v36  ;;  %v2685_v57 = vsel %vm2253_vm10, %v2684_v49, %v2670_v4  ;;  %v2686_v48 = vsel %vm2255_vm9, %v2670_v4, %v2674_v11  ;;  %v3268_v11 = vld [vmem:[%s6636_s9] sm:$0xff]  ;;  %v3719_v36 = vpack.c.bf16 %v3271_v6, %v3269_v40  ;;  %v3270_v49 = vld [vmem:[%s6636_s9 + $0x10] sm:$0xff]  ;;  %vm3120_vm9 = vcmask 909888  }
 0x3d9   :  { %2924 = vmatmul.mubr.f32.gmra.mrb[14].mxu0 %v2759_v19  ;;  %v2738_v43 = vrot.slane %v2685_v57, 6  ;;  %v3273_v19 = vld [vmem:[%s6636_s9 + $0x28] sm:$0xff]  ;;  %v3275_v57 = vld [vmem:[%s6636_s9 + $0x38] sm:$0xff] }
 0x3da   :  { %3720 = vmatprep.subr.bf16.mxu1 %v3719_v36 }
 0x3db   :  { %v2678_v50 = vpop.permute.xlu1 %2677  ;;  %v2761_v26 = vsel %vm2748_vm14, %v2732_v2, %v2738_v43  ;;  %v3272_v43 = vld [vmem:[%s6636_s9 + $0x20] sm:$0xff] }
 0x3dc   :  { %v2687_v34 = vsel %vm2257_vm11, %v2686_v48, %v2678_v50  ;;  %v3721_v48 = vpack.c.bf16 %v3270_v49, %v3268_v11  ;;  %v3723_v50 = vpack.c.bf16 %v3275_v57, %v3273_v19  ;;  %vm3149_vm11 = vmor %vm3148_vm7, %vm3147_vm6 }
 0x3dd   :  { %v2739_v10 = vrot.slane %v2687_v34, 6  ;;  %v3274_v34 = vld [vmem:[%s6636_s9 + $0x30] sm:$0xff] }
 0x3de   :  { %3722 = vmatpush1.bf16.msra.mxu1 %v3721_v48 }
 0x3df   :  { %v2762_v51 = vsel %vm2748_vm14, %v2733_v61, %v2739_v10  ;;  %v3277_v10 = vld [vmem:[%s6636_s9 + $0x48] sm:$0xff]  ;;  %3724 = vmatprep.subr.bf16.mxu1 %v3723_v50  ;;  %vm3389_vm14 = vcmask 850944  }
 0x3e0   :  { %3675 = vmatprep.mubr.msk.f32.mxu0 %vm2793_vm13, %v2762_v51  ;;  %v3279_v51 = vld [vmem:[%s6636_s9 + $0x58] sm:$0xff]  ;;  %vm3156_vm13 = vcmask 516288  }
 0x3e1   :  { %2929 = vmatmul.mubr.f32.gmra.mrb[16].mxu0 %v2761_v26  ;;  %v3725_v26 = vpack.c.bf16 %v3274_v34, %v3272_v43 }
 0x3e3   :  { %3726 = vmatpush1.bf16.msra.mxu1 %v3725_v26 }
 0x446   :  { %v2890_v7 = vpop.f32.mrb[0].mxu0 }
 0x447   :  { %v2892_v18 = vpop.f32.mrb[1].mxu0  ;;  %v6133_v56 = vadd.f32 %v6130_v5, %v2890_v7  ;;  %v3727_v7 = vpack.c.bf16 %v3279_v51, %v3277_v10 }
 0x448   :  { %v3276_v18 = vld [vmem:[%s6636_s9 + $0x40] sm:$0xff] }
 0x449   :  { %v2957_v37 = vmul.f32 %v6133_v56, %v6133_v56  ;;  %v2934_v16 = vsel %vm2245_vm5, %v6133_v56, 0.0  ;;  %3728 = vmatprep.subr.bf16.mxu1 %v3727_v7 }
 0x44b   :  { %v2966_v41 = vsel %vm2245_vm5, %v2957_v37, 0.0  ;;  %v3281_v37 = vld [vmem:[%s6636_s9 + $0x68] sm:$0xff] }
 0x454   :  { %v2895_v47 = vpop.f32.mrb[2].mxu0 }
 0x455   :  { %v6138_v30 = vadd.f32 %v6130_v5, %v2895_v47  ;;  %v2897_v59 = vpop.f32.mrb[3].mxu0  ;;  %v3278_v47 = vld [vmem:[%s6636_s9 + $0x50] sm:$0xff] }
 0x456   :  { %v3283_v59 = vld [vmem:[%s6636_s9 + $0x78] sm:$0xff] }
 0x457   :  { %v2935_v14 = vsel %vm2245_vm5, %v6138_v30, 0.0  ;;  %v2958_v23 = vmul.f32 %v6138_v30, %v6138_v30 }
 0x458   :  { %v2936_v60 = vadd.f32 %v2935_v14, %v2934_v16  ;;  %v3729_v16 = vpack.c.bf16 %v3278_v47, %v3276_v18  ;;  %v3731_v14 = vpack.c.bf16 %v3283_v59, %v3281_v37 }
 0x459   :  { %v2967_v46 = vsel %vm2245_vm5, %v2958_v23, 0.0  ;;  %v2900_v45 = vpop.f32.mrb[4].mxu0  ;;  %v3280_v23 = vld [vmem:[%s6636_s9 + $0x60] sm:$0xff] }
 0x45a   :  { %v2968_v38 = vadd.f32 %v2967_v46, %v2966_v41  ;;  %v6149_v53 = vadd.f32 %v6130_v5, %v2900_v45  ;;  %v2902_v35 = vpop.f32.mrb[5].mxu0  ;;  %v3285_v46 = vld [vmem:[%s6636_s9 + $0x88] sm:$0xff]  ;;  %3730 = vmatpush1.bf16.msra.mxu1 %v3729_v16 }
 0x45b   :  { %3732 = vmatprep.subr.bf16.mxu1 %v3731_v14 }
 0x45c   :  { %v2937_v9 = vsel %vm2245_vm5, %v6149_v53, 0.0  ;;  %v2959_v28 = vmul.f32 %v6149_v53, %v6149_v53 }
 0x45d   :  { %v2938_v52 = vadd.f32 %v2937_v9, %v2936_v60  ;;  %v3282_v60 = vld [vmem:[%s6636_s9 + $0x70] sm:$0xff] }
 0x45e   :  { %v2969_v42 = vsel %vm2245_vm5, %v2959_v28, 0.0  ;;  %v3733_v9 = vpack.c.bf16 %v3282_v60, %v3280_v23  ;;  %v2993_v60 = vld [vmem:[%s6634_s7] sm:$0x1] }
 0x45f   :  { %v2970_v27 = vadd.f32 %v2969_v42, %v2968_v38  ;;  %v3287_v38 = vld [vmem:[%s6636_s9 + $0x98] sm:$0xff] }
 0x460   :  { %v3735_v42 = vpack.c.bf16 %v3287_v38, %v3285_v46  ;;  %3734 = vmatpush1.bf16.msra.mxu1 %v3733_v9  ;;  %v2997_v38 = vld [vmem:[%s6635_s8] sm:$0x1] }
 0x462   :  { %3736 = vmatprep.subr.bf16.mxu1 %v3735_v42 }
 0x472   :  { %v2905_v15 = vpop.f32.mrb[6].mxu0 }
 0x473   :  { %v6157_v13 = vadd.f32 %v6130_v5, %v2905_v15  ;;  %v2907_v22 = vpop.f32.mrb[7].mxu0  ;;  %v3286_v15 = vld [vmem:[%s6636_s9 + $0x90] sm:$0xff] }
 0x475   :  { %v2939_v62 = vsel %vm2245_vm5, %v6157_v13, 0.0  ;;  %v2960_v44 = vmul.f32 %v6157_v13, %v6157_v13 }
 0x476   :  { %v2940_v25 = vadd.f32 %v2939_v62, %v2938_v52  ;;  %v3289_v62 = vld [vmem:[%s6636_s9 + $0xa8] sm:$0xff] }
 0x477   :  { %v2971_v29 = vsel %vm2245_vm5, %v2960_v44, 0.0  ;;  %v3291_v44 = vld [vmem:[%s6636_s9 + $0xb8] sm:$0xff] }
 0x478   :  { %v2972_v39 = vadd.f32 %v2971_v29, %v2970_v27  ;;  %v3284_v27 = vld [vmem:[%s6636_s9 + $0x80] sm:$0xff] }
 0x480   :  { %v2910_v63 = vpop.f32.mrb[8].mxu0 }
 0x481   :  { %v6165_v54 = vadd.f32 %v6130_v5, %v2910_v63  ;;  %v2912_v0 = vpop.f32.mrb[9].mxu0  ;;  %v3739_v63 = vpack.c.bf16 %v3291_v44, %v3289_v62 }
 0x482   :  { %v3288_v0 = vld [vmem:[%s6636_s9 + $0xa0] sm:$0xff] }
 0x483   :  { %v2941_v1 = vsel %vm2245_vm5, %v6165_v54, 0.0  ;;  %v2961_v21 = vmul.f32 %v6165_v54, %v6165_v54 }
 0x484   :  { %v2942_v55 = vadd.f32 %v2941_v1, %v2940_v25  ;;  %v3290_v1 = vld [vmem:[%s6636_s9 + $0xb0] sm:$0xff] }
 0x485   :  { %v2973_v24 = vsel %vm2245_vm5, %v2961_v21, 0.0  ;;  %v2915_v4 = vpop.f32.mrb[10].mxu0  ;;  %v3741_v21 = vpack.c.bf16 %v3290_v1, %v3288_v0 }
 0x486   :  { %v2974_v58 = vadd.f32 %v2973_v24, %v2972_v39  ;;  %v6173_v8 = vadd.f32 %v6130_v5, %v2915_v4  ;;  %v2917_v33 = vpop.f32.mrb[11].mxu0  ;;  %v3737_v39 = vpack.c.bf16 %v3286_v15, %v3284_v27 }
 0x488   :  { %v2943_v2 = vsel %vm2245_vm5, %v6173_v8, 0.0  ;;  %v2962_v31 = vmul.f32 %v6173_v8, %v6173_v8  ;;  %3738 = vmatpush1.bf16.msra.mxu1 %v3737_v39 }
 0x489   :  { %v2944_v20 = vadd.f32 %v2943_v2, %v2942_v55  ;;  %3740 = vmatprep.subr.bf16.mxu1 %v3739_v63 }
 0x48a   :  { %v2975_v61 = vsel %vm2245_vm5, %v2962_v31, 0.0 }
 0x48b   :  { %v2976_v12 = vadd.f32 %v2975_v61, %v2974_v58 }
 0x48c   :  { %3742 = vmatpush1.bf16.msra.mxu1 %v3741_v21 }
 0x49e   :  { %v2920_v41 = vpop.f32.mrb[12].mxu0 }
 0x49f   :  { %v6235_v45 = vadd.f32 %v6130_v5, %v2920_v41  ;;  %v2922_v35 = vpop.f32.mrb[13].mxu0 }
 0x4a1   :  { %v2945_v28 = vsel %vm2245_vm5, %v6235_v45, 0.0  ;;  %v2963_v52 = vmul.f32 %v6235_v45, %v6235_v45 }
 0x4a2   :  { %v2946_v22 = vadd.f32 %v2945_v28, %v2944_v20 }
 0x4a3   :  { %v2977_v25 = vsel %vm2245_vm5, %v2963_v52, 0.0 }
 0x4a4   :  { %v2978_v29 = vadd.f32 %v2977_v25, %v2976_v12 }
 0x4ac   :  { %v2925_v55 = vpop.f32.mrb[14].mxu0 }
 0x4ad   :  { %v2926_v24 = vadd.f32 %v6130_v5, %v2925_v55  ;;  %v2927_v58 = vpop.f32.mrb[15].mxu0 }
 0x4af   :  { %v2947_v4 = vsel %vm2245_vm5, %v2926_v24, 0.0  ;;  %v2964_v33 = vmul.f32 %v2926_v24, %v2926_v24 }
 0x4b0   :  { %v2948_v2 = vadd.f32 %v2947_v4, %v2946_v22 }
 0x4b1   :  { %v2979_v31 = vsel %vm2245_vm5, %v2964_v33, 0.0 }
 0x4b2   :  { %v2980_v20 = vadd.f32 %v2979_v31, %v2978_v29 }
 0x4b4   :  { %v2930_v61 = vpop.f32.mrb[16].mxu0 }
 0x4b5   :  { %v2931_v12 = vadd.f32 %v6130_v5, %v2930_v61  ;;  %v2932_v40 = vpop.f32.mrb[17].mxu0 }
 0x4b6   :  { %v3293_v40 = vld [vmem:[%s6636_s9 + $0xc8] sm:$0xff] }
 0x4b7   :  { %v2949_v6 = vsel %vm2245_vm5, %v2931_v12, 0.0  ;;  %v2965_v11 = vmul.f32 %v2931_v12, %v2931_v12 }
 0x4b8   :  { %v2950_v36 = vadd.f32 %v2949_v6, %v2948_v2  ;;  %v3295_v6 = vld [vmem:[%s6636_s9 + $0xd8] sm:$0xff] }
 0x4b9   :  { %v2981_v49 = vsel %vm2245_vm5, %v2965_v11, 0.0 }
 0x4ba   :  { %v2951_v19 = vrot.slane %v2950_v36, 4  ;;  %v2982_v57 = vadd.f32 %v2981_v49, %v2980_v20  ;;  %v3743_v49 = vpack.c.bf16 %v3295_v6, %v3293_v40 }
 0x4bc   :  { %v2952_v48 = vadd.f32 %v2951_v19, %v2950_v36  ;;  %v2983_v50 = vrot.slane %v2982_v57, 4  ;;  %3744 = vmatprep.subr.bf16.mxu1 %v3743_v49 }
 0x4be   :  { %v2953_v43 = vrot.slane %v2952_v48, 2  ;;  %v2984_v34 = vadd.f32 %v2983_v50, %v2982_v57  ;;  %v6737_v50 = vld [vmem:[#allocation11_spill] sm:$0xff] }
 0x4c0   :  { %v2954_v10 = vadd.f32 %v2953_v43, %v2952_v48  ;;  %v2985_v51 = vrot.slane %v2984_v34, 2 }
 0x4c2   :  { %v2955_v26 = vrot.slane %v2954_v10, 1  ;;  %v2986_v7 = vadd.f32 %v2985_v51, %v2984_v34 }
 0x4c4   :  { %v2956_v18 = vadd.f32 %v2955_v26, %v2954_v10  ;;  %v2987_v47 = vrot.slane %v2986_v7, 1 }
 0x4c6   :  { %v2988_v5 = vadd.f32 %v2987_v47, %v2986_v7  ;;  %v2989_v37 = vmul.f32 0.013888889, %v2956_v18 }
 0x4c8   :  { %v2990_v59 = vmul.f32 0.013888889, %v2988_v5  ;;  %v2991_v16 = vmul.f32 %v2989_v37, %v2989_v37 }
 0x4ca   :  { %v2992_v14 = vsub.f32 %v2990_v59, %v2991_v16 }
 0x4cc   :  { %v2994_v23 = vadd.f32 1e-05, %v2992_v14 }
 0x4ce   :  { %4065 = vrsqrt.f32 %v2994_v23 }
 0x4d8   :  { %v4066_v41 = vpop.eup %4065 }
 0x4d9   :  { %v2996_v46 = vmul.f32 %v4066_v41, %v2993_v60 }
 0x4db   :  { %v2998_v35 = vmul.f32 %v2996_v46, %v2989_v37  ;;  %v3004_v9 = vrot.slane %v2996_v46, %v6732_v17 }
 0x4dd   :  { %v2999_v28 = vsub.f32 %v2997_v38, %v2998_v35  ;;  %v3014_v52 = vmul.f32 %v3004_v9, %v2931_v12  ;;  %v3012_v42 = vmul.f32 %v3004_v9, %v6235_v45  ;;  %v3013_v27 = vmul.f32 %v3004_v9, %v2926_v24 }
 0x4de   :  { %v3007_v15 = vmul.f32 %v3004_v9, %v6138_v30  ;;  %v3008_v22 = vmul.f32 %v3004_v9, %v6149_v53  ;;  %v3009_v62 = vmul.f32 %v3004_v9, %v6157_v13  ;;  %v3010_v44 = vmul.f32 %v3004_v9, %v6165_v54 }
 0x4df   :  { %v3019_v25 = vrot.slane %v2999_v28, %v6732_v17  ;;  %v3011_v29 = vmul.f32 %v3004_v9, %v6173_v8  ;;  %v3006_v39 = vmul.f32 %v3004_v9, %v6133_v56  ;;  %v4123_v8 = vmov 1983009808  }
 0x4e0   :  { %v3062_v20 = vunpack.c.l.s4 %v4123_v8  ;;  %v3301_v8 = vld [vmem:[%s6636_s9 + $0x108] sm:$0xff] }
 0x4e1   :  { %v3029_v63 = vadd.f32 %v3019_v25, %v3014_v52  ;;  %v3027_v0 = vadd.f32 %v3019_v25, %v3012_v42  ;;  %v3028_v1 = vadd.f32 %v3019_v25, %v3013_v27  ;;  %v3022_v21 = vadd.f32 %v3019_v25, %v3007_v15 }
 0x4e2   :  { %v3023_v45 = vadd.f32 %v3019_v25, %v3008_v22  ;;  %v3024_v55 = vadd.f32 %v3019_v25, %v3009_v62  ;;  %v3025_v24 = vadd.f32 %v3019_v25, %v3010_v44  ;;  %v3026_v30 = vadd.f32 %v3019_v25, %v3011_v29  ;;  %v3292_v44 = vld [vmem:[%s6636_s9 + $0xc0] sm:$0xff] }
 0x4e3   :  { %v3038_v58 = vmax.f32 %v3029_v63, 0.0  ;;  %v3036_v53 = vmax.f32 %v3027_v0, 0.0  ;;  %v3037_v4 = vmax.f32 %v3028_v1, 0.0  ;;  %v3031_v13 = vmax.f32 %v3022_v21, 0.0 }
 0x4e4   :  { %v3032_v33 = vmax.f32 %v3023_v45, 0.0  ;;  %v3033_v54 = vmax.f32 %v3024_v55, 0.0  ;;  %v3034_v2 = vmax.f32 %v3025_v24, 0.0  ;;  %v3035_v31 = vmax.f32 %v3026_v30, 0.0 }
 0x4e5   :  { %3047 = vst.msk [vmem:[#allocation4 + $0x40] sm:$0xff] %vm2245_vm5, %v3038_v58  ;;  %3045 = vst.msk [vmem:[#allocation4 + $0x30] sm:$0xff] %vm2245_vm5, %v3036_v53  ;;  %v3021_v56 = vadd.f32 %v3019_v25, %v3006_v39  ;;  %v3063_v12 = vunpack.c.0.s8 %v3062_v20 }
 0x4e6   :  { %3046 = vst.msk [vmem:[#allocation4 + $0x38] sm:$0xff] %vm2245_vm5, %v3037_v4  ;;  %3040 = vst.msk [vmem:[#allocation4 + $0x8] sm:$0xff] %vm2245_vm5, %v3031_v13  ;;  %v3294_v13 = vld [vmem:[%s6636_s9 + $0xd0] sm:$0xff] }
 0x4e7   :  { %3041 = vst.msk [vmem:[#allocation4 + $0x10] sm:$0xff] %vm2245_vm5, %v3032_v33  ;;  %3042 = vst.msk [vmem:[#allocation4 + $0x18] sm:$0xff] %vm2245_vm5, %v3033_v54  ;;  %v3030_v61 = vmax.f32 %v3021_v56, 0.0  ;;  %v6297_v43 = vsub.s32 %v3063_v12, %v6737_v50  ;;  %v3297_v33 = vld [vmem:[%s6636_s9 + $0xe8] sm:$0xff]  ;;  %v3299_v54 = vld [vmem:[%s6636_s9 + $0xf8] sm:$0xff] }
 0x4e8   :  { %3043 = vst.msk [vmem:[#allocation4 + $0x20] sm:$0xff] %vm2245_vm5, %v3034_v2  ;;  %3044 = vst.msk [vmem:[#allocation4 + $0x28] sm:$0xff] %vm2245_vm5, %v3035_v31  ;;  %v3745_v2 = vpack.c.bf16 %v3294_v13, %v3292_v44  ;;  %v3296_v31 = vld [vmem:[%s6636_s9 + $0xe0] sm:$0xff]  ;;  %v3298_v56 = vld [vmem:[%s6636_s9 + $0xf0] sm:$0xff]  ;;  %v3747_v40 = vpack.c.bf16 %v3299_v54, %v3297_v33 }
 0x4e9   :  { %3039 = vst.msk [vmem:[#allocation4] sm:$0xff] %vm2245_vm5, %v3030_v61  ;;  %v3303_v12 = vld [vmem:[%s6636_s9 + $0x118] sm:$0xff]  ;;  %v3749_v6 = vpack.c.bf16 %v3298_v56, %v3296_v31  ;;  %v3325_v13 = vld [vmem:[%s6636_s9 + $0x1c8] sm:$0xff]  ;;  %v3324_v31 = vld [vmem:[%s6636_s9 + $0x1c0] sm:$0xff]  ;;  %vm3114_vm5 = vcmask 581888  }
 0x4ea   :  { %3746 = vmatpush1.bf16.msra.mxu1 %v3745_v2  ;;  %v3751_v49 = vpack.c.bf16 %v3303_v12, %v3301_v8  ;;  %v3319_v44 = vld [vmem:[%s6636_s9 + $0x198] sm:$0xff]  ;;  %v3326_v56 = vld [vmem:[%s6636_s9 + $0x1d0] sm:$0xff]  ;;  %v3329_v8 = vld [vmem:[%s6636_s9 + $0x1e8] sm:$0xff] }
 0x4eb   :  { %3748 = vmatprep.subr.bf16.mxu1 %v3747_v40  ;;  %v3327_v33 = vld [vmem:[%s6636_s9 + $0x1d8] sm:$0xff]  ;;  %v3328_v12 = vld [vmem:[%s6636_s9 + $0x1e0] sm:$0xff]  ;;  %v3330_v40 = vld [vmem:[%s6636_s9 + $0x1f0] sm:$0xff] }
 0x4ec   :  { %v3196_v11 = vld [vmem:[#allocation4 + $0x30] ss:$2 sm:$0x7]  ;;  %v3198_v36 = vld [vmem:[#allocation4 + $0x31] ss:$2 sm:$0x7]  ;;  %v3775_v2 = vpack.c.bf16 %v3327_v33, %v3325_v13 }
 0x4ed   :  { %v3199_v19 = vmax.f32 %v3196_v11, %v3198_v36  ;;  %v3201_v57 = vld [vmem:[#allocation4 + $0x36] ss:$2 sm:$0x7]  ;;  %v3203_v48 = vld [vmem:[#allocation4 + $0x37] ss:$2 sm:$0x7] }
 0x4ee   :  { %v3204_v34 = vmax.f32 %v3201_v57, %v3203_v48  ;;  %v3082_v10 = vld [vmem:[#allocation4 + $0xc] ss:$2 sm:$0x7]  ;;  %v3084_v51 = vld [vmem:[#allocation4 + $0xd] ss:$2 sm:$0x7]  ;;  %3750 = vmatpush1.bf16.msra.mxu1 %v3749_v6 }
 0x4ef   :  { %v3085_v26 = vmax.f32 %v3082_v10, %v3084_v51  ;;  %v3087_v7 = vld [vmem:[#allocation4 + $0x12] ss:$2 sm:$0x7]  ;;  %v3089_v18 = vld [vmem:[#allocation4 + $0x13] ss:$2 sm:$0x7]  ;;  %3752 = vmatprep.subr.bf16.mxu1 %v3751_v49 }
 0x4f0   :  { %v3205_v47 = vmax.f32 %v3199_v19, %v3204_v34  ;;  %v3090_v5 = vmax.f32 %v3087_v7, %v3089_v18  ;;  %v3232_v37 = vld [vmem:[#allocation4 + $0x3c] ss:$2 sm:$0x7]  ;;  %v3234_v59 = vld [vmem:[#allocation4 + $0x3d] ss:$2 sm:$0x7] }
 0x4f1   :  { %v3235_v16 = vmax.f32 %v3232_v37, %v3234_v59  ;;  %v3237_v14 = vld [vmem:[#allocation4 + $0x42] ss:$2 sm:$0x7]  ;;  %v3239_v23 = vld [vmem:[#allocation4 + $0x43] ss:$2 sm:$0x7] }
 0x4f2   :  { %v6300_v60 = vrot.slane %v3205_v47, %v6297_v43  ;;  %v3091_v41 = vmax.f32 %v3085_v26, %v3090_v5  ;;  %v3240_v46 = vmax.f32 %v3237_v14, %v3239_v23  ;;  %v3123_v38 = vld [vmem:[#allocation4 + $0x18] ss:$2 sm:$0x7]  ;;  %v3125_v35 = vld [vmem:[#allocation4 + $0x19] ss:$2 sm:$0x7] }
 0x4f3   :  { %v3126_v9 = vmax.f32 %v3123_v38, %v3125_v35  ;;  %v3128_v28 = vld [vmem:[#allocation4 + $0x1e] ss:$2 sm:$0x7]  ;;  %v3130_v52 = vld [vmem:[#allocation4 + $0x1f] ss:$2 sm:$0x7] }
 0x4f4   :  { %3214 = vrot.lane.b32.xlu1 %v6300_v60, %s4120_s28  ;;  %v6305_v42 = vrot.slane %v3091_v41, %v6297_v43  ;;  %v3241_v27 = vmax.f32 %v3235_v16, %v3240_v46  ;;  %v3131_v15 = vmax.f32 %v3128_v28, %v3130_v52  ;;  %v3165_v22 = vld [vmem:[#allocation4 + $0x24] ss:$2 sm:$0x7]  ;;  %v3167_v62 = vld [vmem:[#allocation4 + $0x25] ss:$2 sm:$0x7]  ;;  %v3226_v52 = vcombine.high %v6300_v60, %v6300_v60 }
 0x4f5   :  { %v3168_v25 = vmax.f32 %v3165_v22, %v3167_v62  ;;  %v3170_v29 = vld [vmem:[#allocation4 + $0x2a] ss:$2 sm:$0x7]  ;;  %v3172_v39 = vld [vmem:[#allocation4 + $0x2b] ss:$2 sm:$0x7] }
 0x4f6   :  { %3100 = vrot.lane.b32.xlu0 %v6305_v42, %s4120_s28  ;;  %v6313_v63 = vrot.slane %v3241_v27, %v6297_v43  ;;  %v3132_v0 = vmax.f32 %v3126_v9, %v3131_v15  ;;  %v3173_v1 = vmax.f32 %v3170_v29, %v3172_v39  ;;  %v3048_v21 = vld [vmem:[#allocation4] ss:$2 sm:$0x7]  ;;  %v3050_v45 = vld [vmem:[#allocation4 + $0x1] ss:$2 sm:$0x7] }
 0x4f7   :  { %v3051_v55 = vmax.f32 %v3048_v21, %v3050_v45  ;;  %v3053_v24 = vld [vmem:[#allocation4 + $0x6] ss:$2 sm:$0x7]  ;;  %v3055_v30 = vld [vmem:[#allocation4 + $0x7] ss:$2 sm:$0x7] }
 0x4f8   :  { %3250 = vrot.lane.b32.xlu1 %v6313_v63, %s4124_s1  ;;  %v6317_v58 = vrot.slane %v3132_v0, %v6297_v43  ;;  %v3174_v53 = vmax.f32 %v3168_v25, %v3173_v1  ;;  %v3056_v4 = vmax.f32 %v3053_v24, %v3055_v30  ;;  %v3300_v19 = vld [vmem:[%s6636_s9 + $0x100] sm:$0xff]  ;;  %v3302_v57 = vld [vmem:[%s6636_s9 + $0x110] sm:$0xff]  ;;  %v3305_v48 = vld [vmem:[%s6636_s9 + $0x128] sm:$0xff]  ;;  %v3680_v14 = vrot.slane %v6300_v60, 9 }
 0x4f9   :  { %v3307_v34 = vld [vmem:[%s6636_s9 + $0x138] sm:$0xff]  ;;  %v3753_v51 = vpack.c.bf16 %v3302_v57, %v3300_v19  ;;  %v3304_v18 = vld [vmem:[%s6636_s9 + $0x120] sm:$0xff]  ;;  %v3306_v47 = vld [vmem:[%s6636_s9 + $0x130] sm:$0xff]  ;;  %v3677_v9 = vrot.slane %v6305_v42, 9  ;;  %v3116_v60 = vcombine.high %v6305_v42, %v6305_v42  ;;  %v3681_v29 = vrot.slane %v6313_v63, 9 }
 0x4fa   :  { %3141 = vrot.lane.b32.xlu0 %v6317_v58, %s4124_s1  ;;  %v3183_v20 = vrot.slane %v3174_v53, %v6297_v43  ;;  %v3057_v61 = vmax.f32 %v3051_v55, %v3056_v4  ;;  %3175 = vst.msk [vmem:[#allocation5 + $0x1] sm:$0x1] %vm3058_vm15, %v3174_v53  ;;  %v3755_v7 = vpack.c.bf16 %v3307_v34, %v3305_v48  ;;  %v3309_v5 = vld [vmem:[%s6636_s9 + $0x148] sm:$0xff]  ;;  %v3311_v37 = vld [vmem:[%s6636_s9 + $0x158] sm:$0xff]  ;;  %v3308_v41 = vld [vmem:[%s6636_s9 + $0x140] sm:$0xff]  ;;  %v3678_v45 = vrot.slane %v6317_v58, 9 }
 0x4fb   :  { %3754 = vmatpush1.bf16.msra.mxu1 %v3753_v51  ;;  %v3757_v16 = vpack.c.bf16 %v3306_v47, %v3304_v18  ;;  %v3759_v23 = vpack.c.bf16 %v3311_v37, %v3309_v5  ;;  %v3310_v46 = vld [vmem:[%s6636_s9 + $0x150] sm:$0xff]  ;;  %v3313_v38 = vld [vmem:[%s6636_s9 + $0x168] sm:$0xff]  ;;  %v3315_v35 = vld [vmem:[%s6636_s9 + $0x178] sm:$0xff]  ;;  %v3262_v24 = vcombine.high %v6313_v63, %v6313_v63  ;;  %v3158_v63 = vcombine.high %v6317_v58, %v6317_v58 }
 0x4fc   :  { %v3679_v11 = vrot.slane %v3183_v20, 9  ;;  %v3067_v36 = vrot.slane %v3057_v61, %v6297_v43  ;;  %3059 = vst.msk [vmem:[#allocation5] sm:$0x1] %vm3058_vm15, %v3057_v61  ;;  %v3190_v26 = vcombine.high %v3183_v20, %v3183_v20  ;;  %3756 = vmatprep.subr.bf16.mxu1 %v3755_v7  ;;  %v3761_v28 = vpack.c.bf16 %v3310_v46, %v3308_v41  ;;  %v3312_v15 = vld [vmem:[%s6636_s9 + $0x160] sm:$0xff]  ;;  %v3314_v22 = vld [vmem:[%s6636_s9 + $0x170] sm:$0xff]  ;;  %v3317_v62 = vld [vmem:[%s6636_s9 + $0x188] sm:$0xff] }
 0x4fd   :  { %v3763_v27 = vpack.c.bf16 %v3315_v35, %v3313_v38  ;;  %v3765_v25 = vpack.c.bf16 %v3314_v22, %v3312_v15  ;;  %v3767_v39 = vpack.c.bf16 %v3319_v44, %v3317_v62  ;;  %v3316_v0 = vld [vmem:[%s6636_s9 + $0x180] sm:$0xff]  ;;  %v3318_v1 = vld [vmem:[%s6636_s9 + $0x190] sm:$0xff]  ;;  %v3321_v21 = vld [vmem:[%s6636_s9 + $0x1a8] sm:$0xff]  ;;  %v3777_v20 = vpack.c.bf16 %v3326_v56, %v3324_v31 }
 0x4fe   :  { %3186 = vrot.lane.b32.xlu1 %v3679_v11, %s4114_s3  ;;  %v3676_v10 = vrot.slane %v3067_v36, 9  ;;  %v3075_v59 = vcombine.high %v3067_v36, %v3067_v36  ;;  %v3323_v42 = vld [vmem:[%s6636_s9 + $0x1b8] sm:$0xff]  ;;  %v3769_v55 = vpack.c.bf16 %v3318_v1, %v3316_v0  ;;  %v3320_v53 = vld [vmem:[%s6636_s9 + $0x1a0] sm:$0xff]  ;;  %v3322_v4 = vld [vmem:[%s6636_s9 + $0x1b0] sm:$0xff]  ;;  %v3781_v36 = vpack.c.bf16 %v3330_v40, %v3328_v12 }
 0x4ff   :  { %3758 = vmatpush1.bf16.msra.mxu1 %v3757_v16  ;;  %v3771_v30 = vpack.c.bf16 %v3323_v42, %v3321_v21  ;;  %v3773_v54 = vpack.c.bf16 %v3322_v4, %v3320_v53  ;;  %v3331_v58 = vld [vmem:[%s6636_s9 + $0x1f8] sm:$0xff]  ;;  %v3333_v6 = vld [vmem:[%s6636_s9 + $0x208] sm:$0xff]  ;;  %v3534_v19 = vld [vmem:[%s6638_s11] sm:$0xff]  ;;  %vm3560_vm15 = vcmask 179200  }
 0x500   :  { %3070 = vrot.lane.b32.xlu0 %v3676_v10, %s4114_s3  ;;  %3760 = vmatprep.subr.bf16.mxu1 %v3759_v23  ;;  %v3779_v61 = vpack.c.bf16 %v3331_v58, %v3329_v8  ;;  %v3335_v11 = vld [vmem:[%s6636_s9 + $0x218] sm:$0xff]  ;;  %v3535_v57 = vld [vmem:[%s6638_s11 + $0x8] sm:$0xff]  ;;  %v3536_v48 = vld [vmem:[%s6638_s11 + $0x10] sm:$0xff] }
 0x501   :  { %v3783_v49 = vpack.c.bf16 %v3335_v11, %v3333_v6  ;;  %v3808_v34 = vpack.c.bf16 %v3535_v57, %v3534_v19  ;;  %v3537_v10 = vld [vmem:[%s6638_s11 + $0x18] sm:$0xff]  ;;  %v3539_v7 = vld [vmem:[%s6638_s11 + $0x28] sm:$0xff]  ;;  %v3540_v47 = vld [vmem:[%s6638_s11 + $0x30] sm:$0xff] }
 0x502   :  { %3191 = vrot.lane.b32.xlu1 %v3190_v26, %s4116_s18  ;;  %v3811_v51 = vpack.c.bf16 %v3537_v10, %v3536_v48  ;;  %v3538_v26 = vld [vmem:[%s6638_s11 + $0x20] sm:$0xff]  ;;  %v3541_v5 = vld [vmem:[%s6638_s11 + $0x38] sm:$0xff]  ;;  %v3543_v16 = vld [vmem:[%s6638_s11 + $0x48] sm:$0xff] }
 0x503   :  { %3762 = vmatpush1.bf16.msra.mxu1 %v3761_v28  ;;  %3809 = vmatpush1.bf16.msra.mxu0 %v3808_v34  ;;  %v3814_v18 = vpack.c.bf16 %v3539_v7, %v3538_v26  ;;  %v3817_v37 = vpack.c.bf16 %v3541_v5, %v3540_v47  ;;  %v3544_v23 = vld [vmem:[%s6638_s11 + $0x50] sm:$0xff]  ;;  %v3545_v41 = vld [vmem:[%s6638_s11 + $0x58] sm:$0xff]  ;;  %v3546_v38 = vld [vmem:[%s6638_s11 + $0x60] sm:$0xff] }
 0x504   :  { %3076 = vrot.lane.b32.xlu0 %v3075_v59, %s4116_s18  ;;  %3764 = vmatprep.subr.bf16.mxu1 %v3763_v27  ;;  %s4127_s18 = smov 64   ;;  %v3542_v59 = vld [vmem:[%s6638_s11 + $0x40] sm:$0xff]  ;;  %v3823_v46 = vpack.c.bf16 %v3545_v41, %v3544_v23  ;;  %v3547_v35 = vld [vmem:[%s6638_s11 + $0x68] sm:$0xff]  ;;  %v3548_v28 = vld [vmem:[%s6638_s11 + $0x70] sm:$0xff] }
 0x505   :  { %3810 = vmatprep.subr.bf16.mxu0 %v4118_v32  ;;  %v3550_v15 = vld [vmem:[%s6638_s11 + $0x80] sm:$0xff]  ;;  %v3551_v22 = vld [vmem:[%s6638_s11 + $0x88] sm:$0xff]  ;;  %v3339_v6 = vld [vmem:[%s6636_s9 + $0x238] sm:$0xff] }
 0x506   :  { %3222 = vrot.lane.b32.xlu1 %v3680_v14, %s4121_s15  ;;  %v3820_v14 = vpack.c.bf16 %v3543_v16, %v3542_v59  ;;  %v3832_v62 = vpack.c.bf16 %v3551_v22, %v3550_v15  ;;  %v3337_v40 = vld [vmem:[%s6636_s9 + $0x228] sm:$0xff]  ;;  %v3336_v19 = vld [vmem:[%s6636_s9 + $0x220] sm:$0xff]  ;;  %v3338_v57 = vld [vmem:[%s6636_s9 + $0x230] sm:$0xff] }
 0x507   :  { %3766 = vmatpush1.bf16.msra.mxu1 %v3765_v25  ;;  %3812 = vmatpush1.bf16.msra.mxu0 %v3811_v51  ;;  %v3341_v48 = vld [vmem:[%s6636_s9 + $0x248] sm:$0xff]  ;;  %v3343_v34 = vld [vmem:[%s6636_s9 + $0x258] sm:$0xff]  ;;  %v3789_v10 = vpack.c.bf16 %v3338_v57, %v3336_v19  ;;  %v3340_v26 = vld [vmem:[%s6636_s9 + $0x240] sm:$0xff] }
 0x508   :  { %3111 = vrot.lane.b32.xlu0 %v3677_v9, %s4121_s15  ;;  %s4125_s15 = smov 72   ;;  %3768 = vmatprep.subr.bf16.mxu1 %v3767_v39  ;;  %v3826_v9 = vpack.c.bf16 %v3547_v35, %v3546_v38  ;;  %v3791_v51 = vpack.c.bf16 %v3343_v34, %v3341_v48  ;;  %v3342_v7 = vld [vmem:[%s6636_s9 + $0x250] sm:$0xff]  ;;  %v3347_v47 = vld [vmem:[%s6636_s9 + $0x278] sm:$0xff]  ;;  %v3349_v16 = vld [vmem:[%s6636_s9 + $0x288] sm:$0xff] }
 0x509   :  { %3813 = vmatprep.subr.bf16.mxu0 %v4118_v32  ;;  %v3346_v59 = vld [vmem:[%s6636_s9 + $0x270] sm:$0xff]  ;;  %v3353_v35 = vld [vmem:[%s6636_s9 + $0x2a8] sm:$0xff] }
 0x50a   :  { %3227 = vrot.lane.b32.xlu1 %v3226_v52, %s4125_s15  ;;  %v3549_v52 = vld [vmem:[%s6638_s11 + $0x78] sm:$0xff]  ;;  %v3350_v38 = vld [vmem:[%s6636_s9 + $0x290] sm:$0xff] }
 0x50b   :  { %3770 = vmatpush1.bf16.msra.mxu1 %v3769_v55  ;;  %3815 = vmatpush1.bf16.msra.mxu0 %v3814_v18  ;;  %v3829_v27 = vpack.c.bf16 %v3549_v52, %v3548_v28  ;;  %v3345_v18 = vld [vmem:[%s6636_s9 + $0x268] sm:$0xff]  ;;  %v3354_v15 = vld [vmem:[%s6636_s9 + $0x2b0] sm:$0xff] }
 0x50c   :  { %3117 = vrot.lane.b32.xlu0 %v3116_v60, %s4125_s15  ;;  %3772 = vmatprep.subr.bf16.mxu1 %v3771_v30  ;;  %v3795_v5 = vpack.c.bf16 %v3347_v47, %v3345_v18 }
 0x50d   :  { %3816 = vmatprep.subr.bf16.mxu0 %v4118_v32 }
 0x50e   :  { %3258 = vrot.lane.b32.xlu1 %v3681_v29, %s4126_s0 }
 0x50f   :  { %3774 = vmatpush1.bf16.msra.mxu1 %v3773_v54  ;;  %3818 = vmatpush1.bf16.msra.mxu0 %v3817_v37  ;;  %v3344_v37 = vld [vmem:[%s6636_s9 + $0x260] sm:$0xff] }
 0x510   :  { %3153 = vrot.lane.b32.xlu0 %v3678_v45, %s4126_s0  ;;  %3776 = vmatprep.subr.bf16.mxu1 %v3775_v2  ;;  %v3797_v23 = vpack.c.bf16 %v3346_v59, %v3344_v37 }
 0x511   :  { %3819 = vmatprep.subr.bf16.mxu0 %v4118_v32 }
 0x512   :  { %3263 = vrot.lane.b32.xlu1 %v3262_v24, %s4127_s18 }
 0x513   :  { %3778 = vmatpush1.bf16.msra.mxu1 %v3777_v20  ;;  %3821 = vmatpush1.bf16.msra.mxu0 %v3820_v14  ;;  %v3332_v20 = vld [vmem:[%s6636_s9 + $0x200] sm:$0xff]  ;;  %v3351_v14 = vld [vmem:[%s6636_s9 + $0x298] sm:$0xff] }
 0x514   :  { %3159 = vrot.lane.b32.xlu0 %v3158_v63, %s4127_s18  ;;  %3780 = vmatprep.subr.bf16.mxu1 %v3779_v61  ;;  %v3334_v61 = vld [vmem:[%s6636_s9 + $0x210] sm:$0xff]  ;;  %v3799_v41 = vpack.c.bf16 %v3351_v14, %v3349_v16 }
 0x515   :  { %3822 = vmatprep.subr.bf16.mxu0 %v4118_v32 }
 0x517   :  { %3782 = vmatpush1.bf16.msra.mxu1 %v3781_v36  ;;  %3824 = vmatpush1.bf16.msra.mxu0 %v3823_v46  ;;  %v3785_v36 = vpack.c.bf16 %v3334_v61, %v3332_v20  ;;  %v3348_v46 = vld [vmem:[%s6636_s9 + $0x280] sm:$0xff] }
 0x518   :  { %3784 = vmatprep.subr.bf16.mxu1 %v3783_v49  ;;  %3825 = vmatprep.subr.bf16.mxu0 %v4118_v32  ;;  %v3787_v49 = vpack.c.bf16 %v3339_v6, %v3337_v40  ;;  %v3801_v28 = vpack.c.bf16 %v3350_v38, %v3348_v46 }
 0x51b   :  { %3827 = vmatpush1.bf16.msra.mxu0 %v3826_v9  ;;  %v3355_v9 = vld [vmem:[%s6636_s9 + $0x2b8] sm:$0xff] }
 0x51c   :  { %3828 = vmatprep.subr.bf16.mxu0 %v4118_v32  ;;  %v3803_v52 = vpack.c.bf16 %v3355_v9, %v3353_v35 }
 0x51f   :  { %3830 = vmatpush1.bf16.msra.mxu0 %v3829_v27  ;;  %v3352_v27 = vld [vmem:[%s6636_s9 + $0x2a0] sm:$0xff] }
 0x520   :  { %3831 = vmatprep.subr.bf16.mxu0 %v4118_v32  ;;  %v3805_v22 = vpack.c.bf16 %v3354_v15, %v3352_v27 }
 0x523   :  { %3833 = vmatpush1.bf16.msra.mxu0 %v3832_v62  ;;  %v3357_v62 = vld [vmem:[%s6636_s9 + $0x2c8] sm:$0xff] }
 0x524   :  { %3603 = vmatprep.subr.mxu0 %v6736_v3 }
 0x566   :  { %v3215_v44 = vpop.permute.xlu1 %3214 }
 0x567   :  { %v3216_v0 = vrot.slane %v3215_v44, 6 }
 0x568   :  { %v3101_v60 = vpop.permute.xlu0 %3100 }
 0x569   :  { %v3102_v21 = vrot.slane %v3101_v60, 6  ;;  %v3217_v32 = vsel %vm2253_vm10, %v3216_v0, %v3215_v44  ;;  %v6738_v0 = vsub.s32 1, %v6737_v50 }
 0x56a   :  { %v3251_v25 = vpop.permute.xlu1 %3250 }
 0x56b   :  { %v3103_v55 = vsel %vm2253_vm10, %v3102_v21, %v3101_v60  ;;  %v3252_v30 = vrot.slane %v3251_v25, 6  ;;  %vm3162_vm10 = vcmask 844288   ;;  %v3356_v60 = vld [vmem:[%s6636_s9 + $0x2c0] sm:$0xff] }
 0x56c   :  { %v3142_v29 = vpop.permute.xlu0 %3141 }
 0x56d   :  { %v3143_v4 = vrot.slane %v3142_v29, 6  ;;  %v3253_v33 = vsel %vm3144_vm8, %v3252_v30, %v3251_v25 }
 0x56f   :  { %v3145_v54 = vsel %vm3144_vm8, %v3143_v4, %v3142_v29  ;;  %v3552_v29 = vld [vmem:[%s6638_s11 + $0x90] sm:$0x3f] }
 0x570   :  { %v3187_v39 = vpop.permute.xlu1 %3186  ;;  %3684 = vmatpush1.msk.msra.mxu0 %vm2742_vm12, %v3552_v29  ;;  %vm3637_vm12 = vcmask 74752  }
 0x571   :  { %3189 = vst.msk [vmem:[#allocation5 + $0x1] sm:$0x1] %vm3073_vm0, %v3187_v39  ;;  %v3358_v39 = vld [vmem:[%s6637_s10] sm:$0x3]  ;;  %s4128_s10 = smov [#allocation6]  }
 0x572   :  { %v3071_v1 = vpop.permute.xlu0 %3070  ;;  %v3363_v21 = vrot.slane %v3358_v39, %v6732_v17  ;;  %s3656_s26 = sshll.u32 %s4128_s10, 4  ;;  %s3657_s26 = int_to_ptr.vmem [resolvable:$true] %s3656_s26 }
 0x573   :  { %3074 = vst.msk [vmem:[#allocation5] sm:$0x1] %vm3073_vm0, %v3071_v1  ;;  %v3367_v1 = vrot.slane %v3358_v39, %v6738_v0  ;;  %p4080_p1 = scmp.lt.s32.totalorder %s3657_s26, %s3657_s26 }
 0x574   :  { %v3192_v42 = vpop.permute.xlu1 %3191 }
 0x575   :  { %3194 = vst.msk [vmem:[#allocation5 + $0x1] sm:$0x1] %vm3079_vm3, %v3192_v42 }
 0x576   :  { %v3077_v45 = vpop.permute.xlu0 %3076  ;;  %3219 = vst.msk [vmem:[#allocation5 + $0x1] sm:$0x5] %vm3107_vm4, %v3217_v32 }
 0x577   :  { %3080 = vst.msk [vmem:[#allocation5] sm:$0x1] %vm3079_vm3, %v3077_v45 }
 0x578   :  { %v3223_v24 = vpop.permute.xlu1 %3222  ;;  %3108 = vst.msk [vmem:[#allocation5] sm:$0x5] %vm3107_vm4, %v3103_v55  ;;  %v3683_v55 = vld [vmem:[%s6639_s12] ss:$0 sm:$0xff]  ;;  %s4075_s12 = scalar_lea.vmem %s3657_s26, 32 }
 0x579   :  { %3225 = vst.msk [vmem:[#allocation5 + $0x3] sm:$0x1] %vm3114_vm5, %v3223_v24  ;;  %p4076_p0 = scmp.ne.s32.totalorder %s3657_s26, %s4075_s12  ;;  %p4081_p2 = scmp.lt.s32.totalorder %s4075_s12, %s4075_s12 }
 0x57a   :  { %v3112_v53 = vpop.permute.xlu0 %3111 }
 0x57b   :  { %3115 = vst.msk [vmem:[#allocation5 + $0x2] sm:$0x1] %vm3114_vm5, %v3112_v53  ;;  %p4082_p3 = por %p4081_p2, %p4080_p1 }
 0x57c   :  { %v3228_v13 = vpop.permute.xlu1 %3227 }
 0x57d   :  { %3230 = vst.msk [vmem:[#allocation5 + $0x3] sm:$0x1] %vm3120_vm9, %v3228_v13  ;;  %p4083_p4 = pnand %p4082_p3, %p4076_p0 }
 0x57e   :  { %v3118_v63 = vpop.permute.xlu0 %3117  ;;  %3255 = vst.msk [vmem:[#allocation5 + $0x3] sm:$0x5] %vm3149_vm11, %v3253_v33 }
 0x57f   :  { %3121 = vst.msk [vmem:[#allocation5 + $0x2] sm:$0x1] %vm3120_vm9, %v3118_v63 }
 0x580   :  { %v3259_v2 = vpop.permute.xlu1 %3258  ;;  %3150 = vst.msk [vmem:[#allocation5 + $0x2] sm:$0x5] %vm3149_vm11, %v3145_v54 }
 0x581   :  { %3261 = vst.msk [vmem:[#allocation5 + $0x5] sm:$0x1] %vm3156_vm13, %v3259_v2 }
 0x582   :  { %v3154_v31 = vpop.permute.xlu0 %3153 }
 0x583   :  { %3157 = vst.msk [vmem:[#allocation5 + $0x4] sm:$0x1] %vm3156_vm13, %v3154_v31 }
 0x584   :  { %v3264_v56 = vpop.permute.xlu1 %3263 }
 0x585   :  { %3266 = vst.msk [vmem:[#allocation5 + $0x5] sm:$0x1] %vm3162_vm10, %v3264_v56 }
 0x586   :  { %v3160_v8 = vpop.permute.xlu0 %3159 }
 0x587   :  { %3163 = vst.msk [vmem:[#allocation5 + $0x4] sm:$0x1] %vm3162_vm10, %v3160_v8 }
 0x58e   :  { %v3267_v58 = vld [vmem:[#allocation5] sm:$0x3f] }
 0x58f   :  { %v3378_v12 = vrot.slane %v3267_v58, %v6297_v43  ;;  %v3371_v44 = vcombine.high %v3267_v58, %v3267_v58 }
 0x591   :  { %v3386_v11 = vcombine.high %v3378_v12, %v3378_v12  ;;  %v3385_v25 = vrot.slane %v3371_v44, %v6297_v43 }
 0x593   :  { %3456 = vmatprep.mubr.f32.mxu1 %v3386_v11 }
 0x594   :  { %3457 = vmatmul.mubr.f32.vlgmr.msra.gmra.mrb[0].mxu1 %v3378_v12 }
 0x595   :  { %3786 = vmatpush1.bf16.msra.mxu1 %v3785_v36  ;;  %3527 = vmatprep.mubr.f32.mxu1 %v6736_v3  ;;  %v3793_v3 = vpack.c.bf16 %v3342_v7, %v3340_v26 }
 0x596   :  { %3788 = vmatprep.subr.bf16.mxu1 %v3787_v49 }
 0x599   :  { %3790 = vmatpush1.bf16.msra.mxu1 %v3789_v10 }
 0x59a   :  { %3792 = vmatprep.subr.bf16.mxu1 %v3791_v51 }
 0x59d   :  { %3794 = vmatpush1.bf16.msra.mxu1 %v3793_v3 }
 0x59e   :  { %3796 = vmatprep.subr.bf16.mxu1 %v3795_v5 }
 0x5a1   :  { %3798 = vmatpush1.bf16.msra.mxu1 %v3797_v23 }
 0x5a2   :  { %3800 = vmatprep.subr.bf16.mxu1 %v3799_v41 }
 0x5a5   :  { %3802 = vmatpush1.bf16.msra.mxu1 %v3801_v28 }
 0x5a6   :  { %3804 = vmatprep.subr.bf16.mxu1 %v3803_v52 }
 0x5a9   :  { %3806 = vmatpush1.bf16.msra.mxu1 %v3805_v22 }
 0x5aa   :  { %3487 = vmatprep.subr.mxu1 %v3357_v62 }
 0x5ad   :  { %3488 = vmatpush1.msra.mxu1 %v3356_v60 }
 0x5ae   :  { %3682 = vmatmul.mubr.msk.f32.vlgmr.msra.gmra.mrb[0].mxu1 %vm3389_vm14, %v3385_v25 }
 0x681   :  { %v3529_v42 = vpop.f32.mrb[0].mxu1 }
 0x682   :  { %v3531_v32 = vpop.f32.mrb[1].mxu1  ;;  %v3834_v45 = vadd.f32 %v3529_v42, %v3363_v21 }
 0x683   :  { %v3835_v43 = vadd.f32 %v3531_v32, %v3367_v1 }
 0x685   :  { %3685 = vmatprep.mubr.msk.f32.mxu0 %vm3560_vm15, %v3835_v43 }
 0x686   :  { %3632 = vmatmul.mubr.f32.vlgmr.msra.gmra.mrb[18].mxu0 %v3834_v45 }
 0x759   :  { %v3633_v24 = vpop.f32.mrb[18].mxu0 }
 0x75a   :  { %v3634_v30 = vadd.f32 %v3683_v55, %v3633_v24  ;;  %v3635_v53 = vpop.f32.mrb[19].mxu0 }
 0x75c   :  { %v3638_v50 = vsel %vm3637_vm12, %v3634_v30, -inf }
 0x75d   :  { %3639 = vmax.xlane.f32.xlu0 %v3638_v50 }
 0x7ea   :  { %v3640_v4 = vpop.xlane.xlu0 %3639 }
 0x7eb   :  { %v3641_v17 = vsub.f32 %v3634_v30, %v3640_v4 }
 0x7ed   :  { %v3642_v13 = vmul.f32 1.442695, %v3641_v17 }
 0x7ef   :  { %4067 = vpow2.f32 %v3642_v13 }
 0x7f9   :  { %v4068_v33 = vpop.eup %4067 }
 0x7fa   :  { %v3644_v63 = vsel %vm3637_vm12, %v4068_v33, 0.0 }
 0x7fb   :  { %3645 = vadd.xlane.f32.xlu1 %v3644_v63 }
 0x888   :  { %v3646_v54 = vpop.xlane.xlu1 %3645 }
 0x889   :  { %4069 = vrcp.f32 %v3646_v54 }
 0x893   :  { %v4070_v2 = vpop.eup %4069 }
 0x894   :  { %v3648_v31 = vmul.f32 %v4070_v2, %v4068_v33 }
 0x896   :  { %3649 = vst.msk [vmem:[#allocation6] sm:$0x3] %vm3637_vm12, %v3648_v31 }
 0x897   :  { %4086 = shalt.err (!%p4083_p4)
}
 0x898   :  { %s4087_s8 = scalar_lea.hbm %s6640_s13, 32 }
 0x899   :  { %p4088_p5 = scmp.ne.s32.totalorder %s6640_s13, %s4087_s8  ;;  %p4091_p6 = scmp.lt.u32.totalorder %s4087_s8, %s6640_s13 }
 0x89b   :  { %p4093_p7 = pnand %p4091_p6, %p4088_p5 }
 0x89d   :  { %4096 = shalt.err (!%p4093_p7)
}
 0x89e   :  { %3659 = dma.vmem_to_hbm [thread:$0]  %s3657_s26, 32, %s6640_s13, [#allocation7]  }
 0x89f   :  { %4097 = dma.done.wait [#allocation7], 32  }
 0x8a0   :  { %4098 = vsyncadd [#allocation7], 4294967264 }
 0x8a1   :  { %3663 = vsyncpa [#allocation7], 1 }

</bundles_post_ra>
